<compile_context>
chip_gen: v5e
topology: v5e:2x2
jax: 0.10.0
libtpu: 0.0.40
codegen_flags: <defaults>
</compile_context>

<pallas_src>
import jax
import jax.numpy as jnp
from jax.experimental import pallas as pl
from jax.experimental.pallas import tpu as pltpu


def decoder_kernel(gemb_ref, h0_ref, c0_ref, ctx_ref, ctxw_ref, out0_ref,
                   wlstm_ref, bias_ref, wc_ref, wo_ref,
                   outputs_ref, hout_ref, cout_ref, attn_ref):
    T = gemb_ref.shape[0]
    L, B, H = h0_ref.shape
    S = ctx_ref.shape[1]

    # ---- loop-invariant loads / broadcasts hoisted out of the unrolled loop ----
    ctx = ctx_ref[...]                          # (B, S, H)  raw context (for weighted sum)
    ctxw = ctxw_ref[...]                        # (B, S, H)  context @ W_in^T (hoisted linear_in)
    # Layer-0 bias is folded into gates_emb in the wrapper; pre-broadcast the rest.
    bias_bc = [jnp.broadcast_to(bias_ref[l], (B, 4 * H)) for l in range(1, L)]

    def step(t, carry):
        hs, cs, out_prev, _ = carry             # hs/cs: tuples of (B,H); out_prev: (B,H)
        ge = gemb_ref[t]                        # (B,4H): emb_t @ W_ih_emb + b (layer 0), hoisted

        x = out_prev                            # input-feed
        new_hs, new_cs = [], []
        for l in range(L):
            # Fused ih/hh matmul: [x_prev, h_l] @ (2H, 4H); bf16 RHS, f32 accumulation.
            xh = jnp.concatenate([x, hs[l]], axis=1).astype(jnp.bfloat16)    # (B, 2H)
            gates = jnp.dot(xh, wlstm_ref[l],
                            preferred_element_type=jnp.float32)              # (B, 4H) f32
            if l == 0:
                gates = gates + ge
            else:
                gates = gates + bias_bc[l - 1]
            # Gate columns pre-ordered [i, f, o, g]: one sigmoid over (B,3H), one tanh over (B,H).
            sig = jax.nn.sigmoid(gates[:, :3 * H])
            i_g = sig[:, 0 * H:1 * H]
            f_g = sig[:, 1 * H:2 * H]
            o_g = sig[:, 2 * H:3 * H]
            g_g = jnp.tanh(gates[:, 3 * H:4 * H])
            c_l = f_g * cs[l] + i_g * g_g
            h_l = o_g * jnp.tanh(c_l)
            new_hs.append(h_l)
            new_cs.append(c_l)
            x = h_l
            # TODO(synk): inter-layer nn.Dropout treated as eval-mode identity (stochastic op).

        output = x                                                            # (B, H)

        # ---- GlobalAttention (Luong "general"); linear_in already applied to ctx ----
        scores = jnp.sum(output[:, None, :] * ctxw, axis=-1)                  # (B, S)  VPU + lane reduce
        m = jnp.max(scores, axis=-1, keepdims=True)
        e = jnp.exp(scores - m)
        denom = jnp.sum(e, axis=-1, keepdims=True)
        attn = e / denom                                                       # exact (attn is returned)
        weighted = jnp.sum(attn[:, :, None] * ctx, axis=1)                    # (B, H)  VPU + sublane reduce
        # linear_out split into two (H,H) halves (bf16): no (B,2H) concat on the critical path.
        attn_out = jnp.tanh(
            jnp.dot(weighted.astype(jnp.bfloat16), wc_ref[...],
                    preferred_element_type=jnp.float32)
            + jnp.dot(output.astype(jnp.bfloat16), wo_ref[...],
                      preferred_element_type=jnp.float32))
        # TODO(synk): output nn.Dropout treated as eval-mode identity (stochastic op).

        outputs_ref[pl.ds(t, 1)] = attn_out[None]                              # lane-dense (H=128)
        return tuple(new_hs), tuple(new_cs), attn_out, attn

    h_init = tuple(h0_ref[l] for l in range(L))
    c_init = tuple(c0_ref[l] for l in range(L))
    attn0 = jnp.zeros((B, S), jnp.float32)
    hs_f, cs_f, _, attn_last = jax.lax.fori_loop(
        0, T, step, (h_init, c_init, out0_ref[...], attn0), unroll=True)

    # Final-state / last-step-attn writes happen exactly once.
    for l in range(L):
        hout_ref[l] = hs_f[l]
        cout_ref[l] = cs_f[l]
    attn_ref[...] = attn_last


def _reorder_gates(w):
    """Reorder gate columns (last axis) from [i, f, g, o] to [i, f, o, g]."""
    H = w.shape[-1] // 4
    i, f, g, o = (w[..., k * H:(k + 1) * H] for k in range(4))
    return jnp.concatenate([i, f, o, g], axis=-1)


def prepare_params(params):
    """Derive the fused/split/bf16 weight layout consumed by the kernel."""
    E = params["embedding"].shape[1]
    L, H, _ = params["whh_T"].shape
    w_emb_T = params["wih0_T"][:E]                                   # (E, 4H)
    w_feed_T = params["wih0_T"][E:]                                  # (H, 4H)
    w0 = jnp.concatenate([w_feed_T, params["whh_T"][0]], axis=0)[None]        # (1, 2H, 4H)
    if L > 1:
        w_rest = jnp.concatenate([params["wih_rest_T"], params["whh_T"][1:]],
                                 axis=1)                                       # (L-1, 2H, 4H)
        w_lstm_T = jnp.concatenate([w0, w_rest], axis=0)
    else:
        w_lstm_T = w0
    # Gate-column reorder [i,f,g,o] -> [i,f,o,g] for contiguous sigmoid/tanh slices.
    w_emb_T = _reorder_gates(w_emb_T)
    w_lstm_T = _reorder_gates(w_lstm_T)
    bias = _reorder_gates(params["bias"])
    return {
        "embedding": params["embedding"],
        "w_emb_T": w_emb_T,                                   # f32 (hoisted XLA einsum only)
        "w_lstm_T": w_lstm_T.astype(jnp.bfloat16),            # (L, 2H, 4H), streamed per step
        "bias": bias,                                         # (L, 1, 4H) f32 (row 0 folded into gates_emb)
        "win_T": params["win_T"],                             # f32 (hoisted onto context)
        "wc_T": params["wout_T"][:H].astype(jnp.bfloat16),    # (H, H) multiplies weighted context
        "wo_T": params["wout_T"][H:].astype(jnp.bfloat16),    # (H, H) multiplies rnn output
    }


def decoder_forward(tokens, hidden, context, init_output, fp):
    """Mirrors Decoder.forward(input, hidden, context, init_output)."""
    h0, c0 = hidden
    emb = jnp.take(fp["embedding"], tokens, axis=0)                  # (T, B, E)
    T, B, E = emb.shape
    L, _, H = h0.shape
    S = context.shape[0]

    # Hoisted (no recurrence dependence):
    #   layer-0 embedding gate contribution + layer-0 bias, and linear_in applied
    #   to the loop-invariant context (Luong "general" attention).
    gates_emb = jnp.einsum("tbe,eg->tbg", emb, fp["w_emb_T"]) + fp["bias"][0]   # (T, B, 4H)
    ctx_bsh = jnp.transpose(context, (1, 0, 2))                                 # (B, S, H)
    ctx_win = jnp.einsum("bsh,kh->bsk", ctx_bsh, fp["win_T"])                   # (B, S, H)

    # TODO(synk): for production T, chunk the time axis (stream gates_emb in /
    # outputs out) so VMEM residency stays bounded on v7x's 64 MiB VMEM.
    vmem = lambda: pl.BlockSpec(memory_space=pltpu.MemorySpace.VMEM)
    outputs, h_T, c_T, attn = pl.pallas_call(
        decoder_kernel,
        out_shape=(
            jax.ShapeDtypeStruct((T, B, H), jnp.float32),
            jax.ShapeDtypeStruct((L, B, H), jnp.float32),
            jax.ShapeDtypeStruct((L, B, H), jnp.float32),
            jax.ShapeDtypeStruct((B, S), jnp.float32),
        ),
        in_specs=[vmem() for _ in range(10)],
        out_specs=(vmem(), vmem(), vmem(), vmem()),
    )(gates_emb, h0, c0, ctx_bsh, ctx_win, init_output,
      fp["w_lstm_T"], fp["bias"], fp["wc_T"], fp["wo_T"])

    return outputs, (h_T, c_T), attn


# ---------- pure-JAX reference (mirrors the PyTorch module, f32 throughout) ----------
def ref_decoder(tokens, hidden, context, init_output, p):
    h0, c0 = hidden
    emb = jnp.take(p["embedding"], tokens, axis=0)
    ctx = jnp.transpose(context, (1, 0, 2))
    L, B, H = h0.shape
    h = [h0[l] for l in range(L)]
    c = [c0[l] for l in range(L)]
    out = init_output
    outs = []
    attn = None
    for t in range(emb.shape[0]):
        x = jnp.concatenate([emb[t], out], axis=1)
        for l in range(L):
            wih = p["wih0_T"] if l == 0 else p["wih_rest_T"][l - 1]
            gates = x @ wih + h[l] @ p["whh_T"][l] + p["bias"][l]
            i_g = jax.nn.sigmoid(gates[:, 0 * H:1 * H])
            f_g = jax.nn.sigmoid(gates[:, 1 * H:2 * H])
            g_g = jnp.tanh(gates[:, 2 * H:3 * H])
            o_g = jax.nn.sigmoid(gates[:, 3 * H:4 * H])
            c[l] = f_g * c[l] + i_g * g_g
            h[l] = o_g * jnp.tanh(c[l])
            x = h[l]
        output = x
        tgt = output @ p["win_T"]
        scores = jnp.einsum("bsh,bh->bs", ctx, tgt)
        attn = jax.nn.softmax(scores, axis=-1)
        weighted = jnp.einsum("bs,bsh->bh", attn, ctx)
        out = jnp.tanh(jnp.concatenate([weighted, output], axis=1) @ p["wout_T"])
        outs.append(out)
    return jnp.stack(outs), (jnp.stack(h), jnp.stack(c)), attn


if __name__ == "__main__":
    # Small shapes consistent with the module.
    V, E, H, L = 32, 64, 128, 2      # vocab, word_vec_size, rnn_size, layers
    T, S, B = 4, 16, 8               # tgt_len, src_len, batch
    PAD = 0

    key = jax.random.PRNGKey(0)
    ks = jax.random.split(key, 12)
    scale = 0.1

    embedding = scale * jax.random.normal(ks[0], (V, E), jnp.float32)
    embedding = embedding.at[PAD].set(0.0)                     # padding_idx=PAD

    params = {
        "embedding": embedding,
        # LSTMCell layer 0: input_size = E + H (input feed); others: H
        "wih0_T": scale * jax.random.normal(ks[1], (E + H, 4 * H), jnp.float32),
        "wih_rest_T": scale * jax.random.normal(ks[2], (L - 1, H, 4 * H), jnp.float32),
        "whh_T": scale * jax.random.normal(ks[3], (L, H, 4 * H), jnp.float32),
        "bias": scale * jax.random.normal(ks[4], (L, 1, 4 * H), jnp.float32),  # b_ih + b_hh
        # GlobalAttention: linear_in (H->H, no bias), linear_out (2H->H, no bias)
        "win_T": scale * jax.random.normal(ks[5], (H, H), jnp.float32),
        "wout_T": scale * jax.random.normal(ks[6], (2 * H, H), jnp.float32),
    }

    tokens = jax.random.randint(ks[7], (T, B), 0, V, jnp.int32)
    h0 = scale * jax.random.normal(ks[8], (L, B, H), jnp.float32)
    c0 = scale * jax.random.normal(ks[9], (L, B, H), jnp.float32)
    context = scale * jax.random.normal(ks[10], (S, B, H), jnp.float32)
    init_output = scale * jax.random.normal(ks[11], (B, H), jnp.float32)

    fused = prepare_params(params)
    run = jax.jit(decoder_forward)
    outputs, (h_T, c_T), attn = run(tokens, (h0, c0), context, init_output, fused)
    jax.block_until_ready(outputs)

    ro, (rh, rc), ra = ref_decoder(tokens, (h0, c0), context, init_output, params)
    # Tolerance reflects bf16 storage of the streamed LSTM / linear_out weights
    # (and bf16 LHS casts) vs. the pure-f32 reference; accumulation is in f32.
    tol = dict(atol=1e-2, rtol=1e-2)
    assert jnp.allclose(outputs, ro, **tol)
    assert jnp.allclose(h_T, rh, **tol)
    assert jnp.allclose(c_T, rc, **tol)
    assert jnp.allclose(attn, ra, **tol)

    print("KERNEL_OK")
</pallas_src>

<mosaic_0001>
module attributes {stable_mosaic.version = 11 : i64} {
  func.func @decoder_kernel(%arg0: memref<4x8x512xf32, #tpu.memory_space<vmem>>, %arg1: memref<2x8x128xf32, #tpu.memory_space<vmem>>, %arg2: memref<2x8x128xf32, #tpu.memory_space<vmem>>, %arg3: memref<8x16x128xf32, #tpu.memory_space<vmem>>, %arg4: memref<8x16x128xf32, #tpu.memory_space<vmem>>, %arg5: memref<8x128xf32, #tpu.memory_space<vmem>>, %arg6: memref<2x256x512xbf16, #tpu.memory_space<vmem>>, %arg7: memref<2x1x512xf32, #tpu.memory_space<vmem>>, %arg8: memref<128x128xbf16, #tpu.memory_space<vmem>>, %arg9: memref<128x128xbf16, #tpu.memory_space<vmem>>, %arg10: memref<4x8x128xf32, #tpu.memory_space<vmem>>, %arg11: memref<2x8x128xf32, #tpu.memory_space<vmem>>, %arg12: memref<2x8x128xf32, #tpu.memory_space<vmem>>, %arg13: memref<8x16xf32, #tpu.memory_space<vmem>>) attributes {dimension_semantics = [], scalar_prefetch = 0 : i64, scratch_operands = 0 : i64, tpu.core_type = #tpu.core_type<tc>} {
    %c0 = arith.constant 0 : index
    %c0_0 = arith.constant 0 : index
    %c0_1 = arith.constant 0 : index
    %0 = vector.load %arg3[%c0, %c0_0, %c0_1] : memref<8x16x128xf32, #tpu.memory_space<vmem>>, vector<8x16x128xf32>
    %c0_2 = arith.constant 0 : index
    %c0_3 = arith.constant 0 : index
    %c0_4 = arith.constant 0 : index
    %1 = vector.load %arg4[%c0_2, %c0_3, %c0_4] : memref<8x16x128xf32, #tpu.memory_space<vmem>>, vector<8x16x128xf32>
    %c1 = arith.constant 1 : index
    %c0_5 = arith.constant 0 : index
    %c0_6 = arith.constant 0 : index
    %2 = vector.load %arg7[%c1, %c0_5, %c0_6] : memref<2x1x512xf32, #tpu.memory_space<vmem>>, vector<1x1x512xf32>
    %3 = vector.shape_cast %2 : vector<1x1x512xf32> to vector<1x512xf32>
    %4 = vector.shape_cast %3 : vector<1x512xf32> to vector<1x512xf32>
    %5 = vector.broadcast %4 : vector<1x512xf32> to vector<8x512xf32>
    %c0_7 = arith.constant 0 : index
    %c0_8 = arith.constant 0 : index
    %c0_9 = arith.constant 0 : index
    %6 = vector.load %arg1[%c0_7, %c0_8, %c0_9] : memref<2x8x128xf32, #tpu.memory_space<vmem>>, vector<1x8x128xf32>
    %7 = vector.shape_cast %6 : vector<1x8x128xf32> to vector<8x128xf32>
    %c1_10 = arith.constant 1 : index
    %c0_11 = arith.constant 0 : index
    %c0_12 = arith.constant 0 : index
    %8 = vector.load %arg1[%c1_10, %c0_11, %c0_12] : memref<2x8x128xf32, #tpu.memory_space<vmem>>, vector<1x8x128xf32>
    %9 = vector.shape_cast %8 : vector<1x8x128xf32> to vector<8x128xf32>
    %c0_13 = arith.constant 0 : index
    %c0_14 = arith.constant 0 : index
    %c0_15 = arith.constant 0 : index
    %10 = vector.load %arg2[%c0_13, %c0_14, %c0_15] : memref<2x8x128xf32, #tpu.memory_space<vmem>>, vector<1x8x128xf32>
    %11 = vector.shape_cast %10 : vector<1x8x128xf32> to vector<8x128xf32>
    %c1_16 = arith.constant 1 : index
    %c0_17 = arith.constant 0 : index
    %c0_18 = arith.constant 0 : index
    %12 = vector.load %arg2[%c1_16, %c0_17, %c0_18] : memref<2x8x128xf32, #tpu.memory_space<vmem>>, vector<1x8x128xf32>
    %13 = vector.shape_cast %12 : vector<1x8x128xf32> to vector<8x128xf32>
    %cst = arith.constant 0.000000e+00 : f32
    %14 = vector.broadcast %cst : f32 to vector<8x16xf32>
    %c0_19 = arith.constant 0 : index
    %c0_20 = arith.constant 0 : index
    %15 = vector.load %arg5[%c0_19, %c0_20] : memref<8x128xf32, #tpu.memory_space<vmem>>, vector<8x128xf32>
    %c0_i32 = arith.constant 0 : i32
    %16 = arith.index_cast %c0_i32 : i32 to index
    %c0_21 = arith.constant 0 : index
    %c0_22 = arith.constant 0 : index
    %17 = vector.load %arg0[%16, %c0_21, %c0_22] : memref<4x8x512xf32, #tpu.memory_space<vmem>>, vector<1x8x512xf32>
    %18 = vector.shape_cast %17 : vector<1x8x512xf32> to vector<8x512xf32>
    %19 = tpu.concatenate %15, %7 in 1 : vector<8x128xf32>, vector<8x128xf32> -> vector<8x256xf32>
    %20 = arith.truncf %19 : vector<8x256xf32> to vector<8x256xbf16>
    %c0_23 = arith.constant 0 : index
    %c0_24 = arith.constant 0 : index
    %c0_25 = arith.constant 0 : index
    %21 = vector.load %arg6[%c0_23, %c0_24, %c0_25] : memref<2x256x512xbf16, #tpu.memory_space<vmem>>, vector<1x256x512xbf16>
    %22 = vector.shape_cast %21 : vector<1x256x512xbf16> to vector<256x512xbf16>
    %cst_26 = arith.constant dense<0.000000e+00> : vector<8x512xf32>
    %23 = tpu.matmul %20, %22, %cst_26 {dimension_numbers = #tpu.dot_dimension_numbers<[1], [0], [0], [1], [0, 0, 1, 1], [], []>} : vector<8x256xbf16>, vector<256x512xbf16>, vector<8x512xf32> -> vector<8x512xf32>
    %24 = arith.addf %23, %18 : vector<8x512xf32>
    %25 = vector.extract_strided_slice %24 {offsets = [0, 0], sizes = [8, 384], strides = [1, 1]} : vector<8x512xf32> to vector<8x384xf32>
    %26 = arith.negf %25 : vector<8x384xf32>
    %27 = math.exp %26 : vector<8x384xf32>
    %cst_27 = arith.constant 1.000000e+00 : f32
    %28 = vector.broadcast %cst_27 : f32 to vector<8x384xf32>
    %29 = arith.addf %28, %27 : vector<8x384xf32>
    %30 = arith.divf %28, %29 : vector<8x384xf32>
    %31 = vector.extract_strided_slice %30 {offsets = [0, 0], sizes = [8, 128], strides = [1, 1]} : vector<8x384xf32> to vector<8x128xf32>
    %32 = vector.extract_strided_slice %30 {offsets = [0, 128], sizes = [8, 128], strides = [1, 1]} : vector<8x384xf32> to vector<8x128xf32>
    %33 = vector.extract_strided_slice %30 {offsets = [0, 256], sizes = [8, 128], strides = [1, 1]} : vector<8x384xf32> to vector<8x128xf32>
    %34 = vector.extract_strided_slice %24 {offsets = [0, 384], sizes = [8, 128], strides = [1, 1]} : vector<8x512xf32> to vector<8x128xf32>
    %35 = math.tanh %34 : vector<8x128xf32>
    %36 = arith.mulf %32, %11 : vector<8x128xf32>
    %37 = arith.mulf %31, %35 : vector<8x128xf32>
    %38 = arith.addf %36, %37 : vector<8x128xf32>
    %39 = math.tanh %38 : vector<8x128xf32>
    %40 = arith.mulf %33, %39 : vector<8x128xf32>
    %41 = tpu.concatenate %40, %9 in 1 : vector<8x128xf32>, vector<8x128xf32> -> vector<8x256xf32>
    %42 = arith.truncf %41 : vector<8x256xf32> to vector<8x256xbf16>
    %c1_28 = arith.constant 1 : index
    %c0_29 = arith.constant 0 : index
    %c0_30 = arith.constant 0 : index
    %43 = vector.load %arg6[%c1_28, %c0_29, %c0_30] : memref<2x256x512xbf16, #tpu.memory_space<vmem>>, vector<1x256x512xbf16>
    %44 = vector.shape_cast %43 : vector<1x256x512xbf16> to vector<256x512xbf16>
    %cst_31 = arith.constant dense<0.000000e+00> : vector<8x512xf32>
    %45 = tpu.matmul %42, %44, %cst_31 {dimension_numbers = #tpu.dot_dimension_numbers<[1], [0], [0], [1], [0, 0, 1, 1], [], []>} : vector<8x256xbf16>, vector<256x512xbf16>, vector<8x512xf32> -> vector<8x512xf32>
    %46 = arith.addf %45, %5 : vector<8x512xf32>
    %47 = vector.extract_strided_slice %46 {offsets = [0, 0], sizes = [8, 384], strides = [1, 1]} : vector<8x512xf32> to vector<8x384xf32>
    %48 = arith.negf %47 : vector<8x384xf32>
    %49 = math.exp %48 : vector<8x384xf32>
    %cst_32 = arith.constant 1.000000e+00 : f32
    %50 = vector.broadcast %cst_32 : f32 to vector<8x384xf32>
    %51 = arith.addf %50, %49 : vector<8x384xf32>
    %52 = arith.divf %50, %51 : vector<8x384xf32>
    %53 = vector.extract_strided_slice %52 {offsets = [0, 0], sizes = [8, 128], strides = [1, 1]} : vector<8x384xf32> to vector<8x128xf32>
    %54 = vector.extract_strided_slice %52 {offsets = [0, 128], sizes = [8, 128], strides = [1, 1]} : vector<8x384xf32> to vector<8x128xf32>
    %55 = vector.extract_strided_slice %52 {offsets = [0, 256], sizes = [8, 128], strides = [1, 1]} : vector<8x384xf32> to vector<8x128xf32>
    %56 = vector.extract_strided_slice %46 {offsets = [0, 384], sizes = [8, 128], strides = [1, 1]} : vector<8x512xf32> to vector<8x128xf32>
    %57 = math.tanh %56 : vector<8x128xf32>
    %58 = arith.mulf %54, %13 : vector<8x128xf32>
    %59 = arith.mulf %53, %57 : vector<8x128xf32>
    %60 = arith.addf %58, %59 : vector<8x128xf32>
    %61 = math.tanh %60 : vector<8x128xf32>
    %62 = arith.mulf %55, %61 : vector<8x128xf32>
    %63 = vector.shape_cast %62 : vector<8x128xf32> to vector<8x1x128xf32>
    %64 = vector.broadcast %63 : vector<8x1x128xf32> to vector<8x16x128xf32>
    %65 = arith.mulf %64, %1 : vector<8x16x128xf32>
    %cst_33 = arith.constant dense<0.000000e+00> : vector<8x16xf32>
    %66 = vector.multi_reduction <add>, %65, %cst_33 [2] : vector<8x16x128xf32> to vector<8x16xf32>
    %cst_34 = arith.constant dense<0xFF800000> : vector<8xf32>
    %67 = vector.multi_reduction <maximumf>, %66, %cst_34 [1] : vector<8x16xf32> to vector<8xf32>
    %68 = vector.shape_cast %67 : vector<8xf32> to vector<8x1xf32>
    %69 = vector.broadcast %68 : vector<8x1xf32> to vector<8x16xf32>
    %70 = arith.subf %66, %69 : vector<8x16xf32>
    %71 = math.exp %70 : vector<8x16xf32>
    %cst_35 = arith.constant dense<0.000000e+00> : vector<8xf32>
    %72 = vector.multi_reduction <add>, %71, %cst_35 [1] : vector<8x16xf32> to vector<8xf32>
    %73 = vector.shape_cast %72 : vector<8xf32> to vector<8x1xf32>
    %74 = vector.broadcast %73 : vector<8x1xf32> to vector<8x16xf32>
    %75 = arith.divf %71, %74 : vector<8x16xf32>
    %76 = vector.shape_cast %75 : vector<8x16xf32> to vector<8x16x1xf32>
    %77 = vector.broadcast %76 : vector<8x16x1xf32> to vector<8x16x128xf32>
    %78 = arith.mulf %77, %0 : vector<8x16x128xf32>
    %cst_36 = arith.constant dense<0.000000e+00> : vector<8x128xf32>
    %79 = vector.multi_reduction <add>, %78, %cst_36 [1] : vector<8x16x128xf32> to vector<8x128xf32>
    %80 = arith.truncf %79 : vector<8x128xf32> to vector<8x128xbf16>
    %c0_37 = arith.constant 0 : index
    %c0_38 = arith.constant 0 : index
    %81 = vector.load %arg8[%c0_37, %c0_38] : memref<128x128xbf16, #tpu.memory_space<vmem>>, vector<128x128xbf16>
    %cst_39 = arith.constant dense<0.000000e+00> : vector<8x128xf32>
    %82 = tpu.matmul %80, %81, %cst_39 {dimension_numbers = #tpu.dot_dimension_numbers<[1], [0], [0], [1], [0, 0, 1, 1], [], []>} : vector<8x128xbf16>, vector<128x128xbf16>, vector<8x128xf32> -> vector<8x128xf32>
    %83 = arith.truncf %62 : vector<8x128xf32> to vector<8x128xbf16>
    %c0_40 = arith.constant 0 : index
    %c0_41 = arith.constant 0 : index
    %84 = vector.load %arg9[%c0_40, %c0_41] : memref<128x128xbf16, #tpu.memory_space<vmem>>, vector<128x128xbf16>
    %cst_42 = arith.constant dense<0.000000e+00> : vector<8x128xf32>
    %85 = tpu.matmul %83, %84, %cst_42 {dimension_numbers = #tpu.dot_dimension_numbers<[1], [0], [0], [1], [0, 0, 1, 1], [], []>} : vector<8x128xbf16>, vector<128x128xbf16>, vector<8x128xf32> -> vector<8x128xf32>
    %86 = arith.addf %82, %85 : vector<8x128xf32>
    %87 = math.tanh %86 : vector<8x128xf32>
    %88 = vector.shape_cast %87 : vector<8x128xf32> to vector<1x8x128xf32>
    %89 = arith.index_cast %c0_i32 : i32 to index
    %c0_43 = arith.constant 0 : index
    %c0_44 = arith.constant 0 : index
    %90 = vector.load %arg10[%89, %c0_43, %c0_44] : memref<4x8x128xf32, #tpu.memory_space<vmem>>, vector<1x8x128xf32>
    tpu.vector_store %arg10[%89, %c0_43, %c0_44], %88 {strides = array<i32>} : memref<4x8x128xf32, #tpu.memory_space<vmem>>, vector<1x8x128xf32>,
    %c1_i32 = arith.constant 1 : i32
    %91 = arith.index_cast %c1_i32 : i32 to index
    %c0_45 = arith.constant 0 : index
    %c0_46 = arith.constant 0 : index
    %92 = vector.load %arg0[%91, %c0_45, %c0_46] : memref<4x8x512xf32, #tpu.memory_space<vmem>>, vector<1x8x512xf32>
    %93 = vector.shape_cast %92 : vector<1x8x512xf32> to vector<8x512xf32>
    %94 = tpu.concatenate %87, %40 in 1 : vector<8x128xf32>, vector<8x128xf32> -> vector<8x256xf32>
    %95 = arith.truncf %94 : vector<8x256xf32> to vector<8x256xbf16>
    %c0_47 = arith.constant 0 : index
    %c0_48 = arith.constant 0 : index
    %c0_49 = arith.constant 0 : index
    %96 = vector.load %arg6[%c0_47, %c0_48, %c0_49] : memref<2x256x512xbf16, #tpu.memory_space<vmem>>, vector<1x256x512xbf16>
    %97 = vector.shape_cast %96 : vector<1x256x512xbf16> to vector<256x512xbf16>
    %cst_50 = arith.constant dense<0.000000e+00> : vector<8x512xf32>
    %98 = tpu.matmul %95, %97, %cst_50 {dimension_numbers = #tpu.dot_dimension_numbers<[1], [0], [0], [1], [0, 0, 1, 1], [], []>} : vector<8x256xbf16>, vector<256x512xbf16>, vector<8x512xf32> -> vector<8x512xf32>
    %99 = arith.addf %98, %93 : vector<8x512xf32>
    %100 = vector.extract_strided_slice %99 {offsets = [0, 0], sizes = [8, 384], strides = [1, 1]} : vector<8x512xf32> to vector<8x384xf32>
    %101 = arith.negf %100 : vector<8x384xf32>
    %102 = math.exp %101 : vector<8x384xf32>
    %cst_51 = arith.constant 1.000000e+00 : f32
    %103 = vector.broadcast %cst_51 : f32 to vector<8x384xf32>
    %104 = arith.addf %103, %102 : vector<8x384xf32>
    %105 = arith.divf %103, %104 : vector<8x384xf32>
    %106 = vector.extract_strided_slice %105 {offsets = [0, 0], sizes = [8, 128], strides = [1, 1]} : vector<8x384xf32> to vector<8x128xf32>
    %107 = vector.extract_strided_slice %105 {offsets = [0, 128], sizes = [8, 128], strides = [1, 1]} : vector<8x384xf32> to vector<8x128xf32>
    %108 = vector.extract_strided_slice %105 {offsets = [0, 256], sizes = [8, 128], strides = [1, 1]} : vector<8x384xf32> to vector<8x128xf32>
    %109 = vector.extract_strided_slice %99 {offsets = [0, 384], sizes = [8, 128], strides = [1, 1]} : vector<8x512xf32> to vector<8x128xf32>
    %110 = math.tanh %109 : vector<8x128xf32>
    %111 = arith.mulf %107, %38 : vector<8x128xf32>
    %112 = arith.mulf %106, %110 : vector<8x128xf32>
    %113 = arith.addf %111, %112 : vector<8x128xf32>
    %114 = math.tanh %113 : vector<8x128xf32>
    %115 = arith.mulf %108, %114 : vector<8x128xf32>
    %116 = tpu.concatenate %115, %62 in 1 : vector<8x128xf32>, vector<8x128xf32> -> vector<8x256xf32>
    %117 = arith.truncf %116 : vector<8x256xf32> to vector<8x256xbf16>
    %c1_52 = arith.constant 1 : index
    %c0_53 = arith.constant 0 : index
    %c0_54 = arith.constant 0 : index
    %118 = vector.load %arg6[%c1_52, %c0_53, %c0_54] : memref<2x256x512xbf16, #tpu.memory_space<vmem>>, vector<1x256x512xbf16>
    %119 = vector.shape_cast %118 : vector<1x256x512xbf16> to vector<256x512xbf16>
    %cst_55 = arith.constant dense<0.000000e+00> : vector<8x512xf32>
    %120 = tpu.matmul %117, %119, %cst_55 {dimension_numbers = #tpu.dot_dimension_numbers<[1], [0], [0], [1], [0, 0, 1, 1], [], []>} : vector<8x256xbf16>, vector<256x512xbf16>, vector<8x512xf32> -> vector<8x512xf32>
    %121 = arith.addf %120, %5 : vector<8x512xf32>
    %122 = vector.extract_strided_slice %121 {offsets = [0, 0], sizes = [8, 384], strides = [1, 1]} : vector<8x512xf32> to vector<8x384xf32>
    %123 = arith.negf %122 : vector<8x384xf32>
    %124 = math.exp %123 : vector<8x384xf32>
    %cst_56 = arith.constant 1.000000e+00 : f32
    %125 = vector.broadcast %cst_56 : f32 to vector<8x384xf32>
    %126 = arith.addf %125, %124 : vector<8x384xf32>
    %127 = arith.divf %125, %126 : vector<8x384xf32>
    %128 = vector.extract_strided_slice %127 {offsets = [0, 0], sizes = [8, 128], strides = [1, 1]} : vector<8x384xf32> to vector<8x128xf32>
    %129 = vector.extract_strided_slice %127 {offsets = [0, 128], sizes = [8, 128], strides = [1, 1]} : vector<8x384xf32> to vector<8x128xf32>
    %130 = vector.extract_strided_slice %127 {offsets = [0, 256], sizes = [8, 128], strides = [1, 1]} : vector<8x384xf32> to vector<8x128xf32>
    %131 = vector.extract_strided_slice %121 {offsets = [0, 384], sizes = [8, 128], strides = [1, 1]} : vector<8x512xf32> to vector<8x128xf32>
    %132 = math.tanh %131 : vector<8x128xf32>
    %133 = arith.mulf %129, %60 : vector<8x128xf32>
    %134 = arith.mulf %128, %132 : vector<8x128xf32>
    %135 = arith.addf %133, %134 : vector<8x128xf32>
    %136 = math.tanh %135 : vector<8x128xf32>
    %137 = arith.mulf %130, %136 : vector<8x128xf32>
    %138 = vector.shape_cast %137 : vector<8x128xf32> to vector<8x1x128xf32>
    %139 = vector.broadcast %138 : vector<8x1x128xf32> to vector<8x16x128xf32>
    %140 = arith.mulf %139, %1 : vector<8x16x128xf32>
    %cst_57 = arith.constant dense<0.000000e+00> : vector<8x16xf32>
    %141 = vector.multi_reduction <add>, %140, %cst_57 [2] : vector<8x16x128xf32> to vector<8x16xf32>
    %cst_58 = arith.constant dense<0xFF800000> : vector<8xf32>
    %142 = vector.multi_reduction <maximumf>, %141, %cst_58 [1] : vector<8x16xf32> to vector<8xf32>
    %143 = vector.shape_cast %142 : vector<8xf32> to vector<8x1xf32>
    %144 = vector.broadcast %143 : vector<8x1xf32> to vector<8x16xf32>
    %145 = arith.subf %141, %144 : vector<8x16xf32>
    %146 = math.exp %145 : vector<8x16xf32>
    %cst_59 = arith.constant dense<0.000000e+00> : vector<8xf32>
    %147 = vector.multi_reduction <add>, %146, %cst_59 [1] : vector<8x16xf32> to vector<8xf32>
    %148 = vector.shape_cast %147 : vector<8xf32> to vector<8x1xf32>
    %149 = vector.broadcast %148 : vector<8x1xf32> to vector<8x16xf32>
    %150 = arith.divf %146, %149 : vector<8x16xf32>
    %151 = vector.shape_cast %150 : vector<8x16xf32> to vector<8x16x1xf32>
    %152 = vector.broadcast %151 : vector<8x16x1xf32> to vector<8x16x128xf32>
    %153 = arith.mulf %152, %0 : vector<8x16x128xf32>
    %cst_60 = arith.constant dense<0.000000e+00> : vector<8x128xf32>
    %154 = vector.multi_reduction <add>, %153, %cst_60 [1] : vector<8x16x128xf32> to vector<8x128xf32>
    %155 = arith.truncf %154 : vector<8x128xf32> to vector<8x128xbf16>
    %c0_61 = arith.constant 0 : index
    %c0_62 = arith.constant 0 : index
    %156 = vector.load %arg8[%c0_61, %c0_62] : memref<128x128xbf16, #tpu.memory_space<vmem>>, vector<128x128xbf16>
    %cst_63 = arith.constant dense<0.000000e+00> : vector<8x128xf32>
    %157 = tpu.matmul %155, %156, %cst_63 {dimension_numbers = #tpu.dot_dimension_numbers<[1], [0], [0], [1], [0, 0, 1, 1], [], []>} : vector<8x128xbf16>, vector<128x128xbf16>, vector<8x128xf32> -> vector<8x128xf32>
    %158 = arith.truncf %137 : vector<8x128xf32> to vector<8x128xbf16>
    %c0_64 = arith.constant 0 : index
    %c0_65 = arith.constant 0 : index
    %159 = vector.load %arg9[%c0_64, %c0_65] : memref<128x128xbf16, #tpu.memory_space<vmem>>, vector<128x128xbf16>
    %cst_66 = arith.constant dense<0.000000e+00> : vector<8x128xf32>
    %160 = tpu.matmul %158, %159, %cst_66 {dimension_numbers = #tpu.dot_dimension_numbers<[1], [0], [0], [1], [0, 0, 1, 1], [], []>} : vector<8x128xbf16>, vector<128x128xbf16>, vector<8x128xf32> -> vector<8x128xf32>
    %161 = arith.addf %157, %160 : vector<8x128xf32>
    %162 = math.tanh %161 : vector<8x128xf32>
    %163 = vector.shape_cast %162 : vector<8x128xf32> to vector<1x8x128xf32>
    %164 = arith.index_cast %c1_i32 : i32 to index
    %c0_67 = arith.constant 0 : index
    %c0_68 = arith.constant 0 : index
    %165 = vector.load %arg10[%164, %c0_67, %c0_68] : memref<4x8x128xf32, #tpu.memory_space<vmem>>, vector<1x8x128xf32>
    tpu.vector_store %arg10[%164, %c0_67, %c0_68], %163 {strides = array<i32>} : memref<4x8x128xf32, #tpu.memory_space<vmem>>, vector<1x8x128xf32>,
    %c2_i32 = arith.constant 2 : i32
    %166 = arith.index_cast %c2_i32 : i32 to index
    %c0_69 = arith.constant 0 : index
    %c0_70 = arith.constant 0 : index
    %167 = vector.load %arg0[%166, %c0_69, %c0_70] : memref<4x8x512xf32, #tpu.memory_space<vmem>>, vector<1x8x512xf32>
    %168 = vector.shape_cast %167 : vector<1x8x512xf32> to vector<8x512xf32>
    %169 = tpu.concatenate %162, %115 in 1 : vector<8x128xf32>, vector<8x128xf32> -> vector<8x256xf32>
    %170 = arith.truncf %169 : vector<8x256xf32> to vector<8x256xbf16>
    %c0_71 = arith.constant 0 : index
    %c0_72 = arith.constant 0 : index
    %c0_73 = arith.constant 0 : index
    %171 = vector.load %arg6[%c0_71, %c0_72, %c0_73] : memref<2x256x512xbf16, #tpu.memory_space<vmem>>, vector<1x256x512xbf16>
    %172 = vector.shape_cast %171 : vector<1x256x512xbf16> to vector<256x512xbf16>
    %cst_74 = arith.constant dense<0.000000e+00> : vector<8x512xf32>
    %173 = tpu.matmul %170, %172, %cst_74 {dimension_numbers = #tpu.dot_dimension_numbers<[1], [0], [0], [1], [0, 0, 1, 1], [], []>} : vector<8x256xbf16>, vector<256x512xbf16>, vector<8x512xf32> -> vector<8x512xf32>
    %174 = arith.addf %173, %168 : vector<8x512xf32>
    %175 = vector.extract_strided_slice %174 {offsets = [0, 0], sizes = [8, 384], strides = [1, 1]} : vector<8x512xf32> to vector<8x384xf32>
    %176 = arith.negf %175 : vector<8x384xf32>
    %177 = math.exp %176 : vector<8x384xf32>
    %cst_75 = arith.constant 1.000000e+00 : f32
    %178 = vector.broadcast %cst_75 : f32 to vector<8x384xf32>
    %179 = arith.addf %178, %177 : vector<8x384xf32>
    %180 = arith.divf %178, %179 : vector<8x384xf32>
    %181 = vector.extract_strided_slice %180 {offsets = [0, 0], sizes = [8, 128], strides = [1, 1]} : vector<8x384xf32> to vector<8x128xf32>
    %182 = vector.extract_strided_slice %180 {offsets = [0, 128], sizes = [8, 128], strides = [1, 1]} : vector<8x384xf32> to vector<8x128xf32>
    %183 = vector.extract_strided_slice %180 {offsets = [0, 256], sizes = [8, 128], strides = [1, 1]} : vector<8x384xf32> to vector<8x128xf32>
    %184 = vector.extract_strided_slice %174 {offsets = [0, 384], sizes = [8, 128], strides = [1, 1]} : vector<8x512xf32> to vector<8x128xf32>
    %185 = math.tanh %184 : vector<8x128xf32>
    %186 = arith.mulf %182, %113 : vector<8x128xf32>
    %187 = arith.mulf %181, %185 : vector<8x128xf32>
    %188 = arith.addf %186, %187 : vector<8x128xf32>
    %189 = math.tanh %188 : vector<8x128xf32>
    %190 = arith.mulf %183, %189 : vector<8x128xf32>
    %191 = tpu.concatenate %190, %137 in 1 : vector<8x128xf32>, vector<8x128xf32> -> vector<8x256xf32>
    %192 = arith.truncf %191 : vector<8x256xf32> to vector<8x256xbf16>
    %c1_76 = arith.constant 1 : index
    %c0_77 = arith.constant 0 : index
    %c0_78 = arith.constant 0 : index
    %193 = vector.load %arg6[%c1_76, %c0_77, %c0_78] : memref<2x256x512xbf16, #tpu.memory_space<vmem>>, vector<1x256x512xbf16>
    %194 = vector.shape_cast %193 : vector<1x256x512xbf16> to vector<256x512xbf16>
    %cst_79 = arith.constant dense<0.000000e+00> : vector<8x512xf32>
    %195 = tpu.matmul %192, %194, %cst_79 {dimension_numbers = #tpu.dot_dimension_numbers<[1], [0], [0], [1], [0, 0, 1, 1], [], []>} : vector<8x256xbf16>, vector<256x512xbf16>, vector<8x512xf32> -> vector<8x512xf32>
    %196 = arith.addf %195, %5 : vector<8x512xf32>
    %197 = vector.extract_strided_slice %196 {offsets = [0, 0], sizes = [8, 384], strides = [1, 1]} : vector<8x512xf32> to vector<8x384xf32>
    %198 = arith.negf %197 : vector<8x384xf32>
    %199 = math.exp %198 : vector<8x384xf32>
    %cst_80 = arith.constant 1.000000e+00 : f32
    %200 = vector.broadcast %cst_80 : f32 to vector<8x384xf32>
    %201 = arith.addf %200, %199 : vector<8x384xf32>
    %202 = arith.divf %200, %201 : vector<8x384xf32>
    %203 = vector.extract_strided_slice %202 {offsets = [0, 0], sizes = [8, 128], strides = [1, 1]} : vector<8x384xf32> to vector<8x128xf32>
    %204 = vector.extract_strided_slice %202 {offsets = [0, 128], sizes = [8, 128], strides = [1, 1]} : vector<8x384xf32> to vector<8x128xf32>
    %205 = vector.extract_strided_slice %202 {offsets = [0, 256], sizes = [8, 128], strides = [1, 1]} : vector<8x384xf32> to vector<8x128xf32>
    %206 = vector.extract_strided_slice %196 {offsets = [0, 384], sizes = [8, 128], strides = [1, 1]} : vector<8x512xf32> to vector<8x128xf32>
    %207 = math.tanh %206 : vector<8x128xf32>
    %208 = arith.mulf %204, %135 : vector<8x128xf32>
    %209 = arith.mulf %203, %207 : vector<8x128xf32>
    %210 = arith.addf %208, %209 : vector<8x128xf32>
    %211 = math.tanh %210 : vector<8x128xf32>
    %212 = arith.mulf %205, %211 : vector<8x128xf32>
    %213 = vector.shape_cast %212 : vector<8x128xf32> to vector<8x1x128xf32>
    %214 = vector.broadcast %213 : vector<8x1x128xf32> to vector<8x16x128xf32>
    %215 = arith.mulf %214, %1 : vector<8x16x128xf32>
    %cst_81 = arith.constant dense<0.000000e+00> : vector<8x16xf32>
    %216 = vector.multi_reduction <add>, %215, %cst_81 [2] : vector<8x16x128xf32> to vector<8x16xf32>
    %cst_82 = arith.constant dense<0xFF800000> : vector<8xf32>
    %217 = vector.multi_reduction <maximumf>, %216, %cst_82 [1] : vector<8x16xf32> to vector<8xf32>
    %218 = vector.shape_cast %217 : vector<8xf32> to vector<8x1xf32>
    %219 = vector.broadcast %218 : vector<8x1xf32> to vector<8x16xf32>
    %220 = arith.subf %216, %219 : vector<8x16xf32>
    %221 = math.exp %220 : vector<8x16xf32>
    %cst_83 = arith.constant dense<0.000000e+00> : vector<8xf32>
    %222 = vector.multi_reduction <add>, %221, %cst_83 [1] : vector<8x16xf32> to vector<8xf32>
    %223 = vector.shape_cast %222 : vector<8xf32> to vector<8x1xf32>
    %224 = vector.broadcast %223 : vector<8x1xf32> to vector<8x16xf32>
    %225 = arith.divf %221, %224 : vector<8x16xf32>
    %226 = vector.shape_cast %225 : vector<8x16xf32> to vector<8x16x1xf32>
    %227 = vector.broadcast %226 : vector<8x16x1xf32> to vector<8x16x128xf32>
    %228 = arith.mulf %227, %0 : vector<8x16x128xf32>
    %cst_84 = arith.constant dense<0.000000e+00> : vector<8x128xf32>
    %229 = vector.multi_reduction <add>, %228, %cst_84 [1] : vector<8x16x128xf32> to vector<8x128xf32>
    %230 = arith.truncf %229 : vector<8x128xf32> to vector<8x128xbf16>
    %c0_85 = arith.constant 0 : index
    %c0_86 = arith.constant 0 : index
    %231 = vector.load %arg8[%c0_85, %c0_86] : memref<128x128xbf16, #tpu.memory_space<vmem>>, vector<128x128xbf16>
    %cst_87 = arith.constant dense<0.000000e+00> : vector<8x128xf32>
    %232 = tpu.matmul %230, %231, %cst_87 {dimension_numbers = #tpu.dot_dimension_numbers<[1], [0], [0], [1], [0, 0, 1, 1], [], []>} : vector<8x128xbf16>, vector<128x128xbf16>, vector<8x128xf32> -> vector<8x128xf32>
    %233 = arith.truncf %212 : vector<8x128xf32> to vector<8x128xbf16>
    %c0_88 = arith.constant 0 : index
    %c0_89 = arith.constant 0 : index
    %234 = vector.load %arg9[%c0_88, %c0_89] : memref<128x128xbf16, #tpu.memory_space<vmem>>, vector<128x128xbf16>
    %cst_90 = arith.constant dense<0.000000e+00> : vector<8x128xf32>
    %235 = tpu.matmul %233, %234, %cst_90 {dimension_numbers = #tpu.dot_dimension_numbers<[1], [0], [0], [1], [0, 0, 1, 1], [], []>} : vector<8x128xbf16>, vector<128x128xbf16>, vector<8x128xf32> -> vector<8x128xf32>
    %236 = arith.addf %232, %235 : vector<8x128xf32>
    %237 = math.tanh %236 : vector<8x128xf32>
    %238 = vector.shape_cast %237 : vector<8x128xf32> to vector<1x8x128xf32>
    %239 = arith.index_cast %c2_i32 : i32 to index
    %c0_91 = arith.constant 0 : index
    %c0_92 = arith.constant 0 : index
    %240 = vector.load %arg10[%239, %c0_91, %c0_92] : memref<4x8x128xf32, #tpu.memory_space<vmem>>, vector<1x8x128xf32>
    tpu.vector_store %arg10[%239, %c0_91, %c0_92], %238 {strides = array<i32>} : memref<4x8x128xf32, #tpu.memory_space<vmem>>, vector<1x8x128xf32>,
    %c3_i32 = arith.constant 3 : i32
    %241 = arith.index_cast %c3_i32 : i32 to index
    %c0_93 = arith.constant 0 : index
    %c0_94 = arith.constant 0 : index
    %242 = vector.load %arg0[%241, %c0_93, %c0_94] : memref<4x8x512xf32, #tpu.memory_space<vmem>>, vector<1x8x512xf32>
    %243 = vector.shape_cast %242 : vector<1x8x512xf32> to vector<8x512xf32>
    %244 = tpu.concatenate %237, %190 in 1 : vector<8x128xf32>, vector<8x128xf32> -> vector<8x256xf32>
    %245 = arith.truncf %244 : vector<8x256xf32> to vector<8x256xbf16>
    %c0_95 = arith.constant 0 : index
    %c0_96 = arith.constant 0 : index
    %c0_97 = arith.constant 0 : index
    %246 = vector.load %arg6[%c0_95, %c0_96, %c0_97] : memref<2x256x512xbf16, #tpu.memory_space<vmem>>, vector<1x256x512xbf16>
    %247 = vector.shape_cast %246 : vector<1x256x512xbf16> to vector<256x512xbf16>
    %cst_98 = arith.constant dense<0.000000e+00> : vector<8x512xf32>
    %248 = tpu.matmul %245, %247, %cst_98 {dimension_numbers = #tpu.dot_dimension_numbers<[1], [0], [0], [1], [0, 0, 1, 1], [], []>} : vector<8x256xbf16>, vector<256x512xbf16>, vector<8x512xf32> -> vector<8x512xf32>
    %249 = arith.addf %248, %243 : vector<8x512xf32>
    %250 = vector.extract_strided_slice %249 {offsets = [0, 0], sizes = [8, 384], strides = [1, 1]} : vector<8x512xf32> to vector<8x384xf32>
    %251 = arith.negf %250 : vector<8x384xf32>
    %252 = math.exp %251 : vector<8x384xf32>
    %cst_99 = arith.constant 1.000000e+00 : f32
    %253 = vector.broadcast %cst_99 : f32 to vector<8x384xf32>
    %254 = arith.addf %253, %252 : vector<8x384xf32>
    %255 = arith.divf %253, %254 : vector<8x384xf32>
    %256 = vector.extract_strided_slice %255 {offsets = [0, 0], sizes = [8, 128], strides = [1, 1]} : vector<8x384xf32> to vector<8x128xf32>
    %257 = vector.extract_strided_slice %255 {offsets = [0, 128], sizes = [8, 128], strides = [1, 1]} : vector<8x384xf32> to vector<8x128xf32>
    %258 = vector.extract_strided_slice %255 {offsets = [0, 256], sizes = [8, 128], strides = [1, 1]} : vector<8x384xf32> to vector<8x128xf32>
    %259 = vector.extract_strided_slice %249 {offsets = [0, 384], sizes = [8, 128], strides = [1, 1]} : vector<8x512xf32> to vector<8x128xf32>
    %260 = math.tanh %259 : vector<8x128xf32>
    %261 = arith.mulf %257, %188 : vector<8x128xf32>
    %262 = arith.mulf %256, %260 : vector<8x128xf32>
    %263 = arith.addf %261, %262 : vector<8x128xf32>
    %264 = math.tanh %263 : vector<8x128xf32>
    %265 = arith.mulf %258, %264 : vector<8x128xf32>
    %266 = tpu.concatenate %265, %212 in 1 : vector<8x128xf32>, vector<8x128xf32> -> vector<8x256xf32>
    %267 = arith.truncf %266 : vector<8x256xf32> to vector<8x256xbf16>
    %c1_100 = arith.constant 1 : index
    %c0_101 = arith.constant 0 : index
    %c0_102 = arith.constant 0 : index
    %268 = vector.load %arg6[%c1_100, %c0_101, %c0_102] : memref<2x256x512xbf16, #tpu.memory_space<vmem>>, vector<1x256x512xbf16>
    %269 = vector.shape_cast %268 : vector<1x256x512xbf16> to vector<256x512xbf16>
    %cst_103 = arith.constant dense<0.000000e+00> : vector<8x512xf32>
    %270 = tpu.matmul %267, %269, %cst_103 {dimension_numbers = #tpu.dot_dimension_numbers<[1], [0], [0], [1], [0, 0, 1, 1], [], []>} : vector<8x256xbf16>, vector<256x512xbf16>, vector<8x512xf32> -> vector<8x512xf32>
    %271 = arith.addf %270, %5 : vector<8x512xf32>
    %272 = vector.extract_strided_slice %271 {offsets = [0, 0], sizes = [8, 384], strides = [1, 1]} : vector<8x512xf32> to vector<8x384xf32>
    %273 = arith.negf %272 : vector<8x384xf32>
    %274 = math.exp %273 : vector<8x384xf32>
    %cst_104 = arith.constant 1.000000e+00 : f32
    %275 = vector.broadcast %cst_104 : f32 to vector<8x384xf32>
    %276 = arith.addf %275, %274 : vector<8x384xf32>
    %277 = arith.divf %275, %276 : vector<8x384xf32>
    %278 = vector.extract_strided_slice %277 {offsets = [0, 0], sizes = [8, 128], strides = [1, 1]} : vector<8x384xf32> to vector<8x128xf32>
    %279 = vector.extract_strided_slice %277 {offsets = [0, 128], sizes = [8, 128], strides = [1, 1]} : vector<8x384xf32> to vector<8x128xf32>
    %280 = vector.extract_strided_slice %277 {offsets = [0, 256], sizes = [8, 128], strides = [1, 1]} : vector<8x384xf32> to vector<8x128xf32>
    %281 = vector.extract_strided_slice %271 {offsets = [0, 384], sizes = [8, 128], strides = [1, 1]} : vector<8x512xf32> to vector<8x128xf32>
    %282 = math.tanh %281 : vector<8x128xf32>
    %283 = arith.mulf %279, %210 : vector<8x128xf32>
    %284 = arith.mulf %278, %282 : vector<8x128xf32>
    %285 = arith.addf %283, %284 : vector<8x128xf32>
    %286 = math.tanh %285 : vector<8x128xf32>
    %287 = arith.mulf %280, %286 : vector<8x128xf32>
    %288 = vector.shape_cast %287 : vector<8x128xf32> to vector<8x1x128xf32>
    %289 = vector.broadcast %288 : vector<8x1x128xf32> to vector<8x16x128xf32>
    %290 = arith.mulf %289, %1 : vector<8x16x128xf32>
    %cst_105 = arith.constant dense<0.000000e+00> : vector<8x16xf32>
    %291 = vector.multi_reduction <add>, %290, %cst_105 [2] : vector<8x16x128xf32> to vector<8x16xf32>
    %cst_106 = arith.constant dense<0xFF800000> : vector<8xf32>
    %292 = vector.multi_reduction <maximumf>, %291, %cst_106 [1] : vector<8x16xf32> to vector<8xf32>
    %293 = vector.shape_cast %292 : vector<8xf32> to vector<8x1xf32>
    %294 = vector.broadcast %293 : vector<8x1xf32> to vector<8x16xf32>
    %295 = arith.subf %291, %294 : vector<8x16xf32>
    %296 = math.exp %295 : vector<8x16xf32>
    %cst_107 = arith.constant dense<0.000000e+00> : vector<8xf32>
    %297 = vector.multi_reduction <add>, %296, %cst_107 [1] : vector<8x16xf32> to vector<8xf32>
    %298 = vector.shape_cast %297 : vector<8xf32> to vector<8x1xf32>
    %299 = vector.broadcast %298 : vector<8x1xf32> to vector<8x16xf32>
    %300 = arith.divf %296, %299 : vector<8x16xf32>
    %301 = vector.shape_cast %300 : vector<8x16xf32> to vector<8x16x1xf32>
    %302 = vector.broadcast %301 : vector<8x16x1xf32> to vector<8x16x128xf32>
    %303 = arith.mulf %302, %0 : vector<8x16x128xf32>
    %cst_108 = arith.constant dense<0.000000e+00> : vector<8x128xf32>
    %304 = vector.multi_reduction <add>, %303, %cst_108 [1] : vector<8x16x128xf32> to vector<8x128xf32>
    %305 = arith.truncf %304 : vector<8x128xf32> to vector<8x128xbf16>
    %c0_109 = arith.constant 0 : index
    %c0_110 = arith.constant 0 : index
    %306 = vector.load %arg8[%c0_109, %c0_110] : memref<128x128xbf16, #tpu.memory_space<vmem>>, vector<128x128xbf16>
    %cst_111 = arith.constant dense<0.000000e+00> : vector<8x128xf32>
    %307 = tpu.matmul %305, %306, %cst_111 {dimension_numbers = #tpu.dot_dimension_numbers<[1], [0], [0], [1], [0, 0, 1, 1], [], []>} : vector<8x128xbf16>, vector<128x128xbf16>, vector<8x128xf32> -> vector<8x128xf32>
    %308 = arith.truncf %287 : vector<8x128xf32> to vector<8x128xbf16>
    %c0_112 = arith.constant 0 : index
    %c0_113 = arith.constant 0 : index
    %309 = vector.load %arg9[%c0_112, %c0_113] : memref<128x128xbf16, #tpu.memory_space<vmem>>, vector<128x128xbf16>
    %cst_114 = arith.constant dense<0.000000e+00> : vector<8x128xf32>
    %310 = tpu.matmul %308, %309, %cst_114 {dimension_numbers = #tpu.dot_dimension_numbers<[1], [0], [0], [1], [0, 0, 1, 1], [], []>} : vector<8x128xbf16>, vector<128x128xbf16>, vector<8x128xf32> -> vector<8x128xf32>
    %311 = arith.addf %307, %310 : vector<8x128xf32>
    %312 = math.tanh %311 : vector<8x128xf32>
    %313 = vector.shape_cast %312 : vector<8x128xf32> to vector<1x8x128xf32>
    %314 = arith.index_cast %c3_i32 : i32 to index
    %c0_115 = arith.constant 0 : index
    %c0_116 = arith.constant 0 : index
    %315 = vector.load %arg10[%314, %c0_115, %c0_116] : memref<4x8x128xf32, #tpu.memory_space<vmem>>, vector<1x8x128xf32>
    tpu.vector_store %arg10[%314, %c0_115, %c0_116], %313 {strides = array<i32>} : memref<4x8x128xf32, #tpu.memory_space<vmem>>, vector<1x8x128xf32>,
    %c4_i32 = arith.constant 4 : i32
    %c0_117 = arith.constant 0 : index
    %c0_118 = arith.constant 0 : index
    %c0_119 = arith.constant 0 : index
    %316 = vector.load %arg11[%c0_117, %c0_118, %c0_119] : memref<2x8x128xf32, #tpu.memory_space<vmem>>, vector<1x8x128xf32>
    %317 = vector.shape_cast %316 : vector<1x8x128xf32> to vector<8x128xf32>
    %318 = vector.shape_cast %265 : vector<8x128xf32> to vector<1x8x128xf32>
    tpu.vector_store %arg11[%c0_117, %c0_118, %c0_119], %318 {strides = array<i32>} : memref<2x8x128xf32, #tpu.memory_space<vmem>>, vector<1x8x128xf32>,
    %c0_120 = arith.constant 0 : index
    %c0_121 = arith.constant 0 : index
    %c0_122 = arith.constant 0 : index
    %319 = vector.load %arg12[%c0_120, %c0_121, %c0_122] : memref<2x8x128xf32, #tpu.memory_space<vmem>>, vector<1x8x128xf32>
    %320 = vector.shape_cast %319 : vector<1x8x128xf32> to vector<8x128xf32>
    %321 = vector.shape_cast %263 : vector<8x128xf32> to vector<1x8x128xf32>
    tpu.vector_store %arg12[%c0_120, %c0_121, %c0_122], %321 {strides = array<i32>} : memref<2x8x128xf32, #tpu.memory_space<vmem>>, vector<1x8x128xf32>,
    %c1_123 = arith.constant 1 : index
    %c0_124 = arith.constant 0 : index
    %c0_125 = arith.constant 0 : index
    %322 = vector.load %arg11[%c1_123, %c0_124, %c0_125] : memref<2x8x128xf32, #tpu.memory_space<vmem>>, vector<1x8x128xf32>
    %323 = vector.shape_cast %322 : vector<1x8x128xf32> to vector<8x128xf32>
    %324 = vector.shape_cast %287 : vector<8x128xf32> to vector<1x8x128xf32>
    tpu.vector_store %arg11[%c1_123, %c0_124, %c0_125], %324 {strides = array<i32>} : memref<2x8x128xf32, #tpu.memory_space<vmem>>, vector<1x8x128xf32>,
    %c1_126 = arith.constant 1 : index
    %c0_127 = arith.constant 0 : index
    %c0_128 = arith.constant 0 : index
    %325 = vector.load %arg12[%c1_126, %c0_127, %c0_128] : memref<2x8x128xf32, #tpu.memory_space<vmem>>, vector<1x8x128xf32>
    %326 = vector.shape_cast %325 : vector<1x8x128xf32> to vector<8x128xf32>
    %327 = vector.shape_cast %285 : vector<8x128xf32> to vector<1x8x128xf32>
    tpu.vector_store %arg12[%c1_126, %c0_127, %c0_128], %327 {strides = array<i32>} : memref<2x8x128xf32, #tpu.memory_space<vmem>>, vector<1x8x128xf32>,
    %c0_129 = arith.constant 0 : index
    %c0_130 = arith.constant 0 : index
    %328 = vector.load %arg13[%c0_129, %c0_130] : memref<8x16xf32, #tpu.memory_space<vmem>>, vector<8x16xf32>
    tpu.vector_store %arg13[%c0_129, %c0_130], %300 {strides = array<i32>} : memref<8x16xf32, #tpu.memory_space<vmem>>, vector<8x16xf32>,
    return
  }
}

</mosaic_0001>

<bundles_post_ra>
// kernel: decoder_forward.1
= control target key start
LH: loop header
LB: loop body
LE: loop exit
PB: predicated region body
PF: predicated region fallthrough
CT: control target
= control target key end

     0   :  { %19 = vsyncpa [#allocation3], 0  ;;  %s13639_s0 = inlined_call_operand.vmem [shape: f32[4,8,512], index: 0, kind: input, shape index: {}]   ;;  %s13640_s1 = inlined_call_operand.vmem [shape: f32[2,8,128], index: 1, kind: input, shape index: {}]   ;;  %s13641_s2 = inlined_call_operand.vmem [shape: f32[2,8,128], index: 2, kind: input, shape index: {}]   ;;  %s13642_s3 = inlined_call_operand.vmem [shape: f32[8,16,128], index: 3, kind: input, shape index: {}]   ;;  %s13643_s4 = inlined_call_operand.vmem [shape: f32[8,16,128], index: 4, kind: input, shape index: {}]   ;;  %s13644_s5 = inlined_call_operand.vmem [shape: f32[8,128], index: 5, kind: input, shape index: {}]   ;;  %s13645_s6 = inlined_call_operand.hbm [shape: bf16[2,256,512], index: 6, kind: input, shape index: {}]   ;;  %s13646_s7 = inlined_call_operand.vmem [shape: f32[2,1,512], index: 7, kind: input, shape index: {}]   ;;  %s13647_s8 = inlined_call_operand.vmem [shape: bf16[128,128], index: 8, kind: input, shape index: {}]   ;;  %s13648_s9 = inlined_call_operand.vmem [shape: bf16[128,128], index: 9, kind: input, shape index: {}]   ;;  %s13649_s10 = inlined_call_operand.hbm [shape: f32[4,8,128], index: 10, kind: output, shape index: {0}]   ;;  %s13650_s11 = inlined_call_operand.hbm [shape: f32[2,8,128], index: 11, kind: output, shape index: {1}]   ;;  %s13651_s12 = inlined_call_operand.hbm [shape: f32[2,8,128], index: 12, kind: output, shape index: {2}]   ;;  %s13652_s13 = inlined_call_operand.hbm [shape: f32[8,16], index: 13, kind: output, shape index: {3}]  }
   0x1   :  { %20 = vsyncpa [#allocation4], 0 }
   0x2   :  { %21 = vsyncpa [#allocation7], 0 }
   0x3   :  { %22 = vsyncpa [#allocation10], 0  ;;  %s39_s27 = sshll.u32 %s13645_s6, 4  ;;  %s11250_s28 = smov [#allocation2]   ;;  %s40_s27 = int_to_ptr.hbm [resolvable:$true] %s39_s27 }
   0x4   :  { %s41_s29 = sshll.u32 %s11250_s28, 4  ;;  %s11251_s30 = smov 256   ;;  %s42_s29 = int_to_ptr.vmem [resolvable:$true] %s41_s29 }
   0x5   :  { %s11252_s14 = smov 16  }
   0x6   :  { %47 = dma.hbm_to_vmem [thread:$0]  %s40_s27, 16384, %s42_s29, [#allocation3], %s11251_s30, %s11251_s30, %s11252_s14  }
   0x7   :  { %11242 = dma.done.wait [#allocation3], 16384  }
   0x8   :  { %11243 = vsyncadd [#allocation3], 4294950912  ;;  %v7883_v0 = vld [vmem:[#allocation2 + $0xe0] sm:$0xf]  ;;  %v10139_v1 = vld [vmem:[#allocation2 + $0xec] sm:$0xf0] }
   0x9   :  { %v8011_v2 = vld [vmem:[#allocation2 + $0x1e0] sm:$0xf]  ;;  %v7884_v3 = vor.u32 %v10139_v1, %v7883_v0  ;;  %v10171_v4 = vld [vmem:[#allocation2 + $0x1ec] sm:$0xf0]  ;;  %v10137_v5 = vld [vmem:[#allocation2 + $0xe4] sm:$0xf] }
   0xa   :  { %v7885_v6 = vld [vmem:[#allocation2 + $0xf0] sm:$0xf0]  ;;  %v8012_v7 = vor.u32 %v10171_v4, %v8011_v2  ;;  %v10169_v9 = vld [vmem:[#allocation2 + $0x1e4] sm:$0xf]  ;;  %v7867_v11 = vld [vmem:[#allocation2 + $0xc0] sm:$0xf] }
   0xb   :  { %v7888_v8 = vor.u32 %v10137_v5, %v7885_v6  ;;  %v8013_v10 = vld [vmem:[#allocation2 + $0x1f0] sm:$0xf0]  ;;  %498 = vmatpush.bf16.msra.mxu0 %v7884_v3  ;;  %v10135_v13 = vld [vmem:[#allocation2 + $0xcc] sm:$0xf0]  ;;  %v7995_v14 = vld [vmem:[#allocation2 + $0x1c0] sm:$0xf] }
   0xc   :  { %v8016_v12 = vor.u32 %v10169_v9, %v8013_v10  ;;  %v10167_v15 = vld [vmem:[#allocation2 + $0x1cc] sm:$0xf0]  ;;  %511 = vmatpush.bf16.msra.mxu1 %v8012_v7  ;;  %v7868_v16 = vor.u32 %v10135_v13, %v7867_v11  ;;  %v10133_v18 = vld [vmem:[#allocation2 + $0xc4] sm:$0xf]  ;;  %v7869_v19 = vld [vmem:[#allocation2 + $0xd0] sm:$0xf0] }
   0xd   :  { %524 = vmatpush.bf16.msra.mxu2 %v7888_v8  ;;  %v7996_v17 = vor.u32 %v10167_v15, %v7995_v14  ;;  %v10165_v20 = vld [vmem:[#allocation2 + $0x1c4] sm:$0xf]  ;;  %v7872_v21 = vor.u32 %v10133_v18, %v7869_v19  ;;  %v7997_v22 = vld [vmem:[#allocation2 + $0x1d0] sm:$0xf0]  ;;  %v7851_v23 = vld [vmem:[#allocation2 + $0xa0] sm:$0xf] }
   0xe   :  { %537 = vmatpush.bf16.msra.mxu3 %v8016_v12  ;;  %v10131_v24 = vld [vmem:[#allocation2 + $0xac] sm:$0xf0]  ;;  %v8000_v25 = vor.u32 %v10165_v20, %v7997_v22  ;;  %v7979_v26 = vld [vmem:[#allocation2 + $0x1a0] sm:$0xf]  ;;  %v10129_v28 = vld [vmem:[#allocation2 + $0xa4] sm:$0xf] }
   0xf   :  { %v10163_v27 = vld [vmem:[#allocation2 + $0x1ac] sm:$0xf0]  ;;  %499 = vmatpush.bf16.msra.mxu0 %v7868_v16  ;;  %v7852_v29 = vor.u32 %v10131_v24, %v7851_v23  ;;  %v7853_v30 = vld [vmem:[#allocation2 + $0xb0] sm:$0xf0]  ;;  %v10161_v31 = vld [vmem:[#allocation2 + $0x1a4] sm:$0xf] }
  0x10   :  { %v7981_v32 = vld [vmem:[#allocation2 + $0x1b0] sm:$0xf0]  ;;  %512 = vmatpush.bf16.msra.mxu1 %v7996_v17  ;;  %v7980_v33 = vor.u32 %v10163_v27, %v7979_v26  ;;  %v7856_v34 = vor.u32 %v10129_v28, %v7853_v30  ;;  %v7835_v35 = vld [vmem:[#allocation2 + $0x80] sm:$0xf]  ;;  %v10127_v36 = vld [vmem:[#allocation2 + $0x8c] sm:$0xf0] }
  0x11   :  { %525 = vmatpush.bf16.msra.mxu2 %v7872_v21  ;;  %v7963_v37 = vld [vmem:[#allocation2 + $0x180] sm:$0xf]  ;;  %v7984_v38 = vor.u32 %v10161_v31, %v7981_v32  ;;  %v10159_v39 = vld [vmem:[#allocation2 + $0x18c] sm:$0xf0]  ;;  %v10125_v40 = vld [vmem:[#allocation2 + $0x84] sm:$0xf]  ;;  %v7836_v44 = vor.u32 %v10127_v36, %v7835_v35 }
  0x12   :  { %538 = vmatpush.bf16.msra.mxu3 %v8000_v25  ;;  %v7837_v41 = vld [vmem:[#allocation2 + $0x90] sm:$0xf0]  ;;  %v10157_v42 = vld [vmem:[#allocation2 + $0x184] sm:$0xf]  ;;  %v7964_v45 = vor.u32 %v10159_v39, %v7963_v37  ;;  %v7819_v47 = vld [vmem:[#allocation2 + $0x60] sm:$0xf] }
  0x13   :  { %v7965_v43 = vld [vmem:[#allocation2 + $0x190] sm:$0xf0]  ;;  %500 = vmatpush.bf16.msra.mxu0 %v7852_v29  ;;  %v7840_v46 = vor.u32 %v10125_v40, %v7837_v41  ;;  %v10123_v48 = vld [vmem:[#allocation2 + $0x6c] sm:$0xf0]  ;;  %v7947_v49 = vld [vmem:[#allocation2 + $0x160] sm:$0xf] }
  0x14   :  { %513 = vmatpush.bf16.msra.mxu1 %v7980_v33  ;;  %v7968_v50 = vor.u32 %v10157_v42, %v7965_v43  ;;  %v10155_v51 = vld [vmem:[#allocation2 + $0x16c] sm:$0xf0]  ;;  %v10121_v52 = vld [vmem:[#allocation2 + $0x64] sm:$0xf]  ;;  %v7821_v53 = vld [vmem:[#allocation2 + $0x70] sm:$0xf0]  ;;  %v7820_v56 = vor.u32 %v10123_v48, %v7819_v47 }
  0x15   :  { %526 = vmatpush.bf16.msra.mxu2 %v7856_v34  ;;  %v10153_v54 = vld [vmem:[#allocation2 + $0x164] sm:$0xf]  ;;  %v7949_v55 = vld [vmem:[#allocation2 + $0x170] sm:$0xf0]  ;;  %v7948_v57 = vor.u32 %v10155_v51, %v7947_v49  ;;  %v7824_v58 = vor.u32 %v10121_v52, %v7821_v53  ;;  %v7803_v59 = vld [vmem:[#allocation2 + $0x40] sm:$0xf] }
  0x16   :  { %539 = vmatpush.bf16.msra.mxu3 %v7984_v38  ;;  %v10119_v60 = vld [vmem:[#allocation2 + $0x4c] sm:$0xf0]  ;;  %v7931_v61 = vld [vmem:[#allocation2 + $0x140] sm:$0xf]  ;;  %v7952_v62 = vor.u32 %v10153_v54, %v7949_v55  ;;  %v10117_v0 = vld [vmem:[#allocation2 + $0x44] sm:$0xf] }
  0x17   :  { %501 = vmatpush.bf16.msra.mxu0 %v7836_v44  ;;  %v10151_v63 = vld [vmem:[#allocation2 + $0x14c] sm:$0xf0]  ;;  %v7805_v1 = vld [vmem:[#allocation2 + $0x50] sm:$0xf0]  ;;  %v10149_v2 = vld [vmem:[#allocation2 + $0x144] sm:$0xf]  ;;  %v7804_v4 = vor.u32 %v10119_v60, %v7803_v59 }
  0x18   :  { %514 = vmatpush.bf16.msra.mxu1 %v7964_v45  ;;  %v7933_v3 = vld [vmem:[#allocation2 + $0x150] sm:$0xf0]  ;;  %v7932_v5 = vor.u32 %v10151_v63, %v7931_v61  ;;  %v7808_v6 = vor.u32 %v10117_v0, %v7805_v1  ;;  %v7787_v7 = vld [vmem:[#allocation2 + $0x20] sm:$0xf]  ;;  %v10115_v8 = vld [vmem:[#allocation2 + $0x2c] sm:$0xf0] }
  0x19   :  { %527 = vmatpush.bf16.msra.mxu2 %v7840_v46  ;;  %v7915_v9 = vld [vmem:[#allocation2 + $0x120] sm:$0xf]  ;;  %v7936_v10 = vor.u32 %v10149_v2, %v7933_v3  ;;  %v10147_v11 = vld [vmem:[#allocation2 + $0x12c] sm:$0xf0]  ;;  %v10113_v12 = vld [vmem:[#allocation2 + $0x24] sm:$0xf]  ;;  %v7788_v16 = vor.u32 %v10115_v8, %v7787_v7 }
  0x1a   :  { %540 = vmatpush.bf16.msra.mxu3 %v7968_v50  ;;  %v7789_v13 = vld [vmem:[#allocation2 + $0x30] sm:$0xf0]  ;;  %v10145_v14 = vld [vmem:[#allocation2 + $0x124] sm:$0xf]  ;;  %v7771_v17 = vld [vmem:[#allocation2] sm:$0xf]  ;;  %v7916_v19 = vor.u32 %v10147_v11, %v7915_v9 }
  0x1b   :  { %502 = vmatpush.bf16.msra.mxu0 %v7820_v56  ;;  %v7917_v15 = vld [vmem:[#allocation2 + $0x130] sm:$0xf0]  ;;  %v10111_v18 = vld [vmem:[#allocation2 + $0xc] sm:$0xf0]  ;;  %v7792_v20 = vor.u32 %v10113_v12, %v7789_v13  ;;  %v7899_v21 = vld [vmem:[#allocation2 + $0x100] sm:$0xf] }
  0x1c   :  { %515 = vmatpush.bf16.msra.mxu1 %v7948_v57  ;;  %v10143_v22 = vld [vmem:[#allocation2 + $0x10c] sm:$0xf0]  ;;  %v10109_v23 = vld [vmem:[#allocation2 + $0x4] sm:$0xf]  ;;  %v7920_v24 = vor.u32 %v10145_v14, %v7917_v15  ;;  %v7773_v25 = vld [vmem:[#allocation2 + $0x10] sm:$0xf0]  ;;  %v7772_v31 = vor.u32 %v10111_v18, %v7771_v17 }
  0x1d   :  { %528 = vmatpush.bf16.msra.mxu2 %v7824_v58  ;;  %v10141_v26 = vld [vmem:[#allocation2 + $0x104] sm:$0xf]  ;;  %v7901_v27 = vld [vmem:[#allocation2 + $0x110] sm:$0xf0]  ;;  %v7891_v28 = vld [vmem:[#allocation2 + $0xe8] sm:$0xf]  ;;  %v7900_v35 = vor.u32 %v10143_v22, %v7899_v21  ;;  %v7776_v36 = vor.u32 %v10109_v23, %v7773_v25 }
  0x1e   :  { %541 = vmatpush.bf16.msra.mxu3 %v7952_v62  ;;  %v10140_v29 = vld [vmem:[#allocation2 + $0xf4] sm:$0xf0]  ;;  %v8019_v30 = vld [vmem:[#allocation2 + $0x1e8] sm:$0xf]  ;;  %v10138_v33 = vld [vmem:[#allocation2 + $0xec] sm:$0xf]  ;;  %v7904_v40 = vor.u32 %v10141_v26, %v7901_v27 }
  0x1f   :  { %503 = vmatpush.bf16.msra.mxu0 %v7804_v4  ;;  %v10172_v32 = vld [vmem:[#allocation2 + $0x1f4] sm:$0xf0]  ;;  %v7893_v34 = vld [vmem:[#allocation2 + $0xf8] sm:$0xf0]  ;;  %v10170_v37 = vld [vmem:[#allocation2 + $0x1ec] sm:$0xf]  ;;  %v7892_v41 = vor.u32 %v10140_v29, %v7891_v28 }
  0x20   :  { %516 = vmatpush.bf16.msra.mxu1 %v7932_v5  ;;  %v8021_v38 = vld [vmem:[#allocation2 + $0x1f8] sm:$0xf0]  ;;  %v107_v39 = vld [vmem:[%s13644_s5] sm:$0xff]  ;;  %v8020_v43 = vor.u32 %v10172_v32, %v8019_v30  ;;  %v7896_v44 = vor.u32 %v10138_v33, %v7893_v34  ;;  %v7875_v45 = vld [vmem:[#allocation2 + $0xc8] sm:$0xf]  ;;  %s7715_s16 = sshll.u32 %s13650_s11, 4  ;;  %s7716_s16 = int_to_ptr.hbm [resolvable:$true] %s7715_s16 }
  0x21   :  { %529 = vmatpush.bf16.msra.mxu2 %v7808_v6  ;;  %v101_v42 = vld [vmem:[%s13640_s1] sm:$0xff]  ;;  %v10136_v46 = vld [vmem:[#allocation2 + $0xd4] sm:$0xf0]  ;;  %v8003_v47 = vld [vmem:[#allocation2 + $0x1c8] sm:$0xf]  ;;  %v8024_v48 = vor.u32 %v10170_v37, %v8021_v38  ;;  %v11339_v49 = vpack.c.bf16 %v107_v39, %v107_v39  ;;  %s11254_s17 = smov [#allocation6]  }
  0x22   :  { %542 = vmatpush.bf16.msra.mxu3 %v7936_v10  ;;  %v10168_v50 = vld [vmem:[#allocation2 + $0x1d4] sm:$0xf0]  ;;  %v10134_v51 = vld [vmem:[#allocation2 + $0xcc] sm:$0xf]  ;;  %v7877_v52 = vld [vmem:[#allocation2 + $0xd8] sm:$0xf0]  ;;  %v11341_v53 = vpack.c.bf16 %v101_v42, %v101_v42  ;;  %v7876_v56 = vor.u32 %v10136_v46, %v7875_v45 }
  0x23   :  { %504 = vmatpush.bf16.msra.mxu0 %v7788_v16  ;;  %v10166_v54 = vld [vmem:[#allocation2 + $0x1cc] sm:$0xf]  ;;  %v8005_v55 = vld [vmem:[#allocation2 + $0x1d8] sm:$0xf0]  ;;  %v8004_v57 = vor.u32 %v10168_v50, %v8003_v47  ;;  %v7880_v58 = vor.u32 %v10134_v51, %v7877_v52  ;;  %v7859_v59 = vld [vmem:[#allocation2 + $0xa8] sm:$0xf] }
  0x24   :  { %517 = vmatpush.bf16.msra.mxu1 %v7916_v19  ;;  %v10132_v60 = vld [vmem:[#allocation2 + $0xb4] sm:$0xf0]  ;;  %v7987_v61 = vld [vmem:[#allocation2 + $0x1a8] sm:$0xf]  ;;  %v8008_v62 = vor.u32 %v10166_v54, %v8005_v55  ;;  %v10130_v0 = vld [vmem:[#allocation2 + $0xac] sm:$0xf] }
  0x25   :  { %530 = vmatpush.bf16.msra.mxu2 %v7792_v20  ;;  %v10164_v63 = vld [vmem:[#allocation2 + $0x1b4] sm:$0xf0]  ;;  %v7861_v1 = vld [vmem:[#allocation2 + $0xb8] sm:$0xf0]  ;;  %v10162_v2 = vld [vmem:[#allocation2 + $0x1ac] sm:$0xf]  ;;  %v7860_v4 = vor.u32 %v10132_v60, %v7859_v59 }
  0x26   :  { %543 = vmatpush.bf16.msra.mxu3 %v7920_v24  ;;  %v7989_v3 = vld [vmem:[#allocation2 + $0x1b8] sm:$0xf0]  ;;  %v7988_v5 = vor.u32 %v10164_v63, %v7987_v61  ;;  %v7864_v6 = vor.u32 %v10130_v0, %v7861_v1  ;;  %v7843_v7 = vld [vmem:[#allocation2 + $0x88] sm:$0xf]  ;;  %v10128_v8 = vld [vmem:[#allocation2 + $0x94] sm:$0xf0] }
  0x27   :  { %505 = vmatpush.bf16.msra.mxu0 %v7772_v31  ;;  %v7971_v9 = vld [vmem:[#allocation2 + $0x188] sm:$0xf]  ;;  %v7992_v10 = vor.u32 %v10162_v2, %v7989_v3  ;;  %v10160_v11 = vld [vmem:[#allocation2 + $0x194] sm:$0xf0]  ;;  %v10126_v12 = vld [vmem:[#allocation2 + $0x8c] sm:$0xf]  ;;  %v7844_v16 = vor.u32 %v10128_v8, %v7843_v7 }
  0x28   :  { %518 = vmatpush.bf16.msra.mxu1 %v7900_v35  ;;  %v7845_v13 = vld [vmem:[#allocation2 + $0x98] sm:$0xf0]  ;;  %v10158_v14 = vld [vmem:[#allocation2 + $0x18c] sm:$0xf]  ;;  %v7972_v17 = vor.u32 %v10160_v11, %v7971_v9  ;;  %v7827_v19 = vld [vmem:[#allocation2 + $0x68] sm:$0xf] }
  0x29   :  { %531 = vmatpush.bf16.msra.mxu2 %v7776_v36  ;;  %v7973_v15 = vld [vmem:[#allocation2 + $0x198] sm:$0xf0]  ;;  %v7848_v18 = vor.u32 %v10126_v12, %v7845_v13  ;;  %v10124_v20 = vld [vmem:[#allocation2 + $0x74] sm:$0xf0]  ;;  %v7955_v21 = vld [vmem:[#allocation2 + $0x168] sm:$0xf] }
  0x2a   :  { %544 = vmatpush.bf16.msra.mxu3 %v7904_v40  ;;  %506 = vmatmul.bf16.vlgmr.msra.gmra.mxu0 %v11339_v49  ;;  %v7976_v22 = vor.u32 %v10158_v14, %v7973_v15  ;;  %v10156_v23 = vld [vmem:[#allocation2 + $0x174] sm:$0xf0]  ;;  %v10122_v24 = vld [vmem:[#allocation2 + $0x6c] sm:$0xf]  ;;  %v7829_v25 = vld [vmem:[#allocation2 + $0x78] sm:$0xf0]  ;;  %v7828_v28 = vor.u32 %v10124_v20, %v7827_v19 }
  0x2b   :  { %550 = vmatpush.bf16.msrb.mxu0 %v7892_v41  ;;  %519 = vmatmul.bf16.vlgmr.msra.gmra.mxu1 %v11341_v53  ;;  %v10154_v26 = vld [vmem:[#allocation2 + $0x16c] sm:$0xf]  ;;  %v7957_v27 = vld [vmem:[#allocation2 + $0x178] sm:$0xf0]  ;;  %v7956_v29 = vor.u32 %v10156_v23, %v7955_v21  ;;  %v7832_v30 = vor.u32 %v10122_v24, %v7829_v25  ;;  %v7811_v31 = vld [vmem:[#allocation2 + $0x48] sm:$0xf] }
  0x2c   :  { %563 = vmatpush.bf16.msrb.mxu1 %v8020_v43  ;;  %532 = vmatmul.bf16.vlgmr.msra.gmra.mxu2 %v11339_v49  ;;  %v10120_v32 = vld [vmem:[#allocation2 + $0x54] sm:$0xf0]  ;;  %v7939_v33 = vld [vmem:[#allocation2 + $0x148] sm:$0xf]  ;;  %v7960_v34 = vor.u32 %v10154_v26, %v7957_v27  ;;  %v10118_v36 = vld [vmem:[#allocation2 + $0x4c] sm:$0xf] }
  0x2d   :  { %576 = vmatpush.bf16.msrb.mxu2 %v7896_v44  ;;  %545 = vmatmul.bf16.vlgmr.msra.gmra.mxu3 %v11341_v53  ;;  %v10152_v35 = vld [vmem:[#allocation2 + $0x154] sm:$0xf0]  ;;  %v7813_v37 = vld [vmem:[#allocation2 + $0x58] sm:$0xf0]  ;;  %v10150_v38 = vld [vmem:[#allocation2 + $0x14c] sm:$0xf]  ;;  %v7812_v40 = vor.u32 %v10120_v32, %v7811_v31 }
  0x2e   :  { %589 = vmatpush.bf16.msrb.mxu3 %v8024_v48  ;;  %v7941_v39 = vld [vmem:[#allocation2 + $0x158] sm:$0xf0]  ;;  %v7940_v41 = vor.u32 %v10152_v35, %v7939_v33  ;;  %v7816_v42 = vor.u32 %v10118_v36, %v7813_v37  ;;  %v7795_v43 = vld [vmem:[#allocation2 + $0x28] sm:$0xf]  ;;  %v10116_v44 = vld [vmem:[#allocation2 + $0x34] sm:$0xf0] }
  0x2f   :  { %551 = vmatpush.bf16.msrb.mxu0 %v7876_v56  ;;  %v7923_v45 = vld [vmem:[#allocation2 + $0x128] sm:$0xf]  ;;  %v7944_v46 = vor.u32 %v10150_v38, %v7941_v39  ;;  %v10148_v47 = vld [vmem:[#allocation2 + $0x134] sm:$0xf0]  ;;  %v10114_v48 = vld [vmem:[#allocation2 + $0x2c] sm:$0xf]  ;;  %v7796_v54 = vor.u32 %v10116_v44, %v7795_v43 }
  0x30   :  { %564 = vmatpush.bf16.msrb.mxu1 %v8004_v57  ;;  %v7797_v50 = vld [vmem:[#allocation2 + $0x38] sm:$0xf0]  ;;  %v10146_v51 = vld [vmem:[#allocation2 + $0x12c] sm:$0xf]  ;;  %v7924_v55 = vor.u32 %v10148_v47, %v7923_v45  ;;  %v7779_v57 = vld [vmem:[#allocation2 + $0x8] sm:$0xf] }
  0x31   :  { %577 = vmatpush.bf16.msrb.mxu2 %v7880_v58  ;;  %v7925_v52 = vld [vmem:[#allocation2 + $0x138] sm:$0xf0]  ;;  %v7800_v56 = vor.u32 %v10114_v48, %v7797_v50  ;;  %v10112_v58 = vld [vmem:[#allocation2 + $0x14] sm:$0xf0]  ;;  %v7907_v59 = vld [vmem:[#allocation2 + $0x108] sm:$0xf] }
  0x32   :  { %590 = vmatpush.bf16.msrb.mxu3 %v8008_v62  ;;  %v7928_v60 = vor.u32 %v10146_v51, %v7925_v52  ;;  %v10144_v61 = vld [vmem:[#allocation2 + $0x114] sm:$0xf0]  ;;  %v10110_v62 = vld [vmem:[#allocation2 + $0xc] sm:$0xf]  ;;  %v7781_v63 = vld [vmem:[#allocation2 + $0x18] sm:$0xf0]  ;;  %v7780_v2 = vor.u32 %v10112_v58, %v7779_v57 }
  0x33   :  { %552 = vmatpush.bf16.msrb.mxu0 %v7860_v4  ;;  %v10142_v0 = vld [vmem:[#allocation2 + $0x10c] sm:$0xf]  ;;  %v7909_v1 = vld [vmem:[#allocation2 + $0x118] sm:$0xf0]  ;;  %v10233_v3 = vld [vmem:[#allocation2 + $0x3e4] sm:$0xf] }
  0x34   :  { %565 = vmatpush.bf16.msrb.mxu1 %v7988_v5  ;;  %v8272_v4 = vld [vmem:[#allocation2 + $0x3f0] sm:$0xf0]  ;;  %v7908_v5 = vor.u32 %v10144_v61, %v7907_v59  ;;  %v7912_v7 = vor.u32 %v10142_v0, %v7909_v1  ;;  %v10229_v9 = vld [vmem:[#allocation2 + $0x3c4] sm:$0xf]  ;;  %v10234_v27 = vld [vmem:[#allocation2 + $0x3ec] sm:$0xf] }
  0x35   :  { %578 = vmatpush.bf16.msrb.mxu2 %v7864_v6  ;;  %v7784_v6 = vor.u32 %v10110_v62, %v7781_v63  ;;  %v8275_v8 = vor.u32 %v10233_v3, %v8272_v4  ;;  %v10225_v12 = vld [vmem:[#allocation2 + $0x3a4] sm:$0xf]  ;;  %v8240_v13 = vld [vmem:[#allocation2 + $0x3b0] sm:$0xf0]  ;;  %v10230_v31 = vld [vmem:[#allocation2 + $0x3cc] sm:$0xf] }
  0x36   :  { %591 = vmatpush.bf16.msrb.mxu3 %v7992_v10  ;;  %v8256_v10 = vld [vmem:[#allocation2 + $0x3d0] sm:$0xf0]  ;;  %v8243_v14 = vor.u32 %v10225_v12, %v8240_v13  ;;  %v10221_v15 = vld [vmem:[#allocation2 + $0x384] sm:$0xf]  ;;  %v8264_v32 = vld [vmem:[#allocation2 + $0x3d8] sm:$0xf0] }
  0x37   :  { %553 = vmatpush.bf16.msrb.mxu0 %v7844_v16  ;;  %v8259_v11 = vor.u32 %v10229_v9, %v8256_v10  ;;  %v8224_v16 = vld [vmem:[#allocation2 + $0x390] sm:$0xf0]  ;;  %v10213_v21 = vld [vmem:[#allocation2 + $0x344] sm:$0xf]  ;;  %v8267_v33 = vor.u32 %v10230_v31, %v8264_v32  ;;  %v8248_v35 = vld [vmem:[#allocation2 + $0x3b8] sm:$0xf0] }
  0x38   :  { %566 = vmatpush.bf16.msrb.mxu1 %v7972_v17  ;;  %v8227_v17 = vor.u32 %v10221_v15, %v8224_v16  ;;  %v8208_v19 = vld [vmem:[#allocation2 + $0x370] sm:$0xf0]  ;;  %v10209_v24 = vld [vmem:[#allocation2 + $0x324] sm:$0xf]  ;;  %v10222_v37 = vld [vmem:[#allocation2 + $0x38c] sm:$0xf] }
  0x39   :  { %579 = vmatpush.bf16.msrb.mxu2 %v7848_v18  ;;  %v10217_v18 = vld [vmem:[#allocation2 + $0x364] sm:$0xf]  ;;  %v8232_v38 = vld [vmem:[#allocation2 + $0x398] sm:$0xf0]  ;;  %v10214_v43 = vld [vmem:[#allocation2 + $0x34c] sm:$0xf] }
  0x3a   :  { %592 = vmatpush.bf16.msrb.mxu3 %v7976_v22  ;;  %v8211_v20 = vor.u32 %v10217_v18, %v8208_v19  ;;  %v8192_v22 = vld [vmem:[#allocation2 + $0x350] sm:$0xf0]  ;;  %v10205_v26 = vld [vmem:[#allocation2 + $0x304] sm:$0xf]  ;;  %v8235_v39 = vor.u32 %v10222_v37, %v8232_v38  ;;  %v8200_v44 = vld [vmem:[#allocation2 + $0x358] sm:$0xf0] }
  0x3b   :  { %554 = vmatpush.bf16.msrb.mxu0 %v7828_v28  ;;  %v8195_v23 = vor.u32 %v10213_v21, %v8192_v22  ;;  %v8280_v28 = vld [vmem:[#allocation2 + $0x3f8] sm:$0xf0]  ;;  %v8203_v45 = vor.u32 %v10214_v43, %v8200_v44  ;;  %v10235_v47 = vld [vmem:[#allocation2 + $0x3ec] sm:$0xf0]  ;;  %v10210_v48 = vld [vmem:[#allocation2 + $0x32c] sm:$0xf] }
  0x3c   :  { %567 = vmatpush.bf16.msrb.mxu1 %v7956_v29  ;;  %v8184_v51 = vld [vmem:[#allocation2 + $0x338] sm:$0xf0]  ;;  %v8142_v59 = vld [vmem:[#allocation2 + $0x2e0] sm:$0xf]  ;;  %v10201_v63 = vld [vmem:[#allocation2 + $0x2e4] sm:$0xf] }
  0x3d   :  { %580 = vmatpush.bf16.msrb.mxu2 %v7832_v30  ;;  %v8283_v30 = vor.u32 %v10234_v27, %v8280_v28  ;;  %v8187_v52 = vor.u32 %v10210_v48, %v8184_v51  ;;  %v8168_v58 = vld [vmem:[#allocation2 + $0x318] sm:$0xf0]  ;;  %v8144_v0 = vld [vmem:[#allocation2 + $0x2f0] sm:$0xf0]  ;;  %v7767_v1 = vld [vmem:[%s13640_s1 + $0x8] sm:$0xff]  ;;  %s7728_s1 = sshll.u32 %s13651_s12, 4  ;;  %s7729_s1 = int_to_ptr.hbm [resolvable:$true] %s7728_s1 }
  0x3e   :  { %593 = vmatpush.bf16.msrb.mxu3 %v7960_v34  ;;  %v10226_v34 = vld [vmem:[#allocation2 + $0x3ac] sm:$0xf]  ;;  %v11354_v3 = vpack.c.bf16 %v7767_v1, %v7767_v1  ;;  %v8597_v4 = vld [vmem:[#allocation2 + $0x1e0] sm:$0xf]  ;;  %v10197_v12 = vld [vmem:[#allocation2 + $0x2c4] sm:$0xf] }
  0x3f   :  { %555 = vmatpush.bf16.msrb.mxu0 %v7812_v40  ;;  %v8251_v36 = vor.u32 %v10226_v34, %v8248_v35  ;;  %v10218_v40 = vld [vmem:[#allocation2 + $0x36c] sm:$0xf]  ;;  %v8126_v10 = vld [vmem:[#allocation2 + $0x2c0] sm:$0xf]  ;;  %v10311_v16 = vld [vmem:[#allocation2 + $0x1cc] sm:$0xf0] }
  0x40   :  { %568 = vmatpush.bf16.msrb.mxu1 %v7940_v41  ;;  %v8216_v41 = vld [vmem:[#allocation2 + $0x378] sm:$0xf0]  ;;  %v8581_v15 = vld [vmem:[#allocation2 + $0x1c0] sm:$0xf]  ;;  %v10223_v21 = vld [vmem:[#allocation2 + $0x38c] sm:$0xf0] }
  0x41   :  { %581 = vmatpush.bf16.msrb.mxu2 %v7816_v42  ;;  %v8219_v42 = vor.u32 %v10218_v40, %v8216_v41  ;;  %v8582_v18 = vor.u32 %v10311_v16, %v8581_v15  ;;  %v108_v19 = vld [vmem:[%s13639_s0] sm:$0xff]  ;;  %v10307_v27 = vld [vmem:[#allocation2 + $0x1ac] sm:$0xf0]  ;;  %v8096_v40 = vld [vmem:[#allocation2 + $0x290] sm:$0xf0]  ;;  %s11257_s19 = smov [#allocation8]  }
  0x42   :  { %594 = vmatpush.bf16.msrb.mxu3 %v7944_v46  ;;  %v8270_v46 = vld [vmem:[#allocation2 + $0x3e0] sm:$0xf]  ;;  %v10219_v32 = vld [vmem:[#allocation2 + $0x36c] sm:$0xf0]  ;;  %v10189_v38 = vld [vmem:[#allocation2 + $0x284] sm:$0xf] }
  0x43   :  { %556 = vmatpush.bf16.msrb.mxu0 %v7796_v54  ;;  %v8271_v50 = vor.u32 %v10235_v47, %v8270_v46  ;;  %v8254_v54 = vld [vmem:[#allocation2 + $0x3c0] sm:$0xf]  ;;  %v10191_v37 = vld [vmem:[#allocation2 + $0x28c] sm:$0xf0]  ;;  %v8099_v44 = vor.u32 %v10189_v38, %v8096_v40  ;;  %v8262_v40 = vld [vmem:[#allocation2 + $0x3c8] sm:$0xf] }
  0x44   :  { %569 = vmatpush.bf16.msrb.mxu1 %v7924_v55  ;;  %v10231_v55 = vld [vmem:[#allocation2 + $0x3cc] sm:$0xf0]  ;;  %v8206_v31 = vld [vmem:[#allocation2 + $0x360] sm:$0xf]  ;;  %s7726_s20 = sshll.u32 %s11257_s19, 4  ;;  %s11258_s21 = smov [#allocation9]   ;;  %s7727_s20 = int_to_ptr.vmem [resolvable:$true] %s7726_s20 }
  0x45   :  { %582 = vmatpush.bf16.msrb.mxu2 %v7800_v56  ;;  %v10206_v56 = vld [vmem:[#allocation2 + $0x30c] sm:$0xf]  ;;  %v8255_v57 = vor.u32 %v10231_v55, %v8254_v54  ;;  %v8207_v35 = vor.u32 %v10219_v32, %v8206_v31  ;;  %v8549_v41 = vld [vmem:[#allocation2 + $0x180] sm:$0xf]  ;;  %v10215_v47 = vld [vmem:[#allocation2 + $0x34c] sm:$0xf0] }
  0x46   :  { %595 = vmatpush.bf16.msrb.mxu3 %v7928_v60  ;;  %v10203_v60 = vld [vmem:[#allocation2 + $0x2ec] sm:$0xf0]  ;;  %v8171_v61 = vor.u32 %v10206_v56, %v8168_v58  ;;  %v8190_v46 = vld [vmem:[#allocation2 + $0x340] sm:$0xf]  ;;  %v10185_v55 = vld [vmem:[#allocation2 + $0x264] sm:$0xf] }
  0x47   :  { %557 = vmatpush.bf16.msrb.mxu0 %v7780_v2  ;;  %v8143_v62 = vor.u32 %v10203_v60, %v8142_v59  ;;  %v8147_v2 = vor.u32 %v10201_v63, %v8144_v0  ;;  %v8191_v51 = vor.u32 %v10215_v47, %v8190_v46  ;;  %v10187_v54 = vld [vmem:[#allocation2 + $0x26c] sm:$0xf0]  ;;  %v8080_v56 = vld [vmem:[#allocation2 + $0x270] sm:$0xf0]  ;;  %v8533_v60 = vld [vmem:[#allocation2 + $0x160] sm:$0xf] }
  0x48   :  { %570 = vmatpush.bf16.msrb.mxu1 %v7908_v5  ;;  %v10315_v5 = vld [vmem:[#allocation2 + $0x1ec] sm:$0xf0]  ;;  %v8083_v59 = vor.u32 %v10185_v55, %v8080_v56  ;;  %v8152_v55 = vld [vmem:[#allocation2 + $0x2f8] sm:$0xf0]  ;;  %v8605_v56 = vld [vmem:[#allocation2 + $0x1e8] sm:$0xf] }
  0x49   :  { %583 = vmatpush.bf16.msrb.mxu2 %v7784_v6  ;;  %v8598_v6 = vor.u32 %v10315_v5, %v8597_v4  ;;  %v10211_v4 = vld [vmem:[#allocation2 + $0x32c] sm:$0xf0]  ;;  %s7740_s22 = sshll.u32 %s11258_s21, 4  ;;  %s7742_s24 = sshll.u32 %s13652_s13, 4  ;;  %s7741_s22 = int_to_ptr.vmem [resolvable:$true] %s7740_s22  ;;  %s7743_s24 = int_to_ptr.hbm [resolvable:$true] %s7742_s24 }
  0x4a   :  { %596 = vmatpush.bf16.msrb.mxu3 %v7912_v7  ;;  %558 = vmatmul.bf16.vlgmr.msrb.gmra.mxu0 %v11339_v49  ;;  %v8238_v7 = vld [vmem:[#allocation2 + $0x3a0] sm:$0xf]  ;;  %v10291_v31 = vld [vmem:[#allocation2 + $0x12c] sm:$0xf0]  ;;  %s11259_s25 = smov [#allocation5]   ;;  %s7702_s27 = sshll.u32 %s13649_s10, 4  ;;  %s7703_s27 = int_to_ptr.hbm [resolvable:$true] %s7702_s27 }
  0x4b   :  { %571 = vmatmul.bf16.vlgmr.msrb.gmra.mxu1 %v11341_v53  ;;  %1052 = vmatpush.bf16.msra.mxu0 %v8143_v62  ;;  %s7700_s12 = sshll.u32 %s11259_s25, 4  ;;  %s7701_s12 = int_to_ptr.vmem [resolvable:$true] %s7700_s12 }
  0x4c   :  { %584 = vmatmul.bf16.vlgmr.msrb.gmra.mxu2 %v11339_v49  ;;  %v8176_v49 = vld [vmem:[#allocation2 + $0x330] sm:$0xf0]  ;;  %1065 = vmatpush.bf16.msra.mxu1 %v8271_v50  ;;  %v109_v50 = vld [vmem:[%s13639_s0 + $0x8] sm:$0xff] }
  0x4d   :  { %597 = vmatmul.bf16.vlgmr.msrb.gmra.mxu3 %v11341_v53  ;;  %v8179_v25 = vor.u32 %v10209_v24, %v8176_v49  ;;  %v8160_v53 = vld [vmem:[#allocation2 + $0x310] sm:$0xf0]  ;;  %1078 = vmatpush.bf16.msra.mxu2 %v8147_v2  ;;  %v10195_v24 = vld [vmem:[#allocation2 + $0x2ac] sm:$0xf0]  ;;  %v10193_v49 = vld [vmem:[#allocation2 + $0x2a4] sm:$0xf] }
  0x4e   :  { %1091 = vmatpush.bf16.msra.mxu3 %v8275_v8  ;;  %v8163_v29 = vor.u32 %v10205_v26, %v8160_v53  ;;  %v10227_v8 = vld [vmem:[#allocation2 + $0x3ac] sm:$0xf0]  ;;  %v8112_v26 = vld [vmem:[#allocation2 + $0x2b0] sm:$0xf0]  ;;  %v8565_v53 = vld [vmem:[#allocation2 + $0x1a0] sm:$0xf] }
  0x4f   :  { %v8239_v9 = vor.u32 %v10227_v8, %v8238_v7  ;;  %v8115_v28 = vor.u32 %v10193_v49, %v8112_v26  ;;  %v8174_v2 = vld [vmem:[#allocation2 + $0x320] sm:$0xf]  ;;  %v10183_v8 = vld [vmem:[#allocation2 + $0x24c] sm:$0xf0]  ;;  %v8048_v26 = vld [vmem:[#allocation2 + $0x230] sm:$0xf0] }
  0x50   :  { %1066 = vmatpush.bf16.msra.mxu1 %v8255_v57  ;;  %v8062_v7 = vld [vmem:[#allocation2 + $0x240] sm:$0xf] }
  0x52   :  { %1092 = vmatpush.bf16.msra.mxu3 %v8259_v11  ;;  %v10199_v11 = vld [vmem:[#allocation2 + $0x2cc] sm:$0xf0] }
  0x53   :  { %v8127_v13 = vor.u32 %v10199_v11, %v8126_v10  ;;  %v8063_v11 = vor.u32 %v10183_v8, %v8062_v7  ;;  %v8589_v7 = vld [vmem:[#allocation2 + $0x1c8] sm:$0xf]  ;;  %v10312_v8 = vld [vmem:[#allocation2 + $0x1d4] sm:$0xf0] }
  0x54   :  { %1067 = vmatpush.bf16.msra.mxu1 %v8239_v9  ;;  %v10181_v9 = vld [vmem:[#allocation2 + $0x244] sm:$0xf] }
  0x55   :  { %1053 = vmatpush.bf16.msra.mxu0 %v8127_v13  ;;  %v8517_v13 = vld [vmem:[#allocation2 + $0x140] sm:$0xf] }
  0x56   :  { %1093 = vmatpush.bf16.msra.mxu3 %v8243_v14  ;;  %v8128_v14 = vld [vmem:[#allocation2 + $0x2d0] sm:$0xf0] }
  0x5a   :  { %1094 = vmatpush.bf16.msra.mxu3 %v8227_v17  ;;  %v8131_v17 = vor.u32 %v10197_v12, %v8128_v14  ;;  %v8064_v12 = vld [vmem:[#allocation2 + $0x250] sm:$0xf0]  ;;  %v10295_v14 = vld [vmem:[#allocation2 + $0x14c] sm:$0xf0] }
  0x5b   :  { %v8067_v15 = vor.u32 %v10181_v9, %v8064_v12  ;;  %v8518_v16 = vor.u32 %v10295_v14, %v8517_v13  ;;  %v110_v9 = vld [vmem:[%s13639_s0 + $0x10] sm:$0xff]  ;;  %v10224_v12 = vld [vmem:[#allocation2 + $0x394] sm:$0xf0] }
  0x5c   :  { %1079 = vmatpush.bf16.msra.mxu2 %v8131_v17 }
  0x5e   :  { %1095 = vmatpush.bf16.msra.mxu3 %v8211_v20  ;;  %v8222_v20 = vld [vmem:[#allocation2 + $0x380] sm:$0xf] }
  0x5f   :  { %v8223_v22 = vor.u32 %v10223_v21, %v8222_v20 }
  0x60   :  { %1080 = vmatpush.bf16.msra.mxu2 %v8115_v28 }
  0x61   :  { %1068 = vmatpush.bf16.msra.mxu1 %v8223_v22  ;;  %v8046_v22 = vld [vmem:[#allocation2 + $0x220] sm:$0xf] }
  0x62   :  { %1096 = vmatpush.bf16.msra.mxu3 %v8195_v23  ;;  %v8110_v23 = vld [vmem:[#allocation2 + $0x2a0] sm:$0xf] }
  0x64   :  { %1081 = vmatpush.bf16.msra.mxu2 %v8099_v44  ;;  %v10287_v44 = vld [vmem:[#allocation2 + $0x10c] sm:$0xf0] }
  0x65   :  { %1069 = vmatpush.bf16.msra.mxu1 %v8207_v35  ;;  %v8030_v35 = vld [vmem:[#allocation2 + $0x200] sm:$0xf] }
  0x66   :  { %1097 = vmatpush.bf16.msra.mxu3 %v8179_v25  ;;  %v8111_v25 = vor.u32 %v10195_v24, %v8110_v23  ;;  %v10179_v23 = vld [vmem:[#allocation2 + $0x22c] sm:$0xf0]  ;;  %v10177_v24 = vld [vmem:[#allocation2 + $0x224] sm:$0xf] }
  0x67   :  { %v8051_v28 = vor.u32 %v10177_v24, %v8048_v26  ;;  %v10220_v26 = vld [vmem:[#allocation2 + $0x374] sm:$0xf0] }
  0x68   :  { %1054 = vmatpush.bf16.msra.mxu0 %v8111_v25  ;;  %1082 = vmatpush.bf16.msra.mxu2 %v8083_v59  ;;  %v8047_v25 = vor.u32 %v10179_v23, %v8046_v22  ;;  %v8246_v59 = vld [vmem:[#allocation2 + $0x3a8] sm:$0xf] }
  0x69   :  { %1070 = vmatpush.bf16.msra.mxu1 %v8191_v51  ;;  %v10202_v51 = vld [vmem:[#allocation2 + $0x2ec] sm:$0xf] }
  0x6a   :  { %1098 = vmatpush.bf16.msra.mxu3 %v8163_v29  ;;  %v8566_v29 = vor.u32 %v10307_v27, %v8565_v53  ;;  %v8278_v53 = vld [vmem:[#allocation2 + $0x3e8] sm:$0xf] }
  0x6c   :  { %1083 = vmatpush.bf16.msra.mxu2 %v8067_v15  ;;  %v8118_v15 = vld [vmem:[#allocation2 + $0x2a8] sm:$0xf] }
  0x6d   :  { %1099 = vmatmul.bf16.vlgmr.msra.gmra.mxu3 %v11354_v3 }
  0x6e   :  { %1143 = vmatpush.bf16.msrb.mxu3 %v8283_v30 }
  0x70   :  { %1084 = vmatpush.bf16.msra.mxu2 %v8051_v28 }
  0x72   :  { %1144 = vmatpush.bf16.msrb.mxu3 %v8267_v33 }
  0x76   :  { %1145 = vmatpush.bf16.msrb.mxu3 %v8251_v36  ;;  %v8094_v36 = vld [vmem:[#allocation2 + $0x280] sm:$0xf] }
  0x7a   :  { %1146 = vmatpush.bf16.msrb.mxu3 %v8235_v39  ;;  %v8095_v39 = vor.u32 %v10191_v37, %v8094_v36  ;;  %v10175_v36 = vld [vmem:[#allocation2 + $0x20c] sm:$0xf0]  ;;  %v10173_v37 = vld [vmem:[#allocation2 + $0x204] sm:$0xf] }
  0x7b   :  { %v8031_v38 = vor.u32 %v10175_v36, %v8030_v35  ;;  %v8104_v35 = vld [vmem:[#allocation2 + $0x298] sm:$0xf0]  ;;  %v8557_v36 = vld [vmem:[#allocation2 + $0x188] sm:$0xf] }
  0x7c   :  { %1055 = vmatpush.bf16.msra.mxu0 %v8095_v39  ;;  %v8032_v39 = vld [vmem:[#allocation2 + $0x210] sm:$0xf0] }
  0x7e   :  { %1147 = vmatpush.bf16.msrb.mxu3 %v8219_v42  ;;  %v10303_v42 = vld [vmem:[#allocation2 + $0x18c] sm:$0xf0] }
  0x82   :  { %1148 = vmatpush.bf16.msrb.mxu3 %v8203_v45  ;;  %v8550_v45 = vor.u32 %v10303_v42, %v8549_v41  ;;  %v8035_v41 = vor.u32 %v10173_v37, %v8032_v39  ;;  %v10232_v42 = vld [vmem:[#allocation2 + $0x3d4] sm:$0xf0] }
  0x83   :  { %v8263_v46 = vor.u32 %v10232_v42, %v8262_v40  ;;  %v111_v42 = vld [vmem:[%s13639_s0 + $0x18] sm:$0xff] }
  0x84   :  { %1085 = vmatpush.bf16.msra.mxu2 %v8035_v41  ;;  %v10304_v41 = vld [vmem:[#allocation2 + $0x194] sm:$0xf0] }
  0x86   :  { %1149 = vmatpush.bf16.msrb.mxu3 %v8187_v52  ;;  %v8078_v52 = vld [vmem:[#allocation2 + $0x260] sm:$0xf] }
  0x87   :  { %v8079_v58 = vor.u32 %v10187_v54, %v8078_v52 }
  0x89   :  { %1056 = vmatpush.bf16.msra.mxu0 %v8079_v58  ;;  %v10316_v58 = vld [vmem:[#allocation2 + $0x1f4] sm:$0xf0] }
  0x8a   :  { %1150 = vmatpush.bf16.msrb.mxu3 %v8171_v61  ;;  %v10299_v61 = vld [vmem:[#allocation2 + $0x16c] sm:$0xf0] }
  0x8b   :  { %v8534_v1 = vor.u32 %v10299_v61, %v8533_v60  ;;  %v10228_v60 = vld [vmem:[#allocation2 + $0x3b4] sm:$0xf0]  ;;  %v8134_v61 = vld [vmem:[#allocation2 + $0x2c8] sm:$0xf] }
  0x8d   :  { %1151 = vmatmul.bf16.vlgmr.msrb.gmra.mxu3 %v11354_v3  ;;  %1057 = vmatpush.bf16.msra.mxu0 %v8063_v11  ;;  %v8230_v11 = vld [vmem:[#allocation2 + $0x388] sm:$0xf] }
  0x8e   :  { %2408 = vmatpush.bf16.msra.mxu3 %v8598_v6  ;;  %v8175_v6 = vor.u32 %v10211_v4, %v8174_v2  ;;  %v10198_v2 = vld [vmem:[#allocation2 + $0x2cc] sm:$0xf]  ;;  %v8136_v4 = vld [vmem:[#allocation2 + $0x2d8] sm:$0xf0]  ;;  %v8231_v14 = vor.u32 %v10224_v12, %v8230_v11 }
  0x90   :  { %1071 = vmatpush.bf16.msra.mxu1 %v8175_v6  ;;  %v8139_v6 = vor.u32 %v10198_v2, %v8136_v4 }
  0x91   :  { %1058 = vmatpush.bf16.msra.mxu0 %v8047_v25  ;;  %v8214_v25 = vld [vmem:[#allocation2 + $0x368] sm:$0xf] }
  0x92   :  { %2409 = vmatpush.bf16.msra.mxu3 %v8582_v18  ;;  %v8158_v18 = vld [vmem:[#allocation2 + $0x300] sm:$0xf] }
  0x95   :  { %1059 = vmatpush.bf16.msra.mxu0 %v8031_v38 }
  0x96   :  { %2410 = vmatpush.bf16.msra.mxu3 %v8566_v29  ;;  %v10236_v29 = vld [vmem:[#allocation2 + $0x3f4] sm:$0xf0] }
  0x9a   :  { %2411 = vmatpush.bf16.msra.mxu3 %v8550_v45 }
  0x9e   :  { %2412 = vmatpush.bf16.msra.mxu3 %v8534_v1  ;;  %v8247_v1 = vor.u32 %v10228_v60, %v8246_v59 }
  0xa2   :  { %2413 = vmatpush.bf16.msra.mxu3 %v8518_v16  ;;  %v10196_v16 = vld [vmem:[#allocation2 + $0x2b4] sm:$0xf0] }
  0xa7   :  { %v507_v30 = vpop.f32.mrf.mxu0 }
  0xa8   :  { %v508_v33 = vadd.f32 %v507_v30, %v108_v19  ;;  %v520_v34 = vpop.f32.mrf.mxu1  ;;  %v10207_v19 = vld [vmem:[#allocation2 + $0x30c] sm:$0xf0]  ;;  %v8501_v30 = vld [vmem:[#allocation2 + $0x120] sm:$0xf] }
  0xa9   :  { %v8159_v21 = vor.u32 %v10207_v19, %v8158_v18  ;;  %v8119_v18 = vor.u32 %v10196_v16, %v8118_v15  ;;  %v8120_v19 = vld [vmem:[#allocation2 + $0x2b8] sm:$0xf0] }
  0xaa   :  { %v521_v43 = vadd.f32 %v520_v34, %v508_v33  ;;  %v8279_v33 = vor.u32 %v10236_v29, %v8278_v53  ;;  %v8502_v34 = vor.u32 %v10291_v31, %v8501_v30  ;;  %v8102_v30 = vld [vmem:[#allocation2 + $0x288] sm:$0xf]  ;;  %v10192_v31 = vld [vmem:[#allocation2 + $0x294] sm:$0xf0] }
  0xab   :  { %1072 = vmatpush.bf16.msra.mxu1 %v8159_v21  ;;  %v10308_v21 = vld [vmem:[#allocation2 + $0x1b4] sm:$0xf0]  ;;  %v8103_v39 = vor.u32 %v10192_v31, %v8102_v30 }
  0xac   :  { %v8025_v48 = vmul.f32 -1.442695, %v521_v43  ;;  %2414 = vmatpush.bf16.msra.mxu3 %v8502_v34  ;;  %v8485_v43 = vld [vmem:[#allocation2 + $0x100] sm:$0xf]  ;;  %v8215_v34 = vor.u32 %v10220_v26, %v8214_v25  ;;  %v8166_v25 = vld [vmem:[#allocation2 + $0x308] sm:$0xf] }
  0xad   :  { %v8486_v47 = vor.u32 %v10287_v44, %v8485_v43  ;;  %v8198_v43 = vld [vmem:[#allocation2 + $0x348] sm:$0xf]  ;;  %v10216_v44 = vld [vmem:[#allocation2 + $0x354] sm:$0xf0] }
  0xae   :  { %10698 = vpow2.f32 %v8025_v48  ;;  %1073 = vmatmul.bf16.vlgmr.msra.gmra.mxu1 %v11354_v3  ;;  %v8150_v48 = vld [vmem:[#allocation2 + $0x2e8] sm:$0xf]  ;;  %v10208_v26 = vld [vmem:[#allocation2 + $0x314] sm:$0xf0] }
  0xaf   :  { %v533_v57 = vpop.f32.mrf.mxu2  ;;  %v509_v0 = vpop.f32.mrf.mxu0  ;;  %1117 = vmatpush.bf16.msrb.mxu1 %v8279_v33 }
  0xb0   :  { %v534_v62 = vadd.f32 %v533_v57, %v109_v50  ;;  %v546_v63 = vpop.f32.mrf.mxu3  ;;  %v522_v5 = vpop.f32.mrf.mxu1  ;;  %v10204_v50 = vld [vmem:[#allocation2 + $0x2f4] sm:$0xf0]  ;;  %v8155_v57 = vor.u32 %v10202_v51, %v8152_v55  ;;  %2415 = vmatpush.bf16.msra.mxu3 %v8486_v47  ;;  %v8606_v0 = vor.u32 %v10316_v58, %v8605_v56  ;;  %v8086_v47 = vld [vmem:[#allocation2 + $0x268] sm:$0xf]  ;;  %v10186_v55 = vld [vmem:[#allocation2 + $0x26c] sm:$0xf] }
  0xb1   :  { %v8151_v54 = vor.u32 %v10204_v50, %v8150_v48  ;;  %v10188_v48 = vld [vmem:[#allocation2 + $0x274] sm:$0xf0]  ;;  %v8088_v56 = vld [vmem:[#allocation2 + $0x278] sm:$0xf0] }
  0xb2   :  { %v547_v10 = vadd.f32 %v546_v63, %v534_v62  ;;  %v10200_v62 = vld [vmem:[#allocation2 + $0x2d4] sm:$0xf0]  ;;  %1130 = vmatpush.bf16.msrb.mxu2 %v8155_v57  ;;  %v8541_v57 = vld [vmem:[#allocation2 + $0x168] sm:$0xf]  ;;  %v8087_v59 = vor.u32 %v10188_v48, %v8086_v47  ;;  %v8091_v60 = vor.u32 %v10186_v55, %v8088_v56  ;;  %v8040_v47 = vld [vmem:[#allocation2 + $0x218] sm:$0xf0] }
  0xb3   :  { %1118 = vmatpush.bf16.msrb.mxu1 %v8263_v46  ;;  %1104 = vmatpush.bf16.msrb.mxu0 %v8151_v54  ;;  %v8135_v5 = vor.u32 %v10200_v62, %v8134_v61  ;;  %v8558_v46 = vor.u32 %v10304_v41, %v8557_v36  ;;  %v8199_v54 = vor.u32 %v10216_v44, %v8198_v43  ;;  %v10300_v61 = vld [vmem:[#allocation2 + $0x174] sm:$0xf0]  ;;  %v8182_v62 = vld [vmem:[#allocation2 + $0x328] sm:$0xf]  ;;  %v104_v48 = vld [vmem:[%s13641_s2] sm:$0xff] }
  0xb4   :  { %v8026_v17 = vmul.f32 -1.442695, %v547_v10  ;;  %v10699_v20 = vpop.eup %10698  ;;  %2460 = vmatpush.bf16.msrb.mxu3 %v8606_v0  ;;  %v8590_v10 = vor.u32 %v10312_v8, %v8589_v7  ;;  %v10212_v0 = vld [vmem:[#allocation2 + $0x334] sm:$0xf0]  ;;  %v10182_v7 = vld [vmem:[#allocation2 + $0x24c] sm:$0xf]  ;;  %v8167_v36 = vor.u32 %v10208_v26, %v8166_v25 }
  0xb5   :  { %v11364_v49 = vadd.f32 1.0, %v10699_v20  ;;  %v8573_v20 = vld [vmem:[#allocation2 + $0x1a8] sm:$0xf]  ;;  %v10288_v56 = vld [vmem:[#allocation2 + $0x114] sm:$0xf0] }
  0xb6   :  { %10700 = vpow2.f32 %v8026_v17  ;;  %v10194_v17 = vld [vmem:[#allocation2 + $0x2ac] sm:$0xf]  ;;  %1131 = vmatpush.bf16.msrb.mxu2 %v8139_v6  ;;  %v8574_v29 = vor.u32 %v10308_v21, %v8573_v20  ;;  %v10184_v6 = vld [vmem:[#allocation2 + $0x254] sm:$0xf0]  ;;  %v8038_v43 = vld [vmem:[#allocation2 + $0x208] sm:$0xf] }
  0xb7   :  { %v535_v27 = vpop.f32.mrf.mxu2  ;;  %10702 = vrcp.f32 %v11364_v49  ;;  %1119 = vmatpush.bf16.msrb.mxu1 %v8247_v1  ;;  %1105 = vmatpush.bf16.msrb.mxu0 %v8135_v5  ;;  %v8123_v24 = vor.u32 %v10194_v17, %v8120_v19  ;;  %vm619_vm1 = vweird.f32 %v11364_v49  ;;  %v8070_v5 = vld [vmem:[#allocation2 + $0x248] sm:$0xf]  ;;  %v625_v11 = vand.u32 2147483648, %v11364_v49  ;;  %v10296_v20 = vld [vmem:[#allocation2 + $0x154] sm:$0xf0] }
  0xb8   :  { %v548_v32 = vpop.f32.mrf.mxu3  ;;  %2461 = vmatpush.bf16.msrb.mxu3 %v8590_v10  ;;  %v623_v10 = vand.u32 2147483647, %v11364_v49  ;;  %v8183_v19 = vor.u32 %v10212_v0, %v8182_v62  ;;  %v8493_v55 = vld [vmem:[#allocation2 + $0x108] sm:$0xf]  ;;  %v8824_v26 = vld [vmem:[#allocation2 + $0x3a0] sm:$0xf] }
  0xb9   :  { %v10190_v32 = vld [vmem:[#allocation2 + $0x28c] sm:$0xf] }
  0xba   :  { %1132 = vmatpush.bf16.msrb.mxu2 %v8123_v24  ;;  %v8107_v40 = vor.u32 %v10190_v32, %v8104_v35  ;;  %vm11423_vm7 = vcmp.eq.f32.partialorder %v623_v10, 8.507059e+37 }
  0xbb   :  { %1120 = vmatpush.bf16.msrb.mxu1 %v8231_v14  ;;  %1106 = vmatpush.bf16.msrb.mxu0 %v8119_v18  ;;  %v8072_v14 = vld [vmem:[#allocation2 + $0x258] sm:$0xf0] }
  0xbc   :  { %v10701_v45 = vpop.eup %10700  ;;  %2462 = vmatpush.bf16.msrb.mxu3 %v8574_v29  ;;  %v8075_v24 = vor.u32 %v10182_v7, %v8072_v14  ;;  %v8056_v29 = vld [vmem:[#allocation2 + $0x238] sm:$0xf0] }
  0xbd   :  { %v11368_v52 = vadd.f32 1.0, %v10701_v45  ;;  %v11371_v63 = vpop.eup %10702 }
  0xbe   :  { %v615_v13 = vmul.f32 %v11371_v63, %v11364_v49  ;;  %vm620_vm2 = vweird.f32 %v11371_v63  ;;  %1133 = vmatpush.bf16.msrb.mxu2 %v8107_v40  ;;  %v8525_v49 = vld [vmem:[#allocation2 + $0x148] sm:$0xf] }
  0xbf   :  { %10704 = vrcp.f32 %v11368_v52  ;;  %vm634_vm0 = vweird.f32 %v11368_v52  ;;  %1121 = vmatpush.bf16.msrb.mxu1 %v8215_v34  ;;  %1107 = vmatpush.bf16.msrb.mxu0 %v8103_v39  ;;  %v640_v8 = vand.u32 2147483648, %v11368_v52  ;;  %vm11396_vm4 = vmor %vm619_vm1, %vm620_vm2  ;;  %v638_v18 = vand.u32 2147483647, %v11368_v52 }
  0xc0   :  { %v616_v33 = vsub.f32 1.0, %v615_v13  ;;  %2463 = vmatpush.bf16.msrb.mxu3 %v8558_v46  ;;  %v8542_v13 = vor.u32 %v10300_v61, %v8541_v57  ;;  %v8526_v32 = vor.u32 %v10296_v20, %v8525_v49  ;;  %v10174_v46 = vld [vmem:[#allocation2 + $0x20c] sm:$0xf]  ;;  %v8494_v61 = vor.u32 %v10288_v56, %v8493_v55  ;;  %v10379_v49 = vld [vmem:[#allocation2 + $0x3ec] sm:$0xf0] }
  0xc1   :  { %v641_v31 = vor.u32 1.1754944e-38, %v640_v8  ;;  %vm11416_vm6 = vcmp.eq.f32.partialorder %v638_v18, 8.507059e+37  ;;  %v8864_v56 = vld [vmem:[#allocation2 + $0x3e8] sm:$0xf] }
  0xc2   :  { %v617_v51 = vmul.f32 %v11371_v63, %v616_v33  ;;  %1134 = vmatpush.bf16.msrb.mxu2 %v8091_v60 }
  0xc3   :  { %1122 = vmatpush.bf16.msrb.mxu1 %v8199_v54  ;;  %1108 = vmatpush.bf16.msrb.mxu0 %v8087_v59  ;;  %v8043_v59 = vor.u32 %v10174_v46, %v8040_v47 }
  0xc4   :  { %v618_v21 = vadd.f32 %v11371_v63, %v617_v51  ;;  %2464 = vmatpush.bf16.msrb.mxu3 %v8542_v13 }
  0xc5   :  { %v11378_v22 = vpop.eup %10704 }
  0xc6   :  { %v630_v53 = vmul.f32 %v11378_v22, %v11368_v52  ;;  %vm635_vm3 = vweird.f32 %v11378_v22  ;;  %v626_v52 = vor.u32 1.1754944e-38, %v625_v11  ;;  %v622_v39 = vsel %vm11396_vm4, %v11371_v63, %v618_v21  ;;  %1135 = vmatpush.bf16.msrb.mxu2 %v8075_v24  ;;  %v8840_v21 = vld [vmem:[#allocation2 + $0x3c0] sm:$0xf] }
  0xc7   :  { %v559_v23 = vpop.f32.mrf.mxu0  ;;  %vm11406_vm5 = vmor %vm634_vm0, %vm635_vm3  ;;  %1123 = vmatpush.bf16.msrb.mxu1 %v8183_v19  ;;  %v8856_v19 = vld [vmem:[#allocation2 + $0x3e0] sm:$0xf] }
  0xc8   :  { %v560_v27 = vadd.f32 %v559_v23, %v110_v9  ;;  %v572_v28 = vpop.f32.mrf.mxu1  ;;  %v631_v37 = vsub.f32 1.0, %v630_v53  ;;  %v8071_v23 = vor.u32 %v10184_v6, %v8070_v5  ;;  %v8054_v53 = vld [vmem:[#allocation2 + $0x228] sm:$0xf]  ;;  %2465 = vmatpush.bf16.msrb.mxu3 %v8526_v32  ;;  %v627_v54 = vsel %vm11423_vm7, %v626_v52, %v622_v39  ;;  %v8792_v32 = vld [vmem:[#allocation2 + $0x360] sm:$0xf] }
  0xc9   :  { %v8857_v20 = vor.u32 %v10379_v49, %v8856_v19  ;;  %v10359_v39 = vld [vmem:[#allocation2 + $0x34c] sm:$0xf0]  ;;  %v10245_v49 = vld [vmem:[%s13648_s9] sm:$0xff] }
  0xca   :  { %v573_v38 = vadd.f32 %v572_v28, %v560_v27  ;;  %v632_v50 = vmul.f32 %v11378_v22, %v631_v37  ;;  %v10180_v27 = vld [vmem:[#allocation2 + $0x234] sm:$0xf0]  ;;  %v10178_v28 = vld [vmem:[#allocation2 + $0x22c] sm:$0xf]  ;;  %v8509_v37 = vld [vmem:[#allocation2 + $0x128] sm:$0xf]  ;;  %1109 = vmatpush.bf16.msrb.mxu0 %v8071_v23 }
  0xcb   :  { %1124 = vmatpush.bf16.msrb.mxu1 %v8167_v36  ;;  %v10375_v23 = vld [vmem:[#allocation2 + $0x3cc] sm:$0xf0] }
  0xcc   :  { %v8027_v45 = vmul.f32 -1.442695, %v573_v38  ;;  %v633_v17 = vadd.f32 %v11378_v22, %v632_v50  ;;  %v10292_v38 = vld [vmem:[#allocation2 + $0x134] sm:$0xf0]  ;;  %v8841_v24 = vor.u32 %v10375_v23, %v8840_v21  ;;  %v10251_v36 = vld [vmem:[%s13648_s9 + $0x30] sm:$0xff] }
  0xcd   :  { %v8510_v50 = vor.u32 %v10292_v38, %v8509_v37  ;;  %v8776_v38 = vld [vmem:[#allocation2 + $0x340] sm:$0xf] }
  0xce   :  { %10706 = vpow2.f32 %v8027_v45  ;;  %v637_v34 = vsel %vm11406_vm5, %v11378_v22, %v633_v17  ;;  %v8055_v22 = vor.u32 %v10180_v27, %v8054_v53  ;;  %v10176_v45 = vld [vmem:[#allocation2 + $0x214] sm:$0xf0]  ;;  %1125 = vmatmul.bf16.vlgmr.msrb.gmra.mxu1 %v11354_v3  ;;  %v10371_v53 = vld [vmem:[#allocation2 + $0x3ac] sm:$0xf0]  ;;  %v8777_v40 = vor.u32 %v10359_v39, %v8776_v38  ;;  %v8784_v39 = vld [vmem:[#allocation2 + $0x348] sm:$0xf] }
  0xcf   :  { %v585_v58 = vpop.f32.mrf.mxu2  ;;  %v561_v4 = vpop.f32.mrf.mxu0  ;;  %v642_v63 = vsel %vm11416_vm6, %v641_v31, %v637_v34  ;;  %2466 = vmatpush.bf16.msrb.mxu3 %v8510_v50  ;;  %v8825_v27 = vor.u32 %v10371_v53, %v8824_v26  ;;  %v10252_v31 = vld [vmem:[%s13648_s9 + $0x38] sm:$0xff]  ;;  %v11458_v34 = vld [vmem:[%s13646_s7 + $0x4] sm:$0xf]  ;;  %v8744_v50 = vld [vmem:[#allocation2 + $0x300] sm:$0xf]  ;;  %s11256_s7 = smov 8  }
  0xd0   :  { %v586_v1 = vadd.f32 %v585_v58, %v111_v42  ;;  %v598_v2 = vpop.f32.mrf.mxu3  ;;  %v574_v12 = vpop.f32.mrf.mxu1  ;;  %v8059_v42 = vor.u32 %v10178_v28, %v8056_v29  ;;  %1110 = vmatpush.bf16.msrb.mxu0 %v8055_v22  ;;  %v8039_v58 = vor.u32 %v10176_v45, %v8038_v43  ;;  %v660_v60 = vmul.f32 %v642_v63, %v104_v48  ;;  %v8808_v28 = vld [vmem:[#allocation2 + $0x380] sm:$0xf]  ;;  %v10367_v29 = vld [vmem:[#allocation2 + $0x38c] sm:$0xf0]  ;;  %v10368_v26 = vld [vmem:[#allocation2 + $0x394] sm:$0xf0] }
  0xd1   :  { %v11464_v37 = vperm.slane %v11458_v34, 0  ;;  %v8760_v43 = vld [vmem:[#allocation2 + $0x320] sm:$0xf]  ;;  %v11471_v47 = vperm.slane %v11458_v34, 1 }
  0xd2   :  { %v599_v16 = vadd.f32 %v598_v2, %v586_v1  ;;  %1136 = vmatpush.bf16.msrb.mxu2 %v8059_v42  ;;  %v10249_v48 = vld [vmem:[%s13648_s9 + $0x20] sm:$0xff] }
  0xd3   :  { %2467 = vmatpush.bf16.msrb.mxu3 %v8494_v61 }
  0xd4   :  { %10708 = vtanh.f32 %v599_v16  ;;  %v10707_v30 = vpop.eup %10706  ;;  %1111 = vmatpush.bf16.msrb.mxu0 %v8039_v58 }
  0xd5   :  { %v613_v33 = vadd.f32 1.0, %v10707_v30  ;;  %v8809_v30 = vor.u32 %v10367_v29, %v8808_v28 }
  0xd6   :  { %1137 = vmatpush.bf16.msrb.mxu2 %v8043_v59 }
  0xd7   :  { %v587_v41 = vpop.f32.mrf.mxu2  ;;  %10710 = vrcp.f32 %v613_v33  ;;  %v655_v4 = vand.u32 2147483648, %v613_v33  ;;  %v653_v6 = vand.u32 2147483647, %v613_v33  ;;  %vm649_vm9 = vweird.f32 %v613_v33 }
  0xd8   :  { %v600_v44 = vpop.f32.mrf.mxu3  ;;  %v10250_v41 = vld [vmem:[%s13648_s9 + $0x28] sm:$0xff] }
  0xd9   :  { %v656_v8 = vor.u32 1.1754944e-38, %v655_v4  ;;  %vm654_vm11 = vcmp.eq.f32.partialorder %v653_v6, 8.507059e+37  ;;  %v10355_v44 = vld [vmem:[#allocation2 + $0x32c] sm:$0xf0]  ;;  %v10376_v4 = vld [vmem:[#allocation2 + $0x3d4] sm:$0xf0] }
  0xda   :  { %v10709_v51 = vpop.eup %10708  ;;  %v8761_v45 = vor.u32 %v10355_v44, %v8760_v43  ;;  %v10247_v6 = vld [vmem:[%s13648_s9 + $0x10] sm:$0xff]  ;;  %v10356_v43 = vld [vmem:[#allocation2 + $0x334] sm:$0xf0] }
  0xdb   :  { %v661_v57 = vmul.f32 %v10709_v51, %v627_v54  ;;  %v10351_v51 = vld [vmem:[#allocation2 + $0x30c] sm:$0xf0] }
  0xdc   :  { %v8745_v55 = vor.u32 %v10351_v51, %v8744_v50 }
  0xdd   :  { %v10711_v62 = vpop.eup %10710  ;;  %v11435_v0 = vadd.f32 %v661_v57, %v660_v60  ;;  %v10380_v57 = vld [vmem:[#allocation2 + $0x3f4] sm:$0xf0] }
  0xde   :  { %v645_v1 = vmul.f32 %v10711_v62, %v613_v33  ;;  %vm650_vm8 = vweird.f32 %v10711_v62  ;;  %v10363_v33 = vld [vmem:[#allocation2 + $0x36c] sm:$0xf0]  ;;  %v10248_v60 = vld [vmem:[%s13648_s9 + $0x18] sm:$0xff]  ;;  %v8865_v61 = vor.u32 %v10380_v57, %v8864_v56 }
  0xdf   :  { %10712 = vtanh.f32 %v11435_v0  ;;  %vm651_vm10 = vmor %vm649_vm9, %vm650_vm8  ;;  %v8793_v35 = vor.u32 %v10363_v33, %v8792_v32  ;;  %vm1312_vm8 = vcmask 130112   ;;  %vm1335_vm9 = vcmask 1041409  }
  0xe0   :  { %v646_v2 = vsub.f32 1.0, %v645_v1 }
  0xe2   :  { %v647_v5 = vmul.f32 %v10711_v62, %v646_v2  ;;  %v8848_v2 = vld [vmem:[#allocation2 + $0x3c8] sm:$0xf] }
  0xe4   :  { %v648_v7 = vadd.f32 %v10711_v62, %v647_v5 }
  0xe5   :  { %v10713_v9 = vpop.eup %10712 }
  0xe6   :  { %v652_v3 = vsel %vm651_vm10, %v10711_v62, %v648_v7  ;;  %v8849_v7 = vor.u32 %v10376_v4, %v8848_v2  ;;  %v8752_v2 = vld [vmem:[#allocation2 + $0x308] sm:$0xf]  ;;  %v10352_v4 = vld [vmem:[#allocation2 + $0x314] sm:$0xf0]  ;;  %vm1337_vm10 = vcmask 1042434  }
  0xe7   :  { %v657_v10 = vsel %vm654_vm11, %v656_v8, %v652_v3  ;;  %v11487_v3 = vperm.slane %v11458_v34, 2  ;;  %vm1339_vm11 = vcmask 1043459  }
  0xe8   :  { %v664_v11 = vmul.f32 %v10713_v9, %v657_v10 }
  0xea   :  { %v11438_v12 = vpack.c.bf16 %v664_v11, %v664_v11  ;;  %v8832_v11 = vld [vmem:[#allocation2 + $0x3a8] sm:$0xf] }
  0xec   :  { %1060 = vmatmul.bf16.vlgmr.msra.gmra.mxu0 %v11438_v12  ;;  %1086 = vmatmul.bf16.vlgmr.msra.gmra.mxu2 %v11438_v12 }
  0xed   :  { %2416 = vmatmul.bf16.vlgmr.msra.gmra.mxu3 %v11438_v12  ;;  %1904 = vmatpush.bf16.msra.mxu0 %v10252_v31  ;;  %v8800_v31 = vld [vmem:[#allocation2 + $0x368] sm:$0xf] }
  0xee   :  { %2960 = vmatpush.bf16.msra.mxu3 %v8857_v20  ;;  %v8816_v20 = vld [vmem:[#allocation2 + $0x388] sm:$0xf] }
  0xf0   :  { %v11446_v13 = vpop.f32.mrf.mxu3 }
  0xf1   :  { %1905 = vmatpush.bf16.msra.mxu0 %v10251_v36 }
  0xf2   :  { %2961 = vmatpush.bf16.msra.mxu3 %v8841_v24  ;;  %v11501_v24 = vperm.slane %v11458_v34, 3 }
  0xf5   :  { %1906 = vmatpush.bf16.msra.mxu0 %v10250_v41 }
  0xf6   :  { %2962 = vmatpush.bf16.msra.mxu3 %v8825_v27  ;;  %v8817_v27 = vor.u32 %v10368_v26, %v8816_v20 }
  0xf8   :  { %v1102_v14 = vpop.f32.mrf.mxu3 }
  0xf9   :  { %1907 = vmatpush.bf16.msra.mxu0 %v10249_v48 }
  0xfa   :  { %2963 = vmatpush.bf16.msra.mxu3 %v8809_v30 }
  0xfc   :  { %1112 = vmatmul.bf16.vlgmr.msrb.gmra.mxu0 %v11438_v12  ;;  %1138 = vmatmul.bf16.vlgmr.msrb.gmra.mxu2 %v11438_v12 }
  0xfd   :  { %2468 = vmatmul.bf16.vlgmr.msrb.gmra.mxu3 %v11438_v12  ;;  %1908 = vmatpush.bf16.msra.mxu0 %v10248_v60 }
  0xfe   :  { %2964 = vmatpush.bf16.msra.mxu3 %v8793_v35 }
 0x101   :  { %1909 = vmatpush.bf16.msra.mxu0 %v10247_v6  ;;  %v8753_v6 = vor.u32 %v10352_v4, %v8752_v2  ;;  %v85_v2 = vld [vmem:[%s13643_s4 + $0x58] sm:$0xff]  ;;  %v84_v4 = vld [vmem:[%s13643_s4 + $0x50] sm:$0xff] }
 0x102   :  { %2965 = vmatpush.bf16.msra.mxu3 %v8777_v40  ;;  %v10360_v40 = vld [vmem:[#allocation2 + $0x354] sm:$0xf0] }
 0x106   :  { %2966 = vmatpush.bf16.msra.mxu3 %v8761_v45 }
 0x10a   :  { %2967 = vmatpush.bf16.msra.mxu3 %v8745_v55 }
 0x10e   :  { %3012 = vmatpush.bf16.msrb.mxu3 %v8865_v61 }
 0x110   :  { %v11448_v15 = vpop.f32.mrf.mxu3 }
 0x112   :  { %3013 = vmatpush.bf16.msrb.mxu3 %v8849_v7 }
 0x118   :  { %v1154_v17 = vpop.f32.mrf.mxu3 }
 0x12b   :  { %v1074_v16 = vpop.f32.mrf.mxu1 }
 0x133   :  { %v1076_v18 = vpop.f32.mrf.mxu1 }
 0x14b   :  { %v11450_v25 = vpop.f32.mrf.mxu1 }
 0x153   :  { %v1128_v52 = vpop.f32.mrf.mxu1 }
 0x169   :  { %v1061_v22 = vpop.f32.mrf.mxu0 }
 0x16a   :  { %v1062_v42 = vadd.f32 %v1061_v22, %v11464_v37  ;;  %v8785_v22 = vor.u32 %v10360_v40, %v8784_v39 }
 0x16c   :  { %v1075_v46 = vadd.f32 %v1074_v16, %v1062_v42  ;;  %v10246_v16 = vld [vmem:[%s13648_s9 + $0x8] sm:$0xff] }
 0x16d   :  { %1910 = vmatpush.bf16.msra.mxu0 %v10246_v16  ;;  %v8768_v42 = vld [vmem:[#allocation2 + $0x328] sm:$0xf] }
 0x16e   :  { %v8284_v63 = vmul.f32 -1.442695, %v1075_v46 }
 0x16f   :  { %v1087_v54 = vpop.f32.mrf.mxu2 }
 0x170   :  { %10714 = vpow2.f32 %v8284_v63  ;;  %v1088_v58 = vadd.f32 %v1087_v54, %v11471_v47  ;;  %v11477_v59 = vpop.f32.mrf.mxu3  ;;  %v8769_v54 = vor.u32 %v10356_v43, %v8768_v42  ;;  %v75_v42 = vld [vmem:[%s13643_s4 + $0x8] sm:$0xff] }
 0x171   :  { %v1063_v62 = vpop.f32.mrf.mxu0  ;;  %1911 = vmatpush.bf16.msra.mxu0 %v10245_v49  ;;  %v79_v43 = vld [vmem:[%s13643_s4 + $0x28] sm:$0xff] }
 0x172   :  { %v1101_v1 = vadd.f32 %v11446_v13, %v1088_v58  ;;  %v10372_v13 = vld [vmem:[#allocation2 + $0x3b4] sm:$0xf0] }
 0x173   :  { %v8833_v17 = vor.u32 %v10372_v13, %v8832_v11 }
 0x174   :  { %v8285_v5 = vmul.f32 -1.442695, %v1101_v1 }
 0x175   :  { %3014 = vmatpush.bf16.msrb.mxu3 %v8833_v17 }
 0x176   :  { %v10715_v8 = vpop.eup %10714  ;;  %10716 = vpow2.f32 %v8285_v5 }
 0x177   :  { %v11489_v9 = vadd.f32 1.0, %v10715_v8  ;;  %v1089_v10 = vpop.f32.mrf.mxu2 }
 0x178   :  { %v2419_v14 = vpop.f32.mrf.mxu3 }
 0x179   :  { %10718 = vrcp.f32 %v11489_v9  ;;  %v1113_v18 = vpop.f32.mrf.mxu0  ;;  %3015 = vmatpush.bf16.msrb.mxu3 %v8817_v27  ;;  %v1179_v50 = vand.u32 2147483648, %v11489_v9  ;;  %vm1173_vm13 = vweird.f32 %v11489_v9  ;;  %v1177_v55 = vand.u32 2147483647, %v11489_v9 }
 0x17a   :  { %v1114_v19 = vadd.f32 %v1113_v18, %v11487_v3 }
 0x17b   :  { %v1180_v1 = vor.u32 1.1754944e-38, %v1179_v50  ;;  %vm1178_vm1 = vcmp.eq.f32.partialorder %v1177_v55, 8.507059e+37  ;;  %v82_v55 = vld [vmem:[%s13643_s4 + $0x40] sm:$0xff] }
 0x17c   :  { %v10717_v21 = vpop.eup %10716  ;;  %v1127_v23 = vadd.f32 %v11450_v25, %v1114_v19  ;;  %v10364_v25 = vld [vmem:[#allocation2 + $0x374] sm:$0xf0] }
 0x17d   :  { %v1166_v53 = vadd.f32 1.0, %v10717_v21  ;;  %v8801_v35 = vor.u32 %v10364_v25, %v8800_v31  ;;  %v74_v31 = vld [vmem:[%s13643_s4] sm:$0xff] }
 0x17e   :  { %v8286_v28 = vmul.f32 -1.442695, %v1127_v23 }
 0x17f   :  { %v10719_v29 = vpop.eup %10718  ;;  %10720 = vrcp.f32 %v1166_v53  ;;  %v1139_v30 = vpop.f32.mrf.mxu2  ;;  %3016 = vmatpush.bf16.msrb.mxu3 %v8801_v35  ;;  %v1194_v57 = vand.u32 2147483648, %v1166_v53  ;;  %v1192_v62 = vand.u32 2147483647, %v1166_v53  ;;  %vm1188_vm0 = vweird.f32 %v1166_v53  ;;  %v78_v35 = vld [vmem:[%s13643_s4 + $0x20] sm:$0xff] }
 0x180   :  { %v1169_v52 = vmul.f32 %v10719_v29, %v11489_v9  ;;  %10722 = vpow2.f32 %v8286_v28  ;;  %v1140_v32 = vadd.f32 %v1139_v30, %v11501_v24  ;;  %v11505_v33 = vpop.f32.mrf.mxu3  ;;  %vm1174_vm12 = vweird.f32 %v10719_v29  ;;  %v7768_v9 = vld [vmem:[%s13641_s2 + $0x8] sm:$0xff] }
 0x181   :  { %v1115_v34 = vpop.f32.mrf.mxu0  ;;  %vm11511_vm14 = vmor %vm1173_vm13, %vm1174_vm12  ;;  %v1195_v8 = vor.u32 1.1754944e-38, %v1194_v57  ;;  %vm1193_vm3 = vcmp.eq.f32.partialorder %v1192_v62, 8.507059e+37  ;;  %v83_v62 = vld [vmem:[%s13643_s4 + $0x48] sm:$0xff]  ;;  %vm1341_vm12 = vcmask 1044484   ;;  %vm1343_vm13 = vcmask 1045509  }
 0x182   :  { %v1170_v36 = vsub.f32 1.0, %v1169_v52  ;;  %v1153_v38 = vadd.f32 %v11448_v15, %v1140_v32 }
 0x183   :  { %3017 = vmatpush.bf16.msrb.mxu3 %v8785_v22 }
 0x184   :  { %v1171_v41 = vmul.f32 %v10719_v29, %v1170_v36  ;;  %10724 = vtanh.f32 %v1153_v38  ;;  %v76_v36 = vld [vmem:[%s13643_s4 + $0x10] sm:$0xff] }
 0x185   :  { %v10721_v44 = vpop.eup %10720 }
 0x186   :  { %v10723_v45 = vpop.eup %10722  ;;  %v1184_v46 = vmul.f32 %v10721_v44, %v1166_v53  ;;  %v1172_v48 = vadd.f32 %v10719_v29, %v1171_v41  ;;  %vm1189_vm15 = vweird.f32 %v10721_v44 }
 0x187   :  { %v1167_v63 = vadd.f32 1.0, %v10723_v45  ;;  %v1141_v51 = vpop.f32.mrf.mxu2  ;;  %3018 = vmatpush.bf16.msrb.mxu3 %v8769_v54  ;;  %vm1190_vm2 = vmor %vm1188_vm0, %vm1189_vm15  ;;  %v80_v54 = vld [vmem:[%s13643_s4 + $0x30] sm:$0xff]  ;;  %vm1347_vm15 = vcmask 1047559   ;;  %vm1350_vm0 = vcmask 130048  }
 0x188   :  { %v1185_v15 = vsub.f32 1.0, %v1184_v46  ;;  %v2471_v56 = vpop.f32.mrf.mxu3  ;;  %v1176_v61 = vsel %vm11511_vm14, %v10719_v29, %v1172_v48  ;;  %vm1345_vm14 = vcmask 1046534  }
 0x189   :  { %10726 = vrcp.f32 %v1167_v63  ;;  %v1181_v10 = vsel %vm1178_vm1, %v1180_v1, %v1176_v61  ;;  %v1209_v20 = vand.u32 2147483648, %v1167_v63  ;;  %v1207_v23 = vand.u32 2147483647, %v1167_v63  ;;  %v81_v56 = vld [vmem:[%s13643_s4 + $0x38] sm:$0xff] }
 0x18a   :  { %v1186_v60 = vmul.f32 %v10721_v44, %v1185_v15  ;;  %v10725_v7 = vpop.eup %10724  ;;  %vm1203_vm5 = vweird.f32 %v1167_v63 }
 0x18b   :  { %3019 = vmatpush.bf16.msrb.mxu3 %v8753_v6  ;;  %v1215_v18 = vmul.f32 %v10725_v7, %v1181_v10  ;;  %v1210_v53 = vor.u32 1.1754944e-38, %v1209_v20  ;;  %vm1208_vm7 = vcmp.eq.f32.partialorder %v1207_v23, 8.507059e+37  ;;  %v89_v20 = vld [vmem:[%s13643_s4 + $0x78] sm:$0xff] }
 0x18c   :  { %v1187_v5 = vadd.f32 %v10721_v44, %v1186_v60 }
 0x18e   :  { %v1191_v11 = vsel %vm1190_vm2, %v10721_v44, %v1187_v5  ;;  %v77_v44 = vld [vmem:[%s13643_s4 + $0x18] sm:$0xff] }
 0x18f   :  { %v10727_v13 = vpop.eup %10726  ;;  %v1196_v14 = vsel %vm1193_vm3, %v1195_v8, %v1191_v11  ;;  %v86_v11 = vld [vmem:[%s13643_s4 + $0x60] sm:$0xff] }
 0x190   :  { %v1199_v16 = vmul.f32 %v10727_v13, %v1167_v63  ;;  %v1214_v17 = vmul.f32 %v7768_v9, %v1196_v14  ;;  %vm1204_vm4 = vweird.f32 %v10727_v13  ;;  %v88_v14 = vld [vmem:[%s13643_s4 + $0x70] sm:$0xff] }
 0x191   :  { %vm1205_vm6 = vmor %vm1203_vm5, %vm1204_vm4 }
 0x192   :  { %v1200_v19 = vsub.f32 1.0, %v1199_v16  ;;  %v11520_v49 = vadd.f32 %v1215_v18, %v1214_v17  ;;  %v87_v16 = vld [vmem:[%s13643_s4 + $0x68] sm:$0xff] }
 0x194   :  { %v1201_v21 = vmul.f32 %v10727_v13, %v1200_v19  ;;  %10728 = vtanh.f32 %v11520_v49 }
 0x196   :  { %v1202_v26 = vadd.f32 %v10727_v13, %v1201_v21 }
 0x198   :  { %v1206_v27 = vsel %vm1205_vm6, %v10727_v13, %v1202_v26 }
 0x199   :  { %v1211_v28 = vsel %vm1208_vm7, %v1210_v53, %v1206_v27 }
 0x19a   :  { %v10729_v29 = vpop.eup %10728 }
 0x19b   :  { %v1218_v30 = vmul.f32 %v10729_v29, %v1211_v28 }
 0x19d   :  { %v11526_v52 = vpack.c.bf16 %v1218_v30, %v1218_v30  ;;  %v1227_v32 = vperm.slane %v1218_v30, 0  ;;  %v1221_v25 = vrot.slane %v1218_v30, 2  ;;  %v1220_v34 = vrot.slane %v1218_v30, 1 }
 0x19e   :  { %v1222_v46 = vrot.slane %v1218_v30, 3  ;;  %v1223_v50 = vrot.slane %v1218_v30, 4  ;;  %v1224_v61 = vrot.slane %v1218_v30, 5  ;;  %v1225_v6 = vrot.slane %v1218_v30, 6 }
 0x19f   :  { %1912 = vmatmul.bf16.vlgmr.msra.gmra.mxu0 %v11526_v52  ;;  %2968 = vmatmul.bf16.vlgmr.msra.gmra.mxu3 %v11526_v52  ;;  %v1243_v38 = vmul.f32 %v1227_v32, %v74_v31  ;;  %v1229_v39 = vperm.slane %v1221_v25, 0  ;;  %v1228_v40 = vperm.slane %v1220_v34, 0  ;;  %v1244_v45 = vmul.f32 %v1227_v32, %v75_v42 }
 0x1a0   :  { %v1230_v51 = vperm.slane %v1222_v46, 0  ;;  %v1231_v15 = vperm.slane %v1223_v50, 0  ;;  %v1232_v1 = vperm.slane %v1224_v61, 0  ;;  %v1226_v9 = vrot.slane %v1218_v30, 7 }
 0x1a1   :  { %1259 = vadd.xlane.f32.xlu0 %v1243_v38  ;;  %v1247_v41 = vmul.f32 %v1229_v39, %v78_v35  ;;  %v1245_v22 = vmul.f32 %v1228_v40, %v76_v36  ;;  %v1248_v48 = vmul.f32 %v1229_v39, %v79_v43  ;;  %v1246_v63 = vmul.f32 %v1228_v40, %v77_v44 }
 0x1a2   :  { %v1249_v57 = vmul.f32 %v1230_v51, %v80_v54  ;;  %v1251_v58 = vmul.f32 %v1231_v15, %v82_v55  ;;  %v1250_v60 = vmul.f32 %v1230_v51, %v81_v56  ;;  %v1252_v5 = vmul.f32 %v1231_v15, %v83_v62 }
 0x1a3   :  { %1267 = vadd.xlane.f32.xlu2 %v1247_v41  ;;  %1263 = vadd.xlane.f32.xlu1 %v1245_v22  ;;  %v1254_v7 = vmul.f32 %v1232_v1, %v85_v2  ;;  %v1253_v8 = vmul.f32 %v1232_v1, %v84_v4  ;;  %v1233_v10 = vperm.slane %v1225_v6, 0  ;;  %v1234_v13 = vperm.slane %v1226_v9, 0 }
 0x1a4   :  { %v1307_v36 = vlaneseq }
 0x1a5   :  { %v1255_v17 = vmul.f32 %v1233_v10, %v86_v11  ;;  %v1257_v18 = vmul.f32 %v1234_v13, %v88_v14  ;;  %v1256_v19 = vmul.f32 %v1233_v10, %v87_v16  ;;  %v1258_v21 = vmul.f32 %v1234_v13, %v89_v20 }
 0x1a6   :  { %v11598_v39 = vand.u32 127, %v1307_v36 }
 0x1a8   :  { %v11603_v41 = vadd.s32 4294967288, %v11598_v39 }
 0x1a9   :  { %1261 = vadd.xlane.f32.xlu0 %v1244_v45 }
 0x1ab   :  { %1269 = vadd.xlane.f32.xlu2 %v1248_v48  ;;  %1265 = vadd.xlane.f32.xlu1 %v1246_v63 }
 0x1af   :  { %3020 = vmatmul.bf16.vlgmr.msrb.gmra.mxu3 %v11526_v52 }
 0x1b1   :  { %1271 = vadd.xlane.f32.xlu0 %v1249_v57 }
 0x1b3   :  { %1275 = vadd.xlane.f32.xlu2 %v1251_v58  ;;  %1273 = vadd.xlane.f32.xlu1 %v1250_v60 }
 0x1b9   :  { %1277 = vadd.xlane.f32.xlu0 %v1252_v5 }
 0x1bb   :  { %1281 = vadd.xlane.f32.xlu2 %v1254_v7  ;;  %1279 = vadd.xlane.f32.xlu1 %v1253_v8 }
 0x1c1   :  { %1283 = vadd.xlane.f32.xlu0 %v1255_v17 }
 0x1c3   :  { %1287 = vadd.xlane.f32.xlu2 %v1257_v18  ;;  %1285 = vadd.xlane.f32.xlu1 %v1256_v19 }
 0x1c9   :  { %1289 = vadd.xlane.f32.xlu0 %v1258_v21 }
 0x214   :  { %v11576_v23 = vpop.xlane.xlu0 %1259 }
 0x215   :  { %v1309_v63 = vperm.slane %v11576_v23, %v11598_v39 }
 0x216   :  { %v11578_v26 = vpop.xlane.xlu2 %1267  ;;  %v11580_v53 = vpop.xlane.xlu1 %1263 }
 0x217   :  { %v1314_v44 = vperm.slane %v11580_v53, %v11598_v39  ;;  %v1317_v54 = vperm.slane %v11578_v26, %v11598_v39 }
 0x21c   :  { %v11582_v27 = vpop.f32.mrf.mxu0  ;;  %v11584_v28 = vpop.xlane.xlu0 %1261 }
 0x21d   :  { %v1311_v45 = vperm.slane %v11584_v28, %v11603_v41 }
 0x21e   :  { %v11586_v29 = vpop.xlane.xlu2 %1269  ;;  %v11588_v30 = vpop.xlane.xlu1 %1265 }
 0x21f   :  { %v1315_v42 = vperm.slane %v11588_v30, %v11603_v41  ;;  %v1318_v46 = vperm.slane %v11586_v29, %v11603_v41  ;;  %v1313_v56 = vsel %vm1312_vm8, %v1311_v45, %v1309_v63 }
 0x221   :  { %v1316_v50 = vsel %vm1312_vm8, %v1315_v42, %v1314_v44  ;;  %v1319_v58 = vsel %vm1312_vm8, %v1318_v46, %v1317_v54  ;;  %v11253_v42 = vmov 0  }
 0x222   :  { %v11590_v31 = vpop.f32.mrf.mxu3  ;;  %v1336_v60 = vsel %vm1335_vm9, %v1316_v50, %v1313_v56  ;;  %10697 = vset.pattern.permute.xlu1 %v11253_v42  ;;  %10696 = vset.pattern.permute.xlu0 %v11253_v42 }
 0x223   :  { %v1338_v7 = vsel %vm1337_vm10, %v1319_v58, %v1336_v60  ;;  %10695 = vset.pattern.permute.xlu2 %v11253_v42 }
 0x224   :  { %v1915_v32 = vpop.f32.mrf.mxu0  ;;  %v11592_v25 = vpop.xlane.xlu0 %1271 }
 0x225   :  { %v1320_v57 = vperm.slane %v11592_v25, %v11598_v39 }
 0x226   :  { %v11594_v34 = vpop.xlane.xlu2 %1275  ;;  %v11596_v35 = vpop.xlane.xlu1 %1273 }
 0x227   :  { %v1321_v51 = vperm.slane %v11596_v35, %v11603_v41  ;;  %v1323_v61 = vperm.slane %v11594_v34, %v11598_v39 }
 0x229   :  { %v1322_v1 = vsel %vm1312_vm8, %v1321_v51, %v1320_v57 }
 0x22a   :  { %v2971_v38 = vpop.f32.mrf.mxu3  ;;  %v1340_v8 = vsel %vm1339_vm11, %v1322_v1, %v1338_v7 }
 0x22c   :  { %v11600_v40 = vpop.xlane.xlu0 %1277 }
 0x22d   :  { %v1324_v15 = vperm.slane %v11600_v40, %v11603_v41 }
 0x22e   :  { %v11605_v22 = vpop.xlane.xlu1 %1279  ;;  %v11609_v43 = vpop.xlane.xlu2 %1281 }
 0x22f   :  { %v1327_v2 = vperm.slane %v11609_v43, %v11603_v41  ;;  %v1326_v4 = vperm.slane %v11605_v22, %v11598_v39  ;;  %v1325_v5 = vsel %vm1312_vm8, %v1324_v15, %v1323_v61 }
 0x230   :  { %v1342_v14 = vsel %vm1341_vm12, %v1325_v5, %v1340_v8 }
 0x231   :  { %v1328_v13 = vsel %vm1312_vm8, %v1327_v2, %v1326_v4 }
 0x232   :  { %v11617_v48 = vpop.f32.mrf.mxu3  ;;  %v1344_v20 = vsel %vm1343_vm13, %v1328_v13, %v1342_v14 }
 0x234   :  { %v11628_v55 = vpop.xlane.xlu0 %1283 }
 0x235   :  { %v1329_v9 = vperm.slane %v11628_v55, %v11598_v39 }
 0x236   :  { %v11637_v62 = vpop.xlane.xlu1 %1285  ;;  %v11651_v10 = vpop.xlane.xlu2 %1287 }
 0x237   :  { %v1330_v6 = vperm.slane %v11637_v62, %v11603_v41  ;;  %v1332_v18 = vperm.slane %v11651_v10, %v11598_v39 }
 0x239   :  { %v1331_v17 = vsel %vm1312_vm8, %v1330_v6, %v1329_v9 }
 0x23a   :  { %v3023_v11 = vpop.f32.mrf.mxu3  ;;  %v1346_v32 = vsel %vm1345_vm14, %v1331_v17, %v1344_v20 }
 0x23c   :  { %v11655_v16 = vpop.xlane.xlu0 %1289 }
 0x23d   :  { %v1333_v19 = vperm.slane %v11655_v16, %v11603_v41 }
 0x23f   :  { %v1334_v21 = vsel %vm1312_vm8, %v1333_v19, %v1332_v18 }
 0x240   :  { %v1348_v36 = vsel %vm1347_vm15, %v1334_v21, %v1346_v32 }
 0x241   :  { %v1351_v38 = vsel %vm1350_vm0, %v1348_v36, -inf }
 0x242   :  { %1352 = vmax.xlane.f32.xlu1 %v1351_v38 }
 0x2b5   :  { %v11667_v44 = vpop.xlane.xlu1 %1352 }
 0x2b6   :  { %v1356_v45 = vperm.slane %v11667_v44, 1  ;;  %v1355_v46 = vperm.slane %v11667_v44, 0  ;;  %v1357_v54 = vperm.slane %v11667_v44, 2  ;;  %v1359_v15 = vperm.slane %v11667_v44, 4 }
 0x2b7   :  { %v1360_v2 = vperm.slane %v11667_v44, 5  ;;  %v1362_v11 = vperm.slane %v11667_v44, 7  ;;  %v1361_v20 = vperm.slane %v11667_v44, 6 }
 0x2b8   :  { %v1373_v63 = vsub.f32 %v11580_v53, %v1356_v45  ;;  %v1372_v50 = vsub.f32 %v11584_v28, %v1355_v46  ;;  %v1371_v51 = vsub.f32 %v11576_v23, %v1355_v46  ;;  %v1376_v60 = vsub.f32 %v11586_v29, %v1357_v54 }
 0x2b9   :  { %v1379_v61 = vsub.f32 %v11594_v34, %v1359_v15  ;;  %v1374_v53 = vsub.f32 %v11588_v30, %v1356_v45  ;;  %v1358_v28 = vperm.slane %v11667_v44, 3  ;;  %v1382_v34 = vsub.f32 %v11609_v43, %v1360_v2 }
 0x2ba   :  { %v1391_v56 = vmul.f32 1.442695, %v1373_v63  ;;  %v1389_v57 = vmul.f32 1.442695, %v1372_v50  ;;  %v1387_v58 = vmul.f32 1.442695, %v1371_v51  ;;  %v1375_v7 = vsub.f32 %v11578_v26, %v1357_v54 }
 0x2bb   :  { %v1397_v1 = vmul.f32 1.442695, %v1376_v60  ;;  %v1403_v23 = vmul.f32 1.442695, %v1379_v61  ;;  %v1393_v5 = vmul.f32 1.442695, %v1374_v53  ;;  %v1378_v30 = vsub.f32 %v11596_v35, %v1358_v28 }
 0x2bc   :  { %10730 = vpow2.f32 %v1391_v56  ;;  %v1409_v9 = vmul.f32 1.442695, %v1382_v34  ;;  %v1395_v14 = vmul.f32 1.442695, %v1375_v7  ;;  %v1381_v43 = vsub.f32 %v11605_v22, %v1360_v2 }
 0x2bd   :  { %10732 = vpow2.f32 %v1389_v57  ;;  %v1401_v8 = vmul.f32 1.442695, %v1378_v30  ;;  %v1385_v26 = vsub.f32 %v11651_v10, %v1362_v11  ;;  %v1377_v18 = vsub.f32 %v11592_v25, %v1358_v28 }
 0x2be   :  { %10734 = vpow2.f32 %v1387_v58  ;;  %v1407_v19 = vmul.f32 1.442695, %v1381_v43  ;;  %v1384_v10 = vsub.f32 %v11637_v62, %v1361_v20  ;;  %v1380_v25 = vsub.f32 %v11600_v40, %v1359_v15 }
 0x2bf   :  { %10736 = vpow2.f32 %v1397_v1  ;;  %v1415_v21 = vmul.f32 1.442695, %v1385_v26  ;;  %v1399_v36 = vmul.f32 1.442695, %v1377_v18  ;;  %v1383_v62 = vsub.f32 %v11628_v55, %v1361_v20 }
 0x2c0   :  { %10738 = vpow2.f32 %v1403_v23  ;;  %v1413_v42 = vmul.f32 1.442695, %v1384_v10  ;;  %v1405_v45 = vmul.f32 1.442695, %v1380_v25  ;;  %v1386_v54 = vsub.f32 %v11655_v16, %v1362_v11 }
 0x2c1   :  { %10740 = vpow2.f32 %v1393_v5  ;;  %v1411_v40 = vmul.f32 1.442695, %v1383_v62 }
 0x2c2   :  { %v11681_v4 = vpop.eup %10730  ;;  %10742 = vpow2.f32 %v1401_v8  ;;  %v1417_v15 = vmul.f32 1.442695, %v1386_v54 }
 0x2c3   :  { %v11683_v6 = vpop.eup %10732  ;;  %1442 = vperm.xlu1 %10697, %v11681_v4   ;;  %10744 = vpow2.f32 %v1409_v9 }
 0x2c4   :  { %v11686_v29 = vpop.eup %10734  ;;  %1439 = vperm.xlu0 %10696, %v11683_v6   ;;  %10746 = vpow2.f32 %v1395_v14 }
 0x2c5   :  { %1436 = vperm.xlu2 %10695, %v11686_v29   ;;  %v11694_v13 = vpop.eup %10736  ;;  %10748 = vpow2.f32 %v1407_v19 }
 0x2c6   :  { %v11696_v17 = vpop.eup %10738  ;;  %10750 = vpow2.f32 %v1415_v21 }
 0x2c7   :  { %v11699_v35 = vpop.eup %10740  ;;  %10752 = vpow2.f32 %v1399_v36 }
 0x2c8   :  { %v11707_v32 = vpop.eup %10742  ;;  %10754 = vpow2.f32 %v1413_v42 }
 0x2c9   :  { %v11709_v38 = vpop.eup %10744  ;;  %10756 = vpow2.f32 %v1405_v45 }
 0x2ca   :  { %v11712_v22 = vpop.eup %10746  ;;  %10758 = vpow2.f32 %v1411_v40 }
 0x2cb   :  { %1451 = vperm.xlu1 %10697, %v11694_v13   ;;  %v11718_v44 = vpop.eup %10748  ;;  %10760 = vpow2.f32 %v1417_v15 }
 0x2cc   :  { %1460 = vperm.xlu0 %10696, %v11696_v17   ;;  %v11720_v46 = vpop.eup %10750 }
 0x2cd   :  { %1445 = vperm.xlu2 %10695, %v11699_v35   ;;  %v11723_v63 = vpop.eup %10752 }
 0x2ce   :  { %v11728_v50 = vpop.eup %10754 }
 0x2cf   :  { %v11731_v51 = vpop.eup %10756 }
 0x2d0   :  { %v11735_v56 = vpop.eup %10758 }
 0x2d1   :  { %v11738_v57 = vpop.eup %10760 }
 0x2d3   :  { %1457 = vperm.xlu1 %10697, %v11707_v32  }
 0x2d4   :  { %1469 = vperm.xlu0 %10696, %v11709_v38  }
 0x2d5   :  { %1448 = vperm.xlu2 %10695, %v11712_v22  }
 0x2db   :  { %1466 = vperm.xlu1 %10697, %v11718_v44  }
 0x2dc   :  { %1478 = vperm.xlu0 %10696, %v11720_v46  }
 0x2dd   :  { %1454 = vperm.xlu2 %10695, %v11723_v63  }
 0x2e3   :  { %1475 = vperm.xlu1 %10697, %v11728_v50  }
 0x2e5   :  { %1463 = vperm.xlu2 %10695, %v11731_v51  }
 0x2ed   :  { %1472 = vperm.xlu2 %10695, %v11735_v56  }
 0x2f5   :  { %1481 = vperm.xlu2 %10695, %v11738_v57  }
 0x31f   :  { %v1437_v55 = vpop.permute.xlu2 %1436 }
 0x320   :  { %v1483_v9 = vperm.slane %v1437_v55, %v11598_v39 }
 0x327   :  { %v1446_v58 = vpop.permute.xlu2 %1445 }
 0x328   :  { %v1487_v11 = vperm.slane %v1446_v58, %v11603_v41 }
 0x32f   :  { %v1449_v60 = vpop.permute.xlu2 %1448 }
 0x330   :  { %v1489_v26 = vperm.slane %v1449_v60, %v11598_v39 }
 0x335   :  { %v1443_v61 = vpop.permute.xlu1 %1442 }
 0x336   :  { %v1440_v53 = vpop.permute.xlu0 %1439  ;;  %v1486_v34 = vperm.slane %v1443_v61, %v11598_v39 }
 0x337   :  { %v1455_v1 = vpop.permute.xlu2 %1454  ;;  %v1484_v7 = vperm.slane %v1440_v53, %v11603_v41 }
 0x338   :  { %v1488_v18 = vsel %vm1312_vm8, %v1487_v11, %v1486_v34  ;;  %v1492_v20 = vperm.slane %v1455_v1, %v11598_v39 }
 0x339   :  { %v1485_v19 = vsel %vm1312_vm8, %v1484_v7, %v1483_v9 }
 0x33a   :  { %v1507_v25 = vsel %vm1335_vm9, %v1488_v18, %v1485_v19 }
 0x33d   :  { %v1452_v28 = vpop.permute.xlu1 %1451 }
 0x33e   :  { %v1461_v23 = vpop.permute.xlu0 %1460  ;;  %v1490_v8 = vperm.slane %v1452_v28, %v11603_v41 }
 0x33f   :  { %v1464_v2 = vpop.permute.xlu2 %1463  ;;  %v1495_v42 = vperm.slane %v1461_v23, %v11598_v39 }
 0x340   :  { %v1491_v21 = vsel %vm1312_vm8, %v1490_v8, %v1489_v26  ;;  %v1496_v45 = vperm.slane %v1464_v2, %v11603_v41 }
 0x341   :  { %v1508_v54 = vsel %vm1337_vm10, %v1491_v21, %v1507_v25 }
 0x342   :  { %v1497_v1 = vsel %vm1312_vm8, %v1496_v45, %v1495_v42 }
 0x345   :  { %v1458_v16 = vpop.permute.xlu1 %1457 }
 0x346   :  { %v1470_v5 = vpop.permute.xlu0 %1469  ;;  %v1493_v14 = vperm.slane %v1458_v16, %v11603_v41 }
 0x347   :  { %v1473_v30 = vpop.permute.xlu2 %1472  ;;  %v1499_v15 = vperm.slane %v1470_v5, %v11603_v41 }
 0x348   :  { %v1494_v36 = vsel %vm1312_vm8, %v1493_v14, %v1492_v20  ;;  %v1501_v28 = vperm.slane %v1473_v30, %v11598_v39 }
 0x349   :  { %v1509_v55 = vsel %vm1339_vm11, %v1494_v36, %v1508_v54 }
 0x34a   :  { %v1510_v2 = vsel %vm1341_vm12, %v1497_v1, %v1509_v55 }
 0x34d   :  { %v1467_v43 = vpop.permute.xlu1 %1466 }
 0x34e   :  { %v1498_v10 = vperm.slane %v1467_v43, %v11598_v39  ;;  %v1479_v62 = vpop.permute.xlu0 %1478 }
 0x34f   :  { %v1482_v40 = vpop.permute.xlu2 %1481  ;;  %v1504_v60 = vperm.slane %v1479_v62, %v11598_v39 }
 0x350   :  { %v1500_v58 = vsel %vm1312_vm8, %v1499_v15, %v1498_v10  ;;  %v1505_v61 = vperm.slane %v1482_v40, %v11603_v41 }
 0x351   :  { %v1511_v5 = vsel %vm1343_vm13, %v1500_v58, %v1510_v2 }
 0x352   :  { %v1506_v34 = vsel %vm1312_vm8, %v1505_v61, %v1504_v60 }
 0x355   :  { %v1476_v53 = vpop.permute.xlu1 %1475 }
 0x356   :  { %v1502_v23 = vperm.slane %v1476_v53, %v11603_v41 }
 0x358   :  { %v1503_v16 = vsel %vm1312_vm8, %v1502_v23, %v1501_v28 }
 0x359   :  { %v1512_v7 = vsel %vm1345_vm14, %v1503_v16, %v1511_v5 }
 0x35a   :  { %v1513_v8 = vsel %vm1347_vm15, %v1506_v34, %v1512_v7 }
 0x35b   :  { %v1515_v9 = vsel %vm1350_vm0, %v1513_v8, 0.0 }
 0x35c   :  { %1516 = vadd.xlane.f32.xlu1 %v1515_v9 }
 0x3cf   :  { %v11773_v11 = vpop.xlane.xlu1 %1516 }
 0x3d0   :  { %v1519_v30 = vperm.slane %v11773_v11, 0  ;;  %v1520_v14 = vperm.slane %v11773_v11, 1  ;;  %v11778_v43 = vperm.slane %v11773_v11, 2  ;;  %v1524_v26 = vperm.slane %v11773_v11, 5 }
 0x3d1   :  { %v11783_v19 = vperm.slane %v11773_v11, 3  ;;  %v11791_v60 = vperm.slane %v11773_v11, 4 }
 0x3d2   :  { %10762 = vrcp.f32 %v1519_v30  ;;  %v1544_v42 = vand.u32 2147483647, %v1519_v30  ;;  %v1546_v45 = vand.u32 2147483648, %v1519_v30  ;;  %v1624_v61 = vand.u32 2147483647, %v1524_v26 }
 0x3d3   :  { %10764 = vrcp.f32 %v1520_v14  ;;  %vm1540_vm2 = vweird.f32 %v1519_v30  ;;  %v1626_v28 = vand.u32 2147483648, %v1524_v26  ;;  %v1562_v9 = vand.u32 2147483648, %v1520_v14 }
 0x3d4   :  { %10766 = vrcp.f32 %v11778_v43  ;;  %vm1545_vm4 = vcmp.eq.f32.partialorder %v1544_v42, 8.507059e+37  ;;  %v1547_v23 = vor.u32 1.1754944e-38, %v1546_v45  ;;  %vm1556_vm7 = vweird.f32 %v1520_v14 }
 0x3d5   :  { %10768 = vrcp.f32 %v1524_v26  ;;  %v1627_v42 = vor.u32 1.1754944e-38, %v1626_v28  ;;  %v1576_v28 = vand.u32 2147483647, %v11778_v43 }
 0x3d6   :  { %10770 = vrcp.f32 %v11783_v19 }
 0x3d7   :  { %10772 = vrcp.f32 %v11791_v60 }
 0x3d8   :  { %v10763_v18 = vpop.eup %10762 }
 0x3d9   :  { %v10765_v20 = vpop.eup %10764  ;;  %v1536_v21 = vmul.f32 %v10763_v18, %v1519_v30  ;;  %vm1541_vm1 = vweird.f32 %v10763_v18  ;;  %v1560_v30 = vand.u32 2147483647, %v1520_v14 }
 0x3da   :  { %v11785_v36 = vpop.eup %10766  ;;  %v1552_v10 = vmul.f32 %v10765_v20, %v1520_v14  ;;  %vm1542_vm3 = vmor %vm1540_vm2, %vm1541_vm1  ;;  %vm1557_vm5 = vweird.f32 %v10765_v20  ;;  %vm1620_vm1 = vweird.f32 %v1524_v26 }
 0x3db   :  { %v1537_v25 = vsub.f32 1.0, %v1536_v21  ;;  %v10769_v40 = vpop.eup %10768  ;;  %v1568_v15 = vmul.f32 %v11785_v36, %v11778_v43  ;;  %vm11798_vm2 = vmor %vm1556_vm7, %vm1557_vm5  ;;  %vm1561_vm5 = vcmp.eq.f32.partialorder %v1560_v30, 8.507059e+37  ;;  %vm1572_vm7 = vweird.f32 %v11778_v43 }
 0x3dc   :  { %v1553_v62 = vsub.f32 1.0, %v1552_v10  ;;  %v1616_v55 = vmul.f32 %v10769_v40, %v1524_v26  ;;  %v11793_v34 = vpop.eup %10770  ;;  %vm1621_vm6 = vweird.f32 %v10769_v40 }
 0x3dd   :  { %v1538_v54 = vmul.f32 %v10763_v18, %v1537_v25  ;;  %v1569_v5 = vsub.f32 1.0, %v1568_v15 }
 0x3de   :  { %v1554_v58 = vmul.f32 %v10765_v20, %v1553_v62  ;;  %v1617_v1 = vsub.f32 1.0, %v1616_v55  ;;  %v1563_v62 = vor.u32 1.1754944e-38, %v1562_v9 }
 0x3df   :  { %v1539_v53 = vadd.f32 %v10763_v18, %v1538_v54  ;;  %v11810_v54 = vperm.slane %v11773_v11, 6 }
 0x3e0   :  { %v1555_v16 = vadd.f32 %v10765_v20, %v1554_v58  ;;  %v1618_v7 = vmul.f32 %v10769_v40, %v1617_v1 }
 0x3e1   :  { %v1543_v2 = vsel %vm1542_vm3, %v10763_v18, %v1539_v53  ;;  %vm1622_vm3 = vmor %vm1620_vm1, %vm1621_vm6  ;;  %vm1573_vm6 = vweird.f32 %v11785_v36  ;;  %v10773_v53 = vpop.eup %10772  ;;  %10774 = vrcp.f32 %v11810_v54 }
 0x3e2   :  { %v1548_v8 = vsel %vm1545_vm4, %v1547_v23, %v1543_v2  ;;  %v1619_v25 = vadd.f32 %v10769_v40, %v1618_v7  ;;  %v1559_v45 = vsel %vm11798_vm2, %v10765_v20, %v1555_v16  ;;  %vm1625_vm4 = vcmp.eq.f32.partialorder %v1624_v61, 8.507059e+37  ;;  %vm1574_vm1 = vmor %vm1572_vm7, %vm1573_vm6 }
 0x3e3   :  { %v1550_v21 = vmul.f32 %v11683_v6, %v1548_v8  ;;  %v1549_v10 = vmul.f32 %v11686_v29, %v1548_v8  ;;  %v1570_v6 = vmul.f32 %v11785_v36, %v1569_v5  ;;  %v1584_v29 = vmul.f32 %v11793_v34, %v11783_v19 }
 0x3e4   :  { %v1623_v14 = vsel %vm1622_vm3, %v10769_v40, %v1619_v25  ;;  %v1564_v55 = vsel %vm1561_vm5, %v1563_v62, %v1559_v45  ;;  %v1578_v40 = vand.u32 2147483648, %v11778_v43  ;;  %v1600_v2 = vmul.f32 %v10773_v53, %v11791_v60 }
 0x3e5   :  { %1670 = vperm.xlu2 %10695, %v1550_v21   ;;  %1665 = vperm.xlu0 %10696, %v1549_v10   ;;  %v11807_v26 = vsel %vm1625_vm4, %v1627_v42, %v1623_v14  ;;  %v1571_v20 = vadd.f32 %v11785_v36, %v1570_v6  ;;  %v1585_v58 = vsub.f32 1.0, %v1584_v29  ;;  %v1566_v61 = vmul.f32 %v11699_v35, %v1564_v55 }
 0x3e6   :  { %v1629_v15 = vmul.f32 %v11718_v44, %v11807_v26  ;;  %v1565_v1 = vmul.f32 %v11681_v4, %v1564_v55  ;;  %v1579_v16 = vor.u32 1.1754944e-38, %v1578_v40  ;;  %vm1577_vm2 = vcmp.eq.f32.partialorder %v1576_v28, 8.507059e+37 }
 0x3e7   :  { %v1575_v44 = vsel %vm1574_vm1, %v11785_v36, %v1571_v20  ;;  %v1586_v23 = vmul.f32 %v11793_v34, %v1585_v58  ;;  %v11826_v35 = vperm.slane %v11773_v11, 7  ;;  %vm1589_vm3 = vweird.f32 %v11793_v34  ;;  %v10775_v7 = vpop.eup %10774 }
 0x3e8   :  { %1715 = vperm.xlu1 %10697, %v1629_v15   ;;  %v1580_v4 = vsel %vm1577_vm2, %v1579_v16, %v1575_v44  ;;  %v1601_v43 = vsub.f32 1.0, %v1600_v2  ;;  %v1594_v8 = vand.u32 2147483648, %v11783_v19  ;;  %vm1588_vm4 = vweird.f32 %v11783_v19 }
 0x3e9   :  { %v1587_v5 = vadd.f32 %v11793_v34, %v1586_v23  ;;  %v1582_v36 = vmul.f32 %v11694_v13, %v1580_v4  ;;  %v1581_v9 = vmul.f32 %v11712_v22, %v1580_v4  ;;  %v1592_v21 = vand.u32 2147483647, %v11783_v19  ;;  %vm1590_vm5 = vmor %vm1588_vm4, %vm1589_vm3 }
 0x3ea   :  { %10776 = vrcp.f32 %v11826_v35  ;;  %v1602_v10 = vmul.f32 %v10773_v53, %v1601_v43  ;;  %v1632_v30 = vmul.f32 %v10775_v7, %v11810_v54  ;;  %v1595_v25 = vor.u32 1.1754944e-38, %v1594_v8 }
 0x3eb   :  { %v1591_v11 = vsel %vm1590_vm5, %v11793_v34, %v1587_v5  ;;  %vm1593_vm6 = vcmp.eq.f32.partialorder %v1592_v21, 8.507059e+37  ;;  %vm1605_vm7 = vweird.f32 %v10773_v53  ;;  %v1610_v45 = vand.u32 2147483648, %v11791_v60 }
 0x3ec   :  { %v1596_v18 = vsel %vm1593_vm6, %v1595_v25, %v1591_v11  ;;  %v1603_v13 = vadd.f32 %v10773_v53, %v1602_v10  ;;  %v1633_v22 = vsub.f32 1.0, %v1632_v30  ;;  %vm1604_vm1 = vweird.f32 %v11791_v60  ;;  %v10240_v11 = vld [vmem:[%s13647_s8 + $0x18] sm:$0xff]  ;;  %v10239_v30 = vld [vmem:[%s13647_s8 + $0x10] sm:$0xff] }
 0x3ed   :  { %1680 = vperm.xlu2 %10695, %v1566_v61   ;;  %1675 = vperm.xlu0 %10696, %v1565_v1   ;;  %v1598_v19 = vmul.f32 %v11707_v32, %v1596_v18  ;;  %v1597_v6 = vmul.f32 %v11723_v63, %v1596_v18  ;;  %v1608_v34 = vand.u32 2147483647, %v11791_v60  ;;  %vm1606_vm2 = vmor %vm1604_vm1, %vm1605_vm7  ;;  %v1611_v15 = vor.u32 1.1754944e-38, %v1610_v45  ;;  %v60_v25 = vld [vmem:[%s13642_s3 + $0x10] sm:$0xff]  ;;  %v58_v18 = vld [vmem:[%s13642_s3] sm:$0xff] }
 0x3ee   :  { %v1607_v29 = vsel %vm1606_vm2, %v10773_v53, %v1603_v13  ;;  %v1634_v14 = vmul.f32 %v10775_v7, %v1633_v22  ;;  %vm1637_vm4 = vweird.f32 %v10775_v7  ;;  %v1642_v32 = vand.u32 2147483648, %v11810_v54  ;;  %v62_v13 = vld [vmem:[%s13642_s3 + $0x20] sm:$0xff]  ;;  %v59_v22 = vld [vmem:[%s13642_s3 + $0x8] sm:$0xff]  ;;  %v64_v45 = vld [vmem:[%s13642_s3 + $0x30] sm:$0xff] }
 0x3ef   :  { %vm1609_vm3 = vcmp.eq.f32.partialorder %v1608_v34, 8.507059e+37  ;;  %vm1636_vm5 = vweird.f32 %v11810_v54  ;;  %v1640_v60 = vand.u32 2147483647, %v11810_v54  ;;  %v1658_v23 = vand.u32 2147483648, %v11826_v35  ;;  %v66_v34 = vld [vmem:[%s13642_s3 + $0x40] sm:$0xff] }
 0x3f0   :  { %v10777_v42 = vpop.eup %10776  ;;  %v1612_v55 = vsel %vm1609_vm3, %v1611_v15, %v1607_v29  ;;  %v1635_v20 = vadd.f32 %v10775_v7, %v1634_v14  ;;  %vm1638_vm6 = vmor %vm1636_vm5, %vm1637_vm4  ;;  %v1643_v1 = vor.u32 1.1754944e-38, %v1642_v32  ;;  %vm1652_vm2 = vweird.f32 %v11826_v35  ;;  %v10238_v29 = vld [vmem:[%s13647_s8 + $0x8] sm:$0xff]  ;;  %v65_v14 = vld [vmem:[%s13642_s3 + $0x38] sm:$0xff] }
 0x3f1   :  { %v1648_v62 = vmul.f32 %v10777_v42, %v11826_v35  ;;  %v1614_v63 = vmul.f32 %v11731_v51, %v1612_v55  ;;  %v1613_v40 = vmul.f32 %v11696_v17, %v1612_v55  ;;  %vm1641_vm7 = vcmp.eq.f32.partialorder %v1640_v60, 8.507059e+37  ;;  %v67_v32 = vld [vmem:[%s13642_s3 + $0x48] sm:$0xff] }
 0x3f2   :  { %v1639_v53 = vsel %vm1638_vm6, %v10775_v7, %v1635_v20  ;;  %vm1653_vm1 = vweird.f32 %v10777_v42  ;;  %v1630_v17 = vmul.f32 %v11709_v38, %v11807_v26  ;;  %v1656_v54 = vand.u32 2147483647, %v11826_v35  ;;  %v10244_v35 = vld [vmem:[%s13647_s8 + $0x38] sm:$0xff] }
 0x3f3   :  { %v1649_v58 = vsub.f32 1.0, %v1648_v62  ;;  %v1644_v28 = vsel %vm1641_vm7, %v1643_v1, %v1639_v53  ;;  %vm1654_vm3 = vmor %vm1652_vm2, %vm1653_vm1  ;;  %v1659_v16 = vor.u32 1.1754944e-38, %v1658_v23  ;;  %1990 = vmatpush.bf16.msra.mxu1 %v10244_v35  ;;  %v8599_v23 = vld [vmem:[#allocation2 + $0x1f0] sm:$0xf0] }
 0x3f4   :  { %v1645_v51 = vmul.f32 %v11735_v56, %v1644_v28  ;;  %vm1657_vm4 = vcmp.eq.f32.partialorder %v1656_v54, 8.507059e+37  ;;  %v1646_v43 = vmul.f32 %v11728_v50, %v1644_v28  ;;  %v10242_v50 = vld [vmem:[%s13647_s8 + $0x28] sm:$0xff]  ;;  %v10237_v28 = vld [vmem:[%s13647_s8] sm:$0xff] }
 0x3f5   :  { %1690 = vperm.xlu2 %10695, %v1582_v36   ;;  %1685 = vperm.xlu0 %10696, %v1581_v9   ;;  %v1650_v61 = vmul.f32 %v10777_v42, %v1649_v58  ;;  %v10241_v9 = vld [vmem:[%s13647_s8 + $0x20] sm:$0xff] }
 0x3f7   :  { %v1651_v44 = vadd.f32 %v10777_v42, %v1650_v61 }
 0x3f9   :  { %v1655_v2 = vsel %vm1654_vm3, %v10777_v42, %v1651_v44  ;;  %v61_v42 = vld [vmem:[%s13642_s3 + $0x18] sm:$0xff]  ;;  %v10313_v44 = vld [vmem:[#allocation2 + $0x1e4] sm:$0xf] }
 0x3fa   :  { %v1660_v4 = vsel %vm1657_vm4, %v1659_v16, %v1655_v2  ;;  %v8602_v2 = vor.u32 %v10313_v44, %v8599_v23 }
 0x3fb   :  { %v1661_v5 = vmul.f32 %v11720_v46, %v1660_v4  ;;  %v1662_v56 = vmul.f32 %v11738_v57, %v1660_v4  ;;  %v10243_v46 = vld [vmem:[%s13647_s8 + $0x30] sm:$0xff]  ;;  %v10309_v4 = vld [vmem:[#allocation2 + $0x1c4] sm:$0xf] }
 0x3fc   :  { %1991 = vmatpush.bf16.msra.mxu1 %v10243_v46 }
 0x3fd   :  { %1700 = vperm.xlu2 %10695, %v1598_v19   ;;  %1695 = vperm.xlu0 %10696, %v1597_v6   ;;  %v63_v19 = vld [vmem:[%s13642_s3 + $0x28] sm:$0xff] }
 0x400   :  { %1992 = vmatpush.bf16.msra.mxu1 %v10242_v50 }
 0x404   :  { %1993 = vmatpush.bf16.msra.mxu1 %v10241_v9 }
 0x405   :  { %1710 = vperm.xlu2 %10695, %v1614_v63   ;;  %1705 = vperm.xlu0 %10696, %v1613_v40  }
 0x408   :  { %1994 = vmatpush.bf16.msra.mxu1 %v10240_v11 }
 0x40c   :  { %1995 = vmatpush.bf16.msra.mxu1 %v10239_v30  ;;  %v10305_v30 = vld [vmem:[#allocation2 + $0x1a4] sm:$0xf] }
 0x40d   :  { %1725 = vperm.xlu2 %10695, %v1645_v51   ;;  %1720 = vperm.xlu0 %10696, %v1630_v17  }
 0x410   :  { %1996 = vmatpush.bf16.msra.mxu1 %v10238_v29  ;;  %v70_v29 = vld [vmem:[%s13642_s3 + $0x60] sm:$0xff] }
 0x414   :  { %1997 = vmatpush.bf16.msra.mxu1 %v10237_v28 }
 0x415   :  { %1735 = vperm.xlu2 %10695, %v1661_v5   ;;  %1730 = vperm.xlu0 %10696, %v1646_v43   ;;  %v8583_v5 = vld [vmem:[#allocation2 + $0x1d0] sm:$0xf0] }
 0x416   :  { %v8586_v46 = vor.u32 %v10309_v4, %v8583_v5  ;;  %v10293_v5 = vld [vmem:[#allocation2 + $0x144] sm:$0xf] }
 0x418   :  { %2434 = vmatpush.bf16.msrb.mxu1 %v8602_v2 }
 0x41c   :  { %2435 = vmatpush.bf16.msrb.mxu1 %v8586_v46 }
 0x41d   :  { %1740 = vperm.xlu0 %10696, %v1662_v56   ;;  %v68_v56 = vld [vmem:[%s13642_s3 + $0x50] sm:$0xff] }
 0x43f   :  { %v1671_v38 = vpop.permute.xlu2 %1670 }
 0x440   :  { %v1744_v40 = vmul.f32 %v1671_v38, %v59_v22 }
 0x447   :  { %v1681_v7 = vpop.permute.xlu2 %1680 }
 0x448   :  { %v1746_v20 = vmul.f32 %v1681_v7, %v61_v42 }
 0x44f   :  { %v1691_v36 = vpop.permute.xlu2 %1690 }
 0x450   :  { %v1748_v60 = vmul.f32 %v1691_v36, %v63_v19 }
 0x457   :  { %v1666_v26 = vpop.permute.xlu0 %1665  ;;  %v1701_v21 = vpop.permute.xlu2 %1700 }
 0x458   :  { %v1743_v62 = vmul.f32 %v1666_v26, %v58_v18  ;;  %v1750_v61 = vmul.f32 %v1701_v21, %v65_v14  ;;  %v69_v26 = vld [vmem:[%s13642_s3 + $0x58] sm:$0xff] }
 0x45a   :  { %v1759_v51 = vadd.f32 %v1744_v40, %v1743_v62  ;;  %v1716_v43 = vpop.permute.xlu1 %1715  ;;  %v71_v62 = vld [vmem:[%s13642_s3 + $0x68] sm:$0xff] }
 0x45b   :  { %v1753_v50 = vmul.f32 %v1716_v43, %v68_v56  ;;  %v8519_v43 = vld [vmem:[#allocation2 + $0x150] sm:$0xf0] }
 0x45c   :  { %v1760_v35 = vrot.slane %v1759_v51, 4 }
 0x45e   :  { %v1761_v18 = vadd.f32 %v1760_v35, %v1759_v51 }
 0x45f   :  { %v1676_v8 = vpop.permute.xlu0 %1675  ;;  %v1711_v58 = vpop.permute.xlu2 %1710 }
 0x460   :  { %v1745_v6 = vmul.f32 %v1676_v8, %v60_v25  ;;  %v1752_v17 = vmul.f32 %v1711_v58, %v67_v32  ;;  %v8567_v25 = vld [vmem:[#allocation2 + $0x1b0] sm:$0xf0] }
 0x461   :  { %v8570_v42 = vor.u32 %v10305_v30, %v8567_v25  ;;  %v10289_v25 = vld [vmem:[#allocation2 + $0x124] sm:$0xf] }
 0x462   :  { %v1766_v1 = vadd.f32 %v1746_v20, %v1745_v6  ;;  %v10301_v6 = vld [vmem:[#allocation2 + $0x184] sm:$0xf]  ;;  %v1762_v20 = vrot.slane %v1761_v18, 2 }
 0x463   :  { %2436 = vmatpush.bf16.msrb.mxu1 %v8570_v42 }
 0x464   :  { %v1767_v7 = vrot.slane %v1766_v1, 4 }
 0x466   :  { %v1768_v11 = vadd.f32 %v1767_v7, %v1766_v1  ;;  %v8535_v1 = vld [vmem:[#allocation2 + $0x170] sm:$0xf0]  ;;  %v73_v7 = vld [vmem:[%s13642_s3 + $0x78] sm:$0xff] }
 0x467   :  { %v1686_v57 = vpop.permute.xlu0 %1685 }
 0x468   :  { %v1747_v15 = vmul.f32 %v1686_v57, %v62_v13  ;;  %v1726_v13 = vpop.permute.xlu2 %1725 }
 0x469   :  { %v1755_v40 = vmul.f32 %v1726_v13, %v70_v29 }
 0x46a   :  { %v1773_v54 = vadd.f32 %v1748_v60, %v1747_v15  ;;  %v1769_v15 = vrot.slane %v1768_v11, 2 }
 0x46c   :  { %v1774_v8 = vrot.slane %v1773_v54, 4  ;;  %v1770_v44 = vadd.f32 %v1769_v15, %v1768_v11 }
 0x46e   :  { %v1775_v22 = vadd.f32 %v1774_v8, %v1773_v54  ;;  %v1771_v35 = vrot.slane %v1770_v44, 1 }
 0x46f   :  { %v1696_v10 = vpop.permute.xlu0 %1695 }
 0x470   :  { %v1749_v63 = vmul.f32 %v1696_v10, %v64_v45  ;;  %v1776_v58 = vrot.slane %v1775_v22, 2  ;;  %v1736_v56 = vpop.permute.xlu2 %1735 }
 0x472   :  { %v1780_v16 = vadd.f32 %v1750_v61, %v1749_v63  ;;  %v10297_v61 = vld [vmem:[#allocation2 + $0x164] sm:$0xf]  ;;  %v1777_v54 = vadd.f32 %v1776_v58, %v1775_v22  ;;  %v1772_v22 = vadd.f32 %v1771_v35, %v1770_v44 }
 0x473   :  { %v8538_v2 = vor.u32 %v10297_v61, %v8535_v1 }
 0x474   :  { %v1781_v57 = vrot.slane %v1780_v16, 4 }
 0x476   :  { %v1782_v45 = vadd.f32 %v1781_v57, %v1780_v16 }
 0x477   :  { %v1706_v55 = vpop.permute.xlu0 %1705 }
 0x478   :  { %v1751_v53 = vmul.f32 %v1706_v55, %v66_v34  ;;  %v8551_v34 = vld [vmem:[#allocation2 + $0x190] sm:$0xf0]  ;;  %v1783_v60 = vrot.slane %v1782_v45, 2 }
 0x479   :  { %v8554_v63 = vor.u32 %v10301_v6, %v8551_v34 }
 0x47a   :  { %v1787_v38 = vadd.f32 %v1752_v17, %v1751_v53  ;;  %v1763_v17 = vadd.f32 %v1762_v20, %v1761_v18  ;;  %v1784_v16 = vadd.f32 %v1783_v60, %v1782_v45  ;;  %v8503_v18 = vld [vmem:[#allocation2 + $0x130] sm:$0xf0] }
 0x47b   :  { %2437 = vmatpush.bf16.msrb.mxu1 %v8554_v63  ;;  %v8506_v34 = vor.u32 %v10289_v25, %v8503_v18  ;;  %v8487_v20 = vld [vmem:[#allocation2 + $0x110] sm:$0xf0] }
 0x47c   :  { %v1788_v21 = vrot.slane %v1787_v38, 4  ;;  %v1764_v46 = vrot.slane %v1763_v17, 1  ;;  %v1785_v11 = vrot.slane %v1784_v16, 1 }
 0x47e   :  { %v1789_v14 = vadd.f32 %v1788_v21, %v1787_v38  ;;  %v72_v38 = vld [vmem:[%s13642_s3 + $0x70] sm:$0xff]  ;;  %v1765_v29 = vadd.f32 %v1764_v46, %v1763_v17 }
 0x47f   :  { %v1721_v36 = vpop.permute.xlu0 %1720  ;;  %2438 = vmatpush.bf16.msrb.mxu1 %v8538_v2  ;;  %v1757_v21 = vmul.f32 %v1736_v56, %v72_v38 }
 0x480   :  { %v1754_v9 = vmul.f32 %v1721_v36, %v69_v26  ;;  %v1790_v28 = vrot.slane %v1789_v14, 2  ;;  %v1815_v1 = vpack.c.bf16 %v1765_v29, %v1765_v29  ;;  %v8559_v29 = vld [vmem:[#allocation2 + $0x198] sm:$0xf0] }
 0x482   :  { %v1794_v10 = vadd.f32 %v1754_v9, %v1753_v50  ;;  %v1791_v26 = vadd.f32 %v1790_v28, %v1789_v14  ;;  %v1778_v50 = vrot.slane %v1777_v54, 1  ;;  %v8522_v9 = vor.u32 %v10293_v5, %v8519_v43 }
 0x483   :  { %v1786_v14 = vadd.f32 %v1785_v11, %v1784_v16 }
 0x484   :  { %v1795_v19 = vrot.slane %v1794_v10, 4  ;;  %v1792_v13 = vrot.slane %v1791_v26, 1  ;;  %v1779_v6 = vadd.f32 %v1778_v50, %v1777_v54  ;;  %2439 = vmatpush.bf16.msrb.mxu1 %v8522_v9  ;;  %v8607_v9 = vld [vmem:[#allocation2 + $0x1f8] sm:$0xf0] }
 0x485   :  { %v1818_v28 = vpack.c.bf16 %v1786_v14, %v1786_v14 }
 0x486   :  { %v1796_v55 = vadd.f32 %v1795_v19, %v1794_v10  ;;  %v1793_v58 = vadd.f32 %v1792_v13, %v1791_v26  ;;  %v1817_v60 = vpack.c.bf16 %v1779_v6, %v1779_v6  ;;  %v10310_v13 = vld [vmem:[#allocation2 + $0x1cc] sm:$0xf] }
 0x487   :  { %v1731_v32 = vpop.permute.xlu0 %1730  ;;  %v1928_v5 = vunpack.c.l.b16 %v1818_v28  ;;  %v8858_v28 = vld [vmem:[#allocation2 + $0x3f0] sm:$0xf0] }
 0x488   :  { %v1756_v53 = vmul.f32 %v1731_v32, %v71_v62  ;;  %v1797_v23 = vrot.slane %v1796_v55, 2  ;;  %v1816_v32 = vpack.c.bf16 %v1772_v22, %v1772_v22  ;;  %2440 = vmatpush.bf16.msrb.mxu1 %v8506_v34  ;;  %v1927_v2 = vunpack.c.l.b16 %v1817_v60  ;;  %v8591_v22 = vld [vmem:[#allocation2 + $0x1d8] sm:$0xf0]  ;;  %v10302_v34 = vld [vmem:[#allocation2 + $0x18c] sm:$0xf] }
 0x489   :  { %v8562_v14 = vor.u32 %v10302_v34, %v8559_v29  ;;  %v8471_v34 = vld [vmem:[#allocation2 + $0xf0] sm:$0xf0]  ;;  %v8453_v29 = vld [vmem:[#allocation2 + $0xc0] sm:$0xf] }
 0x48a   :  { %v1801_v51 = vadd.f32 %v1756_v53, %v1755_v40  ;;  %v1798_v8 = vadd.f32 %v1797_v23, %v1796_v55  ;;  %v10285_v55 = vld [vmem:[#allocation2 + $0x104] sm:$0xf]  ;;  %v1819_v23 = vpack.c.bf16 %v1793_v58, %v1793_v58  ;;  %v8527_v58 = vld [vmem:[#allocation2 + $0x158] sm:$0xf0] }
 0x48b   :  { %v8490_v61 = vor.u32 %v10285_v55, %v8487_v20  ;;  %v10294_v20 = vld [vmem:[#allocation2 + $0x14c] sm:$0xf] }
 0x48c   :  { %v1802_v4 = vrot.slane %v1801_v51, 4  ;;  %v1799_v42 = vrot.slane %v1798_v8, 1  ;;  %v1929_v56 = vunpack.c.l.b16 %v1819_v23 }
 0x48d   :  { %2441 = vmatpush.bf16.msrb.mxu1 %v8490_v61  ;;  %v8495_v61 = vld [vmem:[#allocation2 + $0x118] sm:$0xf0] }
 0x48e   :  { %v1803_v36 = vadd.f32 %v1802_v4, %v1801_v51  ;;  %v1800_v63 = vadd.f32 %v1799_v42, %v1798_v8  ;;  %v1926_v51 = vunpack.c.l.b16 %v1816_v32  ;;  %v1925_v4 = vunpack.c.l.b16 %v1815_v1  ;;  %v10377_v1 = vld [vmem:[#allocation2 + $0x3e4] sm:$0xf] }
 0x48f   :  { %v1741_v57 = vpop.permute.xlu0 %1740  ;;  %v8594_v42 = vor.u32 %v10310_v13, %v8591_v22  ;;  %v8530_v32 = vor.u32 %v10294_v20, %v8527_v58  ;;  %v8861_v23 = vor.u32 %v10377_v1, %v8858_v28  ;;  %v10370_v13 = vld [vmem:[#allocation2 + $0x3ac] sm:$0xf]  ;;  %v8469_v22 = vld [vmem:[#allocation2 + $0xe0] sm:$0xf]  ;;  %v8455_v20 = vld [vmem:[#allocation2 + $0xd0] sm:$0xf0] }
 0x490   :  { %v1804_v10 = vrot.slane %v1803_v36, 2  ;;  %v1758_v30 = vmul.f32 %v1741_v57, %v73_v7  ;;  %v1820_v54 = vpack.c.bf16 %v1800_v63, %v1800_v63  ;;  %v1933_v38 = vsel %vm1335_vm9, %v1926_v51, %v1925_v4  ;;  %v10314_v57 = vld [vmem:[#allocation2 + $0x1ec] sm:$0xf]  ;;  %v10373_v51 = vld [vmem:[#allocation2 + $0x3c4] sm:$0xf] }
 0x491   :  { %v1934_v35 = vsel %vm1337_vm10, %v1927_v2, %v1933_v38  ;;  %v8610_v25 = vor.u32 %v10314_v57, %v8607_v9  ;;  %v10290_v63 = vld [vmem:[#allocation2 + $0x12c] sm:$0xf]  ;;  %v10369_v2 = vld [vmem:[#allocation2 + $0x3a4] sm:$0xf]  ;;  %v8818_v28 = vld [vmem:[#allocation2 + $0x398] sm:$0xf0] }
 0x492   :  { %v1805_v45 = vadd.f32 %v1804_v10, %v1803_v36  ;;  %v1808_v19 = vadd.f32 %v1758_v30, %v1757_v21  ;;  %v1930_v26 = vunpack.c.l.b16 %v1820_v54  ;;  %v1935_v36 = vsel %vm1339_vm11, %v1928_v5, %v1934_v35  ;;  %v8842_v54 = vld [vmem:[#allocation2 + $0x3d0] sm:$0xf0]  ;;  %v10365_v5 = vld [vmem:[#allocation2 + $0x384] sm:$0xf]  ;;  %v10366_v1 = vld [vmem:[#allocation2 + $0x38c] sm:$0xf] }
 0x493   :  { %v1936_v50 = vsel %vm1341_vm12, %v1929_v56, %v1935_v36  ;;  %v10361_v38 = vld [vmem:[#allocation2 + $0x364] sm:$0xf] }
 0x494   :  { %v1806_v62 = vrot.slane %v1805_v45, 1  ;;  %v1809_v15 = vrot.slane %v1808_v19, 4  ;;  %v1937_v11 = vsel %vm1343_vm13, %v1930_v26, %v1936_v50  ;;  %v8794_v26 = vld [vmem:[#allocation2 + $0x370] sm:$0xf0]  ;;  %v10357_v35 = vld [vmem:[#allocation2 + $0x344] sm:$0xf] }
 0x495   :  { %v8762_v50 = vld [vmem:[#allocation2 + $0x330] sm:$0xf0]  ;;  %v10349_v9 = vld [vmem:[#allocation2 + $0x304] sm:$0xf] }
 0x496   :  { %v1810_v40 = vadd.f32 %v1809_v15, %v1808_v19  ;;  %v1807_v53 = vadd.f32 %v1806_v62, %v1805_v45  ;;  %v10306_v45 = vld [vmem:[#allocation2 + $0x1ac] sm:$0xf]  ;;  %v8575_v19 = vld [vmem:[#allocation2 + $0x1b8] sm:$0xf0] }
 0x497   :  { %v8578_v6 = vor.u32 %v10306_v45, %v8575_v19  ;;  %v10298_v62 = vld [vmem:[#allocation2 + $0x16c] sm:$0xf]  ;;  %v8543_v15 = vld [vmem:[#allocation2 + $0x178] sm:$0xf0]  ;;  %v10281_v45 = vld [vmem:[#allocation2 + $0xe4] sm:$0xf] }
 0x498   :  { %v1811_v44 = vrot.slane %v1810_v40, 2  ;;  %v1821_v16 = vpack.c.bf16 %v1807_v53, %v1807_v53  ;;  %v8546_v55 = vor.u32 %v10298_v62, %v8543_v15  ;;  %v10286_v53 = vld [vmem:[#allocation2 + $0x10c] sm:$0xf]  ;;  %v8834_v62 = vld [vmem:[#allocation2 + $0x3b8] sm:$0xf0]  ;;  %v8474_v15 = vor.u32 %v10281_v45, %v8471_v34 }
 0x499   :  { %v10350_v34 = vld [vmem:[#allocation2 + $0x30c] sm:$0xf] }
 0x49a   :  { %v1812_v17 = vadd.f32 %v1811_v44, %v1810_v40  ;;  %v1931_v8 = vunpack.c.l.b16 %v1821_v16  ;;  %v8511_v40 = vld [vmem:[#allocation2 + $0x138] sm:$0xf0]  ;;  %v8498_v44 = vor.u32 %v10286_v53, %v8495_v61  ;;  %v8826_v16 = vld [vmem:[#allocation2 + $0x3b0] sm:$0xf0]  ;;  %2421 = vmatpush.bf16.msrb.mxu0 %v8474_v15  ;;  %v10273_v53 = vld [vmem:[#allocation2 + $0xa4] sm:$0xf] }
 0x49b   :  { %v8514_v60 = vor.u32 %v10290_v63, %v8511_v40  ;;  %v8829_v4 = vor.u32 %v10369_v2, %v8826_v16  ;;  %v8437_v63 = vld [vmem:[#allocation2 + $0xa0] sm:$0xf]  ;;  %v10275_v40 = vld [vmem:[#allocation2 + $0xac] sm:$0xf0]  ;;  %v8439_v61 = vld [vmem:[#allocation2 + $0xb0] sm:$0xf0] }
 0x49c   :  { %v1813_v43 = vrot.slane %v1812_v17, 1  ;;  %v1938_v10 = vsel %vm1345_vm14, %v1931_v8, %v1937_v11  ;;  %v8778_v8 = vld [vmem:[#allocation2 + $0x350] sm:$0xf0]  ;;  %v8866_v11 = vld [vmem:[#allocation2 + $0x3f8] sm:$0xf0] }
 0x49d   :  { %v8781_v36 = vor.u32 %v10357_v35, %v8778_v8  ;;  %v10269_v2 = vld [vmem:[#allocation2 + $0x84] sm:$0xf]  ;;  %v8423_v16 = vld [vmem:[#allocation2 + $0x90] sm:$0xf0]  ;;  %v8357_v15 = vld [vmem:[#allocation2] sm:$0xf] }
 0x49e   :  { %v1814_v7 = vadd.f32 %v1813_v43, %v1812_v17  ;;  %v8845_v17 = vor.u32 %v10373_v51, %v8842_v54  ;;  %v8810_v43 = vld [vmem:[#allocation2 + $0x390] sm:$0xf0]  ;;  %v8421_v51 = vld [vmem:[#allocation2 + $0x80] sm:$0xf]  ;;  %v10271_v54 = vld [vmem:[#allocation2 + $0x8c] sm:$0xf0] }
 0x49f   :  { %v8813_v56 = vor.u32 %v10365_v5, %v8810_v43  ;;  %v8802_v5 = vld [vmem:[#allocation2 + $0x378] sm:$0xf0]  ;;  %v8422_v43 = vor.u32 %v10271_v54, %v8421_v51  ;;  %v10265_v35 = vld [vmem:[#allocation2 + $0x64] sm:$0xf]  ;;  %v8407_v8 = vld [vmem:[#allocation2 + $0x70] sm:$0xf0] }
 0x4a0   :  { %v1822_v46 = vpack.c.bf16 %v1814_v7, %v1814_v7  ;;  %v8797_v7 = vor.u32 %v10361_v38, %v8794_v26  ;;  %v8405_v38 = vld [vmem:[#allocation2 + $0x60] sm:$0xf]  ;;  %v10267_v26 = vld [vmem:[#allocation2 + $0x6c] sm:$0xf0]  ;;  %v10280_v51 = vld [vmem:[#allocation2 + $0xd4] sm:$0xf0] }
 0x4a1   :  { %v10278_v54 = vld [vmem:[#allocation2 + $0xcc] sm:$0xf] }
 0x4a2   :  { %v1932_v21 = vunpack.c.l.b16 %v1822_v46  ;;  %v10353_v46 = vld [vmem:[#allocation2 + $0x324] sm:$0xf] }
 0x4a3   :  { %v8765_v57 = vor.u32 %v10353_v46, %v8762_v50  ;;  %v8786_v46 = vld [vmem:[#allocation2 + $0x358] sm:$0xf0]  ;;  %v8406_v50 = vor.u32 %v10267_v26, %v8405_v38 }
 0x4a4   :  { %v1939_v30 = vsel %vm1347_vm15, %v1932_v21, %v1938_v10  ;;  %v10378_v21 = vld [vmem:[#allocation2 + $0x3ec] sm:$0xf] }
 0x4a5   :  { %v1940_v18 = vpack.c.b16 %v1939_v30, %v1939_v30  ;;  %v8869_v30 = vor.u32 %v10378_v21, %v8866_v11  ;;  %v10261_v11 = vld [vmem:[#allocation2 + $0x44] sm:$0xf] }
 0x4a7   :  { %1998 = vmatmul.bf16.vlgmr.msra.gmra.mxu1 %v1940_v18  ;;  %v8850_v18 = vld [vmem:[#allocation2 + $0x3d8] sm:$0xf0] }
 0x4a8   :  { %2486 = vmatpush.bf16.msra.mxu1 %v8610_v25  ;;  %v10374_v25 = vld [vmem:[#allocation2 + $0x3cc] sm:$0xf] }
 0x4a9   :  { %v8853_v19 = vor.u32 %v10374_v25, %v8850_v18  ;;  %v8770_v25 = vld [vmem:[#allocation2 + $0x338] sm:$0xf0] }
 0x4ac   :  { %2487 = vmatpush.bf16.msra.mxu1 %v8594_v42  ;;  %v10283_v42 = vld [vmem:[#allocation2 + $0xec] sm:$0xf0] }
 0x4b0   :  { %2488 = vmatpush.bf16.msra.mxu1 %v8578_v6  ;;  %v8470_v6 = vor.u32 %v10283_v42, %v8469_v22  ;;  %v8373_v22 = vld [vmem:[#allocation2 + $0x20] sm:$0xf]  ;;  %v10259_v42 = vld [vmem:[#allocation2 + $0x2c] sm:$0xf0] }
 0x4b2   :  { %2395 = vmatpush.bf16.msra.mxu2 %v8470_v6  ;;  %v8375_v6 = vld [vmem:[#allocation2 + $0x30] sm:$0xf0] }
 0x4b4   :  { %2489 = vmatpush.bf16.msra.mxu1 %v8562_v14  ;;  %v10279_v14 = vld [vmem:[#allocation2 + $0xcc] sm:$0xf0] }
 0x4b5   :  { %v8454_v58 = vor.u32 %v10279_v14, %v8453_v29  ;;  %v8754_v29 = vld [vmem:[#allocation2 + $0x318] sm:$0xf0]  ;;  %v8374_v14 = vor.u32 %v10259_v42, %v8373_v22  ;;  %v8381_v42 = vld [vmem:[#allocation2 + $0x28] sm:$0xf] }
 0x4b7   :  { %2442 = vmatmul.bf16.vlgmr.msrb.gmra.mxu1 %v11438_v12  ;;  %2396 = vmatpush.bf16.msra.mxu2 %v8454_v58  ;;  %v10253_v58 = vld [vmem:[#allocation2 + $0x4] sm:$0xf] }
 0x4b8   :  { %2490 = vmatpush.bf16.msra.mxu1 %v8546_v55  ;;  %v10277_v55 = vld [vmem:[#allocation2 + $0xc4] sm:$0xf] }
 0x4bc   :  { %2491 = vmatpush.bf16.msra.mxu1 %v8530_v32  ;;  %v8458_v32 = vor.u32 %v10277_v55, %v8455_v20  ;;  %v10255_v55 = vld [vmem:[#allocation2 + $0xc] sm:$0xf0]  ;;  %v8757_v20 = vor.u32 %v10350_v34, %v8754_v29 }
 0x4be   :  { %2422 = vmatpush.bf16.msrb.mxu0 %v8458_v32  ;;  %v8359_v32 = vld [vmem:[#allocation2 + $0x10] sm:$0xf0] }
 0x4c0   :  { %2492 = vmatpush.bf16.msra.mxu1 %v8514_v60  ;;  %v8837_v60 = vor.u32 %v10370_v13, %v8834_v62 }
 0x4c4   :  { %2493 = vmatpush.bf16.msra.mxu1 %v8498_v44  ;;  %v8438_v44 = vor.u32 %v10275_v40, %v8437_v63  ;;  %v8477_v63 = vld [vmem:[#allocation2 + $0xe8] sm:$0xf]  ;;  %v10284_v40 = vld [vmem:[#allocation2 + $0xf4] sm:$0xf0] }
 0x4c6   :  { %2397 = vmatpush.bf16.msra.mxu2 %v8438_v44 }
 0x4c7   :  { %2494 = vmatmul.bf16.vlgmr.msra.gmra.mxu1 %v11438_v12  ;;  %v8746_v12 = vld [vmem:[#allocation2 + $0x310] sm:$0xf0] }
 0x4c8   :  { %2986 = vmatpush.bf16.msrb.mxu1 %v8861_v23  ;;  %v8749_v10 = vor.u32 %v10349_v9, %v8746_v12  ;;  %v8442_v23 = vor.u32 %v10273_v53, %v8439_v61  ;;  %v8389_v9 = vld [vmem:[#allocation2 + $0x40] sm:$0xf]  ;;  %v10263_v12 = vld [vmem:[#allocation2 + $0x4c] sm:$0xf0]  ;;  %v8479_v53 = vld [vmem:[#allocation2 + $0xf8] sm:$0xf0]  ;;  %v8358_v61 = vor.u32 %v10255_v55, %v8357_v15 }
 0x4c9   :  { %v8390_v18 = vor.u32 %v10263_v12, %v8389_v9  ;;  %v10266_v9 = vld [vmem:[#allocation2 + $0x6c] sm:$0xf]  ;;  %v8415_v12 = vld [vmem:[#allocation2 + $0x78] sm:$0xf0] }
 0x4ca   :  { %2423 = vmatpush.bf16.msrb.mxu0 %v8442_v23  ;;  %2398 = vmatpush.bf16.msra.mxu2 %v8422_v43  ;;  %v8461_v23 = vld [vmem:[#allocation2 + $0xc8] sm:$0xf]  ;;  %v10274_v43 = vld [vmem:[#allocation2 + $0xac] sm:$0xf]  ;;  %v8367_v55 = vld [vmem:[#allocation2 + $0x18] sm:$0xf0] }
 0x4cb   :  { %v10254_v15 = vld [vmem:[#allocation2 + $0xc] sm:$0xf] }
 0x4cc   :  { %2987 = vmatpush.bf16.msrb.mxu1 %v8845_v17  ;;  %v8821_v17 = vor.u32 %v10366_v1, %v8818_v28  ;;  %v8362_v1 = vor.u32 %v10253_v58, %v8359_v32  ;;  %v8478_v28 = vor.u32 %v10284_v40, %v8477_v63  ;;  %v8370_v63 = vor.u32 %v10254_v15, %v8367_v55  ;;  %v8698_v15 = vld [vmem:[#allocation2 + $0x2b0] sm:$0xf0]  ;;  %v9151_v55 = vld [vmem:[#allocation2 + $0x1a0] sm:$0xf] }
 0x4ce   :  { %2399 = vmatpush.bf16.msra.mxu2 %v8406_v50  ;;  %v8413_v50 = vld [vmem:[#allocation2 + $0x68] sm:$0xf] }
 0x4d0   :  { %2988 = vmatpush.bf16.msrb.mxu1 %v8829_v4  ;;  %v10362_v4 = vld [vmem:[#allocation2 + $0x36c] sm:$0xf] }
 0x4d2   :  { %2400 = vmatpush.bf16.msra.mxu2 %v8390_v18  ;;  %v8399_v18 = vld [vmem:[#allocation2 + $0x58] sm:$0xf0] }
 0x4d4   :  { %2989 = vmatpush.bf16.msrb.mxu1 %v8813_v56  ;;  %v8426_v56 = vor.u32 %v10269_v2, %v8423_v16  ;;  %v8463_v2 = vld [vmem:[#allocation2 + $0xd8] sm:$0xf0]  ;;  %v8445_v16 = vld [vmem:[#allocation2 + $0xa8] sm:$0xf] }
 0x4d6   :  { %2424 = vmatpush.bf16.msrb.mxu0 %v8426_v56  ;;  %2401 = vmatpush.bf16.msra.mxu2 %v8374_v14  ;;  %v8447_v56 = vld [vmem:[#allocation2 + $0xb8] sm:$0xf0]  ;;  %v8365_v14 = vld [vmem:[#allocation2 + $0x8] sm:$0xf] }
 0x4d7   :  { %v8450_v26 = vor.u32 %v10274_v43, %v8447_v56  ;;  %v8730_v56 = vld [vmem:[#allocation2 + $0x2f0] sm:$0xf0] }
 0x4d8   :  { %2990 = vmatpush.bf16.msrb.mxu1 %v8797_v7  ;;  %v8805_v7 = vor.u32 %v10362_v4, %v8802_v5  ;;  %v10276_v4 = vld [vmem:[#allocation2 + $0xb4] sm:$0xf0]  ;;  %v8466_v5 = vor.u32 %v10278_v54, %v8463_v2  ;;  %v8728_v2 = vld [vmem:[#allocation2 + $0x2e0] sm:$0xf] }
 0x4d9   :  { %v8446_v38 = vor.u32 %v10276_v4, %v8445_v16  ;;  %v10347_v16 = vld [vmem:[#allocation2 + $0x2ec] sm:$0xf0]  ;;  %v10345_v4 = vld [vmem:[#allocation2 + $0x2e4] sm:$0xf] }
 0x4da   :  { %2402 = vmatpush.bf16.msra.mxu2 %v8358_v61  ;;  %v8729_v43 = vor.u32 %v10347_v16, %v8728_v2  ;;  %v10447_v16 = vld [vmem:[#allocation2 + $0x18c] sm:$0xf0] }
 0x4dc   :  { %2991 = vmatpush.bf16.msrb.mxu1 %v8781_v36  ;;  %v10358_v36 = vld [vmem:[#allocation2 + $0x34c] sm:$0xf] }
 0x4dd   :  { %v8789_v21 = vor.u32 %v10358_v36, %v8786_v46 }
 0x4de   :  { %2447 = vmatpush.bf16.msrb.mxu2 %v8478_v28 }
 0x4e0   :  { %2992 = vmatpush.bf16.msrb.mxu1 %v8765_v57  ;;  %v8410_v57 = vor.u32 %v10265_v35, %v8407_v8  ;;  %v10272_v35 = vld [vmem:[#allocation2 + $0x94] sm:$0xf0]  ;;  %v8431_v8 = vld [vmem:[#allocation2 + $0x98] sm:$0xf0] }
 0x4e2   :  { %2425 = vmatpush.bf16.msrb.mxu0 %v8410_v57  ;;  %v10268_v57 = vld [vmem:[#allocation2 + $0x74] sm:$0xf0] }
 0x4e4   :  { %2993 = vmatpush.bf16.msrb.mxu1 %v8749_v10  ;;  %v8391_v10 = vld [vmem:[#allocation2 + $0x50] sm:$0xf0] }
 0x4e5   :  { %v8394_v13 = vor.u32 %v10261_v11, %v8391_v10  ;;  %v8418_v11 = vor.u32 %v10266_v9, %v8415_v12  ;;  %v8397_v10 = vld [vmem:[#allocation2 + $0x48] sm:$0xf] }
 0x4e7   :  { %2994 = vmatmul.bf16.vlgmr.msrb.gmra.mxu1 %v11526_v52  ;;  %2426 = vmatpush.bf16.msrb.mxu0 %v8394_v13 }
 0x4e8   :  { %3038 = vmatpush.bf16.msra.mxu1 %v8869_v30  ;;  %v10354_v30 = vld [vmem:[#allocation2 + $0x32c] sm:$0xf] }
 0x4e9   :  { %v8773_v45 = vor.u32 %v10354_v30, %v8770_v25  ;;  %v10264_v30 = vld [vmem:[#allocation2 + $0x54] sm:$0xf0]  ;;  %v10262_v25 = vld [vmem:[#allocation2 + $0x4c] sm:$0xf] }
 0x4ea   :  { %v8398_v13 = vor.u32 %v10264_v30, %v8397_v10  ;;  %v8402_v22 = vor.u32 %v10262_v25, %v8399_v18  ;;  %v10341_v10 = vld [vmem:[#allocation2 + $0x2c4] sm:$0xf]  ;;  %v8714_v18 = vld [vmem:[#allocation2 + $0x2d0] sm:$0xf0] }
 0x4ec   :  { %3039 = vmatpush.bf16.msra.mxu1 %v8853_v19  ;;  %v10257_v19 = vld [vmem:[#allocation2 + $0x24] sm:$0xf] }
 0x4ed   :  { %v8378_v62 = vor.u32 %v10257_v19, %v8375_v6  ;;  %v10258_v19 = vld [vmem:[#allocation2 + $0x2c] sm:$0xf]  ;;  %v8383_v6 = vld [vmem:[#allocation2 + $0x38] sm:$0xf0] }
 0x4ee   :  { %v8386_v29 = vor.u32 %v10258_v19, %v8383_v6 }
 0x4ef   :  { %2427 = vmatpush.bf16.msrb.mxu0 %v8378_v62  ;;  %v10256_v62 = vld [vmem:[#allocation2 + $0x14] sm:$0xf0] }
 0x4f0   :  { %3040 = vmatpush.bf16.msra.mxu1 %v8837_v60  ;;  %v10282_v60 = vld [vmem:[#allocation2 + $0xec] sm:$0xf]  ;;  %v8366_v32 = vor.u32 %v10256_v62, %v8365_v14  ;;  %v10339_v14 = vld [vmem:[#allocation2 + $0x2ac] sm:$0xf0]  ;;  %v10337_v62 = vld [vmem:[#allocation2 + $0x2a4] sm:$0xf] }
 0x4f1   :  { %v8482_v44 = vor.u32 %v10282_v60, %v8479_v53 }
 0x4f3   :  { %2428 = vmatpush.bf16.msrb.mxu0 %v8362_v1 }
 0x4f4   :  { %3041 = vmatpush.bf16.msra.mxu1 %v8821_v17  ;;  %v8462_v17 = vor.u32 %v10280_v51, %v8461_v23 }
 0x4f6   :  { %2448 = vmatpush.bf16.msrb.mxu2 %v8462_v17  ;;  %v8352_v17 = vld [vmem:[%s13639_s0 + $0x28] sm:$0xff] }
 0x4f7   :  { %2473 = vmatpush.bf16.msra.mxu0 %v8482_v44 }
 0x4f8   :  { %3042 = vmatpush.bf16.msra.mxu1 %v8805_v7  ;;  %v8429_v7 = vld [vmem:[#allocation2 + $0x88] sm:$0xf] }
 0x4f9   :  { %v8430_v36 = vor.u32 %v10272_v35, %v8429_v7  ;;  %v8733_v35 = vor.u32 %v10345_v4, %v8730_v56 }
 0x4fa   :  { %2449 = vmatpush.bf16.msrb.mxu2 %v8446_v38  ;;  %v9183_v38 = vld [vmem:[#allocation2 + $0x1e0] sm:$0xf] }
 0x4fb   :  { %2474 = vmatpush.bf16.msra.mxu0 %v8466_v5 }
 0x4fc   :  { %3043 = vmatpush.bf16.msra.mxu1 %v8789_v21  ;;  %v8414_v21 = vor.u32 %v10268_v57, %v8413_v50 }
 0x4fe   :  { %2450 = vmatpush.bf16.msrb.mxu2 %v8430_v36  ;;  %v8351_v36 = vld [vmem:[%s13639_s0 + $0x20] sm:$0xff] }
 0x4ff   :  { %2475 = vmatpush.bf16.msra.mxu0 %v8450_v26  ;;  %v10459_v26 = vld [vmem:[#allocation2 + $0x1ec] sm:$0xf0] }
 0x500   :  { %3044 = vmatpush.bf16.msra.mxu1 %v8773_v45  ;;  %v10260_v45 = vld [vmem:[#allocation2 + $0x34] sm:$0xf0] }
 0x501   :  { %v8382_v34 = vor.u32 %v10260_v45, %v8381_v42  ;;  %v10455_v42 = vld [vmem:[#allocation2 + $0x1cc] sm:$0xf0] }
 0x502   :  { %2451 = vmatpush.bf16.msrb.mxu2 %v8414_v21  ;;  %v8712_v21 = vld [vmem:[#allocation2 + $0x2c0] sm:$0xf] }
 0x504   :  { %3045 = vmatpush.bf16.msra.mxu1 %v8757_v20 }
 0x506   :  { %2452 = vmatpush.bf16.msrb.mxu2 %v8398_v13  ;;  %v9167_v13 = vld [vmem:[#allocation2 + $0x1c0] sm:$0xf] }
 0x507   :  { %3046 = vmatmul.bf16.vlgmr.msra.gmra.mxu1 %v11526_v52  ;;  %v10270_v52 = vld [vmem:[#allocation2 + $0x8c] sm:$0xf]  ;;  %v9168_v19 = vor.u32 %v10455_v42, %v9167_v13  ;;  %v8650_v42 = vld [vmem:[#allocation2 + $0x250] sm:$0xf0] }
 0x508   :  { %v8434_v46 = vor.u32 %v10270_v52, %v8431_v8  ;;  %v9184_v52 = vor.u32 %v10459_v26, %v9183_v38  ;;  %v8664_v38 = vld [vmem:[#allocation2 + $0x260] sm:$0xf] }
 0x50a   :  { %2476 = vmatpush.bf16.msra.mxu0 %v8434_v46  ;;  %2453 = vmatpush.bf16.msrb.mxu2 %v8382_v34 }
 0x50b   :  { %4292 = vmatpush.bf16.msrb.mxu1 %v9184_v52  ;;  %v10329_v52 = vld [vmem:[#allocation2 + $0x264] sm:$0xf] }
 0x50e   :  { %2477 = vmatpush.bf16.msra.mxu0 %v8418_v11  ;;  %2454 = vmatpush.bf16.msrb.mxu2 %v8366_v32  ;;  %v10343_v11 = vld [vmem:[#allocation2 + $0x2cc] sm:$0xf0]  ;;  %v8701_v32 = vor.u32 %v10337_v62, %v8698_v15 }
 0x50f   :  { %v8713_v25 = vor.u32 %v10343_v11, %v8712_v21  ;;  %4293 = vmatpush.bf16.msrb.mxu1 %v9168_v19 }
 0x512   :  { %2478 = vmatpush.bf16.msra.mxu0 %v8402_v22  ;;  %v8717_v22 = vor.u32 %v10341_v10, %v8714_v18  ;;  %v10327_v18 = vld [vmem:[#allocation2 + $0x24c] sm:$0xf0] }
 0x516   :  { %2479 = vmatpush.bf16.msra.mxu0 %v8386_v29  ;;  %v8696_v29 = vld [vmem:[#allocation2 + $0x2a0] sm:$0xf] }
 0x51a   :  { %2480 = vmatpush.bf16.msra.mxu0 %v8370_v63 }
 0x524   :  { %v1999_v20 = vpop.f32.mrf.mxu1 }
 0x525   :  { %v2000_v58 = vadd.f32 %v1999_v20, %v11582_v27 }
 0x527   :  { %10778 = vtanh.f32 %v2000_v58  ;;  %v10451_v58 = vld [vmem:[#allocation2 + $0x1ac] sm:$0xf0] }
 0x528   :  { %v9152_v63 = vor.u32 %v10451_v58, %v9151_v55  ;;  %v10321_v55 = vld [vmem:[#allocation2 + $0x224] sm:$0xf] }
 0x52a   :  { %4294 = vmatpush.bf16.msrb.mxu1 %v9152_v63 }
 0x52c   :  { %v2001_v40 = vpop.f32.mrf.mxu1 }
 0x52d   :  { %v10779_v60 = vpop.eup %10778  ;;  %v8680_v40 = vld [vmem:[#allocation2 + $0x280] sm:$0xf] }
 0x52e   :  { %2004 = vst [vmem:[#allocation5] sm:$0xff] %v10779_v60  ;;  %v2010_v53 = vpack.c.bf16 %v10779_v60, %v10779_v60  ;;  %v10335_v60 = vld [vmem:[#allocation2 + $0x28c] sm:$0xf0] }
 0x530   :  { %2403 = vmatmul.bf16.vlgmr.msra.gmra.mxu2 %v2010_v53  ;;  %2429 = vmatmul.bf16.vlgmr.msrb.gmra.mxu0 %v2010_v53 }
 0x531   :  { %2947 = vmatpush.bf16.msra.mxu2 %v8729_v43  ;;  %2973 = vmatpush.bf16.msrb.mxu0 %v8733_v35  ;;  %v8354_v43 = vld [vmem:[%s13639_s0 + $0x38] sm:$0xff]  ;;  %v10331_v35 = vld [vmem:[#allocation2 + $0x26c] sm:$0xf0] }
 0x534   :  { %v2443_v61 = vpop.f32.mrf.mxu1 }
 0x535   :  { %2948 = vmatpush.bf16.msra.mxu2 %v8713_v25  ;;  %2974 = vmatpush.bf16.msrb.mxu0 %v8717_v22  ;;  %v8648_v25 = vld [vmem:[#allocation2 + $0x240] sm:$0xf]  ;;  %v10325_v22 = vld [vmem:[#allocation2 + $0x244] sm:$0xf] }
 0x536   :  { %v8649_v13 = vor.u32 %v10327_v18, %v8648_v25 }
 0x539   :  { %2975 = vmatpush.bf16.msrb.mxu0 %v8701_v32 }
 0x53c   :  { %v2445_v1 = vpop.f32.mrf.mxu1 }
 0x53d   :  { %v10333_v1 = vld [vmem:[#allocation2 + $0x284] sm:$0xf] }
 0x540   :  { %2455 = vmatmul.bf16.vlgmr.msrb.gmra.mxu2 %v2010_v53  ;;  %2481 = vmatmul.bf16.vlgmr.msra.gmra.mxu0 %v2010_v53 }
 0x544   :  { %v11942_v28 = vpop.f32.mrf.mxu1 }
 0x54c   :  { %v2497_v27 = vpop.f32.mrf.mxu1 }
 0x54d   :  { %v8682_v27 = vld [vmem:[#allocation2 + $0x290] sm:$0xf0] }
 0x54e   :  { %v8685_v2 = vor.u32 %v10333_v1, %v8682_v27  ;;  %v8616_v27 = vld [vmem:[#allocation2 + $0x200] sm:$0xf] }
 0x550   :  { %2976 = vmatpush.bf16.msrb.mxu0 %v8685_v2 }
 0x564   :  { %v11944_v44 = vpop.f32.mrf.mxu1 }
 0x56c   :  { %v2997_v23 = vpop.f32.mrf.mxu1 }
 0x56d   :  { %v9135_v23 = vld [vmem:[#allocation2 + $0x180] sm:$0xf] }
 0x56e   :  { %v9136_v4 = vor.u32 %v10447_v16, %v9135_v23  ;;  %v10319_v23 = vld [vmem:[#allocation2 + $0x20c] sm:$0xf0] }
 0x570   :  { %4295 = vmatpush.bf16.msrb.mxu1 %v9136_v4 }
 0x584   :  { %v11946_v51 = vpop.f32.mrf.mxu1 }
 0x58c   :  { %v3049_v54 = vpop.f32.mrf.mxu1 }
 0x5ad   :  { %v2430_v5 = vpop.f32.mrf.mxu0 }
 0x5ae   :  { %v2431_v7 = vadd.f32 %v8352_v17, %v2430_v5  ;;  %v8353_v17 = vld [vmem:[%s13639_s0 + $0x30] sm:$0xff] }
 0x5b0   :  { %v2444_v8 = vadd.f32 %v2443_v61, %v2431_v7  ;;  %v8681_v61 = vor.u32 %v10335_v60, %v8680_v40  ;;  %v9087_v40 = vld [vmem:[#allocation2 + $0x120] sm:$0xf]  ;;  %v10435_v60 = vld [vmem:[#allocation2 + $0x12c] sm:$0xf0] }
 0x5b1   :  { %v9088_v4 = vor.u32 %v10435_v60, %v9087_v40  ;;  %v10340_v60 = vld [vmem:[#allocation2 + $0x2b4] sm:$0xf0] }
 0x5b2   :  { %v8612_v46 = vmul.f32 -1.442695, %v2444_v8  ;;  %v8666_v8 = vld [vmem:[#allocation2 + $0x270] sm:$0xf0] }
 0x5b3   :  { %v2404_v50 = vpop.f32.mrf.mxu2 }
 0x5b4   :  { %10780 = vpow2.f32 %v8612_v46  ;;  %v2405_v57 = vadd.f32 %v8351_v36, %v2404_v50  ;;  %v8665_v50 = vor.u32 %v10331_v35, %v8664_v38  ;;  %v9071_v38 = vld [vmem:[#allocation2 + $0x100] sm:$0xf] }
 0x5b5   :  { %v2432_v9 = vpop.f32.mrf.mxu0 }
 0x5b6   :  { %v2418_v12 = vadd.f32 %v11477_v59, %v2405_v57  ;;  %v8697_v59 = vor.u32 %v10339_v14, %v8696_v29  ;;  %v8669_v57 = vor.u32 %v10329_v52, %v8666_v8  ;;  %v9119_v9 = vld [vmem:[#allocation2 + $0x160] sm:$0xf]  ;;  %v10439_v29 = vld [vmem:[#allocation2 + $0x14c] sm:$0xf0]  ;;  %v10348_v52 = vld [vmem:[#allocation2 + $0x2f4] sm:$0xf0] }
 0x5b7   :  { %v8632_v14 = vld [vmem:[#allocation2 + $0x220] sm:$0xf]  ;;  %v10346_v8 = vld [vmem:[#allocation2 + $0x2ec] sm:$0xf] }
 0x5b8   :  { %v8611_v30 = vmul.f32 -1.442695, %v2418_v12  ;;  %2949 = vmatpush.bf16.msra.mxu2 %v8697_v59  ;;  %v10443_v12 = vld [vmem:[#allocation2 + $0x16c] sm:$0xf0]  ;;  %2977 = vmatpush.bf16.msrb.mxu0 %v8669_v57  ;;  %v8672_v57 = vld [vmem:[#allocation2 + $0x268] sm:$0xf] }
 0x5ba   :  { %v10781_v45 = vpop.eup %10780  ;;  %10782 = vpow2.f32 %v8611_v30  ;;  %v9120_v30 = vor.u32 %v10443_v12, %v9119_v9  ;;  %v8617_v9 = vor.u32 %v10319_v23, %v8616_v27  ;;  %v9191_v12 = vld [vmem:[#allocation2 + $0x1e8] sm:$0xf]  ;;  %v10452_v27 = vld [vmem:[#allocation2 + $0x1b4] sm:$0xf0] }
 0x5bb   :  { %v11955_v6 = vadd.f32 1.0, %v10781_v45  ;;  %v2406_v34 = vpop.f32.mrf.mxu2  ;;  %v9103_v45 = vld [vmem:[#allocation2 + $0x140] sm:$0xf] }
 0x5bc   :  { %2950 = vmatpush.bf16.msra.mxu2 %v8681_v61  ;;  %4296 = vmatpush.bf16.msrb.mxu1 %v9120_v30  ;;  %v8653_v34 = vor.u32 %v10325_v22, %v8650_v42  ;;  %v9104_v15 = vor.u32 %v10439_v29, %v9103_v45  ;;  %v8720_v42 = vld [vmem:[#allocation2 + $0x2c8] sm:$0xf]  ;;  %v10342_v29 = vld [vmem:[#allocation2 + $0x2cc] sm:$0xf] }
 0x5bd   :  { %10784 = vrcp.f32 %v11955_v6  ;;  %v2482_v20 = vpop.f32.mrf.mxu0  ;;  %v2537_v36 = vand.u32 2147483648, %v11955_v6  ;;  %v2535_v63 = vand.u32 2147483647, %v11955_v6  ;;  %vm2531_vm6 = vweird.f32 %v11955_v6 }
 0x5be   :  { %v2483_v11 = vadd.f32 %v8354_v43, %v2482_v20  ;;  %v8634_v20 = vld [vmem:[#allocation2 + $0x230] sm:$0xf0]  ;;  %2978 = vmatpush.bf16.msrb.mxu0 %v8653_v34  ;;  %v10344_v34 = vld [vmem:[#allocation2 + $0x2d4] sm:$0xf0] }
 0x5bf   :  { %v8637_v16 = vor.u32 %v10321_v55, %v8634_v20  ;;  %v8618_v43 = vld [vmem:[#allocation2 + $0x210] sm:$0xf0] }
 0x5c0   :  { %v10783_v53 = vpop.eup %10782  ;;  %2951 = vmatpush.bf16.msra.mxu2 %v8665_v50  ;;  %v2496_v32 = vadd.f32 %v11942_v28, %v2483_v11  ;;  %4297 = vmatpush.bf16.msrb.mxu1 %v9104_v15  ;;  %v10317_v28 = vld [vmem:[#allocation2 + $0x204] sm:$0xf]  ;;  %v2538_v50 = vor.u32 1.1754944e-38, %v2537_v36  ;;  %v9175_v15 = vld [vmem:[#allocation2 + $0x1c8] sm:$0xf] }
 0x5c1   :  { %v11958_v54 = vadd.f32 1.0, %v10783_v53  ;;  %v8621_v30 = vor.u32 %v10317_v28, %v8618_v43 }
 0x5c2   :  { %2979 = vmatpush.bf16.msrb.mxu0 %v8637_v16 }
 0x5c3   :  { %v11963_v5 = vpop.eup %10784  ;;  %10786 = vrcp.f32 %v11958_v54  ;;  %v2456_v56 = vpop.f32.mrf.mxu2  ;;  %v2520_v53 = vand.u32 2147483647, %v11958_v54  ;;  %v2522_v2 = vand.u32 2147483648, %v11958_v54  ;;  %vm2516_vm1 = vweird.f32 %v11958_v54 }
 0x5c4   :  { %v2527_v26 = vmul.f32 %v11963_v5, %v11955_v6  ;;  %v2457_v7 = vadd.f32 %v8353_v17, %v2456_v56  ;;  %2952 = vmatpush.bf16.msra.mxu2 %v8649_v13  ;;  %vm2532_vm5 = vweird.f32 %v11963_v5  ;;  %4298 = vmatpush.bf16.msrb.mxu1 %v9088_v4  ;;  %v8688_v4 = vld [vmem:[#allocation2 + $0x288] sm:$0xf] }
 0x5c5   :  { %v2484_v46 = vpop.f32.mrf.mxu0  ;;  %vm11988_vm2 = vcmp.eq.f32.partialorder %v2520_v53, 8.507059e+37  ;;  %vm11996_vm3 = vmor %vm2531_vm6, %vm2532_vm5  ;;  %vm2536_vm5 = vcmp.eq.f32.partialorder %v2535_v63, 8.507059e+37  ;;  %v10338_v53 = vld [vmem:[#allocation2 + $0x2ac] sm:$0xf]  ;;  %v8706_v63 = vld [vmem:[#allocation2 + $0x2b8] sm:$0xf0] }
 0x5c6   :  { %v2528_v21 = vsub.f32 1.0, %v2527_v26  ;;  %v2470_v10 = vadd.f32 %v11505_v33, %v2457_v7  ;;  %v10323_v33 = vld [vmem:[#allocation2 + $0x22c] sm:$0xf0]  ;;  %v8736_v7 = vld [vmem:[#allocation2 + $0x2e8] sm:$0xf]  ;;  %2980 = vmatpush.bf16.msrb.mxu0 %v8621_v30  ;;  %v8709_v16 = vor.u32 %v10338_v53, %v8706_v63 }
 0x5c7   :  { %v8633_v1 = vor.u32 %v10323_v33, %v8632_v14  ;;  %v10431_v26 = vld [vmem:[#allocation2 + $0x10c] sm:$0xf0]  ;;  %v8738_v46 = vld [vmem:[#allocation2 + $0x2f8] sm:$0xf0]  ;;  %v8737_v6 = vor.u32 %v10348_v52, %v8736_v7  ;;  %v9143_v7 = vld [vmem:[#allocation2 + $0x188] sm:$0xf] }
 0x5c8   :  { %v8613_v19 = vmul.f32 -1.442695, %v2470_v10  ;;  %v2529_v62 = vmul.f32 %v11963_v5, %v2528_v21  ;;  %v10460_v21 = vld [vmem:[#allocation2 + $0x1f4] sm:$0xf0]  ;;  %v9072_v25 = vor.u32 %v10431_v26, %v9071_v38  ;;  %v8741_v22 = vor.u32 %v10346_v8, %v8738_v46  ;;  %v8722_v14 = vld [vmem:[#allocation2 + $0x2d8] sm:$0xf0] }
 0x5c9   :  { %v11973_v59 = vpop.eup %10786  ;;  %2953 = vmatpush.bf16.msra.mxu2 %v8633_v1  ;;  %v9159_v1 = vld [vmem:[#allocation2 + $0x1a8] sm:$0xf]  ;;  %v10334_v38 = vld [vmem:[#allocation2 + $0x28c] sm:$0xf]  ;;  %v8690_v26 = vld [vmem:[#allocation2 + $0x298] sm:$0xf0] }
 0x5ca   :  { %v2512_v58 = vmul.f32 %v11973_v59, %v11958_v54  ;;  %10788 = vpow2.f32 %v8613_v19  ;;  %v2530_v56 = vadd.f32 %v11963_v5, %v2529_v62  ;;  %vm2517_vm7 = vweird.f32 %v11973_v59  ;;  %4299 = vmatpush.bf16.msrb.mxu1 %v9072_v25  ;;  %3025 = vmatpush.bf16.msra.mxu0 %v8741_v22  ;;  %v8674_v10 = vld [vmem:[#allocation2 + $0x278] sm:$0xf0]  ;;  %v9095_v53 = vld [vmem:[#allocation2 + $0x128] sm:$0xf]  ;;  %v10436_v63 = vld [vmem:[#allocation2 + $0x134] sm:$0xf0] }
 0x5cb   :  { %v2458_v61 = vpop.f32.mrf.mxu2  ;;  %10790 = vtanh.f32 %v2496_v32  ;;  %v2523_v54 = vor.u32 1.1754944e-38, %v2522_v2  ;;  %vm2518_vm4 = vmor %vm2516_vm1, %vm2517_vm7  ;;  %v9192_v19 = vor.u32 %v10460_v21, %v9191_v12  ;;  %v8704_v32 = vld [vmem:[#allocation2 + $0x2a8] sm:$0xf]  ;;  %v9160_v43 = vor.u32 %v10452_v27, %v9159_v1  ;;  %v10332_v21 = vld [vmem:[#allocation2 + $0x274] sm:$0xf0] }
 0x5cc   :  { %v2513_v17 = vsub.f32 1.0, %v2512_v58  ;;  %v2534_v18 = vsel %vm11996_vm3, %v11963_v5, %v2530_v56  ;;  %v10456_v5 = vld [vmem:[#allocation2 + $0x1d4] sm:$0xf0]  ;;  %v8725_v58 = vor.u32 %v10342_v29, %v8722_v14  ;;  %v8705_v2 = vor.u32 %v10340_v60, %v8704_v32  ;;  %v8642_v60 = vld [vmem:[#allocation2 + $0x238] sm:$0xf0] }
 0x5cd   :  { %2954 = vmatpush.bf16.msra.mxu2 %v8617_v9  ;;  %v2539_v55 = vsel %vm2536_vm5, %v2538_v50, %v2534_v18  ;;  %v9176_v40 = vor.u32 %v10456_v5, %v9175_v15  ;;  %v10336_v56 = vld [vmem:[#allocation2 + $0x294] sm:$0xf0]  ;;  %v8693_v50 = vor.u32 %v10334_v38, %v8690_v26  ;;  %v8673_v18 = vor.u32 %v10332_v21, %v8672_v57  ;;  %v9111_v15 = vld [vmem:[#allocation2 + $0x148] sm:$0xf] }
 0x5ce   :  { %v2514_v35 = vmul.f32 %v11973_v59, %v2513_v17  ;;  %4344 = vmatpush.bf16.msra.mxu1 %v9192_v19  ;;  %v2557_v61 = vmul.f32 %v2539_v55, %v11435_v0  ;;  %3026 = vmatpush.bf16.msra.mxu0 %v8725_v58  ;;  %v8689_v46 = vor.u32 %v10336_v56, %v8688_v4  ;;  %v10328_v19 = vld [vmem:[#allocation2 + $0x254] sm:$0xf0]  ;;  %v8640_v58 = vld [vmem:[#allocation2 + $0x228] sm:$0xf]  ;;  %v8626_v4 = vld [vmem:[#allocation2 + $0x218] sm:$0xf0] }
 0x5cf   :  { %v10440_v5 = vld [vmem:[#allocation2 + $0x154] sm:$0xf0]  ;;  %v9096_v27 = vor.u32 %v10436_v63, %v9095_v53 }
 0x5d0   :  { %v10789_v11 = vpop.eup %10788  ;;  %v2515_v36 = vadd.f32 %v11973_v59, %v2514_v35  ;;  %v10448_v35 = vld [vmem:[#allocation2 + $0x194] sm:$0xf0] }
 0x5d1   :  { %v12006_v13 = vadd.f32 1.0, %v10789_v11  ;;  %v10791_v33 = vpop.eup %10790  ;;  %2999 = vmatpush.bf16.msrb.mxu2 %v8737_v6  ;;  %v9144_v12 = vor.u32 %v10448_v35, %v9143_v7  ;;  %v10330_v11 = vld [vmem:[#allocation2 + $0x26c] sm:$0xf]  ;;  %v10324_v32 = vld [vmem:[#allocation2 + $0x234] sm:$0xf0] }
 0x5d2   :  { %v2519_v45 = vsel %vm2518_vm4, %v11973_v59, %v2515_v36  ;;  %v8721_v59 = vor.u32 %v10344_v34, %v8720_v42  ;;  %4345 = vmatpush.bf16.msra.mxu1 %v9176_v40  ;;  %3027 = vmatpush.bf16.msra.mxu0 %v8709_v16  ;;  %v9127_v36 = vld [vmem:[#allocation2 + $0x168] sm:$0xf]  ;;  %v8677_v6 = vor.u32 %v10330_v11, %v8674_v10  ;;  %v10326_v34 = vld [vmem:[#allocation2 + $0x24c] sm:$0xf]  ;;  %v9442_v7 = vld [vmem:[#allocation2 + $0x3e0] sm:$0xf] }
 0x5d3   :  { %v2524_v62 = vsel %vm11988_vm2, %v2523_v54, %v2519_v45  ;;  %10792 = vrcp.f32 %v12006_v13  ;;  %v2550_v52 = vand.u32 2147483647, %v12006_v13  ;;  %v2552_v8 = vand.u32 2147483648, %v12006_v13  ;;  %v10444_v54 = vld [vmem:[#allocation2 + $0x174] sm:$0xf0] }
 0x5d4   :  { %v2558_v20 = vmul.f32 %v10791_v33, %v2524_v62  ;;  %vm2546_vm7 = vweird.f32 %v12006_v13  ;;  %v9128_v42 = vor.u32 %v10444_v54, %v9127_v36  ;;  %v8656_v45 = vld [vmem:[#allocation2 + $0x248] sm:$0xf]  ;;  %v8658_v62 = vld [vmem:[#allocation2 + $0x258] sm:$0xf0]  ;;  %v10322_v40 = vld [vmem:[#allocation2 + $0x22c] sm:$0xf] }
 0x5d5   :  { %3000 = vmatpush.bf16.msrb.mxu2 %v8721_v59  ;;  %vm2551_vm2 = vcmp.eq.f32.partialorder %v2550_v52, 8.507059e+37  ;;  %v2553_v25 = vor.u32 1.1754944e-38, %v2552_v8  ;;  %v9112_v59 = vor.u32 %v10440_v5, %v9111_v15  ;;  %v8645_v1 = vor.u32 %v10322_v40, %v8642_v60  ;;  %v10318_v16 = vld [vmem:[#allocation2 + $0x20c] sm:$0xf]  ;;  %v10523_v35 = vld [vmem:[#allocation2 + $0x3ec] sm:$0xf0] }
 0x5d6   :  { %v12013_v17 = vadd.f32 %v2558_v20, %v2557_v61  ;;  %4346 = vmatpush.bf16.msra.mxu1 %v9160_v43  ;;  %3028 = vmatpush.bf16.msra.mxu0 %v8693_v50  ;;  %v8661_v20 = vor.u32 %v10326_v34, %v8658_v62  ;;  %v8641_v61 = vor.u32 %v10324_v32, %v8640_v58  ;;  %v10432_v43 = vld [vmem:[#allocation2 + $0x114] sm:$0xf0]  ;;  %v9426_v36 = vld [vmem:[#allocation2 + $0x3c0] sm:$0xf]  ;;  %v10519_v54 = vld [vmem:[#allocation2 + $0x3cc] sm:$0xf0] }
 0x5d7   :  { %v8629_v38 = vor.u32 %v10318_v16, %v8626_v4  ;;  %v9443_v52 = vor.u32 %v10523_v35, %v9442_v7  ;;  %v10396_v5 = vld [vmem:[%s13648_s9 + $0x38] sm:$0xff]  ;;  %v10507_v32 = vld [vmem:[#allocation2 + $0x36c] sm:$0xf0]  ;;  %v9362_v60 = vld [vmem:[#allocation2 + $0x340] sm:$0xf] }
 0x5d8   :  { %10794 = vtanh.f32 %v12013_v17  ;;  %v10395_v40 = vld [vmem:[%s13648_s9 + $0x30] sm:$0xff]  ;;  %v10394_v4 = vld [vmem:[%s13648_s9 + $0x28] sm:$0xff] }
 0x5d9   :  { %v10793_v23 = vpop.eup %10792  ;;  %3001 = vmatpush.bf16.msrb.mxu2 %v8705_v2  ;;  %v10320_v2 = vld [vmem:[#allocation2 + $0x214] sm:$0xf0] }
 0x5da   :  { %v2542_v28 = vmul.f32 %v10793_v23, %v12006_v13  ;;  %vm2547_vm6 = vweird.f32 %v10793_v23  ;;  %4347 = vmatpush.bf16.msra.mxu1 %v9144_v12  ;;  %3029 = vmatpush.bf16.msra.mxu0 %v8677_v6  ;;  %v8657_v13 = vor.u32 %v10328_v19, %v8656_v45 }
 0x5db   :  { %vm2548_vm1 = vmor %vm2546_vm7, %vm2547_vm6 }
 0x5dc   :  { %v2543_v0 = vsub.f32 1.0, %v2542_v28  ;;  %v9079_v28 = vld [vmem:[#allocation2 + $0x108] sm:$0xf] }
 0x5dd   :  { %3002 = vmatpush.bf16.msrb.mxu2 %v8689_v46  ;;  %v9080_v26 = vor.u32 %v10432_v43, %v9079_v28  ;;  %v9346_v43 = vld [vmem:[#allocation2 + $0x320] sm:$0xf] }
 0x5de   :  { %v2544_v9 = vmul.f32 %v10793_v23, %v2543_v0  ;;  %v10795_v29 = vpop.eup %10794  ;;  %4348 = vmatpush.bf16.msra.mxu1 %v9128_v42  ;;  %3030 = vmatpush.bf16.msra.mxu0 %v8661_v20  ;;  %v10515_v42 = vld [vmem:[#allocation2 + $0x3ac] sm:$0xf0]  ;;  %v9378_v20 = vld [vmem:[#allocation2 + $0x360] sm:$0xf] }
 0x5df   :  { %v9379_v63 = vor.u32 %v10507_v32, %v9378_v20  ;;  %v10516_v32 = vld [vmem:[#allocation2 + $0x3b4] sm:$0xf0] }
 0x5e0   :  { %v2545_v30 = vadd.f32 %v10793_v23, %v2544_v9 }
 0x5e1   :  { %3003 = vmatpush.bf16.msrb.mxu2 %v8673_v18 }
 0x5e2   :  { %v2549_v22 = vsel %vm2548_vm1, %v10793_v23, %v2545_v30  ;;  %4349 = vmatpush.bf16.msra.mxu1 %v9112_v59  ;;  %v8624_v23 = vld [vmem:[#allocation2 + $0x208] sm:$0xf]  ;;  %3031 = vmatpush.bf16.msra.mxu0 %v8645_v1 }
 0x5e3   :  { %v2554_v14 = vsel %vm2551_vm2, %v2553_v25, %v2549_v22  ;;  %v8625_v56 = vor.u32 %v10320_v2, %v8624_v23  ;;  %v9427_v25 = vor.u32 %v10519_v54, %v9426_v36 }
 0x5e4   :  { %v2561_v33 = vmul.f32 %v10795_v29, %v2554_v14  ;;  %v10511_v29 = vld [vmem:[#allocation2 + $0x38c] sm:$0xf0] }
 0x5e5   :  { %3004 = vmatpush.bf16.msrb.mxu2 %v8657_v13 }
 0x5e6   :  { %v12020_v55 = vpack.c.bf16 %v2561_v33, %v2561_v33  ;;  %4350 = vmatpush.bf16.msra.mxu1 %v9096_v27  ;;  %3032 = vmatpush.bf16.msra.mxu0 %v8629_v38 }
 0x5e8   :  { %2955 = vmatmul.bf16.vlgmr.msra.gmra.mxu2 %v12020_v55  ;;  %2981 = vmatmul.bf16.vlgmr.msrb.gmra.mxu0 %v12020_v55 }
 0x5e9   :  { %4300 = vmatmul.bf16.vlgmr.msrb.gmra.mxu1 %v12020_v55  ;;  %3005 = vmatpush.bf16.msrb.mxu2 %v8641_v61  ;;  %v10503_v61 = vld [vmem:[#allocation2 + $0x34c] sm:$0xf0] }
 0x5ea   :  { %4351 = vmatpush.bf16.msra.mxu1 %v9080_v26  ;;  %v9363_v16 = vor.u32 %v10503_v61, %v9362_v60  ;;  %v10390_v60 = vld [vmem:[%s13648_s9 + $0x8] sm:$0xff] }
 0x5ed   :  { %3006 = vmatpush.bf16.msrb.mxu2 %v8625_v56  ;;  %v10499_v56 = vld [vmem:[#allocation2 + $0x32c] sm:$0xf0] }
 0x5ee   :  { %4844 = vmatpush.bf16.msrb.mxu1 %v9443_v52  ;;  %v10393_v52 = vld [vmem:[%s13648_s9 + $0x20] sm:$0xff] }
 0x5f1   :  { %3787 = vmatpush.bf16.msra.mxu2 %v10396_v5 }
 0x5f2   :  { %4845 = vmatpush.bf16.msrb.mxu1 %v9427_v25  ;;  %v10392_v25 = vld [vmem:[%s13648_s9 + $0x18] sm:$0xff] }
 0x5f5   :  { %3788 = vmatpush.bf16.msra.mxu2 %v10395_v40 }
 0x5f8   :  { %3007 = vmatmul.bf16.vlgmr.msrb.gmra.mxu2 %v12020_v55  ;;  %3033 = vmatmul.bf16.vlgmr.msra.gmra.mxu0 %v12020_v55 }
 0x5f9   :  { %4352 = vmatmul.bf16.vlgmr.msra.gmra.mxu1 %v12020_v55  ;;  %3789 = vmatpush.bf16.msra.mxu2 %v10394_v4 }
 0x5fd   :  { %3790 = vmatpush.bf16.msra.mxu2 %v10393_v52  ;;  %v10504_v52 = vld [vmem:[#allocation2 + $0x354] sm:$0xf0] }
 0x601   :  { %3791 = vmatpush.bf16.msra.mxu2 %v10392_v25 }
 0x665   :  { %v2982_v0 = vpop.f32.mrf.mxu0 }
 0x666   :  { %v2983_v8 = vadd.f32 %v2982_v0, %v11471_v47  ;;  %v12029_v46 = vpop.f32.mrf.mxu1  ;;  %v9347_v0 = vor.u32 %v10499_v56, %v9346_v43  ;;  %v10508_v43 = vld [vmem:[#allocation2 + $0x374] sm:$0xf0] }
 0x668   :  { %v2996_v50 = vadd.f32 %v11944_v44, %v2983_v8  ;;  %v9410_v44 = vld [vmem:[#allocation2 + $0x3a0] sm:$0xf] }
 0x669   :  { %v9411_v45 = vor.u32 %v10515_v42, %v9410_v44 }
 0x66a   :  { %v8871_v57 = vmul.f32 -1.442695, %v2996_v50  ;;  %v9330_v50 = vld [vmem:[#allocation2 + $0x300] sm:$0xf] }
 0x66b   :  { %v2956_v9 = vpop.f32.mrf.mxu2  ;;  %4846 = vmatpush.bf16.msrb.mxu1 %v9411_v45 }
 0x66c   :  { %10796 = vpow2.f32 %v8871_v57  ;;  %v2957_v12 = vadd.f32 %v2956_v9, %v11464_v37  ;;  %v10495_v57 = vld [vmem:[#allocation2 + $0x30c] sm:$0xf0] }
 0x66d   :  { %v2984_v21 = vpop.f32.mrf.mxu0 }
 0x66e   :  { %v2970_v11 = vadd.f32 %v11590_v31, %v2957_v12  ;;  %v4303_v10 = vpop.f32.mrf.mxu1  ;;  %v9394_v31 = vld [vmem:[#allocation2 + $0x380] sm:$0xf]  ;;  %v9450_v21 = vld [vmem:[#allocation2 + $0x3e8] sm:$0xf] }
 0x66f   :  { %v9395_v62 = vor.u32 %v10511_v29, %v9394_v31  ;;  %v9434_v31 = vld [vmem:[#allocation2 + $0x3c8] sm:$0xf]  ;;  %v10520_v29 = vld [vmem:[#allocation2 + $0x3d4] sm:$0xf0] }
 0x670   :  { %v8870_v30 = vmul.f32 -1.442695, %v2970_v11  ;;  %v10524_v11 = vld [vmem:[#allocation2 + $0x3f4] sm:$0xf0] }
 0x671   :  { %4847 = vmatpush.bf16.msrb.mxu1 %v9395_v62  ;;  %v9451_v42 = vor.u32 %v10524_v11, %v9450_v21  ;;  %v9354_v11 = vld [vmem:[#allocation2 + $0x328] sm:$0xf] }
 0x672   :  { %v10797_v18 = vpop.eup %10796  ;;  %10798 = vpow2.f32 %v8870_v30  ;;  %v9331_v30 = vor.u32 %v10495_v57, %v9330_v50 }
 0x673   :  { %v12034_v6 = vadd.f32 1.0, %v10797_v18  ;;  %v2958_v22 = vpop.f32.mrf.mxu2 }
 0x675   :  { %10800 = vrcp.f32 %v12034_v6  ;;  %v3034_v19 = vpop.f32.mrf.mxu0  ;;  %4848 = vmatpush.bf16.msrb.mxu1 %v9379_v63  ;;  %v3089_v9 = vand.u32 2147483648, %v12034_v6  ;;  %vm3083_vm5 = vweird.f32 %v12034_v6  ;;  %v3087_v54 = vand.u32 2147483647, %v12034_v6 }
 0x676   :  { %v12037_v34 = vpop.f32.mrf.mxu1  ;;  %v3035_v27 = vadd.f32 %v3034_v19, %v11501_v24 }
 0x678   :  { %v10799_v14 = vpop.eup %10798  ;;  %v3048_v35 = vadd.f32 %v11946_v51, %v3035_v27  ;;  %v10512_v27 = vld [vmem:[#allocation2 + $0x394] sm:$0xf0] }
 0x679   :  { %v12039_v15 = vadd.f32 1.0, %v10799_v14  ;;  %4849 = vmatpush.bf16.msrb.mxu1 %v9363_v16  ;;  %v3090_v14 = vor.u32 1.1754944e-38, %v3089_v9 }
 0x67b   :  { %v12044_v33 = vpop.eup %10800  ;;  %10802 = vrcp.f32 %v12039_v15  ;;  %v3008_v13 = vpop.f32.mrf.mxu2  ;;  %v3074_v12 = vand.u32 2147483648, %v12039_v15  ;;  %v3072_v36 = vand.u32 2147483647, %v12039_v15  ;;  %vm3068_vm7 = vweird.f32 %v12039_v15 }
 0x67c   :  { %v3079_v59 = vmul.f32 %v12044_v33, %v12034_v6  ;;  %v3009_v58 = vadd.f32 %v3008_v13, %v11487_v3  ;;  %vm3084_vm3 = vweird.f32 %v12044_v33 }
 0x67d   :  { %v3036_v53 = vpop.f32.mrf.mxu0  ;;  %4850 = vmatpush.bf16.msrb.mxu1 %v9347_v0  ;;  %vm12076_vm6 = vmor %vm3083_vm5, %vm3084_vm3  ;;  %v3075_v6 = vor.u32 1.1754944e-38, %v3074_v12  ;;  %vm3073_vm2 = vcmp.eq.f32.partialorder %v3072_v36, 8.507059e+37  ;;  %vm3088_vm3 = vcmp.eq.f32.partialorder %v3087_v54, 8.507059e+37  ;;  %v9370_v0 = vld [vmem:[#allocation2 + $0x348] sm:$0xf] }
 0x67e   :  { %v3080_v1 = vsub.f32 1.0, %v3079_v59  ;;  %v3022_v23 = vadd.f32 %v11617_v48, %v3009_v58  ;;  %v4355_v2 = vpop.f32.mrf.mxu1  ;;  %v9435_v59 = vor.u32 %v10520_v29, %v9434_v31  ;;  %v9418_v58 = vld [vmem:[#allocation2 + $0x3a8] sm:$0xf]  ;;  %v9371_v9 = vor.u32 %v10504_v52, %v9370_v0  ;;  %v10496_v31 = vld [vmem:[#allocation2 + $0x314] sm:$0xf0] }
 0x67f   :  { %v9419_v53 = vor.u32 %v10516_v32, %v9418_v58  ;;  %v10389_v2 = vld [vmem:[%s13648_s9] sm:$0xff]  ;;  %v11026_v36 = vld [vmem:[%s13643_s4 + $0x8] sm:$0xff]  ;;  %v11039_v52 = vld [vmem:[%s13643_s4 + $0x58] sm:$0xff] }
 0x680   :  { %v8872_v28 = vmul.f32 -1.442695, %v3022_v23  ;;  %v3081_v26 = vmul.f32 %v12044_v33, %v3080_v1  ;;  %v9402_v1 = vld [vmem:[#allocation2 + $0x388] sm:$0xf] }
 0x681   :  { %v10803_v38 = vpop.eup %10802  ;;  %4851 = vmatpush.bf16.msrb.mxu1 %v9331_v30  ;;  %v11027_v30 = vld [vmem:[%s13643_s4] sm:$0xff] }
 0x682   :  { %v3064_v7 = vmul.f32 %v10803_v38, %v12039_v15  ;;  %10804 = vpow2.f32 %v8872_v28  ;;  %v3082_v51 = vadd.f32 %v12044_v33, %v3081_v26  ;;  %vm3069_vm4 = vweird.f32 %v10803_v38  ;;  %v10391_v15 = vld [vmem:[%s13648_s9 + $0x10] sm:$0xff]  ;;  %v9386_v28 = vld [vmem:[#allocation2 + $0x368] sm:$0xf] }
 0x683   :  { %v3010_v48 = vpop.f32.mrf.mxu2  ;;  %10806 = vtanh.f32 %v3048_v35  ;;  %vm3070_vm1 = vmor %vm3068_vm7, %vm3069_vm4  ;;  %3792 = vmatpush.bf16.msra.mxu2 %v10391_v15 }
 0x684   :  { %v3065_v8 = vsub.f32 1.0, %v3064_v7  ;;  %v3086_v45 = vsel %vm12076_vm6, %v12044_v33, %v3082_v51  ;;  %v9387_v7 = vor.u32 %v10508_v43, %v9386_v28  ;;  %v11036_v43 = vld [vmem:[%s13643_s4 + $0x40] sm:$0xff] }
 0x685   :  { %v3091_v20 = vsel %vm3088_vm3, %v3090_v14, %v3086_v45  ;;  %4896 = vmatpush.bf16.msra.mxu1 %v9451_v42  ;;  %v11028_v42 = vld [vmem:[%s13643_s4 + $0x10] sm:$0xff] }
 0x686   :  { %v3066_v10 = vmul.f32 %v10803_v38, %v3065_v8  ;;  %v3109_v40 = vmul.f32 %v3091_v20, %v11520_v49  ;;  %v9403_v49 = vor.u32 %v10512_v27, %v9402_v1  ;;  %v11034_v27 = vld [vmem:[%s13643_s4 + $0x48] sm:$0xff] }
 0x687   :  { %3793 = vmatpush.bf16.msra.mxu2 %v10390_v60 }
 0x688   :  { %v10805_v18 = vpop.eup %10804  ;;  %v3067_v44 = vadd.f32 %v10803_v38, %v3066_v10  ;;  %v10500_v10 = vld [vmem:[#allocation2 + $0x334] sm:$0xf0] }
 0x689   :  { %v3062_v19 = vadd.f32 1.0, %v10805_v18  ;;  %v10807_v13 = vpop.eup %10806  ;;  %4897 = vmatpush.bf16.msra.mxu1 %v9435_v59  ;;  %v11031_v59 = vld [vmem:[%s13643_s4 + $0x30] sm:$0xff] }
 0x68a   :  { %v3071_v62 = vsel %vm3070_vm1, %v10803_v38, %v3067_v44  ;;  %v9355_v44 = vor.u32 %v10500_v10, %v9354_v11 }
 0x68b   :  { %v3076_v5 = vsel %vm3073_vm2, %v3075_v6, %v3071_v62  ;;  %10808 = vrcp.f32 %v3062_v19  ;;  %v3104_v4 = vand.u32 2147483648, %v3062_v19  ;;  %v3102_v38 = vand.u32 2147483647, %v3062_v19  ;;  %3794 = vmatpush.bf16.msra.mxu2 %v10389_v2 }
 0x68c   :  { %v3110_v33 = vmul.f32 %v10807_v13, %v3076_v5  ;;  %vm3098_vm5 = vweird.f32 %v3062_v19  ;;  %v11029_v5 = vld [vmem:[%s13643_s4 + $0x20] sm:$0xff]  ;;  %v11030_v13 = vld [vmem:[%s13643_s4 + $0x18] sm:$0xff] }
 0x68d   :  { %4898 = vmatpush.bf16.msra.mxu1 %v9419_v53  ;;  %v3105_v35 = vor.u32 1.1754944e-38, %v3104_v4  ;;  %vm3103_vm7 = vcmp.eq.f32.partialorder %v3102_v38, 8.507059e+37  ;;  %v11033_v53 = vld [vmem:[%s13643_s4 + $0x28] sm:$0xff]  ;;  %v11035_v4 = vld [vmem:[%s13643_s4 + $0x50] sm:$0xff]  ;;  %v11037_v38 = vld [vmem:[%s13643_s4 + $0x60] sm:$0xff] }
 0x68e   :  { %v12091_v61 = vadd.f32 %v3110_v33, %v3109_v40  ;;  %v11032_v40 = vld [vmem:[%s13643_s4 + $0x38] sm:$0xff] }
 0x690   :  { %10810 = vtanh.f32 %v12091_v61 }
 0x691   :  { %v10809_v63 = vpop.eup %10808  ;;  %4899 = vmatpush.bf16.msra.mxu1 %v9403_v49 }
 0x692   :  { %v3094_v23 = vmul.f32 %v10809_v63, %v3062_v19  ;;  %vm3099_vm4 = vweird.f32 %v10809_v63  ;;  %v9338_v19 = vld [vmem:[#allocation2 + $0x308] sm:$0xf] }
 0x693   :  { %vm3100_vm6 = vmor %vm3098_vm5, %vm3099_vm4  ;;  %v9339_v14 = vor.u32 %v10496_v31, %v9338_v19 }
 0x694   :  { %v3095_v16 = vsub.f32 1.0, %v3094_v23 }
 0x695   :  { %4900 = vmatpush.bf16.msra.mxu1 %v9387_v7 }
 0x696   :  { %v3096_v56 = vmul.f32 %v10809_v63, %v3095_v16  ;;  %v10811_v8 = vpop.eup %10810 }
 0x698   :  { %v3097_v26 = vadd.f32 %v10809_v63, %v3096_v56 }
 0x699   :  { %4901 = vmatpush.bf16.msra.mxu1 %v9371_v9 }
 0x69a   :  { %v3101_v48 = vsel %vm3100_vm6, %v10809_v63, %v3097_v26 }
 0x69b   :  { %v3106_v50 = vsel %vm3103_vm7, %v3105_v35, %v3101_v48  ;;  %v11038_v48 = vld [vmem:[%s13643_s4 + $0x68] sm:$0xff] }
 0x69c   :  { %v12097_v57 = vmul.f32 %v10811_v8, %v3106_v50  ;;  %v11040_v50 = vld [vmem:[%s13643_s4 + $0x78] sm:$0xff] }
 0x69d   :  { %4902 = vmatpush.bf16.msra.mxu1 %v9355_v44 }
 0x69e   :  { %v12101_v12 = vpack.c.bf16 %v12097_v57, %v12097_v57  ;;  %v3122_v51 = vperm.slane %v12097_v57, 0  ;;  %v3115_v21 = vrot.slane %v12097_v57, 1  ;;  %v3116_v22 = vrot.slane %v12097_v57, 2 }
 0x69f   :  { %v3117_v45 = vrot.slane %v12097_v57, 3  ;;  %v3118_v58 = vrot.slane %v12097_v57, 4  ;;  %v3119_v1 = vrot.slane %v12097_v57, 5  ;;  %v3120_v2 = vrot.slane %v12097_v57, 6 }
 0x6a0   :  { %3795 = vmatmul.bf16.vlgmr.msra.gmra.mxu2 %v12101_v12  ;;  %4852 = vmatmul.bf16.vlgmr.msrb.gmra.mxu1 %v12101_v12  ;;  %v3139_v54 = vmul.f32 %v11026_v36, %v3122_v51  ;;  %v3138_v25 = vmul.f32 %v11027_v30, %v3122_v51  ;;  %v3123_v18 = vperm.slane %v3115_v21, 0  ;;  %v3124_v29 = vperm.slane %v3116_v22, 0 }
 0x6a1   :  { %v3125_v62 = vperm.slane %v3117_v45, 0  ;;  %4903 = vmatpush.bf16.msra.mxu1 %v9339_v14  ;;  %v3126_v32 = vperm.slane %v3118_v58, 0  ;;  %v3127_v16 = vperm.slane %v3119_v1, 0  ;;  %v3128_v49 = vperm.slane %v3120_v2, 0 }
 0x6a2   :  { %3156 = vadd.xlane.f32.xlu1 %v3139_v54  ;;  %3154 = vadd.xlane.f32.xlu2 %v3138_v25  ;;  %v3140_v6 = vmul.f32 %v11028_v42, %v3123_v18  ;;  %v3142_v15 = vmul.f32 %v11029_v5, %v3124_v29  ;;  %v3141_v20 = vmul.f32 %v11030_v13, %v3123_v18  ;;  %v3121_v7 = vrot.slane %v12097_v57, 7  ;;  %v11041_v57 = vld [vmem:[%s13643_s4 + $0x70] sm:$0xff] }
 0x6a3   :  { %v3144_v33 = vmul.f32 %v11031_v59, %v3125_v62  ;;  %v3145_v60 = vmul.f32 %v11032_v40, %v3125_v62  ;;  %v3143_v63 = vmul.f32 %v11033_v53, %v3124_v29  ;;  %v3147_v23 = vmul.f32 %v11034_v27, %v3126_v32 }
 0x6a4   :  { %3158 = vadd.xlane.f32.xlu0 %v3140_v6  ;;  %v3148_v28 = vmul.f32 %v11035_v4, %v3127_v16  ;;  %v3146_v56 = vmul.f32 %v11036_v43, %v3126_v32  ;;  %v3150_v26 = vmul.f32 %v11037_v38, %v3128_v49  ;;  %v3129_v35 = vperm.slane %v3121_v7, 0 }
 0x6a5   :  { %v3151_v0 = vmul.f32 %v11038_v48, %v3128_v49  ;;  %v3149_v8 = vmul.f32 %v11039_v52, %v3127_v16 }
 0x6a6   :  { %v3153_v9 = vmul.f32 %v11040_v50, %v3129_v35  ;;  %v3152_v51 = vmul.f32 %v11041_v57, %v3129_v35 }
 0x6aa   :  { %3162 = vadd.xlane.f32.xlu1 %v3142_v15  ;;  %3160 = vadd.xlane.f32.xlu2 %v3141_v20 }
 0x6ac   :  { %3166 = vadd.xlane.f32.xlu0 %v3144_v33 }
 0x6b0   :  { %4904 = vmatmul.bf16.vlgmr.msra.gmra.mxu1 %v12101_v12 }
 0x6b2   :  { %3168 = vadd.xlane.f32.xlu1 %v3145_v60  ;;  %3164 = vadd.xlane.f32.xlu2 %v3143_v63 }
 0x6b4   :  { %3172 = vadd.xlane.f32.xlu0 %v3147_v23 }
 0x6ba   :  { %3174 = vadd.xlane.f32.xlu1 %v3148_v28  ;;  %3170 = vadd.xlane.f32.xlu2 %v3146_v56 }
 0x6bc   :  { %3178 = vadd.xlane.f32.xlu0 %v3150_v26 }
 0x6c2   :  { %3180 = vadd.xlane.f32.xlu1 %v3151_v0  ;;  %3176 = vadd.xlane.f32.xlu2 %v3149_v8 }
 0x6c4   :  { %3184 = vadd.xlane.f32.xlu0 %v3153_v9 }
 0x6ca   :  { %3182 = vadd.xlane.f32.xlu2 %v3152_v51 }
 0x715   :  { %v3157_v21 = vpop.xlane.xlu1 %3156  ;;  %v3155_v11 = vpop.xlane.xlu2 %3154 }
 0x716   :  { %v3203_v15 = vperm.slane %v3157_v21, %v11603_v41  ;;  %v3202_v13 = vperm.slane %v3155_v11, %v11598_v39 }
 0x717   :  { %v3159_v10 = vpop.xlane.xlu0 %3158 }
 0x718   :  { %v3205_v20 = vperm.slane %v3159_v10, %v11598_v39  ;;  %v3204_v63 = vsel %vm1312_vm8, %v3203_v15, %v3202_v13 }
 0x71d   :  { %v12162_v36 = vpop.f32.mrf.mxu1  ;;  %v12164_v54 = vpop.xlane.xlu1 %3162 }
 0x71e   :  { %v12166_v30 = vpop.xlane.xlu2 %3160  ;;  %v3208_v59 = vperm.slane %v12164_v54, %v11598_v39 }
 0x71f   :  { %v3167_v25 = vpop.xlane.xlu0 %3166  ;;  %v3206_v14 = vperm.slane %v12166_v30, %v11603_v41 }
 0x720   :  { %v3211_v1 = vperm.slane %v3167_v25, %v11598_v39 }
 0x721   :  { %v3207_v33 = vsel %vm1312_vm8, %v3206_v14, %v3205_v20 }
 0x722   :  { %v3226_v2 = vsel %vm1335_vm9, %v3207_v33, %v3204_v63 }
 0x723   :  { %v12168_v18 = vpop.f32.mrf.mxu2 }
 0x725   :  { %v4855_v22 = vpop.f32.mrf.mxu1  ;;  %v12170_v44 = vpop.xlane.xlu1 %3168 }
 0x726   :  { %v12172_v42 = vpop.xlane.xlu2 %3164  ;;  %v3212_v58 = vperm.slane %v12170_v44, %v11603_v41 }
 0x727   :  { %v12174_v6 = vpop.xlane.xlu0 %3172  ;;  %v3209_v62 = vperm.slane %v12172_v42, %v11603_v41 }
 0x728   :  { %v3215_v16 = vperm.slane %v12174_v6, %v11603_v41  ;;  %v3213_v49 = vsel %vm1312_vm8, %v3212_v58, %v3211_v1 }
 0x729   :  { %v3210_v40 = vsel %vm1312_vm8, %v3209_v62, %v3208_v59 }
 0x72a   :  { %v3227_v4 = vsel %vm1337_vm10, %v3210_v40, %v3226_v2 }
 0x72b   :  { %v3798_v45 = vpop.f32.mrf.mxu2  ;;  %v3228_v35 = vsel %vm1339_vm11, %v3213_v49, %v3227_v4 }
 0x72d   :  { %v12176_v19 = vpop.f32.mrf.mxu1  ;;  %v12178_v31 = vpop.xlane.xlu1 %3174 }
 0x72e   :  { %v12180_v29 = vpop.xlane.xlu2 %3170  ;;  %v3217_v28 = vperm.slane %v12178_v31, %v11598_v39 }
 0x72f   :  { %v12186_v5 = vpop.xlane.xlu0 %3178  ;;  %v3214_v60 = vperm.slane %v12180_v29, %v11598_v39 }
 0x730   :  { %v3220_v26 = vperm.slane %v12186_v5, %v11598_v39 }
 0x731   :  { %v3216_v43 = vsel %vm1312_vm8, %v3215_v16, %v3214_v60 }
 0x732   :  { %v3229_v48 = vsel %vm1341_vm12, %v3216_v43, %v3228_v35 }
 0x735   :  { %v4907_v32 = vpop.f32.mrf.mxu1  ;;  %v12203_v27 = vpop.xlane.xlu1 %3180 }
 0x736   :  { %v12199_v53 = vpop.xlane.xlu2 %3176  ;;  %v3221_v56 = vperm.slane %v12203_v27, %v11603_v41 }
 0x737   :  { %v3218_v23 = vperm.slane %v12199_v53, %v11603_v41  ;;  %v12220_v7 = vpop.xlane.xlu0 %3184 }
 0x738   :  { %v3222_v52 = vsel %vm1312_vm8, %v3221_v56, %v3220_v26  ;;  %v3224_v50 = vperm.slane %v12220_v7, %v11603_v41 }
 0x739   :  { %v3219_v38 = vsel %vm1312_vm8, %v3218_v23, %v3217_v28 }
 0x73a   :  { %v3230_v8 = vsel %vm1343_vm13, %v3219_v38, %v3229_v48 }
 0x73b   :  { %v3231_v51 = vsel %vm1345_vm14, %v3222_v52, %v3230_v8 }
 0x73e   :  { %v12224_v0 = vpop.xlane.xlu2 %3182 }
 0x73f   :  { %v3223_v9 = vperm.slane %v12224_v0, %v11598_v39 }
 0x741   :  { %v3225_v57 = vsel %vm1312_vm8, %v3224_v50, %v3223_v9 }
 0x742   :  { %v3232_v22 = vsel %vm1347_vm15, %v3225_v57, %v3231_v51 }
 0x743   :  { %v3234_v45 = vsel %vm1350_vm0, %v3232_v22, -inf }
 0x744   :  { %3235 = vmax.xlane.f32.xlu1 %v3234_v45 }
 0x7b7   :  { %v12236_v14 = vpop.xlane.xlu1 %3235 }
 0x7b8   :  { %v3239_v62 = vperm.slane %v12236_v14, 1  ;;  %v3238_v15 = vperm.slane %v12236_v14, 0  ;;  %v3241_v33 = vperm.slane %v12236_v14, 3  ;;  %v3240_v58 = vperm.slane %v12236_v14, 2 }
 0x7b9   :  { %v3244_v43 = vperm.slane %v12236_v14, 6  ;;  %v3243_v35 = vperm.slane %v12236_v14, 5  ;;  %v3245_v50 = vperm.slane %v12236_v14, 7 }
 0x7ba   :  { %v3256_v13 = vsub.f32 %v3159_v10, %v3239_v62  ;;  %v3255_v20 = vsub.f32 %v3157_v21, %v3238_v15  ;;  %v3254_v59 = vsub.f32 %v3155_v11, %v3238_v15  ;;  %v3260_v63 = vsub.f32 %v3167_v25, %v3241_v33 }
 0x7bb   :  { %v3257_v1 = vsub.f32 %v12166_v30, %v3239_v62  ;;  %v3258_v23 = vsub.f32 %v12164_v54, %v3240_v58  ;;  %v3242_v10 = vperm.slane %v12236_v14, 4  ;;  %v3259_v54 = vsub.f32 %v12172_v42, %v3240_v58 }
 0x7bc   :  { %v3274_v32 = vmul.f32 1.442695, %v3256_v13  ;;  %v3272_v40 = vmul.f32 1.442695, %v3255_v20  ;;  %v3270_v60 = vmul.f32 1.442695, %v3254_v59  ;;  %v3261_v25 = vsub.f32 %v12170_v44, %v3241_v33 }
 0x7bd   :  { %v3282_v2 = vmul.f32 1.442695, %v3260_v63  ;;  %v3276_v21 = vmul.f32 1.442695, %v3257_v1  ;;  %v3278_v16 = vmul.f32 1.442695, %v3258_v23  ;;  %v3263_v30 = vsub.f32 %v12174_v6, %v3242_v10 }
 0x7be   :  { %10812 = vpow2.f32 %v3274_v32  ;;  %v3280_v56 = vmul.f32 1.442695, %v3259_v54  ;;  %v3284_v26 = vmul.f32 1.442695, %v3261_v25  ;;  %v3266_v44 = vsub.f32 %v12186_v5, %v3244_v43 }
 0x7bf   :  { %10814 = vpow2.f32 %v3272_v40  ;;  %v3288_v28 = vmul.f32 1.442695, %v3263_v30  ;;  %v3262_v42 = vsub.f32 %v12180_v29, %v3242_v10  ;;  %v3264_v52 = vsub.f32 %v12178_v31, %v3243_v35 }
 0x7c0   :  { %10816 = vpow2.f32 %v3270_v60  ;;  %v3294_v8 = vmul.f32 1.442695, %v3266_v44  ;;  %v3269_v29 = vsub.f32 %v12220_v7, %v3245_v50  ;;  %v3265_v31 = vsub.f32 %v12199_v53, %v3243_v35 }
 0x7c1   :  { %10818 = vpow2.f32 %v3282_v2  ;;  %v3286_v9 = vmul.f32 1.442695, %v3262_v42  ;;  %v3290_v51 = vmul.f32 1.442695, %v3264_v52  ;;  %v3267_v45 = vsub.f32 %v12203_v27, %v3244_v43 }
 0x7c2   :  { %10820 = vpow2.f32 %v3276_v21  ;;  %v3300_v14 = vmul.f32 1.442695, %v3269_v29  ;;  %v3292_v62 = vmul.f32 1.442695, %v3265_v31  ;;  %v3268_v53 = vsub.f32 %v12224_v0, %v3245_v50 }
 0x7c3   :  { %10822 = vpow2.f32 %v3278_v16  ;;  %v3296_v13 = vmul.f32 1.442695, %v3267_v45 }
 0x7c4   :  { %v12245_v11 = vpop.eup %10812  ;;  %10824 = vpow2.f32 %v3288_v28  ;;  %v3298_v27 = vmul.f32 1.442695, %v3268_v53 }
 0x7c5   :  { %v12247_v49 = vpop.eup %10814  ;;  %3325 = vperm.xlu1 %10697, %v12245_v11   ;;  %10826 = vpow2.f32 %v3280_v56 }
 0x7c6   :  { %v12250_v4 = vpop.eup %10816  ;;  %3322 = vperm.xlu0 %10696, %v12247_v49   ;;  %10828 = vpow2.f32 %v3284_v26 }
 0x7c7   :  { %3319 = vperm.xlu2 %10695, %v12250_v4   ;;  %v12258_v38 = vpop.eup %10818  ;;  %10830 = vpow2.f32 %v3294_v8 }
 0x7c8   :  { %v12261_v48 = vpop.eup %10820  ;;  %10832 = vpow2.f32 %v3286_v9 }
 0x7c9   :  { %v12264_v6 = vpop.eup %10822  ;;  %10834 = vpow2.f32 %v3290_v51 }
 0x7ca   :  { %v12272_v57 = vpop.eup %10824  ;;  %10836 = vpow2.f32 %v3300_v14 }
 0x7cb   :  { %v12274_v22 = vpop.eup %10826  ;;  %10838 = vpow2.f32 %v3292_v62 }
 0x7cc   :  { %v12277_v5 = vpop.eup %10828  ;;  %10840 = vpow2.f32 %v3296_v13 }
 0x7cd   :  { %3337 = vperm.xlu1 %10697, %v12258_v38   ;;  %v12284_v15 = vpop.eup %10830  ;;  %10842 = vpow2.f32 %v3298_v27 }
 0x7ce   :  { %3328 = vperm.xlu0 %10696, %v12261_v48   ;;  %v12286_v20 = vpop.eup %10832 }
 0x7cf   :  { %3331 = vperm.xlu2 %10695, %v12264_v6   ;;  %v12289_v59 = vpop.eup %10834 }
 0x7d0   :  { %v12294_v7 = vpop.eup %10836 }
 0x7d1   :  { %v12296_v33 = vpop.eup %10838 }
 0x7d2   :  { %v12299_v58 = vpop.eup %10840 }
 0x7d3   :  { %v12303_v32 = vpop.eup %10842 }
 0x7d5   :  { %3346 = vperm.xlu1 %10697, %v12272_v57  }
 0x7d6   :  { %3334 = vperm.xlu0 %10696, %v12274_v22  }
 0x7d7   :  { %3340 = vperm.xlu2 %10695, %v12277_v5  }
 0x7dd   :  { %3355 = vperm.xlu1 %10697, %v12284_v15  }
 0x7de   :  { %3343 = vperm.xlu0 %10696, %v12286_v20  }
 0x7df   :  { %3349 = vperm.xlu2 %10695, %v12289_v59  }
 0x7e5   :  { %3364 = vperm.xlu1 %10697, %v12294_v7  }
 0x7e6   :  { %3352 = vperm.xlu0 %10696, %v12296_v33  }
 0x7e7   :  { %3358 = vperm.xlu2 %10695, %v12299_v58  }
 0x7ee   :  { %3361 = vperm.xlu0 %10696, %v12303_v32  }
 0x821   :  { %v3320_v0 = vpop.permute.xlu2 %3319 }
 0x822   :  { %v3366_v35 = vperm.slane %v3320_v0, %v11598_v39 }
 0x829   :  { %v3332_v63 = vpop.permute.xlu2 %3331 }
 0x82a   :  { %v3372_v26 = vperm.slane %v3332_v63, %v11598_v39 }
 0x831   :  { %v3341_v10 = vpop.permute.xlu2 %3340 }
 0x832   :  { %v3376_v45 = vperm.slane %v3341_v10, %v11603_v41 }
 0x837   :  { %v3326_v40 = vpop.permute.xlu1 %3325 }
 0x838   :  { %v3323_v60 = vpop.permute.xlu0 %3322  ;;  %v3369_v43 = vperm.slane %v3326_v40, %v11598_v39 }
 0x839   :  { %v3350_v30 = vpop.permute.xlu2 %3349  ;;  %v3367_v56 = vperm.slane %v3323_v60, %v11603_v41 }
 0x83a   :  { %v3381_v14 = vperm.slane %v3350_v30, %v11598_v39 }
 0x83b   :  { %v3368_v50 = vsel %vm1312_vm8, %v3367_v56, %v3366_v35 }
 0x83f   :  { %v3338_v1 = vpop.permute.xlu1 %3337 }
 0x840   :  { %v3329_v23 = vpop.permute.xlu0 %3328  ;;  %v3375_v9 = vperm.slane %v3338_v1, %v11598_v39 }
 0x841   :  { %v3370_v54 = vperm.slane %v3329_v23, %v11603_v41  ;;  %v3359_v27 = vpop.permute.xlu2 %3358 }
 0x842   :  { %v3377_v53 = vsel %vm1312_vm8, %v3376_v45, %v3375_v9  ;;  %v3385_v23 = vperm.slane %v3359_v27, %v11603_v41 }
 0x843   :  { %v3371_v44 = vsel %vm1312_vm8, %v3370_v54, %v3369_v43 }
 0x844   :  { %v3390_v29 = vsel %vm1335_vm9, %v3371_v44, %v3368_v50 }
 0x847   :  { %v3347_v21 = vpop.permute.xlu1 %3346 }
 0x848   :  { %v3335_v2 = vpop.permute.xlu0 %3334  ;;  %v3379_v31 = vperm.slane %v3347_v21, %v11603_v41 }
 0x849   :  { %v3373_v25 = vperm.slane %v3335_v2, %v11603_v41 }
 0x84b   :  { %v3374_v42 = vsel %vm1312_vm8, %v3373_v25, %v3372_v26 }
 0x84c   :  { %v3391_v62 = vsel %vm1337_vm10, %v3374_v42, %v3390_v29 }
 0x84d   :  { %v3392_v60 = vsel %vm1339_vm11, %v3377_v53, %v3391_v62 }
 0x84f   :  { %v3356_v28 = vpop.permute.xlu1 %3355 }
 0x850   :  { %v3344_v16 = vpop.permute.xlu0 %3343  ;;  %v3384_v40 = vperm.slane %v3356_v28, %v11598_v39 }
 0x851   :  { %v3378_v52 = vperm.slane %v3344_v16, %v11598_v39 }
 0x852   :  { %v3386_v30 = vsel %vm1312_vm8, %v3385_v23, %v3384_v40 }
 0x853   :  { %v3380_v13 = vsel %vm1312_vm8, %v3379_v31, %v3378_v52 }
 0x854   :  { %v3393_v1 = vsel %vm1341_vm12, %v3380_v13, %v3392_v60 }
 0x857   :  { %v3365_v63 = vpop.permute.xlu1 %3364 }
 0x858   :  { %v3353_v8 = vpop.permute.xlu0 %3352  ;;  %v3388_v21 = vperm.slane %v3365_v63, %v11603_v41 }
 0x859   :  { %v3382_v51 = vperm.slane %v3353_v8, %v11603_v41 }
 0x85b   :  { %v3383_v0 = vsel %vm1312_vm8, %v3382_v51, %v3381_v14 }
 0x85c   :  { %v3394_v10 = vsel %vm1343_vm13, %v3383_v0, %v3393_v1 }
 0x85d   :  { %v3395_v25 = vsel %vm1345_vm14, %v3386_v30, %v3394_v10 }
 0x860   :  { %v3362_v2 = vpop.permute.xlu0 %3361 }
 0x861   :  { %v3387_v16 = vperm.slane %v3362_v2, %v11598_v39 }
 0x863   :  { %v3389_v54 = vsel %vm1312_vm8, %v3388_v21, %v3387_v16 }
 0x864   :  { %v3396_v28 = vsel %vm1347_vm15, %v3389_v54, %v3395_v25 }
 0x865   :  { %v3398_v43 = vsel %vm1350_vm0, %v3396_v28, 0.0 }
 0x866   :  { %3399 = vadd.xlane.f32.xlu2 %v3398_v43 }
 0x8d9   :  { %v12338_v56 = vpop.xlane.xlu2 %3399 }
 0x8da   :  { %v3402_v26 = vperm.slane %v12338_v56, 0  ;;  %v3403_v35 = vperm.slane %v12338_v56, 1  ;;  %v12343_v44 = vperm.slane %v12338_v56, 2  ;;  %v3407_v42 = vperm.slane %v12338_v56, 5 }
 0x8db   :  { %v12348_v8 = vperm.slane %v12338_v56, 3  ;;  %v12356_v60 = vperm.slane %v12338_v56, 4 }
 0x8dc   :  { %10844 = vrcp.f32 %v3402_v26  ;;  %v3427_v45 = vand.u32 2147483647, %v3402_v26  ;;  %v3429_v14 = vand.u32 2147483648, %v3402_v26  ;;  %v3507_v63 = vand.u32 2147483647, %v3407_v42 }
 0x8dd   :  { %10846 = vrcp.f32 %v3403_v35  ;;  %vm3423_vm2 = vweird.f32 %v3402_v26  ;;  %v3509_v2 = vand.u32 2147483648, %v3407_v42  ;;  %v3445_v43 = vand.u32 2147483648, %v3403_v35 }
 0x8de   :  { %10848 = vrcp.f32 %v12343_v44  ;;  %vm3428_vm4 = vcmp.eq.f32.partialorder %v3427_v45, 8.507059e+37  ;;  %v3430_v10 = vor.u32 1.1754944e-38, %v3429_v14  ;;  %vm3439_vm7 = vweird.f32 %v3403_v35 }
 0x8df   :  { %10850 = vrcp.f32 %v3407_v42  ;;  %v3510_v45 = vor.u32 1.1754944e-38, %v3509_v2  ;;  %v3459_v2 = vand.u32 2147483647, %v12343_v44 }
 0x8e0   :  { %10852 = vrcp.f32 %v12348_v8 }
 0x8e1   :  { %10854 = vrcp.f32 %v12356_v60 }
 0x8e2   :  { %v10845_v52 = vpop.eup %10844 }
 0x8e3   :  { %v10847_v50 = vpop.eup %10846  ;;  %v3419_v9 = vmul.f32 %v10845_v52, %v3402_v26  ;;  %vm3424_vm1 = vweird.f32 %v10845_v52  ;;  %v3443_v26 = vand.u32 2147483647, %v3403_v35 }
 0x8e4   :  { %v12350_v51 = vpop.eup %10848  ;;  %v3435_v29 = vmul.f32 %v10847_v50, %v3403_v35  ;;  %vm3425_vm3 = vmor %vm3423_vm2, %vm3424_vm1  ;;  %vm3440_vm5 = vweird.f32 %v10847_v50  ;;  %vm3503_vm1 = vweird.f32 %v3407_v42 }
 0x8e5   :  { %v3420_v31 = vsub.f32 1.0, %v3419_v9  ;;  %v10851_v13 = vpop.eup %10850  ;;  %v3451_v27 = vmul.f32 %v12350_v51, %v12343_v44  ;;  %vm12363_vm2 = vmor %vm3439_vm7, %vm3440_vm5  ;;  %vm3444_vm5 = vcmp.eq.f32.partialorder %v3443_v26, 8.507059e+37  ;;  %vm3455_vm7 = vweird.f32 %v12343_v44 }
 0x8e6   :  { %v3436_v62 = vsub.f32 1.0, %v3435_v29  ;;  %v3499_v0 = vmul.f32 %v10851_v13, %v3407_v42  ;;  %v12358_v54 = vpop.eup %10852  ;;  %vm3504_vm6 = vweird.f32 %v10851_v13 }
 0x8e7   :  { %v3421_v53 = vmul.f32 %v10845_v52, %v3420_v31  ;;  %v3452_v30 = vsub.f32 1.0, %v3451_v27 }
 0x8e8   :  { %v3437_v40 = vmul.f32 %v10847_v50, %v3436_v62  ;;  %v3500_v23 = vsub.f32 1.0, %v3499_v0  ;;  %v3446_v62 = vor.u32 1.1754944e-38, %v3445_v43 }
 0x8e9   :  { %v3422_v1 = vadd.f32 %v10845_v52, %v3421_v53  ;;  %v12375_v53 = vperm.slane %v12338_v56, 6 }
 0x8ea   :  { %v3438_v16 = vadd.f32 %v10847_v50, %v3437_v40  ;;  %v3501_v25 = vmul.f32 %v10851_v13, %v3500_v23 }
 0x8eb   :  { %v3426_v21 = vsel %vm3425_vm3, %v10845_v52, %v3422_v1  ;;  %vm3505_vm3 = vmor %vm3503_vm1, %vm3504_vm6  ;;  %vm3456_vm6 = vweird.f32 %v12350_v51  ;;  %v10855_v1 = vpop.eup %10854  ;;  %10856 = vrcp.f32 %v12375_v53 }
 0x8ec   :  { %v3431_v28 = vsel %vm3428_vm4, %v3430_v10, %v3426_v21  ;;  %v3502_v31 = vadd.f32 %v10851_v13, %v3501_v25  ;;  %v3442_v14 = vsel %vm12363_vm2, %v10847_v50, %v3438_v16  ;;  %vm3508_vm4 = vcmp.eq.f32.partialorder %v3507_v63, 8.507059e+37  ;;  %vm3457_vm1 = vmor %vm3455_vm7, %vm3456_vm6 }
 0x8ed   :  { %v3433_v9 = vmul.f32 %v12247_v49, %v3431_v28  ;;  %v3432_v29 = vmul.f32 %v12250_v4, %v3431_v28  ;;  %v3453_v49 = vmul.f32 %v12350_v51, %v3452_v30  ;;  %v3467_v4 = vmul.f32 %v12358_v54, %v12348_v8 }
 0x8ee   :  { %v3506_v35 = vsel %vm3505_vm3, %v10851_v13, %v3502_v31  ;;  %v3447_v0 = vsel %vm3444_vm5, %v3446_v62, %v3442_v14  ;;  %v3461_v13 = vand.u32 2147483648, %v12343_v44  ;;  %v3483_v21 = vmul.f32 %v10855_v1, %v12356_v60 }
 0x8ef   :  { %3553 = vperm.xlu1 %10697, %v3433_v9   ;;  %3548 = vperm.xlu0 %10696, %v3432_v29   ;;  %v12372_v42 = vsel %vm3508_vm4, %v3510_v45, %v3506_v35  ;;  %v3454_v50 = vadd.f32 %v12350_v51, %v3453_v49  ;;  %v3468_v40 = vsub.f32 1.0, %v3467_v4  ;;  %v3449_v63 = vmul.f32 %v12261_v48, %v3447_v0 }
 0x8f0   :  { %v3512_v27 = vmul.f32 %v12289_v59, %v12372_v42  ;;  %v3448_v23 = vmul.f32 %v12245_v11, %v3447_v0  ;;  %v3462_v16 = vor.u32 1.1754944e-38, %v3461_v13  ;;  %vm3460_vm2 = vcmp.eq.f32.partialorder %v3459_v2, 8.507059e+37 }
 0x8f1   :  { %v3458_v59 = vsel %vm3457_vm1, %v12350_v51, %v3454_v50  ;;  %v3469_v10 = vmul.f32 %v12358_v54, %v3468_v40  ;;  %v12391_v48 = vperm.slane %v12338_v56, 7  ;;  %vm3472_vm3 = vweird.f32 %v12358_v54  ;;  %v10857_v25 = vpop.eup %10856 }
 0x8f2   :  { %3598 = vperm.xlu2 %10695, %v3512_v27   ;;  %v3463_v11 = vsel %vm3460_vm2, %v3462_v16, %v3458_v59  ;;  %v3484_v44 = vsub.f32 1.0, %v3483_v21  ;;  %v3477_v28 = vand.u32 2147483648, %v12348_v8  ;;  %vm3471_vm4 = vweird.f32 %v12348_v8 }
 0x8f3   :  { %v3470_v30 = vadd.f32 %v12358_v54, %v3469_v10  ;;  %v3465_v51 = vmul.f32 %v12274_v22, %v3463_v11  ;;  %v3464_v43 = vmul.f32 %v12264_v6, %v3463_v11  ;;  %v3475_v9 = vand.u32 2147483647, %v12348_v8  ;;  %vm3473_vm5 = vmor %vm3471_vm4, %vm3472_vm3 }
 0x8f4   :  { %10858 = vrcp.f32 %v12391_v48  ;;  %v3485_v29 = vmul.f32 %v10855_v1, %v3484_v44  ;;  %v3515_v26 = vmul.f32 %v10857_v25, %v12375_v53  ;;  %v3478_v31 = vor.u32 1.1754944e-38, %v3477_v28 }
 0x8f5   :  { %v3474_v56 = vsel %vm3473_vm5, %v12358_v54, %v3470_v30  ;;  %vm3476_vm6 = vcmp.eq.f32.partialorder %v3475_v9, 8.507059e+37  ;;  %vm3488_vm7 = vweird.f32 %v10855_v1  ;;  %v3493_v14 = vand.u32 2147483648, %v12356_v60  ;;  %v10384_v9 = vld [vmem:[%s13647_s8 + $0x18] sm:$0xff] }
 0x8f6   :  { %v3479_v52 = vsel %vm3476_vm6, %v3478_v31, %v3474_v56  ;;  %v3486_v22 = vadd.f32 %v10855_v1, %v3485_v29  ;;  %v3516_v6 = vsub.f32 1.0, %v3515_v26  ;;  %vm3487_vm1 = vweird.f32 %v12356_v60  ;;  %v10383_v26 = vld [vmem:[%s13647_s8 + $0x10] sm:$0xff]  ;;  %v11042_v31 = vld [vmem:[%s13642_s3 + $0x18] sm:$0xff] }
 0x8f7   :  { %3563 = vperm.xlu1 %10697, %v3449_v63   ;;  %3558 = vperm.xlu0 %10696, %v3448_v23   ;;  %v3481_v8 = vmul.f32 %v12277_v5, %v3479_v52  ;;  %v3480_v49 = vmul.f32 %v12258_v38, %v3479_v52  ;;  %v3491_v54 = vand.u32 2147483647, %v12356_v60  ;;  %vm3489_vm2 = vmor %vm3487_vm1, %vm3488_vm7  ;;  %v3494_v27 = vor.u32 1.1754944e-38, %v3493_v14  ;;  %v11044_v14 = vld [vmem:[%s13642_s3 + $0x8] sm:$0xff] }
 0x8f8   :  { %v3490_v4 = vsel %vm3489_vm2, %v10855_v1, %v3486_v22  ;;  %v3517_v35 = vmul.f32 %v10857_v25, %v3516_v6  ;;  %vm3520_vm4 = vweird.f32 %v10857_v25  ;;  %v3525_v5 = vand.u32 2147483648, %v12375_v53  ;;  %v11043_v22 = vld [vmem:[%s13642_s3 + $0x10] sm:$0xff] }
 0x8f9   :  { %vm3492_vm3 = vcmp.eq.f32.partialorder %v3491_v54, 8.507059e+37  ;;  %vm3519_vm5 = vweird.f32 %v12375_v53  ;;  %v3523_v60 = vand.u32 2147483647, %v12375_v53  ;;  %v3541_v10 = vand.u32 2147483648, %v12391_v48 }
 0x8fa   :  { %v10859_v45 = vpop.eup %10858  ;;  %v3495_v0 = vsel %vm3492_vm3, %v3494_v27, %v3490_v4  ;;  %v3518_v50 = vadd.f32 %v10857_v25, %v3517_v35  ;;  %vm3521_vm6 = vmor %vm3519_vm5, %vm3520_vm4  ;;  %v3526_v23 = vor.u32 1.1754944e-38, %v3525_v5  ;;  %vm3535_vm2 = vweird.f32 %v12391_v48  ;;  %v11046_v4 = vld [vmem:[%s13642_s3 + $0x28] sm:$0xff] }
 0x8fb   :  { %v3531_v62 = vmul.f32 %v10859_v45, %v12391_v48  ;;  %v3497_v38 = vmul.f32 %v12272_v57, %v3495_v0  ;;  %v3496_v13 = vmul.f32 %v12286_v20, %v3495_v0  ;;  %vm3524_vm7 = vcmp.eq.f32.partialorder %v3523_v60, 8.507059e+37  ;;  %v11050_v60 = vld [vmem:[%s13642_s3 + $0x48] sm:$0xff] }
 0x8fc   :  { %v3522_v1 = vsel %vm3521_vm6, %v10857_v25, %v3518_v50  ;;  %vm3536_vm1 = vweird.f32 %v10859_v45  ;;  %v3513_v20 = vmul.f32 %v12296_v33, %v12372_v42  ;;  %v3539_v53 = vand.u32 2147483647, %v12391_v48  ;;  %v10388_v48 = vld [vmem:[%s13647_s8 + $0x38] sm:$0xff] }
 0x8fd   :  { %v3532_v40 = vsub.f32 1.0, %v3531_v62  ;;  %v3527_v2 = vsel %vm3524_vm7, %v3526_v23, %v3522_v1  ;;  %vm3537_vm3 = vmor %vm3535_vm2, %vm3536_vm1  ;;  %v3542_v16 = vor.u32 1.1754944e-38, %v3541_v10  ;;  %3873 = vmatpush.bf16.msra.mxu3 %v10388_v48  ;;  %v11047_v62 = vld [vmem:[%s13642_s3 + $0x20] sm:$0xff] }
 0x8fe   :  { %v3528_v57 = vmul.f32 %v12284_v15, %v3527_v2  ;;  %vm3540_vm4 = vcmp.eq.f32.partialorder %v3539_v53, 8.507059e+37  ;;  %v3529_v44 = vmul.f32 %v12299_v58, %v3527_v2  ;;  %v10386_v58 = vld [vmem:[%s13647_s8 + $0x28] sm:$0xff]  ;;  %v10457_v10 = vld [vmem:[#allocation2 + $0x1e4] sm:$0xf] }
 0x8ff   :  { %3573 = vperm.xlu1 %10697, %v3465_v51   ;;  %3568 = vperm.xlu0 %10696, %v3464_v43   ;;  %v3533_v63 = vmul.f32 %v10859_v45, %v3532_v40  ;;  %v10385_v43 = vld [vmem:[%s13647_s8 + $0x20] sm:$0xff]  ;;  %v11048_v40 = vld [vmem:[%s13642_s3 + $0x38] sm:$0xff] }
 0x901   :  { %v3534_v59 = vadd.f32 %v10859_v45, %v3533_v63  ;;  %v11051_v63 = vld [vmem:[%s13642_s3 + $0x40] sm:$0xff] }
 0x903   :  { %v3538_v21 = vsel %vm3537_vm3, %v10859_v45, %v3534_v59  ;;  %v10382_v45 = vld [vmem:[%s13647_s8 + $0x8] sm:$0xff]  ;;  %v10381_v59 = vld [vmem:[%s13647_s8] sm:$0xff] }
 0x904   :  { %v3543_v11 = vsel %vm3540_vm4, %v3542_v16, %v3538_v21 }
 0x905   :  { %v3544_v30 = vmul.f32 %v12303_v32, %v3543_v11  ;;  %v3545_v15 = vmul.f32 %v12294_v7, %v3543_v11  ;;  %v10387_v32 = vld [vmem:[%s13647_s8 + $0x30] sm:$0xff]  ;;  %v10453_v11 = vld [vmem:[#allocation2 + $0x1c4] sm:$0xf] }
 0x906   :  { %3874 = vmatpush.bf16.msra.mxu3 %v10387_v32  ;;  %v11052_v32 = vld [vmem:[%s13642_s3 + $0x50] sm:$0xff] }
 0x907   :  { %3583 = vperm.xlu1 %10697, %v3481_v8   ;;  %3578 = vperm.xlu0 %10696, %v3480_v49   ;;  %v11045_v49 = vld [vmem:[%s13642_s3] sm:$0xff] }
 0x90a   :  { %3875 = vmatpush.bf16.msra.mxu3 %v10386_v58 }
 0x90e   :  { %3876 = vmatpush.bf16.msra.mxu3 %v10385_v43 }
 0x90f   :  { %3593 = vperm.xlu1 %10697, %v3497_v38   ;;  %3588 = vperm.xlu0 %10696, %v3496_v13   ;;  %v11049_v38 = vld [vmem:[%s13642_s3 + $0x30] sm:$0xff] }
 0x912   :  { %3877 = vmatpush.bf16.msra.mxu3 %v10384_v9 }
 0x916   :  { %3878 = vmatpush.bf16.msra.mxu3 %v10383_v26  ;;  %v10449_v26 = vld [vmem:[#allocation2 + $0x1a4] sm:$0xf] }
 0x917   :  { %3608 = vperm.xlu1 %10697, %v3528_v57   ;;  %3603 = vperm.xlu0 %10696, %v3513_v20   ;;  %v9185_v57 = vld [vmem:[#allocation2 + $0x1f0] sm:$0xf0] }
 0x918   :  { %v9188_v21 = vor.u32 %v10457_v10, %v9185_v57 }
 0x91a   :  { %3879 = vmatpush.bf16.msra.mxu3 %v10382_v45 }
 0x91e   :  { %3880 = vmatpush.bf16.msra.mxu3 %v10381_v59 }
 0x91f   :  { %3618 = vperm.xlu1 %10697, %v3544_v30   ;;  %3613 = vperm.xlu0 %10696, %v3529_v44   ;;  %v9169_v30 = vld [vmem:[#allocation2 + $0x1d0] sm:$0xf0] }
 0x922   :  { %4318 = vmatpush.bf16.msrb.mxu3 %v9188_v21 }
 0x927   :  { %3623 = vperm.xlu0 %10696, %v3545_v15  }
 0x94c   :  { %v3599_v44 = vpop.permute.xlu2 %3598 }
 0x94d   :  { %v3636_v58 = vmul.f32 %v11052_v32, %v3599_v44  ;;  %v9105_v44 = vld [vmem:[#allocation2 + $0x150] sm:$0xf0] }
 0x961   :  { %v3554_v33 = vpop.permute.xlu1 %3553  ;;  %v3549_v42 = vpop.permute.xlu0 %3548 }
 0x962   :  { %v3627_v8 = vmul.f32 %v11044_v14, %v3554_v33  ;;  %v3626_v54 = vmul.f32 %v11045_v49, %v3549_v42  ;;  %v10445_v49 = vld [vmem:[#allocation2 + $0x184] sm:$0xf] }
 0x964   :  { %v3642_v20 = vadd.f32 %v3627_v8, %v3626_v54  ;;  %v9137_v54 = vld [vmem:[#allocation2 + $0x190] sm:$0xf0] }
 0x966   :  { %v3643_v42 = vrot.slane %v3642_v20, 4 }
 0x969   :  { %v3564_v25 = vpop.permute.xlu1 %3563  ;;  %v3559_v28 = vpop.permute.xlu0 %3558 }
 0x96a   :  { %v3629_v52 = vmul.f32 %v11042_v31, %v3564_v25  ;;  %v3628_v6 = vmul.f32 %v11043_v22, %v3559_v28  ;;  %v9172_v28 = vor.u32 %v10453_v11, %v9169_v30  ;;  %v9153_v31 = vld [vmem:[#allocation2 + $0x1b0] sm:$0xf0]  ;;  %v10437_v30 = vld [vmem:[#allocation2 + $0x144] sm:$0xf] }
 0x96b   :  { %v9156_v45 = vor.u32 %v10449_v26, %v9153_v31  ;;  %v10433_v31 = vld [vmem:[#allocation2 + $0x124] sm:$0xf] }
 0x96c   :  { %v3649_v2 = vadd.f32 %v3629_v52, %v3628_v6  ;;  %v3644_v52 = vadd.f32 %v3643_v42, %v3642_v20  ;;  %4319 = vmatpush.bf16.msrb.mxu3 %v9172_v28 }
 0x96e   :  { %v3650_v33 = vrot.slane %v3649_v2, 4 }
 0x970   :  { %4320 = vmatpush.bf16.msrb.mxu3 %v9156_v45 }
 0x971   :  { %v3574_v7 = vpop.permute.xlu1 %3573  ;;  %v3569_v51 = vpop.permute.xlu0 %3568 }
 0x972   :  { %v3631_v35 = vmul.f32 %v11046_v4, %v3574_v7  ;;  %v3630_v27 = vmul.f32 %v11047_v62, %v3569_v51  ;;  %v11053_v51 = vld [vmem:[%s13642_s3 + $0x58] sm:$0xff] }
 0x974   :  { %v3656_v53 = vadd.f32 %v3631_v35, %v3630_v27  ;;  %v3645_v27 = vrot.slane %v3644_v52, 2 }
 0x976   :  { %v3657_v48 = vrot.slane %v3656_v53, 4  ;;  %v3646_v20 = vadd.f32 %v3645_v27, %v3644_v52  ;;  %v9089_v52 = vld [vmem:[#allocation2 + $0x130] sm:$0xf0] }
 0x978   :  { %v3658_v22 = vadd.f32 %v3657_v48, %v3656_v53  ;;  %v3647_v28 = vrot.slane %v3646_v20, 1 }
 0x979   :  { %v3584_v56 = vpop.permute.xlu1 %3583  ;;  %v3579_v29 = vpop.permute.xlu0 %3578 }
 0x97a   :  { %v3633_v5 = vmul.f32 %v11048_v40, %v3584_v56  ;;  %v3632_v13 = vmul.f32 %v11049_v38, %v3579_v29  ;;  %v3651_v56 = vadd.f32 %v3650_v33, %v3649_v2  ;;  %v9140_v40 = vor.u32 %v10445_v49, %v9137_v54  ;;  %v11054_v38 = vld [vmem:[%s13642_s3 + $0x60] sm:$0xff] }
 0x97b   :  { %v9092_v54 = vor.u32 %v10433_v31, %v9089_v52 }
 0x97c   :  { %v3663_v16 = vadd.f32 %v3633_v5, %v3632_v13  ;;  %v3652_v35 = vrot.slane %v3651_v56, 2  ;;  %4321 = vmatpush.bf16.msrb.mxu3 %v9140_v40 }
 0x97e   :  { %v3664_v7 = vrot.slane %v3663_v16, 4  ;;  %v3653_v59 = vadd.f32 %v3652_v35, %v3651_v56 }
 0x980   :  { %v3665_v14 = vadd.f32 %v3664_v7, %v3663_v16  ;;  %v3654_v42 = vrot.slane %v3653_v59, 1  ;;  %v9108_v7 = vor.u32 %v10437_v30, %v9105_v44 }
 0x981   :  { %v3594_v0 = vpop.permute.xlu1 %3593  ;;  %v3589_v50 = vpop.permute.xlu0 %3588 }
 0x982   :  { %v3635_v1 = vmul.f32 %v11050_v60, %v3594_v0  ;;  %v3634_v23 = vmul.f32 %v11051_v63, %v3589_v50  ;;  %v3659_v0 = vrot.slane %v3658_v22, 2  ;;  %v3666_v5 = vrot.slane %v3665_v14, 2  ;;  %v11055_v60 = vld [vmem:[%s13642_s3 + $0x68] sm:$0xff]  ;;  %v10441_v63 = vld [vmem:[#allocation2 + $0x164] sm:$0xf] }
 0x984   :  { %v3670_v15 = vadd.f32 %v3635_v1, %v3634_v23  ;;  %v9121_v23 = vld [vmem:[#allocation2 + $0x170] sm:$0xf0]  ;;  %v3660_v53 = vadd.f32 %v3659_v0, %v3658_v22  ;;  %v3667_v16 = vadd.f32 %v3666_v5, %v3665_v14  ;;  %v10429_v0 = vld [vmem:[#allocation2 + $0x104] sm:$0xf] }
 0x985   :  { %v9124_v21 = vor.u32 %v10441_v63, %v9121_v23 }
 0x986   :  { %v3671_v9 = vrot.slane %v3670_v15, 4  ;;  %v3661_v32 = vrot.slane %v3660_v53, 1 }
 0x987   :  { %4322 = vmatpush.bf16.msrb.mxu3 %v9124_v21 }
 0x988   :  { %v3672_v4 = vadd.f32 %v3671_v9, %v3670_v15  ;;  %v3662_v49 = vadd.f32 %v3661_v32, %v3660_v53 }
 0x989   :  { %v3604_v25 = vpop.permute.xlu0 %3603  ;;  %v3609_v6 = vpop.permute.xlu1 %3608 }
 0x98a   :  { %v3637_v43 = vmul.f32 %v11053_v51, %v3604_v25  ;;  %v3638_v13 = vmul.f32 %v11054_v38, %v3609_v6  ;;  %v3673_v2 = vrot.slane %v3672_v4, 2  ;;  %v3668_v51 = vrot.slane %v3667_v16, 1 }
 0x98b   :  { %v3655_v6 = vadd.f32 %v3654_v42, %v3653_v59  ;;  %4323 = vmatpush.bf16.msrb.mxu3 %v9108_v7 }
 0x98c   :  { %v3677_v29 = vadd.f32 %v3637_v43, %v3636_v58  ;;  %v3674_v15 = vadd.f32 %v3673_v2, %v3672_v4  ;;  %v11056_v43 = vld [vmem:[%s13642_s3 + $0x70] sm:$0xff]  ;;  %v3648_v4 = vadd.f32 %v3647_v28, %v3646_v20  ;;  %v3669_v35 = vadd.f32 %v3668_v51, %v3667_v16  ;;  %v10458_v51 = vld [vmem:[#allocation2 + $0x1ec] sm:$0xf] }
 0x98d   :  { %v3699_v5 = vpack.c.bf16 %v3655_v6, %v3655_v6  ;;  %v9177_v6 = vld [vmem:[#allocation2 + $0x1d8] sm:$0xf0] }
 0x98e   :  { %v3678_v8 = vrot.slane %v3677_v29, 4  ;;  %v3675_v22 = vrot.slane %v3674_v15, 1  ;;  %v3698_v23 = vpack.c.bf16 %v3648_v4, %v3648_v4  ;;  %v3701_v2 = vpack.c.bf16 %v3669_v35, %v3669_v35  ;;  %v9145_v4 = vld [vmem:[#allocation2 + $0x198] sm:$0xf0] }
 0x98f   :  { %4324 = vmatpush.bf16.msrb.mxu3 %v9092_v54  ;;  %v10446_v54 = vld [vmem:[#allocation2 + $0x18c] sm:$0xf] }
 0x990   :  { %v3679_v62 = vadd.f32 %v3678_v8, %v3677_v29  ;;  %v11057_v29 = vld [vmem:[%s13642_s3 + $0x78] sm:$0xff]  ;;  %v3676_v40 = vadd.f32 %v3675_v22, %v3674_v15  ;;  %v3811_v30 = vunpack.c.l.b16 %v3701_v2  ;;  %v10454_v22 = vld [vmem:[#allocation2 + $0x1cc] sm:$0xf]  ;;  %v9148_v35 = vor.u32 %v10446_v54, %v9145_v4  ;;  %v9444_v2 = vld [vmem:[#allocation2 + $0x3f0] sm:$0xf0] }
 0x991   :  { %v3614_v50 = vpop.permute.xlu0 %3613  ;;  %v3619_v33 = vpop.permute.xlu1 %3618  ;;  %v9057_v54 = vld [vmem:[#allocation2 + $0xf0] sm:$0xf0]  ;;  %v9039_v4 = vld [vmem:[#allocation2 + $0xc0] sm:$0xf] }
 0x992   :  { %v3639_v1 = vmul.f32 %v11055_v60, %v3614_v50  ;;  %v3680_v10 = vrot.slane %v3679_v62, 2  ;;  %v3640_v9 = vmul.f32 %v11056_v43, %v3619_v33  ;;  %v9073_v50 = vld [vmem:[#allocation2 + $0x110] sm:$0xf0]  ;;  %v3700_v60 = vpack.c.bf16 %v3662_v49, %v3662_v49  ;;  %v9193_v43 = vld [vmem:[#allocation2 + $0x1f8] sm:$0xf0] }
 0x993   :  { %v9076_v63 = vor.u32 %v10429_v0, %v9073_v50  ;;  %v9196_v31 = vor.u32 %v10458_v51, %v9193_v43  ;;  %v10438_v50 = vld [vmem:[#allocation2 + $0x14c] sm:$0xf]  ;;  %v10493_v43 = vld [vmem:[#allocation2 + $0x304] sm:$0xf] }
 0x994   :  { %v3684_v57 = vadd.f32 %v3639_v1, %v3638_v13  ;;  %v3681_v48 = vadd.f32 %v3680_v10, %v3679_v62  ;;  %v3702_v10 = vpack.c.bf16 %v3676_v40, %v3676_v40  ;;  %v3810_v21 = vunpack.c.l.b16 %v3700_v60  ;;  %v9113_v40 = vld [vmem:[#allocation2 + $0x158] sm:$0xf0] }
 0x995   :  { %4325 = vmatpush.bf16.msrb.mxu3 %v9076_v63  ;;  %v9081_v63 = vld [vmem:[#allocation2 + $0x118] sm:$0xf0] }
 0x996   :  { %v3685_v11 = vrot.slane %v3684_v57, 4  ;;  %v3682_v45 = vrot.slane %v3681_v48, 1  ;;  %v3812_v15 = vunpack.c.l.b16 %v3702_v10 }
 0x998   :  { %v3686_v25 = vadd.f32 %v3685_v11, %v3684_v57  ;;  %v3683_v38 = vadd.f32 %v3682_v45, %v3681_v48  ;;  %v3809_v57 = vunpack.c.l.b16 %v3699_v5  ;;  %v3808_v11 = vunpack.c.l.b16 %v3698_v23  ;;  %v10521_v23 = vld [vmem:[#allocation2 + $0x3e4] sm:$0xf] }
 0x999   :  { %v3624_v58 = vpop.permute.xlu0 %3623  ;;  %v9180_v45 = vor.u32 %v10454_v22, %v9177_v6  ;;  %v9116_v5 = vor.u32 %v10438_v50, %v9113_v40  ;;  %v9447_v10 = vor.u32 %v10521_v23, %v9444_v2  ;;  %v10514_v22 = vld [vmem:[#allocation2 + $0x3ac] sm:$0xf]  ;;  %v9055_v6 = vld [vmem:[#allocation2 + $0xe0] sm:$0xf]  ;;  %v9041_v50 = vld [vmem:[#allocation2 + $0xd0] sm:$0xf0] }
 0x99a   :  { %v3687_v56 = vrot.slane %v3686_v25, 2  ;;  %v3641_v26 = vmul.f32 %v11057_v29, %v3624_v58  ;;  %v3703_v53 = vpack.c.bf16 %v3683_v38, %v3683_v38  ;;  %v3816_v33 = vsel %vm1335_vm9, %v3809_v57, %v3808_v11  ;;  %v10434_v38 = vld [vmem:[#allocation2 + $0x12c] sm:$0xf]  ;;  %v10517_v57 = vld [vmem:[#allocation2 + $0x3c4] sm:$0xf] }
 0x99b   :  { %v10510_v23 = vld [vmem:[#allocation2 + $0x38c] sm:$0xf]  ;;  %v9404_v2 = vld [vmem:[#allocation2 + $0x398] sm:$0xf0] }
 0x99c   :  { %v3688_v14 = vadd.f32 %v3687_v56, %v3686_v25  ;;  %v3691_v8 = vadd.f32 %v3641_v26, %v3640_v9  ;;  %v3813_v42 = vunpack.c.l.b16 %v3703_v53  ;;  %v3817_v25 = vsel %vm1337_vm10, %v3810_v21, %v3816_v33  ;;  %v9428_v53 = vld [vmem:[#allocation2 + $0x3d0] sm:$0xf0]  ;;  %v10513_v21 = vld [vmem:[#allocation2 + $0x3a4] sm:$0xf] }
 0x99d   :  { %v3818_v32 = vsel %vm1339_vm11, %v3811_v30, %v3817_v25  ;;  %v10509_v30 = vld [vmem:[#allocation2 + $0x384] sm:$0xf] }
 0x99e   :  { %v3689_v62 = vrot.slane %v3688_v14, 1  ;;  %v3692_v27 = vrot.slane %v3691_v8, 4  ;;  %v3819_v7 = vsel %vm1341_vm12, %v3812_v15, %v3818_v32  ;;  %v10505_v33 = vld [vmem:[#allocation2 + $0x364] sm:$0xf] }
 0x99f   :  { %v3820_v56 = vsel %vm1343_vm13, %v3813_v42, %v3819_v7  ;;  %v9380_v42 = vld [vmem:[#allocation2 + $0x370] sm:$0xf0]  ;;  %v10501_v25 = vld [vmem:[#allocation2 + $0x344] sm:$0xf] }
 0x9a0   :  { %v3693_v13 = vadd.f32 %v3692_v27, %v3691_v8  ;;  %v3690_v1 = vadd.f32 %v3689_v62, %v3688_v14  ;;  %v10450_v14 = vld [vmem:[#allocation2 + $0x1ac] sm:$0xf]  ;;  %v9161_v8 = vld [vmem:[#allocation2 + $0x1b8] sm:$0xf0]  ;;  %v9348_v7 = vld [vmem:[#allocation2 + $0x330] sm:$0xf0] }
 0x9a1   :  { %v9164_v49 = vor.u32 %v10450_v14, %v9161_v8  ;;  %v10442_v62 = vld [vmem:[#allocation2 + $0x16c] sm:$0xf]  ;;  %v9129_v27 = vld [vmem:[#allocation2 + $0x178] sm:$0xf0]  ;;  %v10425_v14 = vld [vmem:[#allocation2 + $0xe4] sm:$0xf] }
 0x9a2   :  { %v3694_v59 = vrot.slane %v3693_v13, 2  ;;  %v3704_v16 = vpack.c.bf16 %v3690_v1, %v3690_v1  ;;  %v9132_v0 = vor.u32 %v10442_v62, %v9129_v27  ;;  %v10430_v1 = vld [vmem:[#allocation2 + $0x10c] sm:$0xf]  ;;  %v9420_v62 = vld [vmem:[#allocation2 + $0x3b8] sm:$0xf0]  ;;  %v9060_v27 = vor.u32 %v10425_v14, %v9057_v54 }
 0x9a3   :  { %v10494_v54 = vld [vmem:[#allocation2 + $0x30c] sm:$0xf] }
 0x9a4   :  { %v3695_v20 = vadd.f32 %v3694_v59, %v3693_v13  ;;  %v3814_v28 = vunpack.c.l.b16 %v3704_v16  ;;  %v9097_v13 = vld [vmem:[#allocation2 + $0x138] sm:$0xf0]  ;;  %v9084_v59 = vor.u32 %v10430_v1, %v9081_v63  ;;  %v9412_v16 = vld [vmem:[#allocation2 + $0x3b0] sm:$0xf0]  ;;  %4305 = vmatpush.bf16.msrb.mxu2 %v9060_v27  ;;  %v10417_v1 = vld [vmem:[#allocation2 + $0xa4] sm:$0xf] }
 0x9a5   :  { %v9100_v60 = vor.u32 %v10434_v38, %v9097_v13  ;;  %v9415_v11 = vor.u32 %v10513_v21, %v9412_v16  ;;  %v9023_v38 = vld [vmem:[#allocation2 + $0xa0] sm:$0xf]  ;;  %v10419_v13 = vld [vmem:[#allocation2 + $0xac] sm:$0xf0]  ;;  %v9025_v63 = vld [vmem:[#allocation2 + $0xb0] sm:$0xf0] }
 0x9a6   :  { %v3696_v44 = vrot.slane %v3695_v20, 1  ;;  %v3821_v29 = vsel %vm1345_vm14, %v3814_v28, %v3820_v56  ;;  %v9364_v28 = vld [vmem:[#allocation2 + $0x350] sm:$0xf0]  ;;  %v9452_v56 = vld [vmem:[#allocation2 + $0x3f8] sm:$0xf0] }
 0x9a7   :  { %v9367_v32 = vor.u32 %v10501_v25, %v9364_v28  ;;  %v10413_v21 = vld [vmem:[#allocation2 + $0x84] sm:$0xf]  ;;  %v9009_v16 = vld [vmem:[#allocation2 + $0x90] sm:$0xf0]  ;;  %v8943_v27 = vld [vmem:[#allocation2] sm:$0xf] }
 0x9a8   :  { %v3697_v48 = vadd.f32 %v3696_v44, %v3695_v20  ;;  %v9431_v20 = vor.u32 %v10517_v57, %v9428_v53  ;;  %v9396_v44 = vld [vmem:[#allocation2 + $0x390] sm:$0xf0]  ;;  %v9007_v57 = vld [vmem:[#allocation2 + $0x80] sm:$0xf]  ;;  %v10415_v53 = vld [vmem:[#allocation2 + $0x8c] sm:$0xf0] }
 0x9a9   :  { %v9399_v15 = vor.u32 %v10509_v30, %v9396_v44  ;;  %v9388_v30 = vld [vmem:[#allocation2 + $0x378] sm:$0xf0]  ;;  %v9008_v44 = vor.u32 %v10415_v53, %v9007_v57  ;;  %v10409_v25 = vld [vmem:[#allocation2 + $0x64] sm:$0xf]  ;;  %v8993_v28 = vld [vmem:[#allocation2 + $0x70] sm:$0xf0] }
 0x9aa   :  { %v3705_v58 = vpack.c.bf16 %v3697_v48, %v3697_v48  ;;  %v9383_v48 = vor.u32 %v10505_v33, %v9380_v42  ;;  %v8991_v33 = vld [vmem:[#allocation2 + $0x60] sm:$0xf]  ;;  %v10411_v42 = vld [vmem:[#allocation2 + $0x6c] sm:$0xf0]  ;;  %v10424_v57 = vld [vmem:[#allocation2 + $0xd4] sm:$0xf0] }
 0x9ab   :  { %v10422_v53 = vld [vmem:[#allocation2 + $0xcc] sm:$0xf] }
 0x9ac   :  { %v3815_v9 = vunpack.c.l.b16 %v3705_v58  ;;  %v10497_v58 = vld [vmem:[#allocation2 + $0x324] sm:$0xf] }
 0x9ad   :  { %v9351_v51 = vor.u32 %v10497_v58, %v9348_v7  ;;  %v9372_v58 = vld [vmem:[#allocation2 + $0x358] sm:$0xf0]  ;;  %v8992_v7 = vor.u32 %v10411_v42, %v8991_v33 }
 0x9ae   :  { %v3822_v26 = vsel %vm1347_vm15, %v3815_v9, %v3821_v29  ;;  %v10522_v9 = vld [vmem:[#allocation2 + $0x3ec] sm:$0xf] }
 0x9af   :  { %v3823_v52 = vpack.c.b16 %v3822_v26, %v3822_v26  ;;  %v9455_v26 = vor.u32 %v10522_v9, %v9452_v56  ;;  %v10405_v56 = vld [vmem:[#allocation2 + $0x44] sm:$0xf] }
 0x9b1   :  { %3881 = vmatmul.bf16.vlgmr.msra.gmra.mxu3 %v3823_v52  ;;  %v9436_v52 = vld [vmem:[#allocation2 + $0x3d8] sm:$0xf0] }
 0x9b2   :  { %4370 = vmatpush.bf16.msra.mxu3 %v9196_v31  ;;  %v10518_v31 = vld [vmem:[#allocation2 + $0x3cc] sm:$0xf] }
 0x9b3   :  { %v9439_v8 = vor.u32 %v10518_v31, %v9436_v52  ;;  %v9356_v31 = vld [vmem:[#allocation2 + $0x338] sm:$0xf0] }
 0x9b6   :  { %4371 = vmatpush.bf16.msra.mxu3 %v9180_v45  ;;  %v10427_v45 = vld [vmem:[#allocation2 + $0xec] sm:$0xf0] }
 0x9ba   :  { %4372 = vmatpush.bf16.msra.mxu3 %v9164_v49  ;;  %v9056_v49 = vor.u32 %v10427_v45, %v9055_v6  ;;  %v8959_v6 = vld [vmem:[#allocation2 + $0x20] sm:$0xf]  ;;  %v10403_v45 = vld [vmem:[#allocation2 + $0x2c] sm:$0xf0] }
 0x9bc   :  { %4279 = vmatpush.bf16.msrb.mxu0 %v9056_v49  ;;  %v8961_v49 = vld [vmem:[#allocation2 + $0x30] sm:$0xf0] }
 0x9be   :  { %4373 = vmatpush.bf16.msra.mxu3 %v9148_v35  ;;  %v10423_v35 = vld [vmem:[#allocation2 + $0xcc] sm:$0xf0] }
 0x9bf   :  { %v9040_v40 = vor.u32 %v10423_v35, %v9039_v4  ;;  %v9340_v4 = vld [vmem:[#allocation2 + $0x318] sm:$0xf0]  ;;  %v8960_v35 = vor.u32 %v10403_v45, %v8959_v6  ;;  %v8967_v45 = vld [vmem:[#allocation2 + $0x28] sm:$0xf] }
 0x9c1   :  { %4326 = vmatmul.bf16.vlgmr.msrb.gmra.mxu3 %v12020_v55  ;;  %4280 = vmatpush.bf16.msrb.mxu0 %v9040_v40  ;;  %v10397_v40 = vld [vmem:[#allocation2 + $0x4] sm:$0xf] }
 0x9c2   :  { %4374 = vmatpush.bf16.msra.mxu3 %v9132_v0  ;;  %v10421_v0 = vld [vmem:[#allocation2 + $0xc4] sm:$0xf] }
 0x9c6   :  { %4375 = vmatpush.bf16.msra.mxu3 %v9116_v5  ;;  %v9044_v5 = vor.u32 %v10421_v0, %v9041_v50  ;;  %v10399_v0 = vld [vmem:[#allocation2 + $0xc] sm:$0xf0]  ;;  %v9343_v50 = vor.u32 %v10494_v54, %v9340_v4 }
 0x9c8   :  { %4306 = vmatpush.bf16.msrb.mxu2 %v9044_v5  ;;  %v8945_v5 = vld [vmem:[#allocation2 + $0x10] sm:$0xf0] }
 0x9ca   :  { %4376 = vmatpush.bf16.msra.mxu3 %v9100_v60  ;;  %v9423_v60 = vor.u32 %v10514_v22, %v9420_v62 }
 0x9ce   :  { %4377 = vmatpush.bf16.msra.mxu3 %v9084_v59  ;;  %v9024_v59 = vor.u32 %v10419_v13, %v9023_v38  ;;  %v9063_v38 = vld [vmem:[#allocation2 + $0xe8] sm:$0xf]  ;;  %v10428_v13 = vld [vmem:[#allocation2 + $0xf4] sm:$0xf0] }
 0x9d0   :  { %4281 = vmatpush.bf16.msrb.mxu0 %v9024_v59 }
 0x9d1   :  { %4378 = vmatmul.bf16.vlgmr.msra.gmra.mxu3 %v12020_v55  ;;  %v9332_v55 = vld [vmem:[#allocation2 + $0x310] sm:$0xf0] }
 0x9d2   :  { %4870 = vmatpush.bf16.msrb.mxu3 %v9447_v10  ;;  %v9335_v29 = vor.u32 %v10493_v43, %v9332_v55  ;;  %v9028_v10 = vor.u32 %v10417_v1, %v9025_v63  ;;  %v8975_v43 = vld [vmem:[#allocation2 + $0x40] sm:$0xf]  ;;  %v10407_v55 = vld [vmem:[#allocation2 + $0x4c] sm:$0xf0]  ;;  %v9065_v1 = vld [vmem:[#allocation2 + $0xf8] sm:$0xf0]  ;;  %v8944_v63 = vor.u32 %v10399_v0, %v8943_v27 }
 0x9d3   :  { %v8976_v52 = vor.u32 %v10407_v55, %v8975_v43  ;;  %v10410_v43 = vld [vmem:[#allocation2 + $0x6c] sm:$0xf]  ;;  %v9001_v55 = vld [vmem:[#allocation2 + $0x78] sm:$0xf0] }
 0x9d4   :  { %4307 = vmatpush.bf16.msrb.mxu2 %v9028_v10  ;;  %4282 = vmatpush.bf16.msrb.mxu0 %v9008_v44  ;;  %v9047_v10 = vld [vmem:[#allocation2 + $0xc8] sm:$0xf]  ;;  %v10418_v44 = vld [vmem:[#allocation2 + $0xac] sm:$0xf]  ;;  %v8953_v0 = vld [vmem:[#allocation2 + $0x18] sm:$0xf0] }
 0x9d5   :  { %v10398_v27 = vld [vmem:[#allocation2 + $0xc] sm:$0xf] }
 0x9d6   :  { %4871 = vmatpush.bf16.msrb.mxu3 %v9431_v20  ;;  %v9407_v20 = vor.u32 %v10510_v23, %v9404_v2  ;;  %v8948_v23 = vor.u32 %v10397_v40, %v8945_v5  ;;  %v9064_v2 = vor.u32 %v10428_v13, %v9063_v38  ;;  %v8956_v38 = vor.u32 %v10398_v27, %v8953_v0 }
 0x9d8   :  { %4283 = vmatpush.bf16.msrb.mxu0 %v8992_v7  ;;  %v8999_v7 = vld [vmem:[#allocation2 + $0x68] sm:$0xf] }
 0x9da   :  { %4872 = vmatpush.bf16.msrb.mxu3 %v9415_v11  ;;  %v10506_v11 = vld [vmem:[#allocation2 + $0x36c] sm:$0xf] }
 0x9dc   :  { %4284 = vmatpush.bf16.msrb.mxu0 %v8976_v52  ;;  %v8985_v52 = vld [vmem:[#allocation2 + $0x58] sm:$0xf0] }
 0x9de   :  { %4873 = vmatpush.bf16.msrb.mxu3 %v9399_v15  ;;  %v9012_v15 = vor.u32 %v10413_v21, %v9009_v16  ;;  %v9049_v21 = vld [vmem:[#allocation2 + $0xd8] sm:$0xf0]  ;;  %v9031_v16 = vld [vmem:[#allocation2 + $0xa8] sm:$0xf] }
 0x9e0   :  { %4308 = vmatpush.bf16.msrb.mxu2 %v9012_v15  ;;  %4285 = vmatpush.bf16.msrb.mxu0 %v8960_v35  ;;  %v9033_v15 = vld [vmem:[#allocation2 + $0xb8] sm:$0xf0]  ;;  %v8951_v35 = vld [vmem:[#allocation2 + $0x8] sm:$0xf] }
 0x9e1   :  { %v9036_v42 = vor.u32 %v10418_v44, %v9033_v15  ;;  %v10489_v44 = vld [vmem:[#allocation2 + $0x2e4] sm:$0xf]  ;;  %v8938_v15 = vld [vmem:[%s13639_s0 + $0x48] sm:$0xff] }
 0x9e2   :  { %4874 = vmatpush.bf16.msrb.mxu3 %v9383_v48  ;;  %v9391_v48 = vor.u32 %v10506_v11, %v9388_v30  ;;  %v10420_v11 = vld [vmem:[#allocation2 + $0xb4] sm:$0xf0]  ;;  %v9052_v30 = vor.u32 %v10422_v53, %v9049_v21 }
 0x9e3   :  { %v9032_v33 = vor.u32 %v10420_v11, %v9031_v16  ;;  %v9314_v11 = vld [vmem:[#allocation2 + $0x2e0] sm:$0xf] }
 0x9e4   :  { %4286 = vmatpush.bf16.msrb.mxu0 %v8944_v63 }
 0x9e6   :  { %4875 = vmatpush.bf16.msrb.mxu3 %v9367_v32  ;;  %v10502_v32 = vld [vmem:[#allocation2 + $0x34c] sm:$0xf] }
 0x9e7   :  { %v9375_v9 = vor.u32 %v10502_v32, %v9372_v58 }
 0x9e8   :  { %4331 = vmatpush.bf16.msra.mxu0 %v9064_v2 }
 0x9ea   :  { %4876 = vmatpush.bf16.msrb.mxu3 %v9351_v51  ;;  %v8996_v51 = vor.u32 %v10409_v25, %v8993_v28  ;;  %v10416_v25 = vld [vmem:[#allocation2 + $0x94] sm:$0xf0]  ;;  %v9017_v28 = vld [vmem:[#allocation2 + $0x98] sm:$0xf0] }
 0x9ec   :  { %4309 = vmatpush.bf16.msrb.mxu2 %v8996_v51  ;;  %v10412_v51 = vld [vmem:[#allocation2 + $0x74] sm:$0xf0] }
 0x9ee   :  { %4877 = vmatpush.bf16.msrb.mxu3 %v9335_v29  ;;  %v8977_v29 = vld [vmem:[#allocation2 + $0x50] sm:$0xf0] }
 0x9ef   :  { %v8980_v22 = vor.u32 %v10405_v56, %v8977_v29  ;;  %v9004_v56 = vor.u32 %v10410_v43, %v9001_v55  ;;  %v8983_v29 = vld [vmem:[#allocation2 + $0x48] sm:$0xf]  ;;  %v9300_v55 = vld [vmem:[#allocation2 + $0x2d0] sm:$0xf0] }
 0x9f1   :  { %4878 = vmatmul.bf16.vlgmr.msrb.gmra.mxu3 %v12101_v12  ;;  %4310 = vmatpush.bf16.msrb.mxu2 %v8980_v22 }
 0x9f2   :  { %4922 = vmatpush.bf16.msra.mxu3 %v9455_v26  ;;  %v10498_v26 = vld [vmem:[#allocation2 + $0x32c] sm:$0xf] }
 0x9f3   :  { %v9359_v14 = vor.u32 %v10498_v26, %v9356_v31  ;;  %v10408_v26 = vld [vmem:[#allocation2 + $0x54] sm:$0xf0]  ;;  %v10406_v31 = vld [vmem:[#allocation2 + $0x4c] sm:$0xf] }
 0x9f4   :  { %v8984_v22 = vor.u32 %v10408_v26, %v8983_v29  ;;  %v8988_v6 = vor.u32 %v10406_v31, %v8985_v52 }
 0x9f6   :  { %4923 = vmatpush.bf16.msra.mxu3 %v9439_v8  ;;  %v10401_v8 = vld [vmem:[#allocation2 + $0x24] sm:$0xf] }
 0x9f7   :  { %v8964_v62 = vor.u32 %v10401_v8, %v8961_v49  ;;  %v10402_v8 = vld [vmem:[#allocation2 + $0x2c] sm:$0xf]  ;;  %v8969_v49 = vld [vmem:[#allocation2 + $0x38] sm:$0xf0] }
 0x9f8   :  { %v8972_v4 = vor.u32 %v10402_v8, %v8969_v49  ;;  %v10481_v8 = vld [vmem:[#allocation2 + $0x2a4] sm:$0xf] }
 0x9f9   :  { %4311 = vmatpush.bf16.msrb.mxu2 %v8964_v62  ;;  %v10400_v62 = vld [vmem:[#allocation2 + $0x14] sm:$0xf0] }
 0x9fa   :  { %4924 = vmatpush.bf16.msra.mxu3 %v9423_v60  ;;  %v10426_v60 = vld [vmem:[#allocation2 + $0xec] sm:$0xf]  ;;  %v8952_v5 = vor.u32 %v10400_v62, %v8951_v35  ;;  %v10595_v35 = vld [vmem:[#allocation2 + $0x1ac] sm:$0xf0] }
 0x9fb   :  { %v9068_v59 = vor.u32 %v10426_v60, %v9065_v1 }
 0x9fd   :  { %4312 = vmatpush.bf16.msrb.mxu2 %v8948_v23 }
 0x9fe   :  { %4925 = vmatpush.bf16.msra.mxu3 %v9407_v20  ;;  %v9048_v20 = vor.u32 %v10424_v57, %v9047_v10 }
 0xa00   :  { %4332 = vmatpush.bf16.msra.mxu0 %v9048_v20  ;;  %v8937_v20 = vld [vmem:[%s13639_s0 + $0x40] sm:$0xff] }
 0xa01   :  { %4357 = vmatpush.bf16.msra.mxu2 %v9068_v59 }
 0xa02   :  { %4926 = vmatpush.bf16.msra.mxu3 %v9391_v48  ;;  %v9015_v48 = vld [vmem:[#allocation2 + $0x88] sm:$0xf] }
 0xa03   :  { %v9016_v32 = vor.u32 %v10416_v25, %v9015_v48  ;;  %v9769_v48 = vld [vmem:[#allocation2 + $0x1e0] sm:$0xf]  ;;  %v10603_v25 = vld [vmem:[#allocation2 + $0x1ec] sm:$0xf0] }
 0xa04   :  { %4333 = vmatpush.bf16.msra.mxu0 %v9032_v33 }
 0xa05   :  { %4358 = vmatpush.bf16.msra.mxu2 %v9052_v30  ;;  %v10491_v30 = vld [vmem:[#allocation2 + $0x2ec] sm:$0xf0] }
 0xa06   :  { %4927 = vmatpush.bf16.msra.mxu3 %v9375_v9  ;;  %v9000_v9 = vor.u32 %v10412_v51, %v8999_v7  ;;  %v9315_v33 = vor.u32 %v10491_v30, %v9314_v11  ;;  %v10487_v7 = vld [vmem:[#allocation2 + $0x2cc] sm:$0xf0]  ;;  %v10485_v51 = vld [vmem:[#allocation2 + $0x2c4] sm:$0xf]  ;;  %v9250_v11 = vld [vmem:[#allocation2 + $0x260] sm:$0xf] }
 0xa07   :  { %v9303_v26 = vor.u32 %v10485_v51, %v9300_v55  ;;  %v10475_v30 = vld [vmem:[#allocation2 + $0x26c] sm:$0xf0]  ;;  %v9234_v51 = vld [vmem:[#allocation2 + $0x240] sm:$0xf] }
 0xa08   :  { %4334 = vmatpush.bf16.msra.mxu0 %v9016_v32  ;;  %v9770_v32 = vor.u32 %v10603_v25, %v9769_v48 }
 0xa09   :  { %4359 = vmatpush.bf16.msra.mxu2 %v9036_v42  ;;  %v9316_v42 = vld [vmem:[#allocation2 + $0x2f0] sm:$0xf0] }
 0xa0a   :  { %4928 = vmatpush.bf16.msra.mxu3 %v9359_v14  ;;  %v10404_v14 = vld [vmem:[#allocation2 + $0x34] sm:$0xf0] }
 0xa0b   :  { %v8968_v54 = vor.u32 %v10404_v14, %v8967_v45  ;;  %v9282_v45 = vld [vmem:[#allocation2 + $0x2a0] sm:$0xf]  ;;  %v10483_v14 = vld [vmem:[#allocation2 + $0x2ac] sm:$0xf0] }
 0xa0c   :  { %4335 = vmatpush.bf16.msra.mxu0 %v9000_v9  ;;  %v9753_v9 = vld [vmem:[#allocation2 + $0x1c0] sm:$0xf]  ;;  %v9283_v49 = vor.u32 %v10483_v14, %v9282_v45  ;;  %v10467_v45 = vld [vmem:[#allocation2 + $0x22c] sm:$0xf0] }
 0xa0e   :  { %4929 = vmatpush.bf16.msra.mxu3 %v9343_v50 }
 0xa10   :  { %4336 = vmatpush.bf16.msra.mxu0 %v8984_v22 }
 0xa11   :  { %4930 = vmatmul.bf16.vlgmr.msra.gmra.mxu3 %v12101_v12  ;;  %v10414_v12 = vld [vmem:[#allocation2 + $0x8c] sm:$0xf] }
 0xa12   :  { %v9020_v58 = vor.u32 %v10414_v12, %v9017_v28  ;;  %v9319_v28 = vor.u32 %v10489_v44, %v9316_v42  ;;  %6176 = vmatpush.bf16.msrb.mxu3 %v9770_v32  ;;  %v10473_v44 = vld [vmem:[#allocation2 + $0x264] sm:$0xf]  ;;  %v9705_v42 = vld [vmem:[#allocation2 + $0x160] sm:$0xf] }
 0xa14   :  { %4360 = vmatpush.bf16.msra.mxu2 %v9020_v58  ;;  %4337 = vmatpush.bf16.msra.mxu0 %v8968_v54  ;;  %v9298_v58 = vld [vmem:[#allocation2 + $0x2c0] sm:$0xf]  ;;  %v9284_v54 = vld [vmem:[#allocation2 + $0x2b0] sm:$0xf0] }
 0xa15   :  { %v9299_v43 = vor.u32 %v10487_v7, %v9298_v58  ;;  %v9287_v27 = vor.u32 %v10481_v8, %v9284_v54  ;;  %v8940_v58 = vld [vmem:[%s13639_s0 + $0x58] sm:$0xff] }
 0xa18   :  { %4361 = vmatpush.bf16.msra.mxu2 %v9004_v56  ;;  %4338 = vmatpush.bf16.msra.mxu0 %v8952_v5  ;;  %v10599_v56 = vld [vmem:[#allocation2 + $0x1cc] sm:$0xf0] }
 0xa19   :  { %v9754_v31 = vor.u32 %v10599_v56, %v9753_v9  ;;  %v10479_v5 = vld [vmem:[#allocation2 + $0x28c] sm:$0xf0]  ;;  %v10469_v56 = vld [vmem:[#allocation2 + $0x244] sm:$0xf] }
 0xa1b   :  { %6177 = vmatpush.bf16.msrb.mxu3 %v9754_v31  ;;  %v9689_v31 = vld [vmem:[#allocation2 + $0x140] sm:$0xf] }
 0xa1c   :  { %4362 = vmatpush.bf16.msra.mxu2 %v8988_v6 }
 0xa20   :  { %4363 = vmatpush.bf16.msra.mxu2 %v8972_v4  ;;  %v9737_v4 = vld [vmem:[#allocation2 + $0x1a0] sm:$0xf] }
 0xa21   :  { %v9738_v0 = vor.u32 %v10595_v35, %v9737_v4  ;;  %v10465_v4 = vld [vmem:[#allocation2 + $0x224] sm:$0xf]  ;;  %v9220_v35 = vld [vmem:[#allocation2 + $0x230] sm:$0xf0] }
 0xa23   :  { %6178 = vmatpush.bf16.msrb.mxu3 %v9738_v0  ;;  %v9673_v0 = vld [vmem:[#allocation2 + $0x120] sm:$0xf] }
 0xa24   :  { %4364 = vmatpush.bf16.msra.mxu2 %v8956_v38  ;;  %v10477_v38 = vld [vmem:[#allocation2 + $0x284] sm:$0xf] }
 0xa34   :  { %v3882_v50 = vpop.f32.mrf.mxu3 }
 0xa35   :  { %v3883_v40 = vadd.f32 %v3882_v50, %v12168_v18 }
 0xa37   :  { %10860 = vtanh.f32 %v3883_v40  ;;  %v9266_v40 = vld [vmem:[#allocation2 + $0x280] sm:$0xf] }
 0xa3c   :  { %v3884_v13 = vpop.f32.mrf.mxu3 }
 0xa3d   :  { %v10861_v60 = vpop.eup %10860 }
 0xa3e   :  { %3888 = vst [vmem:[#allocation5 + $0x8] sm:$0xff] %v10861_v60  ;;  %v3894_v1 = vpack.c.bf16 %v10861_v60, %v10861_v60 }
 0xa40   :  { %4287 = vmatmul.bf16.vlgmr.msrb.gmra.mxu0 %v3894_v1  ;;  %4313 = vmatmul.bf16.vlgmr.msrb.gmra.mxu2 %v3894_v1 }
 0xa41   :  { %4831 = vmatpush.bf16.msrb.mxu0 %v9315_v33  ;;  %4857 = vmatpush.bf16.msrb.mxu2 %v9319_v28  ;;  %v9252_v33 = vld [vmem:[#allocation2 + $0x270] sm:$0xf0]  ;;  %v10587_v28 = vld [vmem:[#allocation2 + $0x16c] sm:$0xf0] }
 0xa42   :  { %v9706_v7 = vor.u32 %v10587_v28, %v9705_v42  ;;  %v9324_v42 = vld [vmem:[#allocation2 + $0x2f8] sm:$0xf0] }
 0xa44   :  { %v4327_v63 = vpop.f32.mrf.mxu3 }
 0xa45   :  { %4832 = vmatpush.bf16.msrb.mxu0 %v9299_v43  ;;  %4858 = vmatpush.bf16.msrb.mxu2 %v9303_v26  ;;  %v10471_v43 = vld [vmem:[#allocation2 + $0x24c] sm:$0xf0] }
 0xa46   :  { %v9235_v9 = vor.u32 %v10471_v43, %v9234_v51  ;;  %v9306_v51 = vld [vmem:[#allocation2 + $0x2c8] sm:$0xf]  ;;  %v10488_v43 = vld [vmem:[#allocation2 + $0x2d4] sm:$0xf0] }
 0xa49   :  { %4833 = vmatpush.bf16.msrb.mxu0 %v9283_v49  ;;  %4859 = vmatpush.bf16.msrb.mxu2 %v9287_v27 }
 0xa4c   :  { %v4329_v23 = vpop.f32.mrf.mxu3 }
 0xa4d   :  { %v9268_v23 = vld [vmem:[#allocation2 + $0x290] sm:$0xf0] }
 0xa50   :  { %4339 = vmatmul.bf16.vlgmr.msra.gmra.mxu0 %v3894_v1  ;;  %4365 = vmatmul.bf16.vlgmr.msra.gmra.mxu2 %v3894_v1  ;;  %v8939_v1 = vld [vmem:[%s13639_s0 + $0x50] sm:$0xff] }
 0xa54   :  { %v12507_v2 = vpop.f32.mrf.mxu3 }
 0xa5c   :  { %v4381_v18 = vpop.f32.mrf.mxu3 }
 0xa5d   :  { %v9721_v18 = vld [vmem:[#allocation2 + $0x180] sm:$0xf] }
 0xa74   :  { %v12509_v59 = vpop.f32.mrf.mxu3 }
 0xa7c   :  { %v4881_v10 = vpop.f32.mrf.mxu3 }
 0xa7d   :  { %v9271_v10 = vor.u32 %v10477_v38, %v9268_v23  ;;  %v9202_v38 = vld [vmem:[#allocation2 + $0x200] sm:$0xf] }
 0xa7f   :  { %4860 = vmatpush.bf16.msrb.mxu2 %v9271_v10  ;;  %v9657_v10 = vld [vmem:[#allocation2 + $0x100] sm:$0xf] }
 0xa94   :  { %v12511_v57 = vpop.f32.mrf.mxu3 }
 0xa9c   :  { %v4933_v53 = vpop.f32.mrf.mxu3 }
 0xa9d   :  { %v10591_v53 = vld [vmem:[#allocation2 + $0x18c] sm:$0xf0] }
 0xabd   :  { %v4288_v21 = vpop.f32.mrf.mxu0 }
 0xabe   :  { %v4289_v16 = vadd.f32 %v8937_v20, %v4288_v21 }
 0xac0   :  { %v4302_v12 = vadd.f32 %v12029_v46, %v4289_v16  ;;  %v9722_v16 = vor.u32 %v10591_v53, %v9721_v18  ;;  %v9204_v18 = vld [vmem:[#allocation2 + $0x210] sm:$0xf0]  ;;  %v10575_v53 = vld [vmem:[#allocation2 + $0x10c] sm:$0xf0] }
 0xac2   :  { %v9197_v29 = vmul.f32 -1.442695, %v4302_v12  ;;  %6179 = vmatpush.bf16.msrb.mxu3 %v9722_v16  ;;  %v9255_v12 = vor.u32 %v10473_v44, %v9252_v33  ;;  %v9322_v16 = vld [vmem:[#allocation2 + $0x2e8] sm:$0xf] }
 0xac3   :  { %v4314_v52 = vpop.f32.mrf.mxu2 }
 0xac4   :  { %10862 = vpow2.f32 %v9197_v29  ;;  %v4315_v22 = vadd.f32 %v8938_v15, %v4314_v52  ;;  %v9251_v15 = vor.u32 %v10475_v30, %v9250_v11  ;;  %4861 = vmatpush.bf16.msrb.mxu2 %v9255_v12  ;;  %v9236_v29 = vld [vmem:[#allocation2 + $0x250] sm:$0xf0]  ;;  %v10490_v11 = vld [vmem:[#allocation2 + $0x2ec] sm:$0xf] }
 0xac5   :  { %v4290_v6 = vpop.f32.mrf.mxu0  ;;  %v9239_v49 = vor.u32 %v10469_v56, %v9236_v29  ;;  %v9658_v56 = vor.u32 %v10575_v53, %v9657_v10  ;;  %v9327_v29 = vor.u32 %v10490_v11, %v9324_v42  ;;  %v10480_v10 = vld [vmem:[#allocation2 + $0x294] sm:$0xf0] }
 0xac6   :  { %v4328_v46 = vadd.f32 %v4327_v63, %v4315_v22  ;;  %v9267_v63 = vor.u32 %v10479_v5, %v9266_v40  ;;  %6180 = vmatpush.bf16.msrb.mxu3 %v9706_v7  ;;  %v10583_v6 = vld [vmem:[#allocation2 + $0x14c] sm:$0xf0]  ;;  %v9223_v5 = vor.u32 %v10465_v4, %v9220_v35  ;;  %v9290_v35 = vld [vmem:[#allocation2 + $0x2a8] sm:$0xf] }
 0xac7   :  { %v9690_v54 = vor.u32 %v10583_v6, %v9689_v31  ;;  %v9308_v6 = vld [vmem:[#allocation2 + $0x2d8] sm:$0xf0] }
 0xac8   :  { %v9198_v62 = vmul.f32 -1.442695, %v4328_v46  ;;  %4834 = vmatpush.bf16.msrb.mxu0 %v9267_v63  ;;  %v9218_v46 = vld [vmem:[#allocation2 + $0x220] sm:$0xf]  ;;  %4862 = vmatpush.bf16.msrb.mxu2 %v9239_v49  ;;  %v9761_v49 = vld [vmem:[#allocation2 + $0x1c8] sm:$0xf] }
 0xac9   :  { %v9219_v27 = vor.u32 %v10467_v45, %v9218_v46 }
 0xaca   :  { %v10863_v50 = vpop.eup %10862  ;;  %10864 = vpow2.f32 %v9198_v62  ;;  %6181 = vmatpush.bf16.msrb.mxu3 %v9690_v54  ;;  %v10600_v54 = vld [vmem:[#allocation2 + $0x1d4] sm:$0xf0] }
 0xacb   :  { %v12520_v13 = vadd.f32 1.0, %v10863_v50  ;;  %v4316_v60 = vpop.f32.mrf.mxu2  ;;  %v10579_v50 = vld [vmem:[#allocation2 + $0x12c] sm:$0xf0] }
 0xacc   :  { %4835 = vmatpush.bf16.msrb.mxu0 %v9251_v15  ;;  %v10463_v60 = vld [vmem:[#allocation2 + $0x20c] sm:$0xf0]  ;;  %v9674_v23 = vor.u32 %v10579_v50, %v9673_v0  ;;  %4863 = vmatpush.bf16.msrb.mxu2 %v9223_v5  ;;  %v9762_v5 = vor.u32 %v10600_v54, %v9761_v49  ;;  %v10470_v54 = vld [vmem:[#allocation2 + $0x24c] sm:$0xf] }
 0xacd   :  { %10866 = vrcp.f32 %v12520_v13  ;;  %v4340_v20 = vpop.f32.mrf.mxu0  ;;  %v4404_v14 = vand.u32 2147483647, %v12520_v13  ;;  %vm4400_vm5 = vweird.f32 %v12520_v13  ;;  %v4406_v28 = vand.u32 2147483648, %v12520_v13 }
 0xace   :  { %v4341_v21 = vadd.f32 %v8939_v1, %v4340_v20  ;;  %v10461_v1 = vld [vmem:[#allocation2 + $0x204] sm:$0xf]  ;;  %6182 = vmatpush.bf16.msrb.mxu3 %v9674_v23 }
 0xacf   :  { %v9207_v7 = vor.u32 %v10461_v1, %v9204_v18  ;;  %v4407_v4 = vor.u32 1.1754944e-38, %v4406_v28  ;;  %vm4405_vm3 = vcmp.eq.f32.partialorder %v4404_v14, 8.507059e+37  ;;  %v9745_v14 = vld [vmem:[#allocation2 + $0x1a8] sm:$0xf]  ;;  %v10596_v1 = vld [vmem:[#allocation2 + $0x1b4] sm:$0xf0] }
 0xad0   :  { %v10865_v48 = vpop.eup %10864  ;;  %v4354_v25 = vadd.f32 %v12037_v34, %v4341_v21  ;;  %4836 = vmatpush.bf16.msrb.mxu0 %v9235_v9  ;;  %v9203_v21 = vor.u32 %v10463_v60, %v9202_v38  ;;  %v10482_v38 = vld [vmem:[#allocation2 + $0x2ac] sm:$0xf]  ;;  %v9292_v60 = vld [vmem:[#allocation2 + $0x2b8] sm:$0xf0]  ;;  %v9274_v18 = vld [vmem:[#allocation2 + $0x288] sm:$0xf] }
 0xad1   :  { %v12527_v32 = vadd.f32 1.0, %v10865_v48  ;;  %v9777_v48 = vld [vmem:[#allocation2 + $0x1e8] sm:$0xf]  ;;  %4864 = vmatpush.bf16.msrb.mxu2 %v9207_v7  ;;  %v9275_v42 = vor.u32 %v10480_v10, %v9274_v18 }
 0xad2   :  { %v9199_v55 = vmul.f32 -1.442695, %v4354_v25  ;;  %v10604_v25 = vld [vmem:[#allocation2 + $0x1f4] sm:$0xf0]  ;;  %6183 = vmatpush.bf16.msrb.mxu3 %v9658_v56 }
 0xad3   :  { %v12532_v26 = vpop.eup %10866  ;;  %10868 = vrcp.f32 %v12527_v32  ;;  %v4366_v34 = vpop.f32.mrf.mxu2  ;;  %v4421_v9 = vand.u32 2147483648, %v12527_v32  ;;  %v4419_v31 = vand.u32 2147483647, %v12527_v32  ;;  %vm4415_vm2 = vweird.f32 %v12527_v32 }
 0xad4   :  { %v4396_v52 = vmul.f32 %v12532_v26, %v12520_v13  ;;  %10870 = vpow2.f32 %v9199_v55  ;;  %v4367_v22 = vadd.f32 %v8940_v58, %v4366_v34  ;;  %4837 = vmatpush.bf16.msrb.mxu0 %v9219_v27  ;;  %vm4401_vm6 = vweird.f32 %v12532_v26  ;;  %v9713_v34 = vld [vmem:[#allocation2 + $0x168] sm:$0xf] }
 0xad5   :  { %v4342_v8 = vpop.f32.mrf.mxu0  ;;  %vm12556_vm7 = vmor %vm4400_vm5, %vm4401_vm6  ;;  %4909 = vmatpush.bf16.msra.mxu2 %v9327_v29  ;;  %vm4420_vm5 = vcmp.eq.f32.partialorder %v4419_v31, 8.507059e+37  ;;  %v10588_v31 = vld [vmem:[#allocation2 + $0x174] sm:$0xf0] }
 0xad6   :  { %v4397_v62 = vsub.f32 1.0, %v4396_v52  ;;  %v4380_v40 = vadd.f32 %v12507_v2, %v4367_v22  ;;  %v10492_v2 = vld [vmem:[#allocation2 + $0x2f4] sm:$0xf0]  ;;  %v9778_v52 = vor.u32 %v10604_v25, %v9777_v48  ;;  %v10486_v22 = vld [vmem:[#allocation2 + $0x2cc] sm:$0xf]  ;;  %v9307_v8 = vor.u32 %v10488_v43, %v9306_v51 }
 0xad7   :  { %v9323_v33 = vor.u32 %v10492_v2, %v9322_v16  ;;  %v9311_v0 = vor.u32 %v10486_v22, %v9308_v6  ;;  %v9295_v2 = vor.u32 %v10482_v38, %v9292_v60  ;;  %v9729_v48 = vld [vmem:[#allocation2 + $0x188] sm:$0xf]  ;;  %v10592_v25 = vld [vmem:[#allocation2 + $0x194] sm:$0xf0]  ;;  %v9714_v49 = vor.u32 %v10588_v31, %v9713_v34  ;;  %v10466_v60 = vld [vmem:[#allocation2 + $0x22c] sm:$0xf] }
 0xad8   :  { %v4398_v63 = vmul.f32 %v12532_v26, %v4397_v62  ;;  %10872 = vtanh.f32 %v4380_v40  ;;  %4838 = vmatpush.bf16.msrb.mxu0 %v9203_v21  ;;  %v10484_v62 = vld [vmem:[#allocation2 + $0x2b4] sm:$0xf0]  ;;  %6228 = vmatpush.bf16.msra.mxu3 %v9778_v52  ;;  %v9730_v43 = vor.u32 %v10592_v25, %v9729_v48  ;;  %v9242_v22 = vld [vmem:[#allocation2 + $0x248] sm:$0xf]  ;;  %v10667_v48 = vld [vmem:[#allocation2 + $0x3ec] sm:$0xf0] }
 0xad9   :  { %v12540_v20 = vpop.eup %10868  ;;  %v9291_v13 = vor.u32 %v10484_v62, %v9290_v35  ;;  %4910 = vmatpush.bf16.msra.mxu2 %v9311_v0  ;;  %v10472_v6 = vld [vmem:[#allocation2 + $0x254] sm:$0xf0]  ;;  %v9697_v62 = vld [vmem:[#allocation2 + $0x148] sm:$0xf]  ;;  %v10012_v25 = vld [vmem:[#allocation2 + $0x3c0] sm:$0xf] }
 0xada   :  { %v10871_v30 = vpop.eup %10870  ;;  %v4411_v44 = vmul.f32 %v12540_v20, %v12527_v32  ;;  %v4399_v15 = vadd.f32 %v12532_v26, %v4398_v63  ;;  %vm4416_vm1 = vweird.f32 %v12540_v20  ;;  %v9996_v34 = vld [vmem:[#allocation2 + $0x3a0] sm:$0xf]  ;;  %v10659_v31 = vld [vmem:[#allocation2 + $0x3ac] sm:$0xf0] }
 0xadb   :  { %v12547_v12 = vadd.f32 1.0, %v10871_v30  ;;  %v4368_v58 = vpop.f32.mrf.mxu2  ;;  %vm4417_vm4 = vmor %vm4415_vm2, %vm4416_vm1  ;;  %v10478_v30 = vld [vmem:[#allocation2 + $0x28c] sm:$0xf] }
 0xadc   :  { %v4412_v55 = vsub.f32 1.0, %v4411_v44  ;;  %v4403_v45 = vsel %vm12556_vm7, %v12532_v26, %v4399_v15  ;;  %4883 = vmatpush.bf16.msra.mxu0 %v9323_v33  ;;  %v4422_v26 = vor.u32 1.1754944e-38, %v4421_v9  ;;  %6229 = vmatpush.bf16.msra.mxu3 %v9762_v5  ;;  %v9276_v44 = vld [vmem:[#allocation2 + $0x298] sm:$0xf0]  ;;  %v9258_v58 = vld [vmem:[#allocation2 + $0x268] sm:$0xf] }
 0xadd   :  { %10874 = vrcp.f32 %v12547_v12  ;;  %v4408_v40 = vsel %vm4405_vm3, %v4407_v4, %v4403_v45  ;;  %v4434_v11 = vand.u32 2147483647, %v12547_v12  ;;  %v4436_v28 = vand.u32 2147483648, %v12547_v12  ;;  %4911 = vmatpush.bf16.msra.mxu2 %v9295_v2  ;;  %v9260_v9 = vld [vmem:[#allocation2 + $0x278] sm:$0xf0] }
 0xade   :  { %v4413_v46 = vmul.f32 %v12540_v20, %v4412_v55  ;;  %v10873_v50 = vpop.eup %10872  ;;  %v9279_v51 = vor.u32 %v10478_v30, %v9276_v44  ;;  %v10474_v55 = vld [vmem:[#allocation2 + $0x26c] sm:$0xf]  ;;  %vm4430_vm7 = vweird.f32 %v12547_v12  ;;  %v9244_v4 = vld [vmem:[#allocation2 + $0x258] sm:$0xf0]  ;;  %v9665_v2 = vld [vmem:[#allocation2 + $0x108] sm:$0xf] }
 0xadf   :  { %v4442_v16 = vmul.f32 %v10873_v50, %v4408_v40  ;;  %v4437_v52 = vor.u32 1.1754944e-38, %v4436_v28  ;;  %vm4435_vm2 = vcmp.eq.f32.partialorder %v4434_v11, 8.507059e+37  ;;  %v9263_v45 = vor.u32 %v10474_v55, %v9260_v9  ;;  %v9226_v50 = vld [vmem:[#allocation2 + $0x228] sm:$0xf]  ;;  %v10576_v11 = vld [vmem:[#allocation2 + $0x114] sm:$0xf0] }
 0xae0   :  { %v4414_v27 = vadd.f32 %v12540_v20, %v4413_v46  ;;  %4884 = vmatpush.bf16.msra.mxu0 %v9307_v8  ;;  %v9247_v40 = vor.u32 %v10470_v54, %v9244_v4  ;;  %v9666_v30 = vor.u32 %v10576_v11, %v9665_v2  ;;  %v10540_v4 = vld [vmem:[%s13648_s9 + $0x38] sm:$0xff]  ;;  %v10537_v11 = vld [vmem:[%s13648_s9 + $0x20] sm:$0xff] }
 0xae1   :  { %4912 = vmatpush.bf16.msra.mxu2 %v9279_v51 }
 0xae2   :  { %v4418_v32 = vsel %vm4417_vm4, %v12540_v20, %v4414_v27  ;;  %v9746_v20 = vor.u32 %v10596_v1, %v9745_v14  ;;  %v10584_v27 = vld [vmem:[#allocation2 + $0x154] sm:$0xf0]  ;;  %v9681_v14 = vld [vmem:[#allocation2 + $0x128] sm:$0xf] }
 0xae3   :  { %v10875_v63 = vpop.eup %10874  ;;  %v4423_v23 = vsel %vm4420_vm5, %v4422_v26, %v4418_v32  ;;  %v10468_v26 = vld [vmem:[#allocation2 + $0x234] sm:$0xf0]  ;;  %v9698_v38 = vor.u32 %v10584_v27, %v9697_v62  ;;  %v9228_v32 = vld [vmem:[#allocation2 + $0x238] sm:$0xf0]  ;;  %v10651_v62 = vld [vmem:[#allocation2 + $0x36c] sm:$0xf0] }
 0xae4   :  { %v4426_v53 = vmul.f32 %v10875_v63, %v12547_v12  ;;  %v4441_v21 = vmul.f32 %v4423_v23, %v12013_v17  ;;  %4885 = vmatpush.bf16.msra.mxu0 %v9291_v13  ;;  %v10476_v17 = vld [vmem:[#allocation2 + $0x274] sm:$0xf0]  ;;  %vm4431_vm6 = vweird.f32 %v10875_v63  ;;  %6230 = vmatpush.bf16.msra.mxu3 %v9746_v20  ;;  %v9243_v12 = vor.u32 %v10472_v6, %v9242_v22 }
 0xae5   :  { %v9259_v29 = vor.u32 %v10476_v17, %v9258_v58  ;;  %vm4432_vm1 = vmor %vm4430_vm7, %vm4431_vm6  ;;  %4913 = vmatpush.bf16.msra.mxu2 %v9263_v45  ;;  %v9227_v13 = vor.u32 %v10468_v26, %v9226_v50  ;;  %v10580_v1 = vld [vmem:[#allocation2 + $0x134] sm:$0xf0]  ;;  %v9231_v18 = vor.u32 %v10466_v60, %v9228_v32  ;;  %v10663_v58 = vld [vmem:[#allocation2 + $0x3cc] sm:$0xf0] }
 0xae6   :  { %v4427_v15 = vsub.f32 1.0, %v4426_v53  ;;  %v12576_v33 = vadd.f32 %v4442_v16, %v4441_v21  ;;  %v10464_v23 = vld [vmem:[#allocation2 + $0x214] sm:$0xf0]  ;;  %v9682_v10 = vor.u32 %v10580_v1, %v9681_v14  ;;  %v10462_v53 = vld [vmem:[#allocation2 + $0x20c] sm:$0xf] }
 0xae7   :  { %v9212_v21 = vld [vmem:[#allocation2 + $0x218] sm:$0xf0]  ;;  %v9948_v50 = vld [vmem:[#allocation2 + $0x340] sm:$0xf] }
 0xae8   :  { %v4428_v7 = vmul.f32 %v10875_v63, %v4427_v15  ;;  %10876 = vtanh.f32 %v12576_v33  ;;  %4886 = vmatpush.bf16.msra.mxu0 %v9275_v42  ;;  %6231 = vmatpush.bf16.msra.mxu3 %v9730_v43  ;;  %v9215_v20 = vor.u32 %v10462_v53, %v9212_v21  ;;  %v10028_v42 = vld [vmem:[#allocation2 + $0x3e0] sm:$0xf] }
 0xae9   :  { %4914 = vmatpush.bf16.msra.mxu2 %v9247_v40  ;;  %v10029_v28 = vor.u32 %v10667_v48, %v10028_v42  ;;  %v9932_v1 = vld [vmem:[#allocation2 + $0x320] sm:$0xf]  ;;  %v10668_v42 = vld [vmem:[#allocation2 + $0x3f4] sm:$0xf0] }
 0xaea   :  { %v4429_v56 = vadd.f32 %v10875_v63, %v4428_v7  ;;  %v10013_v7 = vor.u32 %v10663_v58, %v10012_v25 }
 0xaec   :  { %v4433_v46 = vsel %vm4432_vm1, %v10875_v63, %v4429_v56  ;;  %4887 = vmatpush.bf16.msra.mxu0 %v9259_v29  ;;  %6232 = vmatpush.bf16.msra.mxu3 %v9714_v49  ;;  %v9210_v63 = vld [vmem:[#allocation2 + $0x208] sm:$0xf] }
 0xaed   :  { %v4438_v8 = vsel %vm4435_vm2, %v4437_v52, %v4433_v46  ;;  %v9211_v16 = vor.u32 %v10464_v23, %v9210_v63  ;;  %4915 = vmatpush.bf16.msra.mxu2 %v9231_v18  ;;  %v9997_v52 = vor.u32 %v10659_v31, %v9996_v34  ;;  %v10655_v46 = vld [vmem:[#allocation2 + $0x38c] sm:$0xf0]  ;;  %v10664_v34 = vld [vmem:[#allocation2 + $0x3d4] sm:$0xf0] }
 0xaee   :  { %v10877_v35 = vpop.eup %10876  ;;  %v10643_v63 = vld [vmem:[#allocation2 + $0x32c] sm:$0xf0] }
 0xaef   :  { %v4445_v0 = vmul.f32 %v10877_v35, %v4438_v8 }
 0xaf0   :  { %4888 = vmatpush.bf16.msra.mxu0 %v9243_v12  ;;  %6233 = vmatpush.bf16.msra.mxu3 %v9698_v38  ;;  %v9964_v12 = vld [vmem:[#allocation2 + $0x360] sm:$0xf]  ;;  %v10647_v38 = vld [vmem:[#allocation2 + $0x34c] sm:$0xf0] }
 0xaf1   :  { %v12581_v5 = vpack.c.bf16 %v4445_v0, %v4445_v0  ;;  %4916 = vmatpush.bf16.msra.mxu2 %v9215_v20  ;;  %v9965_v27 = vor.u32 %v10651_v62, %v9964_v12  ;;  %v10539_v0 = vld [vmem:[%s13648_s9 + $0x30] sm:$0xff]  ;;  %v9949_v32 = vor.u32 %v10647_v38, %v9948_v50  ;;  %v9916_v20 = vld [vmem:[#allocation2 + $0x300] sm:$0xf] }
 0xaf3   :  { %4839 = vmatmul.bf16.vlgmr.msrb.gmra.mxu0 %v12581_v5  ;;  %4865 = vmatmul.bf16.vlgmr.msrb.gmra.mxu2 %v12581_v5 }
 0xaf4   :  { %6184 = vmatmul.bf16.vlgmr.msrb.gmra.mxu3 %v12581_v5  ;;  %4889 = vmatpush.bf16.msra.mxu0 %v9227_v13  ;;  %v10538_v13 = vld [vmem:[%s13648_s9 + $0x28] sm:$0xff] }
 0xaf5   :  { %6234 = vmatpush.bf16.msra.mxu3 %v9682_v10 }
 0xaf8   :  { %4890 = vmatpush.bf16.msra.mxu0 %v9211_v16  ;;  %v9933_v16 = vor.u32 %v10643_v63, %v9932_v1 }
 0xaf9   :  { %6235 = vmatpush.bf16.msra.mxu3 %v9666_v30  ;;  %v10639_v30 = vld [vmem:[#allocation2 + $0x30c] sm:$0xf0] }
 0xafc   :  { %5671 = vmatpush.bf16.msrb.mxu0 %v10540_v4 }
 0xafd   :  { %6728 = vmatpush.bf16.msrb.mxu3 %v10029_v28  ;;  %v9917_v28 = vor.u32 %v10639_v30, %v9916_v20 }
 0xb00   :  { %5672 = vmatpush.bf16.msrb.mxu0 %v10539_v0 }
 0xb01   :  { %6729 = vmatpush.bf16.msrb.mxu3 %v10013_v7 }
 0xb03   :  { %4891 = vmatmul.bf16.vlgmr.msra.gmra.mxu0 %v12581_v5  ;;  %4917 = vmatmul.bf16.vlgmr.msra.gmra.mxu2 %v12581_v5 }
 0xb04   :  { %6236 = vmatmul.bf16.vlgmr.msra.gmra.mxu3 %v12581_v5  ;;  %5673 = vmatpush.bf16.msrb.mxu0 %v10538_v13  ;;  %v9988_v13 = vld [vmem:[#allocation2 + $0x388] sm:$0xf] }
 0xb05   :  { %6730 = vmatpush.bf16.msrb.mxu3 %v9997_v52 }
 0xb08   :  { %5674 = vmatpush.bf16.msrb.mxu0 %v10537_v11 }
 0xb70   :  { %v4840_v44 = vpop.f32.mrf.mxu0 }
 0xb71   :  { %v4841_v15 = vadd.f32 %v4840_v44, %v11464_v37 }
 0xb73   :  { %v4854_v17 = vadd.f32 %v12162_v36, %v4841_v15  ;;  %v9980_v36 = vld [vmem:[#allocation2 + $0x380] sm:$0xf]  ;;  %v10036_v15 = vld [vmem:[#allocation2 + $0x3e8] sm:$0xf] }
 0xb74   :  { %v9981_v49 = vor.u32 %v10655_v46, %v9980_v36  ;;  %v9924_v36 = vld [vmem:[#allocation2 + $0x308] sm:$0xf] }
 0xb75   :  { %v9456_v51 = vmul.f32 -1.442695, %v4854_v17 }
 0xb76   :  { %v4866_v43 = vpop.f32.mrf.mxu2  ;;  %6731 = vmatpush.bf16.msrb.mxu3 %v9981_v49 }
 0xb77   :  { %10878 = vpow2.f32 %v9456_v51  ;;  %v4867_v55 = vadd.f32 %v4866_v43, %v11471_v47  ;;  %v12592_v9 = vpop.f32.mrf.mxu3  ;;  %v10536_v51 = vld [vmem:[%s13648_s9 + $0x18] sm:$0xff]  ;;  %v10037_v43 = vor.u32 %v10668_v42, %v10036_v15  ;;  %v9956_v15 = vld [vmem:[#allocation2 + $0x348] sm:$0xf] }
 0xb78   :  { %v4842_v56 = vpop.f32.mrf.mxu0  ;;  %5675 = vmatpush.bf16.msrb.mxu0 %v10536_v51  ;;  %v10648_v42 = vld [vmem:[#allocation2 + $0x354] sm:$0xf0] }
 0xb79   :  { %v4880_v29 = vadd.f32 %v12509_v59, %v4867_v55  ;;  %v10644_v51 = vld [vmem:[#allocation2 + $0x334] sm:$0xf0] }
 0xb7a   :  { %6732 = vmatpush.bf16.msrb.mxu3 %v9965_v27 }
 0xb7b   :  { %v9457_v22 = vmul.f32 -1.442695, %v4880_v29  ;;  %v10020_v29 = vld [vmem:[#allocation2 + $0x3c8] sm:$0xf] }
 0xb7d   :  { %v10879_v6 = vpop.eup %10878  ;;  %10880 = vpow2.f32 %v9457_v22 }
 0xb7e   :  { %v12595_v45 = vadd.f32 1.0, %v10879_v6  ;;  %v4868_v8 = vpop.f32.mrf.mxu2  ;;  %6733 = vmatpush.bf16.msrb.mxu3 %v9949_v32 }
 0xb7f   :  { %v6187_v54 = vpop.f32.mrf.mxu3 }
 0xb80   :  { %10882 = vrcp.f32 %v12595_v45  ;;  %v4892_v59 = vpop.f32.mrf.mxu0  ;;  %vm4952_vm4 = vweird.f32 %v12595_v45  ;;  %v4956_v52 = vand.u32 2147483647, %v12595_v45  ;;  %v10021_v54 = vor.u32 %v10664_v34, %v10020_v29  ;;  %v11058_v29 = vld [vmem:[%s13643_s4 + $0x8] sm:$0xff] }
 0xb81   :  { %v4893_v35 = vadd.f32 %v4892_v59, %v11487_v3  ;;  %v10004_v59 = vld [vmem:[#allocation2 + $0x3a8] sm:$0xf] }
 0xb82   :  { %6734 = vmatpush.bf16.msrb.mxu3 %v9933_v16  ;;  %vm4957_vm1 = vcmp.eq.f32.partialorder %v4956_v52, 8.507059e+37  ;;  %v9972_v16 = vld [vmem:[#allocation2 + $0x368] sm:$0xf] }
 0xb83   :  { %v10881_v26 = vpop.eup %10880  ;;  %v4906_v40 = vadd.f32 %v12176_v19, %v4893_v35  ;;  %v10660_v35 = vld [vmem:[#allocation2 + $0x3b4] sm:$0xf0] }
 0xb84   :  { %v12606_v60 = vadd.f32 1.0, %v10881_v26  ;;  %v10534_v26 = vld [vmem:[%s13648_s9 + $0x8] sm:$0xff] }
 0xb85   :  { %v9458_v14 = vmul.f32 -1.442695, %v4906_v40  ;;  %v10005_v40 = vor.u32 %v10660_v35, %v10004_v59  ;;  %v11062_v35 = vld [vmem:[%s13643_s4 + $0x18] sm:$0xff] }
 0xb86   :  { %v10883_v23 = vpop.eup %10882  ;;  %10884 = vrcp.f32 %v12606_v60  ;;  %v4918_v18 = vpop.f32.mrf.mxu2  ;;  %v4973_v6 = vand.u32 2147483648, %v12606_v60  ;;  %v4971_v46 = vand.u32 2147483647, %v12606_v60  ;;  %6735 = vmatpush.bf16.msrb.mxu3 %v9917_v28  ;;  %vm4967_vm7 = vweird.f32 %v12606_v60 }
 0xb87   :  { %v4948_v10 = vmul.f32 %v10883_v23, %v12595_v45  ;;  %10886 = vpow2.f32 %v9458_v14  ;;  %v4919_v19 = vadd.f32 %v4918_v18, %v11501_v24  ;;  %v12614_v53 = vpop.f32.mrf.mxu3  ;;  %vm4953_vm3 = vweird.f32 %v10883_v23  ;;  %v10656_v14 = vld [vmem:[#allocation2 + $0x394] sm:$0xf0] }
 0xb88   :  { %v4894_v21 = vpop.f32.mrf.mxu0  ;;  %vm12632_vm5 = vmor %vm4952_vm4, %vm4953_vm3  ;;  %v4974_v27 = vor.u32 1.1754944e-38, %v4973_v6  ;;  %vm4972_vm3 = vcmp.eq.f32.partialorder %v4971_v46, 8.507059e+37  ;;  %v10640_v46 = vld [vmem:[#allocation2 + $0x314] sm:$0xf0] }
 0xb89   :  { %v4949_v2 = vsub.f32 1.0, %v4948_v10  ;;  %v4932_v44 = vadd.f32 %v12511_v57, %v4919_v19  ;;  %v4958_v57 = vand.u32 2147483648, %v12595_v45  ;;  %v10535_v45 = vld [vmem:[%s13648_s9 + $0x10] sm:$0xff]  ;;  %v10533_v10 = vld [vmem:[%s13648_s9] sm:$0xff]  ;;  %v9989_v19 = vor.u32 %v10656_v14, %v9988_v13 }
 0xb8a   :  { %6780 = vmatpush.bf16.msra.mxu3 %v10037_v43  ;;  %5676 = vmatpush.bf16.msrb.mxu0 %v10535_v45  ;;  %v9925_v45 = vor.u32 %v10640_v46, %v9924_v36  ;;  %v11065_v13 = vld [vmem:[%s13643_s4 + $0x30] sm:$0xff] }
 0xb8b   :  { %v4950_v48 = vmul.f32 %v10883_v23, %v4949_v2  ;;  %10888 = vtanh.f32 %v4932_v44  ;;  %v4959_v4 = vor.u32 1.1754944e-38, %v4958_v57  ;;  %v10652_v2 = vld [vmem:[#allocation2 + $0x374] sm:$0xf0] }
 0xb8c   :  { %v10885_v25 = vpop.eup %10884  ;;  %v9973_v30 = vor.u32 %v10652_v2, %v9972_v16 }
 0xb8d   :  { %v10887_v58 = vpop.eup %10886  ;;  %v4963_v17 = vmul.f32 %v10885_v25, %v12606_v60  ;;  %v4951_v7 = vadd.f32 %v10883_v23, %v4950_v48  ;;  %vm4968_vm6 = vweird.f32 %v10885_v25 }
 0xb8e   :  { %v12624_v55 = vadd.f32 1.0, %v10887_v58  ;;  %v4920_v56 = vpop.f32.mrf.mxu2  ;;  %vm4969_vm2 = vmor %vm4967_vm7, %vm4968_vm6  ;;  %6781 = vmatpush.bf16.msra.mxu3 %v10021_v54  ;;  %5677 = vmatpush.bf16.msrb.mxu0 %v10534_v26  ;;  %v9957_v58 = vor.u32 %v10648_v42, %v9956_v15  ;;  %v11070_v15 = vld [vmem:[%s13643_s4 + $0x68] sm:$0xff] }
 0xb8f   :  { %v4964_v31 = vsub.f32 1.0, %v4963_v17  ;;  %v6239_v22 = vpop.f32.mrf.mxu3  ;;  %v4955_v49 = vsel %vm12632_vm5, %v10883_v23, %v4951_v7  ;;  %v9940_v7 = vld [vmem:[#allocation2 + $0x328] sm:$0xf] }
 0xb90   :  { %10890 = vrcp.f32 %v12624_v55  ;;  %v4960_v0 = vsel %vm4957_vm1, %v4959_v4, %v4955_v49  ;;  %v4988_v21 = vand.u32 2147483648, %v12624_v55  ;;  %v4986_v20 = vand.u32 2147483647, %v12624_v55  ;;  %v11061_v4 = vld [vmem:[%s13643_s4 + $0x20] sm:$0xff] }
 0xb91   :  { %v4965_v8 = vmul.f32 %v10885_v25, %v4964_v31  ;;  %v10889_v62 = vpop.eup %10888  ;;  %vm4982_vm5 = vweird.f32 %v12624_v55  ;;  %v9941_v56 = vor.u32 %v10644_v51, %v9940_v7  ;;  %v11059_v31 = vld [vmem:[%s13643_s4] sm:$0xff] }
 0xb92   :  { %v4994_v63 = vmul.f32 %v10889_v62, %v4960_v0  ;;  %6782 = vmatpush.bf16.msra.mxu3 %v10005_v40  ;;  %5678 = vmatpush.bf16.msrb.mxu0 %v10533_v10  ;;  %v4989_v44 = vor.u32 1.1754944e-38, %v4988_v21  ;;  %vm4987_vm7 = vcmp.eq.f32.partialorder %v4986_v20, 8.507059e+37  ;;  %v11067_v10 = vld [vmem:[%s13643_s4 + $0x50] sm:$0xff]  ;;  %v11068_v21 = vld [vmem:[%s13643_s4 + $0x48] sm:$0xff] }
 0xb93   :  { %v4966_v12 = vadd.f32 %v10885_v25, %v4965_v8  ;;  %v11060_v8 = vld [vmem:[%s13643_s4 + $0x10] sm:$0xff] }
 0xb95   :  { %v4970_v50 = vsel %vm4969_vm2, %v10885_v25, %v4966_v12 }
 0xb96   :  { %v10891_v38 = vpop.eup %10890  ;;  %v4975_v32 = vsel %vm4972_vm3, %v4974_v27, %v4970_v50  ;;  %6783 = vmatpush.bf16.msra.mxu3 %v9989_v19  ;;  %v11063_v27 = vld [vmem:[%s13643_s4 + $0x28] sm:$0xff] }
 0xb97   :  { %v4978_v60 = vmul.f32 %v10891_v38, %v12624_v55  ;;  %v4993_v1 = vmul.f32 %v4975_v32, %v12091_v61  ;;  %vm4983_vm4 = vweird.f32 %v10891_v38 }
 0xb98   :  { %vm4984_vm6 = vmor %vm4982_vm5, %vm4983_vm4 }
 0xb99   :  { %v4979_v23 = vsub.f32 1.0, %v4978_v60  ;;  %v12648_v18 = vadd.f32 %v4994_v63, %v4993_v1  ;;  %v11066_v1 = vld [vmem:[%s13643_s4 + $0x40] sm:$0xff] }
 0xb9a   :  { %6784 = vmatpush.bf16.msra.mxu3 %v9973_v30 }
 0xb9b   :  { %v4980_v11 = vmul.f32 %v10891_v38, %v4979_v23  ;;  %10892 = vtanh.f32 %v12648_v18 }
 0xb9d   :  { %v4981_v61 = vadd.f32 %v10891_v38, %v4980_v11  ;;  %v11069_v11 = vld [vmem:[%s13643_s4 + $0x58] sm:$0xff] }
 0xb9e   :  { %6785 = vmatpush.bf16.msra.mxu3 %v9957_v58 }
 0xb9f   :  { %v4985_v48 = vsel %vm4984_vm6, %v10891_v38, %v4981_v61  ;;  %v11064_v38 = vld [vmem:[%s13643_s4 + $0x38] sm:$0xff] }
 0xba0   :  { %v4990_v25 = vsel %vm4987_vm7, %v4989_v44, %v4985_v48  ;;  %v11071_v48 = vld [vmem:[%s13643_s4 + $0x60] sm:$0xff] }
 0xba1   :  { %v10893_v28 = vpop.eup %10892 }
 0xba2   :  { %v12657_v17 = vmul.f32 %v10893_v28, %v4990_v25  ;;  %6786 = vmatpush.bf16.msra.mxu3 %v9941_v56  ;;  %v11072_v28 = vld [vmem:[%s13643_s4 + $0x70] sm:$0xff] }
 0xba4   :  { %v12661_v43 = vpack.c.bf16 %v12657_v17, %v12657_v17  ;;  %v5006_v55 = vperm.slane %v12657_v17, 0  ;;  %v4999_v57 = vrot.slane %v12657_v17, 1  ;;  %v5000_v6 = vrot.slane %v12657_v17, 2 }
 0xba5   :  { %v5001_v62 = vrot.slane %v12657_v17, 3  ;;  %v5002_v50 = vrot.slane %v12657_v17, 4  ;;  %v5003_v60 = vrot.slane %v12657_v17, 5  ;;  %v5004_v2 = vrot.slane %v12657_v17, 6 }
 0xba6   :  { %5679 = vmatmul.bf16.vlgmr.msrb.gmra.mxu0 %v12661_v43  ;;  %6736 = vmatmul.bf16.vlgmr.msrb.gmra.mxu3 %v12661_v43  ;;  %v5023_v34 = vmul.f32 %v11058_v29, %v5006_v55  ;;  %v5022_v52 = vmul.f32 %v11059_v31, %v5006_v55  ;;  %v5007_v22 = vperm.slane %v4999_v57, 0  ;;  %v5008_v54 = vperm.slane %v5000_v6, 0 }
 0xba7   :  { %6787 = vmatpush.bf16.msra.mxu3 %v9925_v45  ;;  %v5009_v26 = vperm.slane %v5001_v62, 0  ;;  %v5010_v40 = vperm.slane %v5002_v50, 0  ;;  %v5011_v23 = vperm.slane %v5003_v60, 0  ;;  %v5005_v61 = vrot.slane %v12657_v17, 7  ;;  %v11073_v17 = vld [vmem:[%s13643_s4 + $0x78] sm:$0xff] }
 0xba8   :  { %5040 = vadd.xlane.f32.xlu2 %v5023_v34  ;;  %5038 = vadd.xlane.f32.xlu1 %v5022_v52  ;;  %v5024_v49 = vmul.f32 %v11060_v8, %v5007_v22  ;;  %v5026_v59 = vmul.f32 %v11061_v4, %v5008_v54  ;;  %v5025_v12 = vmul.f32 %v11062_v35, %v5007_v22  ;;  %v5012_v30 = vperm.slane %v5004_v2, 0 }
 0xba9   :  { %v5027_v0 = vmul.f32 %v11063_v27, %v5008_v54  ;;  %v5029_v32 = vmul.f32 %v11064_v38, %v5009_v26  ;;  %v5028_v14 = vmul.f32 %v11065_v13, %v5009_v26  ;;  %v5030_v63 = vmul.f32 %v11066_v1, %v5010_v40 }
 0xbaa   :  { %5042 = vadd.xlane.f32.xlu0 %v5024_v49  ;;  %v5032_v19 = vmul.f32 %v11067_v10, %v5011_v23  ;;  %v5031_v16 = vmul.f32 %v11068_v21, %v5010_v40  ;;  %v5033_v20 = vmul.f32 %v11069_v11, %v5011_v23  ;;  %v5013_v44 = vperm.slane %v5005_v61, 0 }
 0xbab   :  { %v5035_v42 = vmul.f32 %v11070_v15, %v5012_v30  ;;  %v5034_v25 = vmul.f32 %v11071_v48, %v5012_v30 }
 0xbac   :  { %v5036_v58 = vmul.f32 %v11072_v28, %v5013_v44  ;;  %v5037_v7 = vmul.f32 %v11073_v17, %v5013_v44 }
 0xbb0   :  { %5046 = vadd.xlane.f32.xlu2 %v5026_v59  ;;  %5044 = vadd.xlane.f32.xlu1 %v5025_v12 }
 0xbb2   :  { %5048 = vadd.xlane.f32.xlu0 %v5027_v0 }
 0xbb6   :  { %6788 = vmatmul.bf16.vlgmr.msra.gmra.mxu3 %v12661_v43 }
 0xbb8   :  { %5052 = vadd.xlane.f32.xlu2 %v5029_v32  ;;  %5050 = vadd.xlane.f32.xlu1 %v5028_v14 }
 0xbba   :  { %5054 = vadd.xlane.f32.xlu0 %v5030_v63 }
 0xbc0   :  { %5058 = vadd.xlane.f32.xlu2 %v5032_v19  ;;  %5056 = vadd.xlane.f32.xlu1 %v5031_v16 }
 0xbc2   :  { %5060 = vadd.xlane.f32.xlu0 %v5033_v20 }
 0xbc8   :  { %5064 = vadd.xlane.f32.xlu2 %v5035_v42  ;;  %5062 = vadd.xlane.f32.xlu1 %v5034_v25 }
 0xbca   :  { %5066 = vadd.xlane.f32.xlu0 %v5036_v58 }
 0xbd0   :  { %5068 = vadd.xlane.f32.xlu1 %v5037_v7 }
 0xc1b   :  { %v5041_v51 = vpop.xlane.xlu2 %5040  ;;  %v5039_v55 = vpop.xlane.xlu1 %5038 }
 0xc1c   :  { %v5087_v59 = vperm.slane %v5041_v51, %v11603_v41  ;;  %v5086_v35 = vperm.slane %v5039_v55, %v11598_v39 }
 0xc1d   :  { %v5043_v57 = vpop.xlane.xlu0 %5042 }
 0xc1e   :  { %v5089_v12 = vperm.slane %v5043_v57, %v11598_v39  ;;  %v5088_v13 = vsel %vm1312_vm8, %v5087_v59, %v5086_v35 }
 0xc23   :  { %v12722_v56 = vpop.f32.mrf.mxu0  ;;  %v12724_v29 = vpop.xlane.xlu2 %5046 }
 0xc24   :  { %v12726_v34 = vpop.xlane.xlu1 %5044  ;;  %v5092_v40 = vperm.slane %v12724_v29, %v11598_v39 }
 0xc25   :  { %v5049_v31 = vpop.xlane.xlu0 %5048  ;;  %v5090_v54 = vperm.slane %v12726_v34, %v11603_v41 }
 0xc26   :  { %v5093_v27 = vperm.slane %v5049_v31, %v11603_v41 }
 0xc27   :  { %v5091_v0 = vsel %vm1312_vm8, %v5090_v54, %v5089_v12 }
 0xc28   :  { %v5110_v60 = vsel %vm1335_vm9, %v5091_v0, %v5088_v13  ;;  %v5094_v1 = vsel %vm1312_vm8, %v5093_v27, %v5092_v40 }
 0xc29   :  { %v12728_v52 = vpop.f32.mrf.mxu3  ;;  %v5111_v2 = vsel %vm1337_vm10, %v5094_v1, %v5110_v60 }
 0xc2b   :  { %v5682_v22 = vpop.f32.mrf.mxu0  ;;  %v12730_v6 = vpop.xlane.xlu2 %5052 }
 0xc2c   :  { %v12732_v36 = vpop.xlane.xlu1 %5050  ;;  %v5096_v50 = vperm.slane %v12730_v6, %v11603_v41 }
 0xc2d   :  { %v12734_v46 = vpop.xlane.xlu0 %5054  ;;  %v5095_v26 = vperm.slane %v12732_v36, %v11598_v39 }
 0xc2e   :  { %v5098_v63 = vperm.slane %v12734_v46, %v11598_v39 }
 0xc2f   :  { %v5097_v23 = vsel %vm1312_vm8, %v5096_v50, %v5095_v26 }
 0xc30   :  { %v5112_v61 = vsel %vm1339_vm11, %v5097_v23, %v5111_v2 }
 0xc31   :  { %v6739_v8 = vpop.f32.mrf.mxu3 }
 0xc33   :  { %v12736_v49 = vpop.xlane.xlu2 %5058 }
 0xc34   :  { %v12738_v45 = vpop.xlane.xlu1 %5056  ;;  %v5101_v11 = vperm.slane %v12736_v49, %v11598_v39 }
 0xc35   :  { %v12742_v4 = vpop.xlane.xlu0 %5060  ;;  %v5099_v38 = vperm.slane %v12738_v45, %v11603_v41 }
 0xc36   :  { %v5102_v10 = vperm.slane %v12742_v4, %v11603_v41 }
 0xc37   :  { %v5100_v19 = vsel %vm1312_vm8, %v5099_v38, %v5098_v63 }
 0xc38   :  { %v5103_v44 = vsel %vm1312_vm8, %v5102_v10, %v5101_v11  ;;  %v5113_v15 = vsel %vm1341_vm12, %v5100_v19, %v5112_v61 }
 0xc39   :  { %v12747_v62 = vpop.f32.mrf.mxu3  ;;  %v5114_v58 = vsel %vm1343_vm13, %v5103_v44, %v5113_v15 }
 0xc3b   :  { %v12762_v14 = vpop.xlane.xlu2 %5064 }
 0xc3c   :  { %v12759_v32 = vpop.xlane.xlu1 %5062  ;;  %v5105_v21 = vperm.slane %v12762_v14, %v11603_v41 }
 0xc3d   :  { %v5104_v16 = vperm.slane %v12759_v32, %v11598_v39  ;;  %v12780_v30 = vpop.xlane.xlu0 %5066 }
 0xc3e   :  { %v5107_v25 = vperm.slane %v12780_v30, %v11598_v39 }
 0xc3f   :  { %v5106_v48 = vsel %vm1312_vm8, %v5105_v21, %v5104_v16 }
 0xc40   :  { %v5115_v7 = vsel %vm1345_vm14, %v5106_v48, %v5114_v58 }
 0xc41   :  { %v6791_v20 = vpop.f32.mrf.mxu3 }
 0xc44   :  { %v12784_v42 = vpop.xlane.xlu1 %5068 }
 0xc45   :  { %v5108_v28 = vperm.slane %v12784_v42, %v11603_v41 }
 0xc47   :  { %v5109_v17 = vsel %vm1312_vm8, %v5108_v28, %v5107_v25 }
 0xc48   :  { %v5116_v22 = vsel %vm1347_vm15, %v5109_v17, %v5115_v7 }
 0xc49   :  { %v5118_v8 = vsel %vm1350_vm0, %v5116_v22, -inf }
 0xc4a   :  { %5119 = vmax.xlane.f32.xlu2 %v5118_v8 }
 0xcbd   :  { %v12796_v54 = vpop.xlane.xlu2 %5119 }
 0xcbe   :  { %v5123_v59 = vperm.slane %v12796_v54, 1  ;;  %v5122_v35 = vperm.slane %v12796_v54, 0  ;;  %v5124_v50 = vperm.slane %v12796_v54, 2  ;;  %v5126_v23 = vperm.slane %v12796_v54, 4 }
 0xcbf   :  { %v5127_v2 = vperm.slane %v12796_v54, 5  ;;  %v5129_v25 = vperm.slane %v12796_v54, 7  ;;  %v5128_v58 = vperm.slane %v12796_v54, 6 }
 0xcc0   :  { %v5140_v12 = vsub.f32 %v5043_v57, %v5123_v59  ;;  %v5139_v27 = vsub.f32 %v5041_v51, %v5122_v35  ;;  %v5138_v0 = vsub.f32 %v5039_v55, %v5122_v35  ;;  %v5143_v13 = vsub.f32 %v5049_v31, %v5124_v50 }
 0xcc1   :  { %v5142_v60 = vsub.f32 %v12724_v29, %v5124_v50  ;;  %v5141_v1 = vsub.f32 %v12726_v34, %v5123_v59  ;;  %v5125_v51 = vperm.slane %v12796_v54, 3  ;;  %v5146_v29 = vsub.f32 %v12734_v46, %v5126_v23 }
 0xcc2   :  { %v5158_v26 = vmul.f32 1.442695, %v5140_v12  ;;  %v5156_v40 = vmul.f32 1.442695, %v5139_v27  ;;  %v5154_v38 = vmul.f32 1.442695, %v5138_v0  ;;  %v5147_v15 = vsub.f32 %v12738_v45, %v5126_v23 }
 0xcc3   :  { %v5164_v63 = vmul.f32 1.442695, %v5143_v13  ;;  %v5162_v10 = vmul.f32 1.442695, %v5142_v60  ;;  %v5160_v57 = vmul.f32 1.442695, %v5141_v1  ;;  %v5145_v34 = vsub.f32 %v12730_v6, %v5125_v51 }
 0xcc4   :  { %10894 = vpow2.f32 %v5158_v26  ;;  %v5144_v21 = vsub.f32 %v12732_v36, %v5125_v51  ;;  %v5170_v16 = vmul.f32 1.442695, %v5146_v29  ;;  %v5149_v6 = vsub.f32 %v12742_v4, %v5127_v2 }
 0xcc5   :  { %10896 = vpow2.f32 %v5156_v40  ;;  %v5168_v11 = vmul.f32 1.442695, %v5145_v34  ;;  %v5148_v36 = vsub.f32 %v12736_v49, %v5127_v2  ;;  %v5172_v7 = vmul.f32 1.442695, %v5147_v15 }
 0xcc6   :  { %10898 = vpow2.f32 %v5154_v38  ;;  %v5166_v61 = vmul.f32 1.442695, %v5144_v21  ;;  %v5176_v48 = vmul.f32 1.442695, %v5149_v6  ;;  %v5152_v49 = vsub.f32 %v12780_v30, %v5129_v25 }
 0xcc7   :  { %10900 = vpow2.f32 %v5164_v63  ;;  %v5174_v28 = vmul.f32 1.442695, %v5148_v36  ;;  %v5151_v45 = vsub.f32 %v12762_v14, %v5128_v58  ;;  %v5150_v8 = vsub.f32 %v12759_v32, %v5128_v58 }
 0xcc8   :  { %10902 = vpow2.f32 %v5162_v10  ;;  %v5182_v54 = vmul.f32 1.442695, %v5152_v49  ;;  %v5153_v32 = vsub.f32 %v12784_v42, %v5129_v25 }
 0xcc9   :  { %10904 = vpow2.f32 %v5160_v57  ;;  %v5180_v59 = vmul.f32 1.442695, %v5151_v45  ;;  %v5178_v12 = vmul.f32 1.442695, %v5150_v8 }
 0xcca   :  { %v12805_v55 = vpop.eup %10894  ;;  %10906 = vpow2.f32 %v5170_v16  ;;  %v5184_v30 = vmul.f32 1.442695, %v5153_v32 }
 0xccb   :  { %v12807_v19 = vpop.eup %10896  ;;  %5209 = vperm.xlu2 %10695, %v12805_v55   ;;  %10908 = vpow2.f32 %v5168_v11 }
 0xccc   :  { %v12810_v31 = vpop.eup %10898  ;;  %5206 = vperm.xlu1 %10697, %v12807_v19   ;;  %10910 = vpow2.f32 %v5166_v61 }
 0xccd   :  { %5203 = vperm.xlu0 %10696, %v12810_v31   ;;  %v12818_v20 = vpop.eup %10900  ;;  %10912 = vpow2.f32 %v5176_v48 }
 0xcce   :  { %v12820_v44 = vpop.eup %10902  ;;  %10914 = vpow2.f32 %v5174_v28 }
 0xccf   :  { %v12823_v46 = vpop.eup %10904  ;;  %10916 = vpow2.f32 %v5172_v7 }
 0xcd0   :  { %v12832_v17 = vpop.eup %10906  ;;  %10918 = vpow2.f32 %v5182_v54 }
 0xcd1   :  { %v12834_v22 = vpop.eup %10908  ;;  %10920 = vpow2.f32 %v5180_v59 }
 0xcd2   :  { %v12837_v4 = vpop.eup %10910  ;;  %10922 = vpow2.f32 %v5178_v12 }
 0xcd3   :  { %5218 = vperm.xlu2 %10695, %v12818_v20   ;;  %v12844_v35 = vpop.eup %10912  ;;  %10924 = vpow2.f32 %v5184_v30 }
 0xcd4   :  { %5215 = vperm.xlu1 %10697, %v12820_v44   ;;  %v12846_v27 = vpop.eup %10914 }
 0xcd5   :  { %5212 = vperm.xlu0 %10696, %v12823_v46   ;;  %v12849_v0 = vpop.eup %10916 }
 0xcd6   :  { %v12854_v14 = vpop.eup %10918 }
 0xcd7   :  { %v12856_v50 = vpop.eup %10920 }
 0xcd8   :  { %v12859_v26 = vpop.eup %10922 }
 0xcd9   :  { %v12863_v40 = vpop.eup %10924 }
 0xcdb   :  { %5227 = vperm.xlu2 %10695, %v12832_v17  }
 0xcdc   :  { %5224 = vperm.xlu1 %10697, %v12834_v22  }
 0xcdd   :  { %5221 = vperm.xlu0 %10696, %v12837_v4  }
 0xce3   :  { %5236 = vperm.xlu2 %10695, %v12844_v35  }
 0xce4   :  { %5233 = vperm.xlu1 %10697, %v12846_v27  }
 0xce5   :  { %5230 = vperm.xlu0 %10696, %v12849_v0  }
 0xceb   :  { %5245 = vperm.xlu2 %10695, %v12854_v14  }
 0xcec   :  { %5242 = vperm.xlu1 %10697, %v12856_v50  }
 0xced   :  { %5239 = vperm.xlu0 %10696, %v12859_v26  }
 0xcf5   :  { %5248 = vperm.xlu0 %10696, %v12863_v40  }
 0xd25   :  { %v5210_v38 = vpop.permute.xlu2 %5209 }
 0xd26   :  { %v5253_v16 = vperm.slane %v5210_v38, %v11598_v39 }
 0xd2d   :  { %v5219_v1 = vpop.permute.xlu2 %5218 }
 0xd2e   :  { %v5257_v48 = vperm.slane %v5219_v1, %v11603_v41 }
 0xd35   :  { %v5228_v51 = vpop.permute.xlu2 %5227 }
 0xd36   :  { %v5262_v49 = vperm.slane %v5228_v51, %v11598_v39 }
 0xd3d   :  { %v5237_v21 = vpop.permute.xlu2 %5236 }
 0xd3e   :  { %v5207_v42 = vpop.permute.xlu1 %5206  ;;  %v5266_v38 = vperm.slane %v5237_v21, %v11603_v41 }
 0xd3f   :  { %v5204_v13 = vpop.permute.xlu0 %5203  ;;  %v5251_v2 = vperm.slane %v5207_v42, %v11603_v41 }
 0xd40   :  { %v5250_v11 = vperm.slane %v5204_v13, %v11598_v39 }
 0xd42   :  { %v5252_v58 = vsel %vm1312_vm8, %v5251_v2, %v5250_v11 }
 0xd45   :  { %v5246_v13 = vpop.permute.xlu2 %5245 }
 0xd46   :  { %v5216_v60 = vpop.permute.xlu1 %5215  ;;  %v5271_v51 = vperm.slane %v5246_v13, %v11598_v39 }
 0xd47   :  { %v5213_v63 = vpop.permute.xlu0 %5212  ;;  %v5256_v61 = vperm.slane %v5216_v60, %v11598_v39 }
 0xd48   :  { %v5254_v34 = vperm.slane %v5213_v63, %v11603_v41 }
 0xd49   :  { %v5258_v45 = vsel %vm1312_vm8, %v5257_v48, %v5256_v61 }
 0xd4a   :  { %v5255_v6 = vsel %vm1312_vm8, %v5254_v34, %v5253_v16 }
 0xd4b   :  { %v5274_v8 = vsel %vm1335_vm9, %v5255_v6, %v5252_v58 }
 0xd4c   :  { %v5275_v42 = vsel %vm1337_vm10, %v5258_v45, %v5274_v8 }
 0xd4e   :  { %v5225_v23 = vpop.permute.xlu1 %5224 }
 0xd4f   :  { %v5222_v10 = vpop.permute.xlu0 %5221  ;;  %v5260_v36 = vperm.slane %v5225_v23, %v11603_v41 }
 0xd50   :  { %v5259_v15 = vperm.slane %v5222_v10, %v11598_v39 }
 0xd52   :  { %v5261_v54 = vsel %vm1312_vm8, %v5260_v36, %v5259_v15 }
 0xd53   :  { %v5276_v60 = vsel %vm1339_vm11, %v5261_v54, %v5275_v42 }
 0xd56   :  { %v5234_v57 = vpop.permute.xlu1 %5233 }
 0xd57   :  { %v5231_v29 = vpop.permute.xlu0 %5230  ;;  %v5265_v59 = vperm.slane %v5234_v57, %v11598_v39 }
 0xd58   :  { %v5263_v25 = vperm.slane %v5231_v29, %v11603_v41 }
 0xd59   :  { %v5267_v1 = vsel %vm1312_vm8, %v5266_v38, %v5265_v59 }
 0xd5a   :  { %v5264_v12 = vsel %vm1312_vm8, %v5263_v25, %v5262_v49 }
 0xd5b   :  { %v5277_v63 = vsel %vm1341_vm12, %v5264_v12, %v5276_v60 }
 0xd5c   :  { %v5278_v29 = vsel %vm1343_vm13, %v5267_v1, %v5277_v63 }
 0xd5e   :  { %v5243_v7 = vpop.permute.xlu1 %5242 }
 0xd5f   :  { %v5240_v28 = vpop.permute.xlu0 %5239  ;;  %v5269_v32 = vperm.slane %v5243_v7, %v11603_v41 }
 0xd60   :  { %v5268_v30 = vperm.slane %v5240_v28, %v11598_v39 }
 0xd62   :  { %v5270_v23 = vsel %vm1312_vm8, %v5269_v32, %v5268_v30 }
 0xd63   :  { %v5279_v21 = vsel %vm1345_vm14, %v5270_v23, %v5278_v29 }
 0xd67   :  { %v5249_v10 = vpop.permute.xlu0 %5248 }
 0xd68   :  { %v5272_v57 = vperm.slane %v5249_v10, %v11603_v41 }
 0xd6a   :  { %v5273_v34 = vsel %vm1312_vm8, %v5272_v57, %v5271_v51 }
 0xd6b   :  { %v5280_v16 = vsel %vm1347_vm15, %v5273_v34, %v5279_v21 }
 0xd6c   :  { %v5282_v2 = vsel %vm1350_vm0, %v5280_v16, 0.0 }
 0xd6d   :  { %5283 = vadd.xlane.f32.xlu1 %v5282_v2 }
 0xde0   :  { %v12898_v11 = vpop.xlane.xlu1 %5283 }
 0xde1   :  { %v5286_v61 = vperm.slane %v12898_v11, 0  ;;  %v5287_v6 = vperm.slane %v12898_v11, 1  ;;  %v12903_v36 = vperm.slane %v12898_v11, 2  ;;  %v5292_v15 = vperm.slane %v12898_v11, 6 }
 0xde2   :  { %v12908_v48 = vperm.slane %v12898_v11, 3  ;;  %v12916_v38 = vperm.slane %v12898_v11, 4 }
 0xde3   :  { %10926 = vrcp.f32 %v5286_v61  ;;  %v5311_v8 = vand.u32 2147483647, %v5286_v61  ;;  %v5313_v54 = vand.u32 2147483648, %v5286_v61  ;;  %v5407_v60 = vand.u32 2147483647, %v5292_v15 }
 0xde4   :  { %10928 = vrcp.f32 %v5287_v6  ;;  %vm5307_vm2 = vweird.f32 %v5286_v61  ;;  %v5409_v63 = vand.u32 2147483648, %v5292_v15  ;;  %vm5323_vm6 = vweird.f32 %v5287_v6 }
 0xde5   :  { %10930 = vrcp.f32 %v12903_v36  ;;  %vm5312_vm4 = vcmp.eq.f32.partialorder %v5311_v8, 8.507059e+37  ;;  %v5314_v23 = vor.u32 1.1754944e-38, %v5313_v54  ;;  %v5327_v16 = vand.u32 2147483647, %v5287_v6 }
 0xde6   :  { %10932 = vrcp.f32 %v5292_v15  ;;  %v5329_v2 = vand.u32 2147483648, %v5287_v6 }
 0xde7   :  { %10934 = vrcp.f32 %v12908_v48 }
 0xde8   :  { %10936 = vrcp.f32 %v12916_v38  ;;  %v5330_v54 = vor.u32 1.1754944e-38, %v5329_v2 }
 0xde9   :  { %v10927_v25 = vpop.eup %10926 }
 0xdea   :  { %v10929_v28 = vpop.eup %10928  ;;  %v5303_v58 = vmul.f32 %v10927_v25, %v5286_v61  ;;  %vm5308_vm1 = vweird.f32 %v10927_v25 }
 0xdeb   :  { %v12910_v7 = vpop.eup %10930  ;;  %v5319_v49 = vmul.f32 %v10929_v28, %v5287_v6  ;;  %vm5309_vm3 = vmor %vm5307_vm2, %vm5308_vm1  ;;  %vm5324_vm5 = vweird.f32 %v10929_v28  ;;  %vm5403_vm2 = vweird.f32 %v5292_v15 }
 0xdec   :  { %v5304_v45 = vsub.f32 1.0, %v5303_v58  ;;  %v5335_v32 = vmul.f32 %v12910_v7, %v12903_v36  ;;  %v10933_v30 = vpop.eup %10932  ;;  %vm12924_vm1 = vmor %vm5323_vm6, %vm5324_vm5  ;;  %vm5328_vm5 = vcmp.eq.f32.partialorder %v5327_v16, 8.507059e+37  ;;  %vm5340_vm6 = vweird.f32 %v12910_v7 }
 0xded   :  { %v5320_v59 = vsub.f32 1.0, %v5319_v49  ;;  %v5399_v13 = vmul.f32 %v10933_v30, %v5292_v15  ;;  %v12918_v10 = vpop.eup %10934  ;;  %vm5404_vm7 = vweird.f32 %v10933_v30  ;;  %v5361_v16 = vand.u32 2147483648, %v12908_v48 }
 0xdee   :  { %v5305_v12 = vmul.f32 %v10927_v25, %v5304_v45  ;;  %v5336_v34 = vsub.f32 1.0, %v5335_v32 }
 0xdef   :  { %v5321_v42 = vmul.f32 %v10929_v28, %v5320_v59  ;;  %v5400_v51 = vsub.f32 1.0, %v5399_v13  ;;  %v5362_v45 = vor.u32 1.1754944e-38, %v5361_v16  ;;  %v10532_v16 = vld [vmem:[%s13647_s8 + $0x38] sm:$0xff] }
 0xdf0   :  { %v5306_v1 = vadd.f32 %v10927_v25, %v5305_v12  ;;  %v12934_v12 = vperm.slane %v12898_v11, 5  ;;  %5757 = vmatpush.bf16.msrb.mxu1 %v10532_v16 }
 0xdf1   :  { %v5322_v29 = vadd.f32 %v10929_v28, %v5321_v42  ;;  %v5401_v58 = vmul.f32 %v10933_v30, %v5400_v51 }
 0xdf2   :  { %v5310_v57 = vsel %vm5309_vm3, %v10927_v25, %v5306_v1  ;;  %v5351_v25 = vmul.f32 %v12918_v10, %v12908_v48  ;;  %vm5405_vm3 = vmor %vm5403_vm2, %vm5404_vm7  ;;  %v10937_v1 = vpop.eup %10936  ;;  %vm5339_vm7 = vweird.f32 %v12903_v36  ;;  %10938 = vrcp.f32 %v12934_v12 }
 0xdf3   :  { %v5315_v21 = vsel %vm5312_vm4, %v5314_v23, %v5310_v57  ;;  %v5402_v8 = vadd.f32 %v10933_v30, %v5401_v58  ;;  %v5326_v6 = vsel %vm12924_vm1, %v10929_v28, %v5322_v29  ;;  %vm5408_vm4 = vcmp.eq.f32.partialorder %v5407_v60, 8.507059e+37  ;;  %vm5341_vm1 = vmor %vm5339_vm7, %vm5340_vm6 }
 0xdf4   :  { %v5317_v49 = vmul.f32 %v12807_v19, %v5315_v21  ;;  %v5316_v61 = vmul.f32 %v12810_v31, %v5315_v21  ;;  %v5337_v19 = vmul.f32 %v12910_v7, %v5336_v34  ;;  %v5410_v31 = vor.u32 1.1754944e-38, %v5409_v63 }
 0xdf5   :  { %v5406_v59 = vsel %vm5405_vm3, %v10933_v30, %v5402_v8  ;;  %v5331_v42 = vsel %vm5328_vm5, %v5330_v54, %v5326_v6  ;;  %v5352_v28 = vsub.f32 1.0, %v5351_v25  ;;  %v5345_v63 = vand.u32 2147483648, %v12903_v36 }
 0xdf6   :  { %5437 = vperm.xlu0 %10696, %v5317_v49   ;;  %5432 = vperm.xlu2 %10695, %v5316_v61   ;;  %v12936_v32 = vsel %vm5408_vm4, %v5410_v31, %v5406_v59  ;;  %v5338_v13 = vadd.f32 %v12910_v7, %v5337_v19  ;;  %v5333_v30 = vmul.f32 %v12823_v46, %v5331_v42  ;;  %v5343_v23 = vand.u32 2147483647, %v12903_v36 }
 0xdf7   :  { %v5412_v15 = vmul.f32 %v12859_v26, %v12936_v32  ;;  %v5332_v60 = vmul.f32 %v12805_v55, %v5331_v42  ;;  %v5353_v51 = vmul.f32 %v12918_v10, %v5352_v28  ;;  %v5367_v57 = vmul.f32 %v10937_v1, %v12916_v38 }
 0xdf8   :  { %v5342_v26 = vsel %vm5341_vm1, %v12910_v7, %v5338_v13  ;;  %v5346_v29 = vor.u32 1.1754944e-38, %v5345_v63  ;;  %vm5344_vm2 = vcmp.eq.f32.partialorder %v5343_v23, 8.507059e+37  ;;  %v12952_v46 = vperm.slane %v12898_v11, 7  ;;  %v10939_v21 = vpop.eup %10938 }
 0xdf9   :  { %5492 = vperm.xlu1 %10697, %v5412_v15   ;;  %v5354_v34 = vadd.f32 %v12918_v10, %v5353_v51  ;;  %vm5356_vm3 = vweird.f32 %v12918_v10  ;;  %v5368_v36 = vsub.f32 1.0, %v5367_v57  ;;  %vm5355_vm4 = vweird.f32 %v12908_v48 }
 0xdfa   :  { %v5347_v55 = vsel %vm5344_vm2, %v5346_v29, %v5342_v26  ;;  %v5359_v58 = vand.u32 2147483647, %v12908_v48  ;;  %10940 = vrcp.f32 %v12952_v46  ;;  %vm5357_vm5 = vmor %vm5355_vm4, %vm5356_vm3  ;;  %v5383_v61 = vmul.f32 %v10939_v21, %v12934_v12 }
 0xdfb   :  { %v5349_v7 = vmul.f32 %v12818_v20, %v5347_v55  ;;  %v5348_v2 = vmul.f32 %v12820_v44, %v5347_v55  ;;  %v5358_v11 = vsel %vm5357_vm5, %v12918_v10, %v5354_v34  ;;  %v5369_v49 = vmul.f32 %v10937_v1, %v5368_v36 }
 0xdfc   :  { %vm5360_vm6 = vcmp.eq.f32.partialorder %v5359_v58, 8.507059e+37  ;;  %vm5372_vm7 = vweird.f32 %v10937_v1  ;;  %v5384_v44 = vsub.f32 1.0, %v5383_v61  ;;  %v5377_v6 = vand.u32 2147483648, %v12916_v38  ;;  %v10529_v58 = vld [vmem:[%s13647_s8 + $0x20] sm:$0xff] }
 0xdfd   :  { %v5363_v25 = vsel %vm5360_vm6, %v5362_v45, %v5358_v11  ;;  %v5370_v20 = vadd.f32 %v10937_v1, %v5369_v49  ;;  %vm5371_vm1 = vweird.f32 %v12916_v38  ;;  %v5375_v10 = vand.u32 2147483647, %v12916_v38  ;;  %v10528_v11 = vld [vmem:[%s13647_s8 + $0x18] sm:$0xff] }
 0xdfe   :  { %5447 = vperm.xlu0 %10696, %v5333_v30   ;;  %5442 = vperm.xlu2 %10695, %v5332_v60   ;;  %v5365_v48 = vmul.f32 %v12834_v22, %v5363_v25  ;;  %v5364_v19 = vmul.f32 %v12837_v4, %v5363_v25  ;;  %vm5373_vm2 = vmor %vm5371_vm1, %vm5372_vm7  ;;  %v5385_v54 = vmul.f32 %v10939_v21, %v5384_v44  ;;  %v5378_v42 = vor.u32 1.1754944e-38, %v5377_v6  ;;  %v11074_v45 = vld [vmem:[%s13642_s3 + $0x18] sm:$0xff]  ;;  %v11076_v6 = vld [vmem:[%s13642_s3 + $0x10] sm:$0xff] }
 0xdff   :  { %v5374_v31 = vsel %vm5373_vm2, %v10937_v1, %v5370_v20  ;;  %vm5376_vm3 = vcmp.eq.f32.partialorder %v5375_v10, 8.507059e+37  ;;  %vm5388_vm4 = vweird.f32 %v10939_v21  ;;  %v5393_v22 = vand.u32 2147483648, %v12934_v12  ;;  %v11075_v20 = vld [vmem:[%s13642_s3 + $0x28] sm:$0xff] }
 0xe00   :  { %v10941_v8 = vpop.eup %10940  ;;  %v5379_v15 = vsel %vm5376_vm3, %v5378_v42, %v5374_v31  ;;  %v5386_v13 = vadd.f32 %v10939_v21, %v5385_v54  ;;  %vm5387_vm5 = vweird.f32 %v12934_v12  ;;  %v5391_v38 = vand.u32 2147483647, %v12934_v12  ;;  %v11078_v31 = vld [vmem:[%s13642_s3 + $0x8] sm:$0xff] }
 0xe01   :  { %v5415_v59 = vmul.f32 %v10941_v8, %v12952_v46  ;;  %v5381_v4 = vmul.f32 %v12849_v0, %v5379_v15  ;;  %v5380_v63 = vmul.f32 %v12832_v17, %v5379_v15  ;;  %vm5389_vm6 = vmor %vm5387_vm5, %vm5388_vm4  ;;  %v5394_v60 = vor.u32 1.1754944e-38, %v5393_v22  ;;  %v11080_v22 = vld [vmem:[%s13642_s3 + $0x30] sm:$0xff] }
 0xe02   :  { %v5390_v1 = vsel %vm5389_vm6, %v10939_v21, %v5386_v13  ;;  %vm5392_vm7 = vcmp.eq.f32.partialorder %v5391_v38, 8.507059e+37  ;;  %vm5420_vm1 = vweird.f32 %v10941_v8  ;;  %v5425_v51 = vand.u32 2147483648, %v12952_v46  ;;  %v11079_v13 = vld [vmem:[%s13642_s3] sm:$0xff]  ;;  %v11081_v38 = vld [vmem:[%s13642_s3 + $0x38] sm:$0xff] }
 0xe03   :  { %v5416_v28 = vsub.f32 1.0, %v5415_v59  ;;  %v5395_v23 = vsel %vm5392_vm7, %v5394_v60, %v5390_v1  ;;  %vm5419_vm2 = vweird.f32 %v12952_v46  ;;  %v5423_v12 = vand.u32 2147483647, %v12952_v46  ;;  %v10526_v59 = vld [vmem:[%s13647_s8 + $0x8] sm:$0xff] }
 0xe04   :  { %v5397_v0 = vmul.f32 %v12844_v35, %v5395_v23  ;;  %v5396_v17 = vmul.f32 %v12846_v27, %v5395_v23  ;;  %vm5421_vm3 = vmor %vm5419_vm2, %vm5420_vm1  ;;  %v5426_v29 = vor.u32 1.1754944e-38, %v5425_v51  ;;  %v5413_v34 = vmul.f32 %v12856_v50, %v12936_v32  ;;  %v10531_v50 = vld [vmem:[%s13647_s8 + $0x30] sm:$0xff] }
 0xe05   :  { %v5417_v30 = vmul.f32 %v10941_v8, %v5416_v28  ;;  %vm5424_vm4 = vcmp.eq.f32.partialorder %v5423_v12, 8.507059e+37  ;;  %5758 = vmatpush.bf16.msrb.mxu1 %v10531_v50  ;;  %v10601_v12 = vld [vmem:[#allocation2 + $0x1e4] sm:$0xf] }
 0xe06   :  { %5457 = vperm.xlu0 %10696, %v5349_v7   ;;  %5452 = vperm.xlu2 %10695, %v5348_v2   ;;  %v11084_v50 = vld [vmem:[%s13642_s3 + $0x40] sm:$0xff] }
 0xe07   :  { %v5418_v26 = vadd.f32 %v10941_v8, %v5417_v30 }
 0xe09   :  { %v5422_v57 = vsel %vm5421_vm3, %v10941_v8, %v5418_v26  ;;  %v10527_v8 = vld [vmem:[%s13647_s8 + $0x10] sm:$0xff] }
 0xe0a   :  { %v5427_v55 = vsel %vm5424_vm4, %v5426_v29, %v5422_v57  ;;  %v11082_v57 = vld [vmem:[%s13642_s3 + $0x68] sm:$0xff] }
 0xe0b   :  { %v5428_v36 = vmul.f32 %v12854_v14, %v5427_v55  ;;  %v5429_v35 = vmul.f32 %v12863_v40, %v5427_v55  ;;  %v10530_v14 = vld [vmem:[%s13647_s8 + $0x28] sm:$0xff]  ;;  %v9771_v55 = vld [vmem:[#allocation2 + $0x1f0] sm:$0xf0] }
 0xe0c   :  { %5759 = vmatpush.bf16.msrb.mxu1 %v10530_v14 }
 0xe0e   :  { %5467 = vperm.xlu0 %10696, %v5365_v48   ;;  %5462 = vperm.xlu2 %10695, %v5364_v19   ;;  %v11077_v19 = vld [vmem:[%s13642_s3 + $0x20] sm:$0xff] }
 0xe10   :  { %5760 = vmatpush.bf16.msrb.mxu1 %v10529_v58 }
 0xe14   :  { %5761 = vmatpush.bf16.msrb.mxu1 %v10528_v11 }
 0xe16   :  { %5477 = vperm.xlu0 %10696, %v5381_v4   ;;  %5472 = vperm.xlu2 %10695, %v5380_v63  }
 0xe18   :  { %5762 = vmatpush.bf16.msrb.mxu1 %v10527_v8  ;;  %v10593_v8 = vld [vmem:[#allocation2 + $0x1a4] sm:$0xf] }
 0xe1c   :  { %5763 = vmatpush.bf16.msrb.mxu1 %v10526_v59  ;;  %v9723_v59 = vld [vmem:[#allocation2 + $0x190] sm:$0xf0] }
 0xe1e   :  { %5487 = vperm.xlu0 %10696, %v5397_v0   ;;  %5482 = vperm.xlu2 %10695, %v5396_v17   ;;  %v10525_v17 = vld [vmem:[%s13647_s8] sm:$0xff] }
 0xe20   :  { %5764 = vmatpush.bf16.msrb.mxu1 %v10525_v17 }
 0xe26   :  { %5502 = vperm.xlu0 %10696, %v5428_v36   ;;  %5497 = vperm.xlu2 %10695, %v5413_v34   ;;  %v10597_v34 = vld [vmem:[#allocation2 + $0x1c4] sm:$0xf]  ;;  %v9755_v36 = vld [vmem:[#allocation2 + $0x1d0] sm:$0xf0] }
 0xe27   :  { %v9758_v11 = vor.u32 %v10597_v34, %v9755_v36 }
 0xe2e   :  { %5507 = vperm.xlu2 %10695, %v5429_v35  }
 0xe50   :  { %v5433_v27 = vpop.permute.xlu2 %5432 }
 0xe51   :  { %v5510_v28 = vmul.f32 %v11079_v13, %v5433_v27 }
 0xe58   :  { %v5443_v21 = vpop.permute.xlu2 %5442 }
 0xe59   :  { %v5512_v48 = vmul.f32 %v11076_v6, %v5443_v21  ;;  %v9774_v21 = vor.u32 %v10601_v12, %v9771_v55  ;;  %v9739_v6 = vld [vmem:[#allocation2 + $0x1b0] sm:$0xf0] }
 0xe5b   :  { %6202 = vmatpush.bf16.msra.mxu1 %v9774_v21  ;;  %v10581_v21 = vld [vmem:[#allocation2 + $0x144] sm:$0xf] }
 0xe5f   :  { %6203 = vmatpush.bf16.msra.mxu1 %v9758_v11 }
 0xe60   :  { %v5453_v46 = vpop.permute.xlu2 %5452 }
 0xe61   :  { %v5514_v10 = vmul.f32 %v11077_v19, %v5453_v46  ;;  %v11083_v46 = vld [vmem:[%s13642_s3 + $0x60] sm:$0xff] }
 0xe68   :  { %v5438_v7 = vpop.permute.xlu0 %5437  ;;  %v5463_v2 = vpop.permute.xlu2 %5462 }
 0xe69   :  { %v5511_v54 = vmul.f32 %v11078_v31, %v5438_v7  ;;  %v5516_v4 = vmul.f32 %v11080_v22, %v5463_v2 }
 0xe6b   :  { %v5526_v30 = vadd.f32 %v5511_v54, %v5510_v28  ;;  %v5493_v51 = vpop.permute.xlu1 %5492  ;;  %v10589_v54 = vld [vmem:[#allocation2 + $0x184] sm:$0xf] }
 0xe6c   :  { %v5522_v16 = vmul.f32 %v11083_v46, %v5493_v51  ;;  %v10585_v51 = vld [vmem:[#allocation2 + $0x164] sm:$0xf]  ;;  %v9691_v46 = vld [vmem:[#allocation2 + $0x150] sm:$0xf0] }
 0xe6d   :  { %v5527_v35 = vrot.slane %v5526_v30, 4 }
 0xe70   :  { %v5448_v40 = vpop.permute.xlu0 %5447  ;;  %v5473_v32 = vpop.permute.xlu2 %5472 }
 0xe71   :  { %v5513_v25 = vmul.f32 %v11074_v45, %v5448_v40  ;;  %v5518_v14 = vmul.f32 %v11084_v50, %v5473_v32  ;;  %v11085_v40 = vld [vmem:[%s13642_s3 + $0x48] sm:$0xff] }
 0xe73   :  { %v5533_v42 = vadd.f32 %v5513_v25, %v5512_v48  ;;  %v5528_v25 = vadd.f32 %v5527_v35, %v5526_v30 }
 0xe75   :  { %v5534_v26 = vrot.slane %v5533_v42, 4 }
 0xe77   :  { %v5535_v7 = vadd.f32 %v5534_v26, %v5533_v42  ;;  %v5529_v42 = vrot.slane %v5528_v25, 2 }
 0xe78   :  { %v5458_v49 = vpop.permute.xlu0 %5457  ;;  %v12999_v61 = vpop.permute.xlu2 %5482 }
 0xe79   :  { %v5515_v44 = vmul.f32 %v11075_v20, %v5458_v49  ;;  %v5536_v48 = vrot.slane %v5535_v7, 2  ;;  %v5530_v17 = vadd.f32 %v5529_v42, %v5528_v25 }
 0xe7b   :  { %v5540_v63 = vadd.f32 %v5515_v44, %v5514_v10  ;;  %v9742_v10 = vor.u32 %v10593_v8, %v9739_v6  ;;  %v5537_v28 = vadd.f32 %v5536_v48, %v5535_v7  ;;  %v10577_v6 = vld [vmem:[#allocation2 + $0x124] sm:$0xf]  ;;  %v9675_v48 = vld [vmem:[#allocation2 + $0x130] sm:$0xf0] }
 0xe7d   :  { %v5541_v0 = vrot.slane %v5540_v63, 4  ;;  %6204 = vmatpush.bf16.msra.mxu1 %v9742_v10 }
 0xe7f   :  { %v5542_v49 = vadd.f32 %v5541_v0, %v5540_v63  ;;  %v9707_v0 = vld [vmem:[#allocation2 + $0x170] sm:$0xf0] }
 0xe80   :  { %v5468_v15 = vpop.permute.xlu0 %5467  ;;  %v5498_v23 = vpop.permute.xlu2 %5497 }
 0xe81   :  { %v5517_v1 = vmul.f32 %v11081_v38, %v5468_v15  ;;  %v5523_v29 = vmul.f32 %v11082_v57, %v5498_v23  ;;  %v5543_v31 = vrot.slane %v5542_v49, 2 }
 0xe83   :  { %v5547_v60 = vadd.f32 %v5517_v1, %v5516_v4  ;;  %v5568_v45 = vadd.f32 %v5523_v29, %v5522_v16  ;;  %v11086_v4 = vld [vmem:[%s13642_s3 + $0x50] sm:$0xff]  ;;  %v11087_v1 = vld [vmem:[%s13642_s3 + $0x58] sm:$0xff]  ;;  %v5544_v23 = vadd.f32 %v5543_v31, %v5542_v49  ;;  %v5538_v29 = vrot.slane %v5537_v28, 1 }
 0xe84   :  { %v5520_v63 = vmul.f32 %v11086_v4, %v12999_v61  ;;  %v9710_v61 = vor.u32 %v10585_v51, %v9707_v0  ;;  %v5531_v16 = vrot.slane %v5530_v17, 1  ;;  %v10573_v4 = vld [vmem:[#allocation2 + $0x104] sm:$0xf] }
 0xe85   :  { %v5548_v27 = vrot.slane %v5547_v60, 4  ;;  %v5569_v32 = vrot.slane %v5568_v45, 4  ;;  %v5545_v36 = vrot.slane %v5544_v23, 1  ;;  %v5539_v50 = vadd.f32 %v5538_v29, %v5537_v28 }
 0xe87   :  { %v5549_v20 = vadd.f32 %v5548_v27, %v5547_v60  ;;  %v9726_v60 = vor.u32 %v10589_v54, %v9723_v59  ;;  %v5570_v26 = vadd.f32 %v5569_v32, %v5568_v45  ;;  %v11089_v45 = vld [vmem:[%s13642_s3 + $0x70] sm:$0xff]  ;;  %v5583_v59 = vpack.c.bf16 %v5539_v50, %v5539_v50 }
 0xe88   :  { %v5478_v2 = vpop.permute.xlu0 %5477  ;;  %v5508_v27 = vpop.permute.xlu2 %5507 }
 0xe89   :  { %v5519_v58 = vmul.f32 %v11085_v40, %v5478_v2  ;;  %v5550_v15 = vrot.slane %v5549_v20, 2  ;;  %6205 = vmatpush.bf16.msra.mxu1 %v9726_v60  ;;  %v5571_v35 = vrot.slane %v5570_v26, 2 }
 0xe8b   :  { %v5554_v44 = vadd.f32 %v5519_v58, %v5518_v14  ;;  %v5551_v12 = vadd.f32 %v5550_v15, %v5549_v20  ;;  %v11088_v58 = vld [vmem:[%s13642_s3 + $0x78] sm:$0xff]  ;;  %v9694_v20 = vor.u32 %v10581_v21, %v9691_v46  ;;  %v5572_v8 = vadd.f32 %v5571_v35, %v5570_v26 }
 0xe8c   :  { %v5525_v11 = vmul.f32 %v11088_v58, %v5508_v27  ;;  %v5693_v26 = vunpack.c.l.b16 %v5583_v59  ;;  %v10602_v58 = vld [vmem:[#allocation2 + $0x1ec] sm:$0xf] }
 0xe8d   :  { %v5555_v19 = vrot.slane %v5554_v44, 4  ;;  %v5552_v7 = vrot.slane %v5551_v12, 1  ;;  %6206 = vmatpush.bf16.msra.mxu1 %v9710_v61 }
 0xe8f   :  { %v5556_v13 = vadd.f32 %v5555_v19, %v5554_v44  ;;  %v5546_v44 = vadd.f32 %v5545_v36, %v5544_v23  ;;  %v5532_v19 = vadd.f32 %v5531_v16, %v5530_v17  ;;  %v5553_v10 = vadd.f32 %v5552_v7, %v5551_v12 }
 0xe90   :  { %v5488_v22 = vpop.permute.xlu0 %5487 }
 0xe91   :  { %v5557_v38 = vrot.slane %v5556_v13, 2  ;;  %v5521_v30 = vmul.f32 %v11087_v1, %v5488_v22  ;;  %6207 = vmatpush.bf16.msra.mxu1 %v9694_v20  ;;  %v5584_v28 = vpack.c.bf16 %v5546_v44, %v5546_v44  ;;  %v5573_v22 = vrot.slane %v5572_v8, 1 }
 0xe92   :  { %v5585_v1 = vpack.c.bf16 %v5553_v10, %v5553_v10  ;;  %v9747_v10 = vld [vmem:[#allocation2 + $0x1b8] sm:$0xf0] }
 0xe93   :  { %v5561_v57 = vadd.f32 %v5521_v30, %v5520_v63  ;;  %v5558_v55 = vadd.f32 %v5557_v38, %v5556_v13  ;;  %v9678_v13 = vor.u32 %v10577_v6, %v9675_v48  ;;  %v9659_v63 = vld [vmem:[#allocation2 + $0x110] sm:$0xf0]  ;;  %v5582_v38 = vpack.c.bf16 %v5532_v19, %v5532_v19  ;;  %v9763_v6 = vld [vmem:[#allocation2 + $0x1d8] sm:$0xf0]  ;;  %v10594_v19 = vld [vmem:[#allocation2 + $0x1ac] sm:$0xf] }
 0xe94   :  { %v9662_v17 = vor.u32 %v10573_v4, %v9659_v63  ;;  %v5694_v12 = vunpack.c.l.b16 %v5584_v28  ;;  %v10582_v28 = vld [vmem:[#allocation2 + $0x14c] sm:$0xf] }
 0xe95   :  { %v5562_v34 = vrot.slane %v5561_v57, 4  ;;  %v5559_v14 = vrot.slane %v5558_v55, 1  ;;  %6208 = vmatpush.bf16.msra.mxu1 %v9678_v13  ;;  %v5692_v29 = vunpack.c.l.b16 %v5582_v38  ;;  %v10578_v63 = vld [vmem:[#allocation2 + $0x12c] sm:$0xf]  ;;  %v9683_v38 = vld [vmem:[#allocation2 + $0x138] sm:$0xf0] }
 0xe97   :  { %v5563_v2 = vadd.f32 %v5562_v34, %v5561_v57  ;;  %v5560_v54 = vadd.f32 %v5559_v14, %v5558_v55  ;;  %v5574_v57 = vadd.f32 %v5573_v22, %v5572_v8  ;;  %v5695_v55 = vunpack.c.l.b16 %v5585_v1  ;;  %v10598_v8 = vld [vmem:[#allocation2 + $0x1cc] sm:$0xf]  ;;  %v9699_v22 = vld [vmem:[#allocation2 + $0x158] sm:$0xf0] }
 0xe98   :  { %v5503_v40 = vpop.permute.xlu0 %5502  ;;  %v5700_v36 = vsel %vm1335_vm9, %v5693_v26, %v5692_v29  ;;  %v9766_v48 = vor.u32 %v10598_v8, %v9763_v6  ;;  %v9702_v4 = vor.u32 %v10582_v28, %v9699_v22  ;;  %v9686_v1 = vor.u32 %v10578_v63, %v9683_v38  ;;  %v10030_v26 = vld [vmem:[#allocation2 + $0x3f0] sm:$0xf0]  ;;  %v10657_v29 = vld [vmem:[#allocation2 + $0x3a4] sm:$0xf]  ;;  %v10658_v8 = vld [vmem:[#allocation2 + $0x3ac] sm:$0xf] }
 0xe99   :  { %v5564_v49 = vrot.slane %v5563_v2, 2  ;;  %v5524_v25 = vmul.f32 %v11089_v45, %v5503_v40  ;;  %v5586_v23 = vpack.c.bf16 %v5560_v54, %v5560_v54  ;;  %6209 = vmatpush.bf16.msra.mxu1 %v9662_v17  ;;  %v5701_v21 = vsel %vm1337_vm10, %v5694_v12, %v5700_v36  ;;  %v9731_v54 = vld [vmem:[#allocation2 + $0x198] sm:$0xf0]  ;;  %v10661_v17 = vld [vmem:[#allocation2 + $0x3c4] sm:$0xf] }
 0xe9a   :  { %v5588_v46 = vpack.c.bf16 %v5574_v57, %v5574_v57  ;;  %v5702_v16 = vsel %vm1339_vm11, %v5695_v55, %v5701_v21  ;;  %v10014_v12 = vld [vmem:[#allocation2 + $0x3d0] sm:$0xf0]  ;;  %v9641_v6 = vld [vmem:[#allocation2 + $0xe0] sm:$0xf]  ;;  %v10563_v38 = vld [vmem:[#allocation2 + $0xac] sm:$0xf0] }
 0xe9b   :  { %v5565_v31 = vadd.f32 %v5564_v49, %v5563_v2  ;;  %v5575_v32 = vadd.f32 %v5525_v11, %v5524_v25  ;;  %v5696_v61 = vunpack.c.l.b16 %v5586_v23  ;;  %v9779_v11 = vld [vmem:[#allocation2 + $0x1f8] sm:$0xf0]  ;;  %v10665_v23 = vld [vmem:[#allocation2 + $0x3e4] sm:$0xf]  ;;  %v10017_v57 = vor.u32 %v10661_v17, %v10014_v12  ;;  %v9998_v55 = vld [vmem:[#allocation2 + $0x3b0] sm:$0xf0] }
 0xe9c   :  { %v5698_v40 = vunpack.c.l.b16 %v5588_v46  ;;  %v9782_v20 = vor.u32 %v10602_v58, %v9779_v11  ;;  %v9982_v36 = vld [vmem:[#allocation2 + $0x390] sm:$0xf0]  ;;  %v10637_v58 = vld [vmem:[#allocation2 + $0x304] sm:$0xf]  ;;  %v10666_v11 = vld [vmem:[#allocation2 + $0x3ec] sm:$0xf] }
 0xe9d   :  { %v5566_v42 = vrot.slane %v5565_v31, 1  ;;  %v5576_v15 = vrot.slane %v5575_v32, 4  ;;  %v5703_v2 = vsel %vm1341_vm12, %v5696_v61, %v5702_v16  ;;  %v10653_v61 = vld [vmem:[#allocation2 + $0x384] sm:$0xf]  ;;  %v9966_v21 = vld [vmem:[#allocation2 + $0x370] sm:$0xf0] }
 0xe9e   :  { %v10645_v16 = vld [vmem:[#allocation2 + $0x344] sm:$0xf]  ;;  %v9627_v28 = vld [vmem:[#allocation2 + $0xd0] sm:$0xf0]  ;;  %v9609_v63 = vld [vmem:[#allocation2 + $0xa0] sm:$0xf] }
 0xe9f   :  { %v5567_v30 = vadd.f32 %v5566_v42, %v5565_v31  ;;  %v5577_v60 = vadd.f32 %v5576_v15, %v5575_v32  ;;  %v9750_v31 = vor.u32 %v10594_v19, %v9747_v10  ;;  %v10590_v32 = vld [vmem:[#allocation2 + $0x18c] sm:$0xf]  ;;  %v9715_v15 = vld [vmem:[#allocation2 + $0x178] sm:$0xf0]  ;;  %v10569_v19 = vld [vmem:[#allocation2 + $0xe4] sm:$0xf] }
 0xea0   :  { %v9734_v59 = vor.u32 %v10590_v32, %v9731_v54  ;;  %v10586_v42 = vld [vmem:[#allocation2 + $0x16c] sm:$0xf]  ;;  %v9643_v32 = vld [vmem:[#allocation2 + $0xf0] sm:$0xf0]  ;;  %v9625_v54 = vld [vmem:[#allocation2 + $0xc0] sm:$0xf] }
 0xea1   :  { %v5587_v51 = vpack.c.bf16 %v5567_v30, %v5567_v30  ;;  %v5578_v0 = vrot.slane %v5577_v60, 2  ;;  %v9718_v13 = vor.u32 %v10586_v42, %v9715_v15  ;;  %v10574_v30 = vld [vmem:[#allocation2 + $0x10c] sm:$0xf]  ;;  %v10006_v42 = vld [vmem:[#allocation2 + $0x3b8] sm:$0xf0]  ;;  %v9646_v15 = vor.u32 %v10569_v19, %v9643_v32 }
 0xea2   :  { %v9593_v17 = vld [vmem:[#allocation2 + $0x80] sm:$0xf]  ;;  %v10559_v12 = vld [vmem:[#allocation2 + $0x8c] sm:$0xf0]  ;;  %v10638_v32 = vld [vmem:[#allocation2 + $0x30c] sm:$0xf] }
 0xea3   :  { %v5579_v34 = vadd.f32 %v5578_v0, %v5577_v60  ;;  %v5697_v35 = vunpack.c.l.b16 %v5587_v51  ;;  %v9667_v60 = vld [vmem:[#allocation2 + $0x118] sm:$0xf0]  ;;  %v10033_v0 = vor.u32 %v10665_v23, %v10030_v26  ;;  %6189 = vmatpush.bf16.msra.mxu0 %v9646_v15  ;;  %v10654_v23 = vld [vmem:[#allocation2 + $0x38c] sm:$0xf]  ;;  %v9529_v15 = vld [vmem:[#allocation2] sm:$0xf] }
 0xea4   :  { %v9670_v51 = vor.u32 %v10574_v30, %v9667_v60  ;;  %v10561_v30 = vld [vmem:[#allocation2 + $0xa4] sm:$0xf]  ;;  %v9611_v60 = vld [vmem:[#allocation2 + $0xb0] sm:$0xf0]  ;;  %v9990_v26 = vld [vmem:[#allocation2 + $0x398] sm:$0xf0] }
 0xea5   :  { %v5580_v27 = vrot.slane %v5579_v34, 1  ;;  %v5704_v50 = vsel %vm1343_vm13, %v5697_v35, %v5703_v2  ;;  %v9985_v35 = vor.u32 %v10653_v61, %v9982_v36  ;;  %v9974_v61 = vld [vmem:[#allocation2 + $0x378] sm:$0xf0]  ;;  %v9594_v36 = vor.u32 %v10559_v12, %v9593_v17  ;;  %v10568_v17 = vld [vmem:[#allocation2 + $0xd4] sm:$0xf0] }
 0xea6   :  { %v5705_v45 = vsel %vm1345_vm14, %v5698_v40, %v5704_v50  ;;  %v10641_v50 = vld [vmem:[#allocation2 + $0x324] sm:$0xf]  ;;  %v10566_v12 = vld [vmem:[#allocation2 + $0xcc] sm:$0xf] }
 0xea7   :  { %v5581_v7 = vadd.f32 %v5580_v27, %v5579_v34  ;;  %v10001_v34 = vor.u32 %v10657_v29, %v9998_v55  ;;  %v10649_v27 = vld [vmem:[#allocation2 + $0x364] sm:$0xf]  ;;  %v9595_v55 = vld [vmem:[#allocation2 + $0x90] sm:$0xf0] }
 0xea8   :  { %v9969_v46 = vor.u32 %v10649_v27, %v9966_v21  ;;  %v10557_v29 = vld [vmem:[#allocation2 + $0x84] sm:$0xf]  ;;  %v9577_v27 = vld [vmem:[#allocation2 + $0x60] sm:$0xf]  ;;  %v10555_v21 = vld [vmem:[#allocation2 + $0x6c] sm:$0xf0] }
 0xea9   :  { %v5589_v14 = vpack.c.bf16 %v5581_v7, %v5581_v7  ;;  %v9950_v7 = vld [vmem:[#allocation2 + $0x350] sm:$0xf0] }
 0xeaa   :  { %v9953_v2 = vor.u32 %v10645_v16, %v9950_v7  ;;  %v10553_v16 = vld [vmem:[#allocation2 + $0x64] sm:$0xf]  ;;  %v9579_v7 = vld [vmem:[#allocation2 + $0x70] sm:$0xf0] }
 0xeab   :  { %v5699_v49 = vunpack.c.l.b16 %v5589_v14  ;;  %v9934_v14 = vld [vmem:[#allocation2 + $0x330] sm:$0xf0] }
 0xeac   :  { %v9937_v40 = vor.u32 %v10641_v50, %v9934_v14  ;;  %v9958_v50 = vld [vmem:[#allocation2 + $0x358] sm:$0xf0]  ;;  %v9578_v14 = vor.u32 %v10555_v21, %v9577_v27 }
 0xead   :  { %v5706_v25 = vsel %vm1347_vm15, %v5699_v49, %v5705_v45  ;;  %v10038_v49 = vld [vmem:[#allocation2 + $0x3f8] sm:$0xf0] }
 0xeae   :  { %v5707_v44 = vpack.c.b16 %v5706_v25, %v5706_v25  ;;  %v10041_v25 = vor.u32 %v10666_v11, %v10038_v49  ;;  %v10549_v49 = vld [vmem:[#allocation2 + $0x44] sm:$0xf] }
 0xeb0   :  { %5765 = vmatmul.bf16.vlgmr.msrb.gmra.mxu1 %v5707_v44  ;;  %v10022_v44 = vld [vmem:[#allocation2 + $0x3d8] sm:$0xf0] }
 0xeb1   :  { %6254 = vmatpush.bf16.msrb.mxu1 %v9782_v20  ;;  %v10662_v20 = vld [vmem:[#allocation2 + $0x3cc] sm:$0xf] }
 0xeb2   :  { %v10025_v10 = vor.u32 %v10662_v20, %v10022_v44  ;;  %v9942_v20 = vld [vmem:[#allocation2 + $0x338] sm:$0xf0] }
 0xeb5   :  { %6255 = vmatpush.bf16.msrb.mxu1 %v9766_v48  ;;  %v10571_v48 = vld [vmem:[#allocation2 + $0xec] sm:$0xf0] }
 0xeb9   :  { %6256 = vmatpush.bf16.msrb.mxu1 %v9750_v31  ;;  %v9642_v31 = vor.u32 %v10571_v48, %v9641_v6  ;;  %v9545_v6 = vld [vmem:[#allocation2 + $0x20] sm:$0xf]  ;;  %v10547_v48 = vld [vmem:[#allocation2 + $0x2c] sm:$0xf0] }
 0xebb   :  { %6163 = vmatpush.bf16.msrb.mxu2 %v9642_v31  ;;  %v9547_v31 = vld [vmem:[#allocation2 + $0x30] sm:$0xf0] }
 0xebd   :  { %6257 = vmatpush.bf16.msrb.mxu1 %v9734_v59  ;;  %v10567_v59 = vld [vmem:[#allocation2 + $0xcc] sm:$0xf0] }
 0xebe   :  { %v9626_v22 = vor.u32 %v10567_v59, %v9625_v54  ;;  %v9926_v54 = vld [vmem:[#allocation2 + $0x318] sm:$0xf0]  ;;  %v9546_v59 = vor.u32 %v10547_v48, %v9545_v6  ;;  %v9553_v48 = vld [vmem:[#allocation2 + $0x28] sm:$0xf] }
 0xec0   :  { %6210 = vmatmul.bf16.vlgmr.msra.gmra.mxu1 %v12581_v5  ;;  %6164 = vmatpush.bf16.msrb.mxu2 %v9626_v22  ;;  %v10541_v22 = vld [vmem:[#allocation2 + $0x4] sm:$0xf] }
 0xec1   :  { %6258 = vmatpush.bf16.msrb.mxu1 %v9718_v13  ;;  %v10565_v13 = vld [vmem:[#allocation2 + $0xc4] sm:$0xf] }
 0xec5   :  { %6259 = vmatpush.bf16.msrb.mxu1 %v9702_v4  ;;  %v9630_v4 = vor.u32 %v10565_v13, %v9627_v28  ;;  %v10543_v13 = vld [vmem:[#allocation2 + $0xc] sm:$0xf0]  ;;  %v9929_v28 = vor.u32 %v10638_v32, %v9926_v54 }
 0xec7   :  { %6190 = vmatpush.bf16.msra.mxu0 %v9630_v4  ;;  %v9531_v4 = vld [vmem:[#allocation2 + $0x10] sm:$0xf0] }
 0xec9   :  { %6260 = vmatpush.bf16.msrb.mxu1 %v9686_v1  ;;  %v10009_v1 = vor.u32 %v10658_v8, %v10006_v42 }
 0xecd   :  { %6261 = vmatpush.bf16.msrb.mxu1 %v9670_v51  ;;  %v9610_v51 = vor.u32 %v10563_v38, %v9609_v63  ;;  %v9649_v63 = vld [vmem:[#allocation2 + $0xe8] sm:$0xf]  ;;  %v10572_v38 = vld [vmem:[#allocation2 + $0xf4] sm:$0xf0] }
 0xecf   :  { %6165 = vmatpush.bf16.msrb.mxu2 %v9610_v51 }
 0xed0   :  { %6262 = vmatmul.bf16.vlgmr.msrb.gmra.mxu1 %v12581_v5  ;;  %v9918_v5 = vld [vmem:[#allocation2 + $0x310] sm:$0xf0] }
 0xed1   :  { %6754 = vmatpush.bf16.msra.mxu1 %v10033_v0  ;;  %v9921_v45 = vor.u32 %v10637_v58, %v9918_v5  ;;  %v9614_v0 = vor.u32 %v10561_v30, %v9611_v60  ;;  %v9561_v58 = vld [vmem:[#allocation2 + $0x40] sm:$0xf]  ;;  %v10551_v5 = vld [vmem:[#allocation2 + $0x4c] sm:$0xf0]  ;;  %v9651_v30 = vld [vmem:[#allocation2 + $0xf8] sm:$0xf0]  ;;  %v9530_v60 = vor.u32 %v10543_v13, %v9529_v15 }
 0xed2   :  { %v9562_v44 = vor.u32 %v10551_v5, %v9561_v58  ;;  %v10554_v58 = vld [vmem:[#allocation2 + $0x6c] sm:$0xf]  ;;  %v9587_v5 = vld [vmem:[#allocation2 + $0x78] sm:$0xf0] }
 0xed3   :  { %6191 = vmatpush.bf16.msra.mxu0 %v9614_v0  ;;  %6166 = vmatpush.bf16.msrb.mxu2 %v9594_v36  ;;  %v9633_v0 = vld [vmem:[#allocation2 + $0xc8] sm:$0xf]  ;;  %v10562_v36 = vld [vmem:[#allocation2 + $0xac] sm:$0xf]  ;;  %v9539_v13 = vld [vmem:[#allocation2 + $0x18] sm:$0xf0] }
 0xed4   :  { %v10542_v15 = vld [vmem:[#allocation2 + $0xc] sm:$0xf] }
 0xed5   :  { %6755 = vmatpush.bf16.msra.mxu1 %v10017_v57  ;;  %v9993_v57 = vor.u32 %v10654_v23, %v9990_v26  ;;  %v9534_v23 = vor.u32 %v10541_v22, %v9531_v4  ;;  %v9650_v26 = vor.u32 %v10572_v38, %v9649_v63  ;;  %v9542_v63 = vor.u32 %v10542_v15, %v9539_v13  ;;  %v9854_v13 = vld [vmem:[#allocation2 + $0x290] sm:$0xf0] }
 0xed7   :  { %6167 = vmatpush.bf16.msrb.mxu2 %v9578_v14  ;;  %v9585_v14 = vld [vmem:[#allocation2 + $0x68] sm:$0xf] }
 0xed9   :  { %6756 = vmatpush.bf16.msra.mxu1 %v10001_v34  ;;  %v10650_v34 = vld [vmem:[#allocation2 + $0x36c] sm:$0xf] }
 0xedb   :  { %6168 = vmatpush.bf16.msrb.mxu2 %v9562_v44  ;;  %v9571_v44 = vld [vmem:[#allocation2 + $0x58] sm:$0xf0] }
 0xedd   :  { %6757 = vmatpush.bf16.msra.mxu1 %v9985_v35  ;;  %v9598_v35 = vor.u32 %v10557_v29, %v9595_v55  ;;  %v9635_v29 = vld [vmem:[#allocation2 + $0xd8] sm:$0xf0]  ;;  %v9617_v55 = vld [vmem:[#allocation2 + $0xa8] sm:$0xf] }
 0xedf   :  { %6192 = vmatpush.bf16.msra.mxu0 %v9598_v35  ;;  %6169 = vmatpush.bf16.msrb.mxu2 %v9546_v59  ;;  %v9619_v35 = vld [vmem:[#allocation2 + $0xb8] sm:$0xf0]  ;;  %v9537_v59 = vld [vmem:[#allocation2 + $0x8] sm:$0xf] }
 0xee0   :  { %v9622_v21 = vor.u32 %v10562_v36, %v9619_v35  ;;  %v9902_v35 = vld [vmem:[#allocation2 + $0x2f0] sm:$0xf0] }
 0xee1   :  { %6758 = vmatpush.bf16.msra.mxu1 %v9969_v46  ;;  %v9977_v46 = vor.u32 %v10650_v34, %v9974_v61  ;;  %v10564_v34 = vld [vmem:[#allocation2 + $0xb4] sm:$0xf0]  ;;  %v9638_v61 = vor.u32 %v10566_v12, %v9635_v29  ;;  %v9900_v29 = vld [vmem:[#allocation2 + $0x2e0] sm:$0xf] }
 0xee2   :  { %v9618_v27 = vor.u32 %v10564_v34, %v9617_v55  ;;  %v10635_v55 = vld [vmem:[#allocation2 + $0x2ec] sm:$0xf0]  ;;  %v10633_v34 = vld [vmem:[#allocation2 + $0x2e4] sm:$0xf] }
 0xee3   :  { %6170 = vmatpush.bf16.msrb.mxu2 %v9530_v60  ;;  %v9901_v36 = vor.u32 %v10635_v55, %v9900_v29  ;;  %v10615_v29 = vld [vmem:[#allocation2 + $0x24c] sm:$0xf0] }
 0xee5   :  { %6759 = vmatpush.bf16.msra.mxu1 %v9953_v2  ;;  %v10646_v2 = vld [vmem:[#allocation2 + $0x34c] sm:$0xf] }
 0xee6   :  { %v9961_v11 = vor.u32 %v10646_v2, %v9958_v50 }
 0xee7   :  { %6215 = vmatpush.bf16.msra.mxu2 %v9650_v26 }
 0xee9   :  { %6760 = vmatpush.bf16.msra.mxu1 %v9937_v40  ;;  %v9582_v40 = vor.u32 %v10553_v16, %v9579_v7  ;;  %v10560_v16 = vld [vmem:[#allocation2 + $0x94] sm:$0xf0]  ;;  %v9603_v7 = vld [vmem:[#allocation2 + $0x98] sm:$0xf0] }
 0xeeb   :  { %6193 = vmatpush.bf16.msra.mxu0 %v9582_v40  ;;  %v10556_v40 = vld [vmem:[#allocation2 + $0x74] sm:$0xf0] }
 0xeed   :  { %6761 = vmatpush.bf16.msra.mxu1 %v9921_v45  ;;  %v9563_v45 = vld [vmem:[#allocation2 + $0x50] sm:$0xf0] }
 0xeee   :  { %v9566_v8 = vor.u32 %v10549_v49, %v9563_v45  ;;  %v9590_v49 = vor.u32 %v10554_v58, %v9587_v5  ;;  %v9569_v45 = vld [vmem:[#allocation2 + $0x48] sm:$0xf]  ;;  %v10631_v58 = vld [vmem:[#allocation2 + $0x2cc] sm:$0xf0]  ;;  %v10629_v5 = vld [vmem:[#allocation2 + $0x2c4] sm:$0xf] }
 0xef0   :  { %6762 = vmatmul.bf16.vlgmr.msra.gmra.mxu1 %v12661_v43  ;;  %6194 = vmatpush.bf16.msra.mxu0 %v9566_v8 }
 0xef1   :  { %6806 = vmatpush.bf16.msrb.mxu1 %v10041_v25  ;;  %v10642_v25 = vld [vmem:[#allocation2 + $0x32c] sm:$0xf] }
 0xef2   :  { %v9945_v19 = vor.u32 %v10642_v25, %v9942_v20  ;;  %v10552_v25 = vld [vmem:[#allocation2 + $0x54] sm:$0xf0]  ;;  %v10550_v20 = vld [vmem:[#allocation2 + $0x4c] sm:$0xf] }
 0xef3   :  { %v9570_v8 = vor.u32 %v10552_v25, %v9569_v45  ;;  %v9574_v6 = vor.u32 %v10550_v20, %v9571_v44  ;;  %v9886_v45 = vld [vmem:[#allocation2 + $0x2d0] sm:$0xf0] }
 0xef4   :  { %v9889_v25 = vor.u32 %v10629_v5, %v9886_v45  ;;  %v10609_v45 = vld [vmem:[#allocation2 + $0x224] sm:$0xf] }
 0xef5   :  { %6807 = vmatpush.bf16.msrb.mxu1 %v10025_v10  ;;  %v10545_v10 = vld [vmem:[#allocation2 + $0x24] sm:$0xf] }
 0xef6   :  { %v9550_v42 = vor.u32 %v10545_v10, %v9547_v31  ;;  %v10546_v10 = vld [vmem:[#allocation2 + $0x2c] sm:$0xf]  ;;  %v9555_v31 = vld [vmem:[#allocation2 + $0x38] sm:$0xf0] }
 0xef7   :  { %v9558_v54 = vor.u32 %v10546_v10, %v9555_v31  ;;  %v10625_v10 = vld [vmem:[#allocation2 + $0x2a4] sm:$0xf]  ;;  %v9870_v31 = vld [vmem:[#allocation2 + $0x2b0] sm:$0xf0] }
 0xef8   :  { %6195 = vmatpush.bf16.msra.mxu0 %v9550_v42  ;;  %v10544_v42 = vld [vmem:[#allocation2 + $0x14] sm:$0xf0] }
 0xef9   :  { %6808 = vmatpush.bf16.msrb.mxu1 %v10009_v1  ;;  %v10570_v1 = vld [vmem:[#allocation2 + $0xec] sm:$0xf]  ;;  %v9538_v4 = vor.u32 %v10544_v42, %v9537_v59  ;;  %v10623_v59 = vld [vmem:[#allocation2 + $0x28c] sm:$0xf0]  ;;  %v10621_v42 = vld [vmem:[#allocation2 + $0x284] sm:$0xf] }
 0xefa   :  { %v9654_v51 = vor.u32 %v10570_v1, %v9651_v30 }
 0xefc   :  { %6196 = vmatpush.bf16.msra.mxu0 %v9534_v23 }
 0xefd   :  { %6809 = vmatpush.bf16.msrb.mxu1 %v9993_v57  ;;  %v9634_v57 = vor.u32 %v10568_v17, %v9633_v0 }
 0xeff   :  { %6216 = vmatpush.bf16.msra.mxu2 %v9634_v57  ;;  %v9524_v57 = vld [vmem:[%s13639_s0 + $0x68] sm:$0xff] }
 0xf00   :  { %6241 = vmatpush.bf16.msrb.mxu0 %v9654_v51 }
 0xf01   :  { %6810 = vmatpush.bf16.msrb.mxu1 %v9977_v46  ;;  %v9601_v46 = vld [vmem:[#allocation2 + $0x88] sm:$0xf] }
 0xf02   :  { %v9602_v2 = vor.u32 %v10560_v16, %v9601_v46  ;;  %v9523_v16 = vld [vmem:[%s13639_s0 + $0x60] sm:$0xff] }
 0xf03   :  { %6217 = vmatpush.bf16.msra.mxu2 %v9618_v27 }
 0xf04   :  { %6242 = vmatpush.bf16.msrb.mxu0 %v9638_v61 }
 0xf05   :  { %6811 = vmatpush.bf16.msrb.mxu1 %v9961_v11  ;;  %v9586_v11 = vor.u32 %v10556_v40, %v9585_v14  ;;  %v9884_v40 = vld [vmem:[#allocation2 + $0x2c0] sm:$0xf] }
 0xf07   :  { %6218 = vmatpush.bf16.msra.mxu2 %v9602_v2 }
 0xf08   :  { %6243 = vmatpush.bf16.msrb.mxu0 %v9622_v21  ;;  %v9905_v21 = vor.u32 %v10633_v34, %v9902_v35 }
 0xf09   :  { %6812 = vmatpush.bf16.msrb.mxu1 %v9945_v19  ;;  %v10548_v19 = vld [vmem:[#allocation2 + $0x34] sm:$0xf0] }
 0xf0a   :  { %v9554_v32 = vor.u32 %v10548_v19, %v9553_v48  ;;  %v10627_v48 = vld [vmem:[#allocation2 + $0x2ac] sm:$0xf0] }
 0xf0b   :  { %6219 = vmatpush.bf16.msra.mxu2 %v9586_v11 }
 0xf0d   :  { %6813 = vmatpush.bf16.msrb.mxu1 %v9929_v28 }
 0xf0f   :  { %6220 = vmatpush.bf16.msra.mxu2 %v9570_v8 }
 0xf10   :  { %6814 = vmatmul.bf16.vlgmr.msrb.gmra.mxu1 %v12661_v43  ;;  %v10558_v43 = vld [vmem:[#allocation2 + $0x8c] sm:$0xf] }
 0xf11   :  { %v9606_v50 = vor.u32 %v10558_v43, %v9603_v7 }
 0xf13   :  { %6244 = vmatpush.bf16.msrb.mxu0 %v9606_v50  ;;  %6221 = vmatpush.bf16.msra.mxu2 %v9554_v32  ;;  %v9873_v32 = vor.u32 %v10625_v10, %v9870_v31  ;;  %v10607_v10 = vld [vmem:[#allocation2 + $0x20c] sm:$0xf0] }
 0xf17   :  { %6245 = vmatpush.bf16.msrb.mxu0 %v9590_v49  ;;  %6222 = vmatpush.bf16.msra.mxu2 %v9538_v4  ;;  %v9885_v49 = vor.u32 %v10631_v58, %v9884_v40  ;;  %v9857_v4 = vor.u32 %v10621_v42, %v9854_v13  ;;  %v10605_v42 = vld [vmem:[#allocation2 + $0x204] sm:$0xf] }
 0xf1b   :  { %6246 = vmatpush.bf16.msrb.mxu0 %v9574_v6  ;;  %v9868_v6 = vld [vmem:[#allocation2 + $0x2a0] sm:$0xf] }
 0xf1c   :  { %v9869_v19 = vor.u32 %v10627_v48, %v9868_v6 }
 0xf1f   :  { %6247 = vmatpush.bf16.msrb.mxu0 %v9558_v54  ;;  %v9852_v54 = vld [vmem:[#allocation2 + $0x280] sm:$0xf] }
 0xf20   :  { %v9853_v15 = vor.u32 %v10623_v59, %v9852_v54 }
 0xf23   :  { %6248 = vmatpush.bf16.msrb.mxu0 %v9542_v63  ;;  %v10619_v63 = vld [vmem:[#allocation2 + $0x26c] sm:$0xf0] }
 0xf2d   :  { %v5766_v28 = vpop.f32.mrf.mxu1 }
 0xf2e   :  { %v5767_v22 = vadd.f32 %v5766_v28, %v12722_v56  ;;  %v9836_v28 = vld [vmem:[#allocation2 + $0x260] sm:$0xf] }
 0xf30   :  { %10942 = vtanh.f32 %v5767_v22 }
 0xf35   :  { %v5768_v38 = vpop.f32.mrf.mxu1 }
 0xf36   :  { %v10943_v1 = vpop.eup %10942 }
 0xf37   :  { %5772 = vst [vmem:[#allocation5 + $0x10] sm:$0xff] %v10943_v1  ;;  %v5778_v30 = vpack.c.bf16 %v10943_v1, %v10943_v1  ;;  %v9525_v1 = vld [vmem:[%s13639_s0 + $0x70] sm:$0xff] }
 0xf39   :  { %6171 = vmatmul.bf16.vlgmr.msrb.gmra.mxu2 %v5778_v30  ;;  %6197 = vmatmul.bf16.vlgmr.msra.gmra.mxu0 %v5778_v30 }
 0xf3a   :  { %6715 = vmatpush.bf16.msrb.mxu2 %v9901_v36  ;;  %6741 = vmatpush.bf16.msra.mxu0 %v9905_v21  ;;  %v9822_v21 = vld [vmem:[#allocation2 + $0x250] sm:$0xf0] }
 0xf3d   :  { %v6211_v60 = vpop.f32.mrf.mxu1 }
 0xf3e   :  { %6716 = vmatpush.bf16.msrb.mxu2 %v9885_v49  ;;  %6742 = vmatpush.bf16.msra.mxu0 %v9889_v25 }
 0xf42   :  { %6717 = vmatpush.bf16.msrb.mxu2 %v9869_v19  ;;  %6743 = vmatpush.bf16.msra.mxu0 %v9873_v32  ;;  %v9788_v19 = vld [vmem:[#allocation2 + $0x200] sm:$0xf]  ;;  %v10636_v32 = vld [vmem:[#allocation2 + $0x2f4] sm:$0xf0] }
 0xf45   :  { %v6213_v23 = vpop.f32.mrf.mxu1 }
 0xf46   :  { %v9526_v23 = vld [vmem:[%s13639_s0 + $0x78] sm:$0xff]  ;;  %6718 = vmatpush.bf16.msrb.mxu2 %v9853_v15  ;;  %6744 = vmatpush.bf16.msra.mxu0 %v9857_v4  ;;  %v9790_v15 = vld [vmem:[#allocation2 + $0x210] sm:$0xf0]  ;;  %s11255_s0 = smov 128  }
 0xf47   :  { %v9910_v4 = vld [vmem:[#allocation2 + $0x2f8] sm:$0xf0] }
 0xf49   :  { %6223 = vmatmul.bf16.vlgmr.msra.gmra.mxu2 %v5778_v30  ;;  %6249 = vmatmul.bf16.vlgmr.msrb.gmra.mxu0 %v5778_v30  ;;  %v10617_v30 = vld [vmem:[#allocation2 + $0x264] sm:$0xf] }
 0xf4d   :  { %v13071_v26 = vpop.f32.mrf.mxu1 }
 0xf55   :  { %v6265_v56 = vpop.f32.mrf.mxu1 }
 0xf56   :  { %v9837_v56 = vor.u32 %v10619_v63, %v9836_v28  ;;  %v9789_v28 = vor.u32 %v10607_v10, %v9788_v19 }
 0xf58   :  { %6719 = vmatpush.bf16.msrb.mxu2 %v9837_v56  ;;  %v9892_v56 = vld [vmem:[#allocation2 + $0x2c8] sm:$0xf] }
 0xf6d   :  { %v13073_v51 = vpop.f32.mrf.mxu1 }
 0xf75   :  { %v6765_v0 = vpop.f32.mrf.mxu1 }
 0xf8d   :  { %v13075_v17 = vpop.f32.mrf.mxu1 }
 0xf95   :  { %v6817_v12 = vpop.f32.mrf.mxu1 }
 0xfb6   :  { %v6198_v61 = vpop.f32.mrf.mxu0 }
 0xfb7   :  { %v6199_v27 = vadd.f32 %v9524_v57, %v6198_v61  ;;  %v9820_v57 = vld [vmem:[#allocation2 + $0x240] sm:$0xf] }
 0xfb9   :  { %v6212_v46 = vadd.f32 %v6211_v60, %v6199_v27  ;;  %v9838_v60 = vld [vmem:[#allocation2 + $0x270] sm:$0xf0]  ;;  %v10613_v27 = vld [vmem:[#allocation2 + $0x244] sm:$0xf] }
 0xfba   :  { %v9841_v61 = vor.u32 %v10617_v30, %v9838_v60  ;;  %v9825_v58 = vor.u32 %v10613_v27, %v9822_v21 }
 0xfbb   :  { %v9784_v43 = vmul.f32 -1.442695, %v6212_v46 }
 0xfbc   :  { %v6172_v7 = vpop.f32.mrf.mxu2  ;;  %6745 = vmatpush.bf16.msra.mxu0 %v9841_v61  ;;  %v10630_v61 = vld [vmem:[#allocation2 + $0x2cc] sm:$0xf] }
 0xfbd   :  { %10944 = vpow2.f32 %v9784_v43  ;;  %v6173_v2 = vadd.f32 %v9523_v16, %v6172_v7  ;;  %v9821_v43 = vor.u32 %v10615_v29, %v9820_v57  ;;  %v9804_v7 = vld [vmem:[#allocation2 + $0x220] sm:$0xf] }
 0xfbe   :  { %v6200_v50 = vpop.f32.mrf.mxu0 }
 0xfbf   :  { %v6186_v14 = vadd.f32 %v12592_v9, %v6173_v2  ;;  %v10611_v2 = vld [vmem:[#allocation2 + $0x22c] sm:$0xf0]  ;;  %6720 = vmatpush.bf16.msrb.mxu2 %v9821_v43  ;;  %v10628_v43 = vld [vmem:[#allocation2 + $0x2b4] sm:$0xf0] }
 0xfc0   :  { %6746 = vmatpush.bf16.msra.mxu0 %v9825_v58  ;;  %v9860_v58 = vld [vmem:[#allocation2 + $0x288] sm:$0xf] }
 0xfc1   :  { %v9783_v11 = vmul.f32 -1.442695, %v6186_v14 }
 0xfc3   :  { %v10945_v20 = vpop.eup %10944  ;;  %10946 = vpow2.f32 %v9783_v11 }
 0xfc4   :  { %v13084_v44 = vadd.f32 1.0, %v10945_v20  ;;  %v6174_v8 = vpop.f32.mrf.mxu2 }
 0xfc5   :  { %v9805_v8 = vor.u32 %v10611_v2, %v9804_v7 }
 0xfc6   :  { %10948 = vrcp.f32 %v13084_v44  ;;  %v6250_v9 = vpop.f32.mrf.mxu0  ;;  %v6305_v14 = vand.u32 2147483648, %v13084_v44  ;;  %v6303_v49 = vand.u32 2147483647, %v13084_v44  ;;  %vm6299_vm6 = vweird.f32 %v13084_v44 }
 0xfc7   :  { %v6251_v36 = vadd.f32 %v9526_v23, %v6250_v9  ;;  %v9908_v9 = vld [vmem:[#allocation2 + $0x2e8] sm:$0xf]  ;;  %6721 = vmatpush.bf16.msrb.mxu2 %v9805_v8  ;;  %v9793_v23 = vor.u32 %v10605_v42, %v9790_v15  ;;  %v10616_v42 = vld [vmem:[#allocation2 + $0x254] sm:$0xf0] }
 0xfc8   :  { %v6306_v63 = vor.u32 1.1754944e-38, %v6305_v14  ;;  %vm6304_vm3 = vcmp.eq.f32.partialorder %v6303_v49, 8.507059e+37  ;;  %v9878_v14 = vld [vmem:[#allocation2 + $0x2b8] sm:$0xf0]  ;;  %v9844_v8 = vld [vmem:[#allocation2 + $0x268] sm:$0xf] }
 0xfc9   :  { %v10947_v22 = vpop.eup %10946  ;;  %v6264_v11 = vadd.f32 %v13071_v26, %v6251_v36  ;;  %v9894_v36 = vld [vmem:[#allocation2 + $0x2d8] sm:$0xf0] }
 0xfca   :  { %v13087_v38 = vadd.f32 1.0, %v10947_v22  ;;  %v10634_v22 = vld [vmem:[#allocation2 + $0x2ec] sm:$0xf]  ;;  %v9897_v7 = vor.u32 %v10630_v61, %v9894_v36 }
 0xfcb   :  { %6722 = vmatpush.bf16.msrb.mxu2 %v9789_v28  ;;  %v10614_v28 = vld [vmem:[#allocation2 + $0x24c] sm:$0xf] }
 0xfcc   :  { %v13095_v0 = vpop.eup %10948  ;;  %10950 = vrcp.f32 %v13087_v38  ;;  %v6224_v12 = vpop.f32.mrf.mxu2  ;;  %v6288_v6 = vand.u32 2147483647, %v13087_v38  ;;  %v6290_v59 = vand.u32 2147483648, %v13087_v38  ;;  %vm6284_vm2 = vweird.f32 %v13087_v38  ;;  %v10606_v36 = vld [vmem:[#allocation2 + $0x20c] sm:$0xf] }
 0xfcd   :  { %v6295_v55 = vmul.f32 %v13095_v0, %v13084_v44  ;;  %v6225_v34 = vadd.f32 %v9525_v1, %v6224_v12  ;;  %vm6300_vm5 = vweird.f32 %v13095_v0  ;;  %v9909_v1 = vor.u32 %v10636_v32, %v9908_v9  ;;  %v10632_v12 = vld [vmem:[#allocation2 + $0x2d4] sm:$0xf0]  ;;  %v9846_v9 = vld [vmem:[#allocation2 + $0x278] sm:$0xf0] }
 0xfce   :  { %v6252_v35 = vpop.f32.mrf.mxu0  ;;  %vm13112_vm7 = vmor %vm6299_vm6, %vm6300_vm5  ;;  %v6291_v57 = vor.u32 1.1754944e-38, %v6290_v59  ;;  %vm6289_vm5 = vcmp.eq.f32.partialorder %v6288_v6, 8.507059e+37  ;;  %v10620_v6 = vld [vmem:[#allocation2 + $0x274] sm:$0xf0]  ;;  %v9828_v59 = vld [vmem:[#allocation2 + $0x248] sm:$0xf] }
 0xfcf   :  { %v6296_v46 = vsub.f32 1.0, %v6295_v55  ;;  %v6238_v16 = vadd.f32 %v12614_v53, %v6225_v34  ;;  %v9806_v53 = vld [vmem:[#allocation2 + $0x230] sm:$0xf0]  ;;  %v9913_v55 = vor.u32 %v10634_v22, %v9910_v4  ;;  %6767 = vmatpush.bf16.msra.mxu2 %v9909_v1  ;;  %v9845_v32 = vor.u32 %v10620_v6, %v9844_v8  ;;  %v9830_v22 = vld [vmem:[#allocation2 + $0x258] sm:$0xf0] }
 0xfd0   :  { %v9809_v26 = vor.u32 %v10609_v45, %v9806_v53  ;;  %v10622_v53 = vld [vmem:[#allocation2 + $0x28c] sm:$0xf]  ;;  %v9829_v1 = vor.u32 %v10616_v42, %v9828_v59  ;;  %v10683_v8 = vld [vmem:[%s13648_s9 + $0x30] sm:$0xff] }
 0xfd1   :  { %v6297_v50 = vmul.f32 %v13095_v0, %v6296_v46  ;;  %v9785_v40 = vmul.f32 -1.442695, %v6238_v16  ;;  %v9876_v16 = vld [vmem:[#allocation2 + $0x2a8] sm:$0xf] }
 0xfd2   :  { %v10951_v5 = vpop.eup %10950  ;;  %6747 = vmatpush.bf16.msra.mxu0 %v9809_v26  ;;  %v10618_v26 = vld [vmem:[#allocation2 + $0x26c] sm:$0xf] }
 0xfd3   :  { %v6280_v25 = vmul.f32 %v10951_v5, %v13087_v38  ;;  %v6298_v20 = vadd.f32 %v13095_v0, %v6297_v50  ;;  %10952 = vpow2.f32 %v9785_v40  ;;  %vm6285_vm1 = vweird.f32 %v10951_v5  ;;  %v10626_v50 = vld [vmem:[#allocation2 + $0x2ac] sm:$0xf] }
 0xfd4   :  { %v6226_v48 = vpop.f32.mrf.mxu2  ;;  %10954 = vtanh.f32 %v6264_v11  ;;  %vm6286_vm4 = vmor %vm6284_vm2, %vm6285_vm1  ;;  %v9893_v38 = vor.u32 %v10632_v12, %v9892_v56  ;;  %v9877_v40 = vor.u32 %v10628_v43, %v9876_v16  ;;  %v9881_v49 = vor.u32 %v10626_v50, %v9878_v14 }
 0xfd5   :  { %v6281_v31 = vsub.f32 1.0, %v6280_v25  ;;  %v6302_v44 = vsel %vm13112_vm7, %v13095_v0, %v6298_v20  ;;  %v9833_v56 = vor.u32 %v10614_v28, %v9830_v22 }
 0xfd6   :  { %v6307_v29 = vsel %vm6304_vm3, %v6306_v63, %v6302_v44  ;;  %6748 = vmatpush.bf16.msra.mxu0 %v9793_v23  ;;  %6768 = vmatpush.bf16.msra.mxu2 %v9893_v38  ;;  %v10612_v23 = vld [vmem:[#allocation2 + $0x234] sm:$0xf0] }
 0xfd7   :  { %v6282_v13 = vmul.f32 %v10951_v5, %v6281_v31  ;;  %v6325_v21 = vmul.f32 %v6307_v29, %v12576_v33  ;;  %v9862_v33 = vld [vmem:[#allocation2 + $0x298] sm:$0xf0] }
 0xfd8   :  { %v9865_v19 = vor.u32 %v10622_v53, %v9862_v33  ;;  %v9814_v29 = vld [vmem:[#allocation2 + $0x238] sm:$0xf0] }
 0xfd9   :  { %v10953_v30 = vpop.eup %10952  ;;  %v6283_v60 = vadd.f32 %v10951_v5, %v6282_v13  ;;  %v9849_v13 = vor.u32 %v10618_v26, %v9846_v9 }
 0xfda   :  { %v6278_v0 = vadd.f32 1.0, %v10953_v30  ;;  %v10955_v35 = vpop.eup %10954  ;;  %6793 = vmatpush.bf16.msrb.mxu0 %v9913_v55  ;;  %6769 = vmatpush.bf16.msra.mxu2 %v9877_v40  ;;  %v9796_v55 = vld [vmem:[#allocation2 + $0x208] sm:$0xf] }
 0xfdb   :  { %v6287_v34 = vsel %vm6286_vm4, %v10951_v5, %v6283_v60  ;;  %v10624_v5 = vld [vmem:[#allocation2 + $0x294] sm:$0xf0]  ;;  %v9812_v60 = vld [vmem:[#allocation2 + $0x228] sm:$0xf] }
 0xfdc   :  { %v6292_v27 = vsel %vm6289_vm5, %v6291_v57, %v6287_v34  ;;  %10956 = vrcp.f32 %v6278_v0  ;;  %v9861_v25 = vor.u32 %v10624_v5, %v9860_v58  ;;  %v6320_v48 = vand.u32 2147483648, %v6278_v0  ;;  %v10610_v57 = vld [vmem:[#allocation2 + $0x22c] sm:$0xf]  ;;  %v10608_v34 = vld [vmem:[#allocation2 + $0x214] sm:$0xf0] }
 0xfdd   :  { %v6326_v46 = vmul.f32 %v10955_v35, %v6292_v27  ;;  %v6318_v31 = vand.u32 2147483647, %v6278_v0  ;;  %vm6314_vm7 = vweird.f32 %v6278_v0  ;;  %v9817_v61 = vor.u32 %v10610_v57, %v9814_v29  ;;  %v9798_v35 = vld [vmem:[#allocation2 + $0x218] sm:$0xf0]  ;;  %v10679_v29 = vld [vmem:[%s13648_s9 + $0x10] sm:$0xff] }
 0xfde   :  { %6794 = vmatpush.bf16.msrb.mxu0 %v9897_v7  ;;  %6770 = vmatpush.bf16.msra.mxu2 %v9861_v25  ;;  %v6321_v15 = vor.u32 1.1754944e-38, %v6320_v48  ;;  %v9797_v27 = vor.u32 %v10608_v34, %v9796_v55  ;;  %v9801_v38 = vor.u32 %v10606_v36, %v9798_v35 }
 0xfdf   :  { %v6327_v2 = vadd.f32 %v6326_v46, %v6325_v21  ;;  %vm6319_vm2 = vcmp.eq.f32.partialorder %v6318_v31, 8.507059e+37 }
 0xfe1   :  { %7658 = vst [vmem:[#allocation8] sm:$0xff] %v6327_v2  ;;  %10958 = vtanh.f32 %v6327_v2 }
 0xfe2   :  { %v10957_v11 = vpop.eup %10956  ;;  %6795 = vmatpush.bf16.msrb.mxu0 %v9881_v49  ;;  %6771 = vmatpush.bf16.msra.mxu2 %v9845_v32 }
 0xfe3   :  { %v6310_v45 = vmul.f32 %v10957_v11, %v6278_v0  ;;  %vm6315_vm6 = vweird.f32 %v10957_v11  ;;  %v9813_v0 = vor.u32 %v10612_v23, %v9812_v60 }
 0xfe4   :  { %vm6316_vm1 = vmor %vm6314_vm7, %vm6315_vm6 }
 0xfe5   :  { %v6311_v20 = vsub.f32 1.0, %v6310_v45 }
 0xfe6   :  { %6796 = vmatpush.bf16.msrb.mxu0 %v9865_v19  ;;  %6772 = vmatpush.bf16.msra.mxu2 %v9829_v1  ;;  %v10682_v19 = vld [vmem:[%s13648_s9 + $0x28] sm:$0xff] }
 0xfe7   :  { %v6312_v10 = vmul.f32 %v10957_v11, %v6311_v20  ;;  %v10959_v4 = vpop.eup %10958 }
 0xfe9   :  { %v6313_v54 = vadd.f32 %v10957_v11, %v6312_v10 }
 0xfea   :  { %6797 = vmatpush.bf16.msrb.mxu0 %v9849_v13  ;;  %6773 = vmatpush.bf16.msra.mxu2 %v9813_v0 }
 0xfeb   :  { %v6317_v44 = vsel %vm6316_vm1, %v10957_v11, %v6313_v54 }
 0xfec   :  { %v6322_v63 = vsel %vm6319_vm2, %v6321_v15, %v6317_v44 }
 0xfed   :  { %v6329_v30 = vmul.f32 %v10959_v4, %v6322_v63  ;;  %v10680_v4 = vld [vmem:[%s13648_s9 + $0x18] sm:$0xff] }
 0xfee   :  { %6798 = vmatpush.bf16.msrb.mxu0 %v9833_v56  ;;  %6774 = vmatpush.bf16.msra.mxu2 %v9797_v27  ;;  %v10677_v27 = vld [vmem:[%s13648_s9] sm:$0xff] }
 0xfef   :  { %v6330_v12 = vpack.c.bf16 %v6329_v30, %v6329_v30  ;;  %7657 = vst [vmem:[#allocation6] sm:$0xff] %v6329_v30 }
 0xff1   :  { %6723 = vmatmul.bf16.vlgmr.msrb.gmra.mxu2 %v6330_v12  ;;  %6749 = vmatmul.bf16.vlgmr.msra.gmra.mxu0 %v6330_v12 }
 0xff2   :  { %6799 = vmatpush.bf16.msrb.mxu0 %v9817_v61  ;;  %v10678_v61 = vld [vmem:[%s13648_s9 + $0x8] sm:$0xff] }
 0xff6   :  { %6800 = vmatpush.bf16.msrb.mxu0 %v9801_v38 }
0x1001   :  { %6775 = vmatmul.bf16.vlgmr.msra.gmra.mxu2 %v6330_v12  ;;  %6801 = vmatmul.bf16.vlgmr.msrb.gmra.mxu0 %v6330_v12 }
0x106e   :  { %v6750_v21 = vpop.f32.mrf.mxu0 }
0x106f   :  { %v6751_v46 = vadd.f32 %v6750_v21, %v11471_v47  ;;  %v10684_v47 = vld [vmem:[%s13648_s9 + $0x38] sm:$0xff] }
0x1070   :  { %7555 = vmatpush.bf16.msrb.mxu2 %v10684_v47 }
0x1071   :  { %v6764_v16 = vadd.f32 %v13073_v51, %v6751_v46 }
0x1073   :  { %v10043_v43 = vmul.f32 -1.442695, %v6764_v16 }
0x1074   :  { %v6724_v7 = vpop.f32.mrf.mxu2  ;;  %7556 = vmatpush.bf16.msrb.mxu2 %v10683_v8  ;;  %v11093_v8 = vld [vmem:[%s13643_s4 + $0x20] sm:$0xff] }
0x1075   :  { %10960 = vpow2.f32 %v10043_v43  ;;  %v6725_v2 = vadd.f32 %v6724_v7, %v11464_v37 }
0x1076   :  { %v6752_v50 = vpop.f32.mrf.mxu0 }
0x1077   :  { %v6738_v14 = vadd.f32 %v12728_v52, %v6725_v2 }
0x1078   :  { %7557 = vmatpush.bf16.msrb.mxu2 %v10682_v19 }
0x1079   :  { %v10042_v40 = vmul.f32 -1.442695, %v6738_v14 }
0x107b   :  { %v10961_v58 = vpop.eup %10960  ;;  %10962 = vpow2.f32 %v10042_v40 }
0x107c   :  { %v6829_v5 = vadd.f32 1.0, %v10961_v58  ;;  %v6726_v11 = vpop.f32.mrf.mxu2 }
0x107d   :  { %v11090_v11 = vld [vmem:[%s13643_s4 + $0x8] sm:$0xff] }
0x107e   :  { %10964 = vrcp.f32 %v6829_v5  ;;  %v6802_v49 = vpop.f32.mrf.mxu0  ;;  %v6857_v32 = vand.u32 2147483648, %v6829_v5  ;;  %vm6851_vm4 = vweird.f32 %v6829_v5  ;;  %v6855_v42 = vand.u32 2147483647, %v6829_v5 }
0x107f   :  { %v6803_v25 = vadd.f32 %v6802_v49, %v11501_v24 }
0x1080   :  { %v6858_v22 = vor.u32 1.1754944e-38, %v6857_v32  ;;  %vm6856_vm1 = vcmp.eq.f32.partialorder %v6855_v42, 8.507059e+37  ;;  %v11097_v32 = vld [vmem:[%s13643_s4 + $0x28] sm:$0xff] }
0x1081   :  { %v10963_v45 = vpop.eup %10962 }
0x1082   :  { %v6828_v53 = vadd.f32 1.0, %v10963_v45  ;;  %v11091_v45 = vld [vmem:[%s13643_s4] sm:$0xff] }
0x1084   :  { %v10965_v51 = vpop.eup %10964  ;;  %10966 = vrcp.f32 %v6828_v53  ;;  %v6776_v33 = vpop.f32.mrf.mxu2  ;;  %v6842_v13 = vand.u32 2147483648, %v6828_v53  ;;  %v6840_v44 = vand.u32 2147483647, %v6828_v53  ;;  %vm6836_vm7 = vweird.f32 %v6828_v53 }
0x1085   :  { %v6847_v37 = vmul.f32 %v10965_v51, %v6829_v5  ;;  %v6777_v52 = vadd.f32 %v6776_v33, %v11487_v3  ;;  %v6816_v3 = vadd.f32 %v13075_v17, %v6803_v25  ;;  %vm6852_vm3 = vweird.f32 %v10965_v51  ;;  %v11092_v33 = vld [vmem:[%s13643_s4 + $0x10] sm:$0xff] }
0x1086   :  { %v6804_v20 = vpop.f32.mrf.mxu0  ;;  %vm13143_vm5 = vmor %vm6851_vm4, %vm6852_vm3  ;;  %v6843_v30 = vor.u32 1.1754944e-38, %v6842_v13  ;;  %vm6841_vm3 = vcmp.eq.f32.partialorder %v6840_v44, 8.507059e+37  ;;  %v11099_v44 = vld [vmem:[%s13643_s4 + $0x50] sm:$0xff] }
0x1087   :  { %v6848_v6 = vsub.f32 1.0, %v6847_v37  ;;  %v6790_v48 = vadd.f32 %v12747_v62, %v6777_v52  ;;  %v10681_v62 = vld [vmem:[%s13648_s9 + $0x20] sm:$0xff] }
0x1088   :  { %7558 = vmatpush.bf16.msrb.mxu2 %v10681_v62 }
0x1089   :  { %v6849_v10 = vmul.f32 %v10965_v51, %v6848_v6  ;;  %v10044_v31 = vmul.f32 -1.442695, %v6790_v48  ;;  %v11094_v48 = vld [vmem:[%s13643_s4 + $0x18] sm:$0xff] }
0x108a   :  { %v10967_v26 = vpop.eup %10966 }
0x108b   :  { %v6832_v24 = vmul.f32 %v10967_v26, %v6828_v53  ;;  %v6850_v9 = vadd.f32 %v10965_v51, %v6849_v10  ;;  %10968 = vpow2.f32 %v10044_v31  ;;  %vm6837_vm6 = vweird.f32 %v10967_v26  ;;  %v11095_v10 = vld [vmem:[%s13643_s4 + $0x30] sm:$0xff] }
0x108c   :  { %v6778_v54 = vpop.f32.mrf.mxu2  ;;  %10970 = vtanh.f32 %v6816_v3  ;;  %vm6838_vm2 = vmor %vm6836_vm7, %vm6837_vm6  ;;  %7559 = vmatpush.bf16.msrb.mxu2 %v10680_v4 }
0x108d   :  { %v6833_v59 = vsub.f32 1.0, %v6832_v24  ;;  %v6854_v28 = vsel %vm13143_vm5, %v10965_v51, %v6850_v9  ;;  %v11096_v24 = vld [vmem:[%s13643_s4 + $0x38] sm:$0xff] }
0x108e   :  { %v6859_v60 = vsel %vm6856_vm1, %v6858_v22, %v6854_v28  ;;  %v11100_v22 = vld [vmem:[%s13643_s4 + $0x40] sm:$0xff] }
0x108f   :  { %v6834_v17 = vmul.f32 %v10967_v26, %v6833_v59  ;;  %v6877_v0 = vmul.f32 %v6859_v60, %v12648_v18  ;;  %v11098_v59 = vld [vmem:[%s13643_s4 + $0x48] sm:$0xff] }
0x1090   :  { %7560 = vmatpush.bf16.msrb.mxu2 %v10679_v29  ;;  %v11104_v29 = vld [vmem:[%s13643_s4 + $0x78] sm:$0xff] }
0x1091   :  { %v10969_v63 = vpop.eup %10968  ;;  %v6835_v1 = vadd.f32 %v10967_v26, %v6834_v17 }
0x1092   :  { %v6830_v23 = vadd.f32 1.0, %v10969_v63  ;;  %v10971_v12 = vpop.eup %10970  ;;  %v11101_v63 = vld [vmem:[%s13643_s4 + $0x60] sm:$0xff] }
0x1093   :  { %v6839_v56 = vsel %vm6838_vm2, %v10967_v26, %v6835_v1 }
0x1094   :  { %v6844_v57 = vsel %vm6841_vm3, %v6843_v30, %v6839_v56  ;;  %10972 = vrcp.f32 %v6830_v23  ;;  %7561 = vmatpush.bf16.msrb.mxu2 %v10678_v61  ;;  %v6872_v21 = vand.u32 2147483648, %v6830_v23  ;;  %v6870_v18 = vand.u32 2147483647, %v6830_v23 }
0x1095   :  { %v6878_v55 = vmul.f32 %v10971_v12, %v6844_v57  ;;  %vm6866_vm5 = vweird.f32 %v6830_v23  ;;  %v11103_v12 = vld [vmem:[%s13643_s4 + $0x58] sm:$0xff] }
0x1096   :  { %v6873_v43 = vor.u32 1.1754944e-38, %v6872_v21  ;;  %vm6871_vm7 = vcmp.eq.f32.partialorder %v6870_v18, 8.507059e+37 }
0x1097   :  { %v6879_v34 = vadd.f32 %v6878_v55, %v6877_v0  ;;  %v11105_v55 = vld [vmem:[%s13643_s4 + $0x70] sm:$0xff] }
0x1098   :  { %7562 = vmatpush.bf16.msrb.mxu2 %v10677_v27 }
0x1099   :  { %7662 = vst [vmem:[#allocation8 + $0x8] sm:$0xff] %v6879_v34  ;;  %10974 = vtanh.f32 %v6879_v34 }
0x109a   :  { %v10973_v36 = vpop.eup %10972 }
0x109b   :  { %v6862_v35 = vmul.f32 %v10973_v36, %v6830_v23  ;;  %vm6867_vm4 = vweird.f32 %v10973_v36  ;;  %v11102_v23 = vld [vmem:[%s13643_s4 + $0x68] sm:$0xff]  ;;  %s7713_s4 = sshll.u32 %s11254_s17, 4  ;;  %s7714_s4 = int_to_ptr.vmem [resolvable:$true] %s7713_s4 }
0x109c   :  { %vm6868_vm6 = vmor %vm6866_vm5, %vm6867_vm4 }
0x109d   :  { %v6863_v38 = vsub.f32 1.0, %v6862_v35 }
0x109f   :  { %v6864_v46 = vmul.f32 %v10973_v36, %v6863_v38  ;;  %v10975_v2 = vpop.eup %10974 }
0x10a1   :  { %v6865_v16 = vadd.f32 %v10973_v36, %v6864_v46 }
0x10a3   :  { %v6869_v7 = vsel %vm6868_vm6, %v10973_v36, %v6865_v16 }
0x10a4   :  { %v6874_v50 = vsel %vm6871_vm7, %v6873_v43, %v6869_v7 }
0x10a5   :  { %v6881_v14 = vmul.f32 %v10975_v2, %v6874_v50 }
0x10a7   :  { %7660 = vst [vmem:[#allocation6 + $0x8] sm:$0xff] %v6881_v14  ;;  %v7490_v40 = vpack.c.bf16 %v6881_v14, %v6881_v14  ;;  %v6890_v58 = vperm.slane %v6881_v14, 0  ;;  %v6883_v5 = vrot.slane %v6881_v14, 1  ;;  %v6884_v51 = vrot.slane %v6881_v14, 2 }
0x10a8   :  { %v6885_v52 = vrot.slane %v6881_v14, 3  ;;  %v6886_v26 = vrot.slane %v6881_v14, 4  ;;  %v6887_v62 = vrot.slane %v6881_v14, 5  ;;  %v6888_v15 = vrot.slane %v6881_v14, 6  ;;  %7721 = dma.vmem_to_hbm [thread:$0]  %s7714_s4, 256, %s7716_s16, [#allocation7], %s11255_s0, %s11255_s0, %s11256_s7  }
0x10a9   :  { %7563 = vmatmul.bf16.vlgmr.msrb.gmra.mxu2 %v7490_v40  ;;  %v6907_v49 = vmul.f32 %v11090_v11, %v6890_v58  ;;  %v6906_v53 = vmul.f32 %v11091_v45, %v6890_v58  ;;  %v6891_v47 = vperm.slane %v6883_v5, 0  ;;  %v6892_v25 = vperm.slane %v6884_v51, 0  ;;  %7734 = dma.vmem_to_hbm [thread:$0]  %s7727_s20, 256, %s7729_s1, [#allocation7], %s11255_s0, %s11255_s0, %s11256_s7  }
0x10aa   :  { %v6893_v20 = vperm.slane %v6885_v52, 0  ;;  %v6894_v3 = vperm.slane %v6886_v26, 0  ;;  %v6895_v13 = vperm.slane %v6887_v62, 0  ;;  %v6896_v17 = vperm.slane %v6888_v15, 0 }
0x10ab   :  { %6924 = vadd.xlane.f32.xlu2 %v6907_v49  ;;  %6922 = vadd.xlane.f32.xlu0 %v6906_v53  ;;  %v6908_v37 = vmul.f32 %v11092_v33, %v6891_v47  ;;  %v6910_v6 = vmul.f32 %v11093_v8, %v6892_v25  ;;  %v6909_v19 = vmul.f32 %v11094_v48, %v6891_v47  ;;  %v6889_v30 = vrot.slane %v6881_v14, 7 }
0x10ac   :  { %v6912_v31 = vmul.f32 %v11095_v10, %v6893_v20  ;;  %v6913_v9 = vmul.f32 %v11096_v24, %v6893_v20  ;;  %v6911_v54 = vmul.f32 %v11097_v32, %v6892_v25  ;;  %v6915_v42 = vmul.f32 %v11098_v59, %v6894_v3 }
0x10ad   :  { %6926 = vadd.xlane.f32.xlu1 %v6908_v37  ;;  %v6916_v28 = vmul.f32 %v11099_v44, %v6895_v13  ;;  %v6914_v4 = vmul.f32 %v11100_v22, %v6894_v3  ;;  %v6918_v1 = vmul.f32 %v11101_v63, %v6896_v17  ;;  %v6897_v60 = vperm.slane %v6889_v30, 0 }
0x10ae   :  { %v6919_v56 = vmul.f32 %v11102_v23, %v6896_v17  ;;  %v6917_v57 = vmul.f32 %v11103_v12, %v6895_v13 }
0x10af   :  { %v6921_v0 = vmul.f32 %v11104_v29, %v6897_v60  ;;  %v6920_v34 = vmul.f32 %v11105_v55, %v6897_v60 }
0x10b3   :  { %6930 = vadd.xlane.f32.xlu2 %v6910_v6  ;;  %6928 = vadd.xlane.f32.xlu0 %v6909_v19 }
0x10b5   :  { %6934 = vadd.xlane.f32.xlu1 %v6912_v31 }
0x10bb   :  { %6936 = vadd.xlane.f32.xlu2 %v6913_v9  ;;  %6932 = vadd.xlane.f32.xlu0 %v6911_v54 }
0x10bd   :  { %6940 = vadd.xlane.f32.xlu1 %v6915_v42 }
0x10c3   :  { %6942 = vadd.xlane.f32.xlu2 %v6916_v28  ;;  %6938 = vadd.xlane.f32.xlu0 %v6914_v4 }
0x10c5   :  { %6946 = vadd.xlane.f32.xlu1 %v6918_v1 }
0x10cb   :  { %6948 = vadd.xlane.f32.xlu2 %v6919_v56  ;;  %6944 = vadd.xlane.f32.xlu0 %v6917_v57 }
0x10cd   :  { %6952 = vadd.xlane.f32.xlu1 %v6921_v0 }
0x10d3   :  { %6950 = vadd.xlane.f32.xlu0 %v6920_v34 }
0x111e   :  { %v6925_v61 = vpop.xlane.xlu2 %6924  ;;  %v6923_v36 = vpop.xlane.xlu0 %6922 }
0x111f   :  { %v6971_v5 = vperm.slane %v6925_v61, %v11603_v41  ;;  %v6970_v11 = vperm.slane %v6923_v36, %v11598_v39 }
0x1120   :  { %v6927_v35 = vpop.xlane.xlu1 %6926 }
0x1121   :  { %v6973_v49 = vperm.slane %v6927_v35, %v11598_v39  ;;  %v6972_v52 = vsel %vm1312_vm8, %v6971_v5, %v6970_v11 }
0x1126   :  { %v6931_v27 = vpop.xlane.xlu2 %6930  ;;  %v6929_v38 = vpop.xlane.xlu0 %6928 }
0x1127   :  { %v6974_v14 = vperm.slane %v6929_v38, %v11603_v41  ;;  %v6976_v45 = vperm.slane %v6931_v27, %v11598_v39 }
0x1128   :  { %v6935_v21 = vpop.xlane.xlu1 %6934 }
0x1129   :  { %v6975_v53 = vsel %vm1312_vm8, %v6974_v14, %v6973_v49  ;;  %v6979_v25 = vperm.slane %v6935_v21, %v11598_v39 }
0x112a   :  { %v6994_v6 = vsel %vm1335_vm9, %v6975_v53, %v6972_v52 }
0x112c   :  { %v13210_v46 = vpop.f32.mrf.mxu2 }
0x112e   :  { %v13212_v18 = vpop.xlane.xlu2 %6936  ;;  %v13214_v16 = vpop.xlane.xlu0 %6932 }
0x112f   :  { %v6977_v40 = vperm.slane %v13214_v16, %v11603_v41  ;;  %v6980_v47 = vperm.slane %v13212_v18, %v11603_v41 }
0x1130   :  { %v13216_v43 = vpop.xlane.xlu1 %6940 }
0x1131   :  { %v6978_v51 = vsel %vm1312_vm8, %v6977_v40, %v6976_v45  ;;  %v6983_v48 = vperm.slane %v13216_v43, %v11603_v41  ;;  %v6981_v19 = vsel %vm1312_vm8, %v6980_v47, %v6979_v25 }
0x1132   :  { %v6995_v10 = vsel %vm1337_vm10, %v6978_v51, %v6994_v6 }
0x1133   :  { %v6996_v9 = vsel %vm1339_vm11, %v6981_v19, %v6995_v10 }
0x1134   :  { %v7566_v7 = vpop.f32.mrf.mxu2 }
0x1136   :  { %v13218_v2 = vpop.xlane.xlu2 %6942  ;;  %v13220_v50 = vpop.xlane.xlu0 %6938 }
0x1137   :  { %v6982_v33 = vperm.slane %v13220_v50, %v11598_v39  ;;  %v6985_v31 = vperm.slane %v13218_v2, %v11598_v39 }
0x1138   :  { %v13225_v58 = vpop.xlane.xlu1 %6946 }
0x1139   :  { %v6984_v26 = vsel %vm1312_vm8, %v6983_v48, %v6982_v33  ;;  %v6988_v32 = vperm.slane %v13225_v58, %v11598_v39 }
0x113a   :  { %v6997_v62 = vsel %vm1341_vm12, %v6984_v26, %v6996_v9 }
0x113e   :  { %v13237_v37 = vpop.xlane.xlu0 %6944  ;;  %v13241_v20 = vpop.xlane.xlu2 %6948 }
0x113f   :  { %v6986_v8 = vperm.slane %v13237_v37, %v11603_v41  ;;  %v6989_v3 = vperm.slane %v13241_v20, %v11603_v41 }
0x1140   :  { %v13259_v54 = vpop.xlane.xlu1 %6952 }
0x1141   :  { %v6987_v24 = vsel %vm1312_vm8, %v6986_v8, %v6985_v31  ;;  %v6990_v59 = vsel %vm1312_vm8, %v6989_v3, %v6988_v32  ;;  %v6992_v13 = vperm.slane %v13259_v54, %v11603_v41 }
0x1142   :  { %v6998_v15 = vsel %vm1343_vm13, %v6987_v24, %v6997_v62 }
0x1143   :  { %v6999_v28 = vsel %vm1345_vm14, %v6990_v59, %v6998_v15 }
0x1146   :  { %v13263_v42 = vpop.xlane.xlu0 %6950 }
0x1147   :  { %v6991_v17 = vperm.slane %v13263_v42, %v11598_v39 }
0x1149   :  { %v6993_v44 = vsel %vm1312_vm8, %v6992_v13, %v6991_v17 }
0x114a   :  { %v7000_v22 = vsel %vm1347_vm15, %v6993_v44, %v6999_v28 }
0x114b   :  { %v7002_v4 = vsel %vm1350_vm0, %v7000_v22, -inf }
0x114c   :  { %7003 = vmax.xlane.f32.xlu2 %v7002_v4 }
0x11bf   :  { %v13274_v63 = vpop.xlane.xlu2 %7003 }
0x11c0   :  { %v7006_v1 = vperm.slane %v13274_v63, 0  ;;  %v7007_v30 = vperm.slane %v13274_v63, 1  ;;  %v7008_v12 = vperm.slane %v13274_v63, 2  ;;  %v7009_v57 = vperm.slane %v13274_v63, 3 }
0x11c1   :  { %v7011_v53 = vperm.slane %v13274_v63, 5  ;;  %v7012_v33 = vperm.slane %v13274_v63, 6  ;;  %v7013_v10 = vperm.slane %v13274_v63, 7 }
0x11c2   :  { %v7022_v60 = vsub.f32 %v6923_v36, %v7006_v1  ;;  %v7023_v23 = vsub.f32 %v6925_v61, %v7006_v1  ;;  %v7024_v56 = vsub.f32 %v6927_v35, %v7007_v30  ;;  %v7025_v34 = vsub.f32 %v6929_v38, %v7007_v30 }
0x11c3   :  { %v7026_v7 = vsub.f32 %v6931_v27, %v7008_v12  ;;  %v7028_v14 = vsub.f32 %v6935_v21, %v7009_v57  ;;  %v7010_v61 = vperm.slane %v13274_v63, 4  ;;  %v7027_v38 = vsub.f32 %v13214_v16, %v7008_v12 }
0x11c4   :  { %v7038_v29 = vmul.f32 1.442695, %v7022_v60  ;;  %v7040_v0 = vmul.f32 1.442695, %v7023_v23  ;;  %v7042_v55 = vmul.f32 1.442695, %v7024_v56  ;;  %v7029_v27 = vsub.f32 %v13212_v18, %v7009_v57 }
0x11c5   :  { %v7044_v40 = vmul.f32 1.442695, %v7025_v34  ;;  %v7046_v5 = vmul.f32 1.442695, %v7026_v7  ;;  %v7050_v36 = vmul.f32 1.442695, %v7028_v14  ;;  %v7031_v21 = vsub.f32 %v13216_v43, %v7010_v61 }
0x11c6   :  { %10976 = vpow2.f32 %v7038_v29  ;;  %v7048_v45 = vmul.f32 1.442695, %v7027_v38  ;;  %v7052_v47 = vmul.f32 1.442695, %v7029_v27  ;;  %v7030_v25 = vsub.f32 %v13220_v50, %v7010_v61 }
0x11c7   :  { %10978 = vpow2.f32 %v7040_v0  ;;  %v7056_v16 = vmul.f32 1.442695, %v7031_v21  ;;  %v7032_v43 = vsub.f32 %v13218_v2, %v7011_v53  ;;  %v7034_v8 = vsub.f32 %v13225_v58, %v7012_v33 }
0x11c8   :  { %10980 = vpow2.f32 %v7042_v55  ;;  %v7054_v6 = vmul.f32 1.442695, %v7030_v25  ;;  %v7033_v2 = vsub.f32 %v13237_v37, %v7011_v53  ;;  %v7035_v58 = vsub.f32 %v13241_v20, %v7012_v33 }
0x11c9   :  { %10982 = vpow2.f32 %v7044_v40  ;;  %v7058_v48 = vmul.f32 1.442695, %v7032_v43  ;;  %v7062_v31 = vmul.f32 1.442695, %v7034_v8  ;;  %v7037_v3 = vsub.f32 %v13259_v54, %v7013_v10 }
0x11ca   :  { %10984 = vpow2.f32 %v7046_v5  ;;  %v7060_v24 = vmul.f32 1.442695, %v7033_v2  ;;  %v7064_v9 = vmul.f32 1.442695, %v7035_v58  ;;  %v7036_v15 = vsub.f32 %v13263_v42, %v7013_v10 }
0x11cb   :  { %10986 = vpow2.f32 %v7050_v36  ;;  %v7068_v62 = vmul.f32 1.442695, %v7037_v3 }
0x11cc   :  { %v13280_v11 = vpop.eup %10976  ;;  %10988 = vpow2.f32 %v7048_v45  ;;  %v7066_v20 = vmul.f32 1.442695, %v7036_v15 }
0x11cd   :  { %v13283_v35 = vpop.eup %10978  ;;  %7087 = vperm.xlu0 %10696, %v13280_v11   ;;  %10990 = vpow2.f32 %v7052_v47 }
0x11ce   :  { %v13286_v49 = vpop.eup %10980  ;;  %7090 = vperm.xlu1 %10697, %v13283_v35   ;;  %10992 = vpow2.f32 %v7056_v16 }
0x11cf   :  { %7093 = vperm.xlu2 %10695, %v13286_v49   ;;  %v13294_v51 = vpop.eup %10982  ;;  %10994 = vpow2.f32 %v7054_v6 }
0x11d0   :  { %v13297_v52 = vpop.eup %10984  ;;  %10996 = vpow2.f32 %v7058_v48 }
0x11d1   :  { %v13300_v18 = vpop.eup %10986  ;;  %10998 = vpow2.f32 %v7062_v31 }
0x11d2   :  { %v13307_v19 = vpop.eup %10988  ;;  %11000 = vpow2.f32 %v7060_v24 }
0x11d3   :  { %v13310_v26 = vpop.eup %10990  ;;  %11002 = vpow2.f32 %v7064_v9 }
0x11d4   :  { %v13313_v50 = vpop.eup %10992  ;;  %11004 = vpow2.f32 %v7068_v62 }
0x11d5   :  { %7096 = vperm.xlu0 %10696, %v13294_v51   ;;  %v13320_v32 = vpop.eup %10994  ;;  %11006 = vpow2.f32 %v7066_v20 }
0x11d6   :  { %7099 = vperm.xlu1 %10697, %v13297_v52   ;;  %v13322_v59 = vpop.eup %10996 }
0x11d7   :  { %7105 = vperm.xlu2 %10695, %v13300_v18   ;;  %v13325_v37 = vpop.eup %10998 }
0x11d8   :  { %v13330_v54 = vpop.eup %11000 }
0x11d9   :  { %v13332_v13 = vpop.eup %11002 }
0x11da   :  { %v13335_v17 = vpop.eup %11004 }
0x11db   :  { %v13339_v42 = vpop.eup %11006 }
0x11dd   :  { %7102 = vperm.xlu0 %10696, %v13307_v19  }
0x11de   :  { %7108 = vperm.xlu1 %10697, %v13310_v26  }
0x11df   :  { %7114 = vperm.xlu2 %10695, %v13313_v50  }
0x11e5   :  { %7111 = vperm.xlu0 %10696, %v13320_v32  }
0x11e6   :  { %7117 = vperm.xlu1 %10697, %v13322_v59  }
0x11e7   :  { %7123 = vperm.xlu2 %10695, %v13325_v37  }
0x11ed   :  { %7120 = vperm.xlu0 %10696, %v13330_v54  }
0x11ee   :  { %7126 = vperm.xlu1 %10697, %v13332_v13  }
0x11ef   :  { %7132 = vperm.xlu2 %10695, %v13335_v17  }
0x11f5   :  { %7129 = vperm.xlu0 %10696, %v13339_v42  }
0x1229   :  { %v7094_v44 = vpop.permute.xlu2 %7093 }
0x122a   :  { %v7137_v55 = vperm.slane %v7094_v44, %v11598_v39 }
0x1231   :  { %v7106_v4 = vpop.permute.xlu2 %7105 }
0x1232   :  { %v7143_v27 = vperm.slane %v7106_v4, %v11598_v39 }
0x1239   :  { %v7115_v23 = vpop.permute.xlu2 %7114 }
0x123a   :  { %v7147_v47 = vperm.slane %v7115_v23, %v11603_v41 }
0x123f   :  { %v7088_v28 = vpop.permute.xlu0 %7087 }
0x1240   :  { %v7091_v22 = vpop.permute.xlu1 %7090  ;;  %v7134_v7 = vperm.slane %v7088_v28, %v11598_v39 }
0x1241   :  { %v7124_v29 = vpop.permute.xlu2 %7123  ;;  %v7135_v34 = vperm.slane %v7091_v22, %v11603_v41 }
0x1242   :  { %v7152_v10 = vperm.slane %v7124_v29, %v11598_v39 }
0x1243   :  { %v7136_v21 = vsel %vm1312_vm8, %v7135_v34, %v7134_v7 }
0x1247   :  { %v7097_v63 = vpop.permute.xlu0 %7096 }
0x1248   :  { %v7100_v1 = vpop.permute.xlu1 %7099  ;;  %v7138_v57 = vperm.slane %v7097_v63, %v11603_v41 }
0x1249   :  { %v7140_v14 = vperm.slane %v7100_v1, %v11598_v39  ;;  %v7133_v31 = vpop.permute.xlu2 %7132 }
0x124a   :  { %v7139_v40 = vsel %vm1312_vm8, %v7138_v57, %v7137_v55  ;;  %v7156_v62 = vperm.slane %v7133_v31, %v11603_v41 }
0x124b   :  { %v7158_v33 = vsel %vm1335_vm9, %v7139_v40, %v7136_v21 }
0x124f   :  { %v7103_v30 = vpop.permute.xlu0 %7102 }
0x1250   :  { %v7109_v60 = vpop.permute.xlu1 %7108  ;;  %v7141_v0 = vperm.slane %v7103_v30, %v11603_v41 }
0x1251   :  { %v7144_v5 = vperm.slane %v7109_v60, %v11603_v41 }
0x1252   :  { %v7142_v61 = vsel %vm1312_vm8, %v7141_v0, %v7140_v14 }
0x1253   :  { %v7145_v16 = vsel %vm1312_vm8, %v7144_v5, %v7143_v27  ;;  %v7159_v25 = vsel %vm1337_vm10, %v7142_v61, %v7158_v33 }
0x1254   :  { %v7160_v2 = vsel %vm1339_vm11, %v7145_v16, %v7159_v25 }
0x1257   :  { %v7112_v56 = vpop.permute.xlu0 %7111 }
0x1258   :  { %v7118_v12 = vpop.permute.xlu1 %7117  ;;  %v7146_v36 = vperm.slane %v7112_v56, %v11598_v39 }
0x1259   :  { %v7149_v43 = vperm.slane %v7118_v12, %v11598_v39 }
0x125a   :  { %v7148_v8 = vsel %vm1312_vm8, %v7147_v47, %v7146_v36 }
0x125b   :  { %v7161_v58 = vsel %vm1341_vm12, %v7148_v8, %v7160_v2 }
0x125f   :  { %v7121_v38 = vpop.permute.xlu0 %7120 }
0x1260   :  { %v7127_v45 = vpop.permute.xlu1 %7126  ;;  %v7150_v53 = vperm.slane %v7121_v38, %v11603_v41 }
0x1261   :  { %v7153_v6 = vperm.slane %v7127_v45, %v11603_v41 }
0x1262   :  { %v7151_v48 = vsel %vm1312_vm8, %v7150_v53, %v7149_v43 }
0x1263   :  { %v7154_v3 = vsel %vm1312_vm8, %v7153_v6, %v7152_v10  ;;  %v7162_v9 = vsel %vm1343_vm13, %v7151_v48, %v7161_v58 }
0x1264   :  { %v7163_v44 = vsel %vm1345_vm14, %v7154_v3, %v7162_v9 }
0x1267   :  { %v7130_v24 = vpop.permute.xlu0 %7129 }
0x1268   :  { %v7155_v15 = vperm.slane %v7130_v24, %v11598_v39 }
0x126a   :  { %v7157_v20 = vsel %vm1312_vm8, %v7156_v62, %v7155_v15 }
0x126b   :  { %v7164_v28 = vsel %vm1347_vm15, %v7157_v20, %v7163_v44 }
0x126c   :  { %v7166_v22 = vsel %vm1350_vm0, %v7164_v28, 0.0 }
0x126d   :  { %7167 = vadd.xlane.f32.xlu1 %v7166_v22 }
0x12e0   :  { %v13374_v4 = vpop.xlane.xlu1 %7167 }
0x12e1   :  { %v7170_v63 = vperm.slane %v13374_v4, 0  ;;  %v7171_v1 = vperm.slane %v13374_v4, 1  ;;  %v13379_v30 = vperm.slane %v13374_v4, 2  ;;  %v7175_v60 = vperm.slane %v13374_v4, 5 }
0x12e2   :  { %v13384_v56 = vperm.slane %v13374_v4, 3  ;;  %v13392_v27 = vperm.slane %v13374_v4, 4  ;;  %v13411_v28 = vperm.slane %v13374_v4, 6 }
0x12e3   :  { %11008 = vrcp.f32 %v7170_v63  ;;  %v7195_v34 = vand.u32 2147483647, %v7170_v63  ;;  %v7197_v7 = vand.u32 2147483648, %v7170_v63  ;;  %v7275_v21 = vand.u32 2147483647, %v7175_v60 }
0x12e4   :  { %11010 = vrcp.f32 %v7171_v1  ;;  %vm7191_vm2 = vweird.f32 %v7170_v63  ;;  %v7277_v47 = vand.u32 2147483648, %v7175_v60  ;;  %v7213_v10 = vand.u32 2147483648, %v7171_v1 }
0x12e5   :  { %11012 = vrcp.f32 %v13379_v30  ;;  %vm7196_vm4 = vcmp.eq.f32.partialorder %v7195_v34, 8.507059e+37  ;;  %v7198_v33 = vor.u32 1.1754944e-38, %v7197_v7  ;;  %vm7207_vm7 = vweird.f32 %v7171_v1 }
0x12e6   :  { %11014 = vrcp.f32 %v7175_v60  ;;  %v7211_v58 = vand.u32 2147483647, %v7171_v1  ;;  %v7278_v9 = vor.u32 1.1754944e-38, %v7277_v47  ;;  %v7214_v20 = vor.u32 1.1754944e-38, %v7213_v10 }
0x12e7   :  { %11016 = vrcp.f32 %v13384_v56 }
0x12e8   :  { %11018 = vrcp.f32 %v13392_v27 }
0x12e9   :  { %v11009_v23 = vpop.eup %11008  ;;  %11020 = vrcp.f32 %v13411_v28 }
0x12ea   :  { %v11011_v12 = vpop.eup %11010  ;;  %v7187_v57 = vmul.f32 %v11009_v23, %v7170_v63  ;;  %vm7192_vm1 = vweird.f32 %v11009_v23 }
0x12eb   :  { %v13386_v29 = vpop.eup %11012  ;;  %v7203_v0 = vmul.f32 %v11011_v12, %v7171_v1  ;;  %vm7193_vm3 = vmor %vm7191_vm2, %vm7192_vm1  ;;  %vm7208_vm5 = vweird.f32 %v11011_v12  ;;  %vm7271_vm1 = vweird.f32 %v7175_v60 }
0x12ec   :  { %v7188_v55 = vsub.f32 1.0, %v7187_v57  ;;  %v11015_v40 = vpop.eup %11014  ;;  %v7219_v61 = vmul.f32 %v13386_v29, %v13379_v30  ;;  %vm13399_vm2 = vmor %vm7207_vm7, %vm7208_vm5  ;;  %vm7212_vm5 = vcmp.eq.f32.partialorder %v7211_v58, 8.507059e+37  ;;  %vm7223_vm7 = vweird.f32 %v13379_v30 }
0x12ed   :  { %v7204_v14 = vsub.f32 1.0, %v7203_v0  ;;  %v7267_v36 = vmul.f32 %v11015_v40, %v7175_v60  ;;  %v13394_v8 = vpop.eup %11016  ;;  %vm7272_vm6 = vweird.f32 %v11015_v40 }
0x12ee   :  { %v7189_v5 = vmul.f32 %v11009_v23, %v7188_v55  ;;  %v7220_v43 = vsub.f32 1.0, %v7219_v61  ;;  %v7227_v55 = vand.u32 2147483647, %v13379_v30  ;;  %v7245_v61 = vand.u32 2147483648, %v13384_v56 }
0x12ef   :  { %v7205_v38 = vmul.f32 %v11011_v12, %v7204_v14  ;;  %v7268_v53 = vsub.f32 1.0, %v7267_v36 }
0x12f0   :  { %v7190_v45 = vadd.f32 %v11009_v23, %v7189_v5 }
0x12f1   :  { %v7206_v25 = vadd.f32 %v11011_v12, %v7205_v38  ;;  %v7269_v6 = vmul.f32 %v11015_v40, %v7268_v53  ;;  %v7243_v38 = vand.u32 2147483647, %v13384_v56  ;;  %v7246_v53 = vor.u32 1.1754944e-38, %v7245_v61 }
0x12f2   :  { %v7194_v16 = vsel %vm7193_vm3, %v11009_v23, %v7190_v45  ;;  %vm7273_vm3 = vmor %vm7271_vm1, %vm7272_vm6  ;;  %vm7224_vm6 = vweird.f32 %v13386_v29  ;;  %v11019_v23 = vpop.eup %11018 }
0x12f3   :  { %v7199_v48 = vsel %vm7196_vm4, %v7198_v33, %v7194_v16  ;;  %v7270_v3 = vadd.f32 %v11015_v40, %v7269_v6  ;;  %v7210_v62 = vsel %vm13399_vm2, %v11011_v12, %v7206_v25  ;;  %vm7276_vm4 = vcmp.eq.f32.partialorder %v7275_v21, 8.507059e+37  ;;  %vm7225_vm1 = vmor %vm7223_vm7, %vm7224_vm6  ;;  %v11021_v5 = vpop.eup %11020 }
0x12f4   :  { %v7201_v31 = vmul.f32 %v13283_v35, %v7199_v48  ;;  %v7200_v2 = vmul.f32 %v13280_v11, %v7199_v48  ;;  %v7221_v35 = vmul.f32 %v13386_v29, %v7220_v43  ;;  %v7235_v11 = vmul.f32 %v13394_v8, %v13384_v56 }
0x12f5   :  { %v7274_v15 = vsel %vm7273_vm3, %v11015_v40, %v7270_v3  ;;  %v7215_v63 = vsel %vm7212_vm5, %v7214_v20, %v7210_v62  ;;  %v7229_v12 = vand.u32 2147483648, %v13379_v30  ;;  %v7251_v7 = vmul.f32 %v11019_v23, %v13392_v27 }
0x12f6   :  { %7321 = vperm.xlu2 %10695, %v7201_v31   ;;  %7316 = vperm.xlu0 %10696, %v7200_v2   ;;  %v13408_v44 = vsel %vm7276_vm4, %v7278_v9, %v7274_v15  ;;  %v7222_v1 = vadd.f32 %v13386_v29, %v7221_v35  ;;  %v7236_v60 = vsub.f32 1.0, %v7235_v11  ;;  %v7217_v57 = vmul.f32 %v13294_v51, %v7215_v63 }
0x12f7   :  { %v7281_v22 = vmul.f32 %v13330_v54, %v13408_v44  ;;  %v7216_v0 = vmul.f32 %v13286_v49, %v7215_v63  ;;  %v7230_v14 = vor.u32 1.1754944e-38, %v7229_v12  ;;  %vm7228_vm2 = vcmp.eq.f32.partialorder %v7227_v55, 8.507059e+37 }
0x12f8   :  { %v7226_v54 = vsel %vm7225_vm1, %v13386_v29, %v7222_v1  ;;  %v7237_v34 = vmul.f32 %v13394_v8, %v7236_v60  ;;  %v13427_v51 = vperm.slane %v13374_v4, 7  ;;  %vm7240_vm3 = vweird.f32 %v13394_v8 }
0x12f9   :  { %7371 = vperm.xlu1 %10697, %v7281_v22   ;;  %v7231_v49 = vsel %vm7228_vm2, %v7230_v14, %v7226_v54  ;;  %v7252_v30 = vsub.f32 1.0, %v7251_v7  ;;  %vm7239_vm4 = vweird.f32 %v13384_v56  ;;  %v7283_v45 = vmul.f32 %v11021_v5, %v13411_v28  ;;  %v11107_v54 = vld [vmem:[%s13642_s3 + $0x8] sm:$0xff]  ;;  %v11108_v7 = vld [vmem:[%s13642_s3 + $0x10] sm:$0xff] }
0x12fa   :  { %v7238_v40 = vadd.f32 %v13394_v8, %v7237_v34  ;;  %v7233_v29 = vmul.f32 %v13307_v19, %v7231_v49  ;;  %v7232_v36 = vmul.f32 %v13297_v52, %v7231_v49  ;;  %11022 = vrcp.f32 %v13427_v51  ;;  %vm7241_vm5 = vmor %vm7239_vm4, %vm7240_vm3  ;;  %v11109_v49 = vld [vmem:[%s13642_s3 + $0x18] sm:$0xff] }
0x12fb   :  { %v7253_v21 = vmul.f32 %v11019_v23, %v7252_v30  ;;  %vm7244_vm6 = vcmp.eq.f32.partialorder %v7243_v38, 8.507059e+37  ;;  %vm7256_vm7 = vweird.f32 %v11019_v23  ;;  %v7284_v52 = vsub.f32 1.0, %v7283_v45 }
0x12fc   :  { %v7242_v4 = vsel %vm7241_vm5, %v13394_v8, %v7238_v40  ;;  %v7261_v16 = vand.u32 2147483648, %v13392_v27  ;;  %vm7255_vm1 = vweird.f32 %v13392_v27  ;;  %v7259_v43 = vand.u32 2147483647, %v13392_v27 }
0x12fd   :  { %v7247_v47 = vsel %vm7244_vm6, %v7246_v53, %v7242_v4  ;;  %v7254_v19 = vadd.f32 %v11019_v23, %v7253_v21  ;;  %vm7257_vm2 = vmor %vm7255_vm1, %vm7256_vm7  ;;  %v7285_v6 = vmul.f32 %v11021_v5, %v7284_v52  ;;  %vm7288_vm4 = vweird.f32 %v11021_v5  ;;  %v11112_v21 = vld [vmem:[%s13642_s3 + $0x28] sm:$0xff]  ;;  %v11113_v53 = vld [vmem:[%s13642_s3 + $0x38] sm:$0xff] }
0x12fe   :  { %7331 = vperm.xlu2 %10695, %v7217_v57   ;;  %7326 = vperm.xlu0 %10696, %v7216_v0   ;;  %v7249_v56 = vmul.f32 %v13310_v26, %v7247_v47  ;;  %v7248_v25 = vmul.f32 %v13300_v18, %v7247_v47  ;;  %v7262_v10 = vor.u32 1.1754944e-38, %v7261_v16  ;;  %vm7260_vm3 = vcmp.eq.f32.partialorder %v7259_v43, 8.507059e+37  ;;  %v11114_v52 = vld [vmem:[%s13642_s3 + $0x40] sm:$0xff]  ;;  %v10676_v16 = vld [vmem:[%s13647_s8 + $0x38] sm:$0xff] }
0x12ff   :  { %v7258_v8 = vsel %vm7257_vm2, %v11019_v23, %v7254_v19  ;;  %v7286_v2 = vadd.f32 %v11021_v5, %v7285_v6  ;;  %v7293_v26 = vand.u32 2147483648, %v13411_v28  ;;  %vm7287_vm5 = vweird.f32 %v13411_v28  ;;  %7641 = vmatpush.bf16.msrb.mxu3 %v10676_v16 }
0x1300   :  { %v11023_v33 = vpop.eup %11022  ;;  %v7263_v31 = vsel %vm7260_vm3, %v7262_v10, %v7258_v8  ;;  %v7291_v27 = vand.u32 2147483647, %v13411_v28  ;;  %vm7289_vm6 = vmor %vm7287_vm5, %vm7288_vm4  ;;  %v7309_v15 = vand.u32 2147483648, %v13427_v51  ;;  %vm7303_vm2 = vweird.f32 %v13427_v51 }
0x1301   :  { %v7299_v48 = vmul.f32 %v11023_v33, %v13427_v51  ;;  %v7265_v18 = vmul.f32 %v13313_v50, %v7263_v31  ;;  %v7264_v3 = vmul.f32 %v13320_v32, %v7263_v31  ;;  %v7290_v24 = vsel %vm7289_vm6, %v11021_v5, %v7286_v2  ;;  %v11110_v5 = vld [vmem:[%s13642_s3 + $0x20] sm:$0xff] }
0x1302   :  { %v7294_v62 = vor.u32 1.1754944e-38, %v7293_v26  ;;  %vm7292_vm7 = vcmp.eq.f32.partialorder %v7291_v27, 8.507059e+37  ;;  %vm7304_vm1 = vweird.f32 %v11023_v33  ;;  %v7280_v32 = vmul.f32 %v13322_v59, %v13408_v44 }
0x1303   :  { %v7300_v58 = vsub.f32 1.0, %v7299_v48  ;;  %v7307_v20 = vand.u32 2147483647, %v13427_v51  ;;  %vm7305_vm3 = vmor %vm7303_vm2, %vm7304_vm1  ;;  %v7310_v22 = vor.u32 1.1754944e-38, %v7309_v15  ;;  %v10675_v48 = vld [vmem:[%s13647_s8 + $0x30] sm:$0xff] }
0x1304   :  { %v7295_v35 = vsel %vm7292_vm7, %v7294_v62, %v7290_v24  ;;  %v11117_v62 = vld [vmem:[%s13642_s3 + $0x50] sm:$0xff]  ;;  %7642 = vmatpush.bf16.msrb.mxu3 %v10675_v48 }
0x1305   :  { %v7301_v9 = vmul.f32 %v11023_v33, %v7300_v58  ;;  %v7296_v50 = vmul.f32 %v13325_v37, %v7295_v35  ;;  %vm7308_vm4 = vcmp.eq.f32.partialorder %v7307_v20, 8.507059e+37  ;;  %v7297_v60 = vmul.f32 %v13332_v13, %v7295_v35  ;;  %v10674_v20 = vld [vmem:[%s13647_s8 + $0x28] sm:$0xff] }
0x1306   :  { %7341 = vperm.xlu2 %10695, %v7233_v29   ;;  %7336 = vperm.xlu0 %10696, %v7232_v36   ;;  %v11111_v29 = vld [vmem:[%s13642_s3 + $0x30] sm:$0xff] }
0x1307   :  { %v7302_v11 = vadd.f32 %v11023_v33, %v7301_v9 }
0x1308   :  { %7643 = vmatpush.bf16.msrb.mxu3 %v10674_v20 }
0x1309   :  { %v7306_v28 = vsel %vm7305_vm3, %v11023_v33, %v7302_v11 }
0x130a   :  { %v7311_v63 = vsel %vm7308_vm4, %v7310_v22, %v7306_v28 }
0x130b   :  { %v7312_v1 = vmul.f32 %v13339_v42, %v7311_v63  ;;  %v7313_v37 = vmul.f32 %v13335_v17, %v7311_v63  ;;  %v11106_v17 = vld [vmem:[%s13642_s3] sm:$0xff] }
0x130e   :  { %7351 = vperm.xlu2 %10695, %v7249_v56   ;;  %7346 = vperm.xlu0 %10696, %v7248_v25   ;;  %v11115_v56 = vld [vmem:[%s13642_s3 + $0x48] sm:$0xff] }
0x1316   :  { %7361 = vperm.xlu2 %10695, %v7265_v18   ;;  %7356 = vperm.xlu0 %10696, %v7264_v3   ;;  %v11116_v3 = vld [vmem:[%s13642_s3 + $0x58] sm:$0xff] }
0x131e   :  { %7376 = vperm.xlu2 %10695, %v7296_v50   ;;  %7366 = vperm.xlu0 %10696, %v7280_v32  }
0x1326   :  { %7386 = vperm.xlu2 %10695, %v7312_v1   ;;  %7381 = vperm.xlu0 %10696, %v7297_v60  }
0x132e   :  { %7391 = vperm.xlu0 %10696, %v7313_v37  }
0x1350   :  { %v13459_v59 = vpop.permute.xlu2 %7321 }
0x1351   :  { %v7395_v34 = vmul.f32 %v11107_v54, %v13459_v59  ;;  %v7664_v1 = vperm.slane %v13459_v59, %v11603_v41 }
0x1358   :  { %v13463_v23 = vpop.permute.xlu2 %7331 }
0x1359   :  { %v7397_v40 = vmul.f32 %v11109_v49, %v13463_v23  ;;  %v7667_v60 = vperm.slane %v13463_v23, %v11603_v41 }
0x1360   :  { %v13467_v57 = vpop.permute.xlu2 %7341 }
0x1361   :  { %v7399_v45 = vmul.f32 %v11112_v21, %v13467_v57 }
0x1368   :  { %v13461_v44 = vpop.permute.xlu0 %7316  ;;  %v13471_v42 = vpop.permute.xlu2 %7351 }
0x1369   :  { %v7394_v55 = vmul.f32 %v11106_v17, %v13461_v44  ;;  %v7401_v47 = vmul.f32 %v11113_v53, %v13471_v42  ;;  %v7663_v50 = vperm.slane %v13461_v44, %v11598_v39  ;;  %v10673_v44 = vld [vmem:[%s13647_s8 + $0x20] sm:$0xff] }
0x136a   :  { %7644 = vmatpush.bf16.msrb.mxu3 %v10673_v44 }
0x136b   :  { %v7410_v51 = vadd.f32 %v7395_v34, %v7394_v55  ;;  %v13525_v10 = vpop.permute.xlu1 %7371  ;;  %v7670_v55 = vperm.slane %v13467_v57, %v11603_v41  ;;  %v7665_v23 = vsel %vm1312_vm8, %v7664_v1, %v7663_v50 }
0x136c   :  { %v7405_v27 = vmul.f32 %v11116_v3, %v13525_v10  ;;  %v7679_v59 = vperm.slane %v13525_v10, %v11603_v41 }
0x136d   :  { %v7411_v19 = vrot.slane %v7410_v51, 4 }
0x136f   :  { %v7412_v31 = vadd.f32 %v7411_v19, %v7410_v51 }
0x1370   :  { %v13465_v12 = vpop.permute.xlu0 %7326  ;;  %v13491_v30 = vpop.permute.xlu2 %7361 }
0x1371   :  { %v7396_v14 = vmul.f32 %v11108_v7, %v13465_v12  ;;  %v7403_v25 = vmul.f32 %v11115_v56, %v13491_v30  ;;  %v7413_v11 = vrot.slane %v7412_v31, 2  ;;  %v7666_v28 = vperm.slane %v13465_v12, %v11598_v39 }
0x1372   :  { %v7673_v12 = vperm.slane %v13471_v42, %v11603_v41 }
0x1373   :  { %v7417_v4 = vadd.f32 %v7397_v40, %v7396_v14  ;;  %v13557_v54 = vadd.f32 %v7413_v11, %v7412_v31  ;;  %v7668_v51 = vsel %vm1312_vm8, %v7667_v60, %v7666_v28  ;;  %v10671_v31 = vld [vmem:[%s13647_s8 + $0x10] sm:$0xff]  ;;  %v10670_v60 = vld [vmem:[%s13647_s8 + $0x8] sm:$0xff] }
0x1374   :  { %v7687_v56 = vsel %vm1335_vm9, %v7668_v51, %v7665_v23 }
0x1375   :  { %v7418_v6 = vrot.slane %v7417_v4, 4  ;;  %v7415_v21 = vrot.slane %v13557_v54, 1 }
0x1377   :  { %v7419_v24 = vadd.f32 %v7418_v6, %v7417_v4 }
0x1378   :  { %v13469_v0 = vpop.permute.xlu0 %7336  ;;  %v13533_v9 = vpop.permute.xlu2 %7376 }
0x1379   :  { %v7398_v61 = vmul.f32 %v11110_v5, %v13469_v0  ;;  %v7420_v37 = vrot.slane %v7419_v24, 2  ;;  %v7669_v7 = vperm.slane %v13469_v0, %v11598_v39  ;;  %v11119_v0 = vld [vmem:[%s13642_s3 + $0x68] sm:$0xff] }
0x137b   :  { %v7424_v43 = vadd.f32 %v7399_v45, %v7398_v61  ;;  %v7421_v5 = vadd.f32 %v7420_v37, %v7419_v24  ;;  %v11118_v61 = vld [vmem:[%s13642_s3 + $0x60] sm:$0xff]  ;;  %v7676_v45 = vperm.slane %v13491_v30, %v11603_v41  ;;  %v7681_v30 = vperm.slane %v13533_v9, %v11598_v39 }
0x137d   :  { %v7425_v58 = vrot.slane %v7424_v43, 4  ;;  %v7422_v6 = vrot.slane %v7421_v5, 1 }
0x137f   :  { %v7426_v22 = vadd.f32 %v7425_v58, %v7424_v43  ;;  %v11120_v58 = vld [vmem:[%s13642_s3 + $0x70] sm:$0xff] }
0x1380   :  { %v13473_v13 = vpop.permute.xlu0 %7346  ;;  %v7387_v19 = vpop.permute.xlu2 %7386 }
0x1381   :  { %v7400_v36 = vmul.f32 %v11111_v29, %v13473_v13  ;;  %v7427_v49 = vrot.slane %v7426_v22, 2  ;;  %v7672_v57 = vperm.slane %v13473_v13, %v11598_v39  ;;  %v7406_v29 = vmul.f32 %v11118_v61, %v13533_v9  ;;  %v10672_v13 = vld [vmem:[%s13647_s8 + $0x18] sm:$0xff] }
0x1382   :  { %7645 = vmatpush.bf16.msrb.mxu3 %v10672_v13  ;;  %v7684_v11 = vperm.slane %v7387_v19, %v11598_v39 }
0x1383   :  { %v7431_v8 = vadd.f32 %v7401_v47, %v7400_v36 }
0x1385   :  { %v7432_v26 = vrot.slane %v7431_v8, 4 }
0x1386   :  { %7646 = vmatpush.bf16.msrb.mxu3 %v10671_v31 }
0x1387   :  { %v7433_v63 = vadd.f32 %v7432_v26, %v7431_v8  ;;  %v7674_v8 = vsel %vm1312_vm8, %v7673_v12, %v7672_v57  ;;  %v7408_v26 = vmul.f32 %v11120_v58, %v7387_v19 }
0x1388   :  { %v13501_v38 = vpop.permute.xlu0 %7356 }
0x1389   :  { %v7402_v33 = vmul.f32 %v11114_v52, %v13501_v38  ;;  %v7434_v40 = vrot.slane %v7433_v63, 2  ;;  %v7675_v36 = vperm.slane %v13501_v38, %v11598_v39  ;;  %v7671_v38 = vsel %vm1312_vm8, %v7670_v55, %v7669_v7 }
0x138a   :  { %v7416_v7 = vadd.f32 %v7415_v21, %v13557_v54  ;;  %7647 = vmatpush.bf16.msrb.mxu3 %v10670_v60 }
0x138b   :  { %v7438_v2 = vadd.f32 %v7403_v25, %v7402_v33  ;;  %v7428_v25 = vadd.f32 %v7427_v49, %v7426_v22  ;;  %v7435_v43 = vadd.f32 %v7434_v40, %v7433_v63  ;;  %v7677_v48 = vsel %vm1312_vm8, %v7676_v45, %v7675_v36  ;;  %v11121_v22 = vld [vmem:[%s13642_s3 + $0x78] sm:$0xff]  ;;  %v10669_v49 = vld [vmem:[%s13647_s8] sm:$0xff] }
0x138c   :  { %v7466_v36 = vpack.c.bf16 %v7416_v7, %v7416_v7 }
0x138d   :  { %v7439_v15 = vrot.slane %v7438_v2, 4 }
0x138e   :  { %7648 = vmatpush.bf16.msrb.mxu3 %v10669_v49 }
0x138f   :  { %v7440_v34 = vadd.f32 %v7439_v15, %v7438_v2  ;;  %v7688_v2 = vsel %vm1337_vm10, %v7671_v38, %v7687_v56  ;;  %v7436_v15 = vrot.slane %v7435_v43, 1  ;;  %v7576_v38 = vunpack.c.l.b16 %v7466_v36 }
0x1390   :  { %v13527_v18 = vpop.permute.xlu0 %7366 }
0x1391   :  { %v7404_v35 = vmul.f32 %v11117_v62, %v13527_v18  ;;  %v7441_v53 = vrot.slane %v7440_v34, 2  ;;  %v7678_v47 = vperm.slane %v13527_v18, %v11598_v39  ;;  %v7423_v39 = vadd.f32 %v7422_v6, %v7421_v5 }
0x1393   :  { %v7445_v32 = vadd.f32 %v7405_v27, %v7404_v35  ;;  %v7442_v18 = vadd.f32 %v7441_v53, %v7440_v34  ;;  %v7680_v3 = vsel %vm1312_vm8, %v7679_v59, %v7678_v47  ;;  %v7689_v27 = vsel %vm1339_vm11, %v7674_v8, %v7688_v2 }
0x1394   :  { %v7429_v35 = vrot.slane %v7428_v25, 1  ;;  %v7690_v50 = vsel %vm1341_vm12, %v7677_v48, %v7689_v27  ;;  %v7467_v57 = vpack.c.bf16 %v7423_v39, %v7423_v39 }
0x1395   :  { %v7446_v17 = vrot.slane %v7445_v32, 4  ;;  %v7691_v20 = vsel %vm1343_vm13, %v7680_v3, %v7690_v50  ;;  %v7443_v37 = vrot.slane %v7442_v18, 1 }
0x1396   :  { %v7430_v59 = vadd.f32 %v7429_v35, %v7428_v25  ;;  %v7577_v13 = vunpack.c.l.b16 %v7467_v57 }
0x1397   :  { %v7447_v14 = vadd.f32 %v7446_v17, %v7445_v32  ;;  %v7444_v40 = vadd.f32 %v7443_v37, %v7442_v18 }
0x1398   :  { %v7382_v42 = vpop.permute.xlu0 %7381  ;;  %v7468_v61 = vpack.c.bf16 %v7430_v59, %v7430_v59 }
0x1399   :  { %v7407_v4 = vmul.f32 %v11119_v0, %v7382_v42  ;;  %v7448_v52 = vrot.slane %v7447_v14, 2  ;;  %v7682_v16 = vperm.slane %v7382_v42, %v11603_v41  ;;  %v7470_v54 = vpack.c.bf16 %v7444_v40, %v7444_v40 }
0x139a   :  { %v7578_v53 = vunpack.c.l.b16 %v7468_v61 }
0x139b   :  { %v7452_v33 = vadd.f32 %v7407_v4, %v7406_v29  ;;  %v7449_v24 = vadd.f32 %v7448_v52, %v7447_v14  ;;  %v7683_v62 = vsel %vm1312_vm8, %v7682_v16, %v7681_v30  ;;  %v7584_v16 = vsel %vm1335_vm9, %v7577_v13, %v7576_v38 }
0x139c   :  { %v7692_v17 = vsel %vm1345_vm14, %v7683_v62, %v7691_v20 }
0x139d   :  { %v7453_v10 = vrot.slane %v7452_v33, 4  ;;  %v7450_v44 = vrot.slane %v7449_v24, 1 }
0x139f   :  { %v7454_v9 = vadd.f32 %v7453_v10, %v7452_v33  ;;  %v7451_v42 = vadd.f32 %v7450_v44, %v7449_v24  ;;  %v7580_v33 = vunpack.c.l.b16 %v7470_v54 }
0x13a0   :  { %v7392_v32 = vpop.permute.xlu0 %7391 }
0x13a1   :  { %v7455_v28 = vrot.slane %v7454_v9, 2  ;;  %v7409_v63 = vmul.f32 %v11121_v22, %v7392_v32  ;;  %v7685_v1 = vperm.slane %v7392_v32, %v11603_v41  ;;  %v7437_v41 = vadd.f32 %v7436_v15, %v7435_v43 }
0x13a2   :  { %v7471_v21 = vpack.c.bf16 %v7451_v42, %v7451_v42  ;;  %v7585_v43 = vsel %vm1337_vm10, %v7578_v53, %v7584_v16 }
0x13a3   :  { %v7456_v55 = vadd.f32 %v7455_v28, %v7454_v9  ;;  %v7459_v12 = vadd.f32 %v7409_v63, %v7408_v26  ;;  %v7686_v34 = vsel %vm1312_vm8, %v7685_v1, %v7684_v11  ;;  %v7469_v0 = vpack.c.bf16 %v7437_v41, %v7437_v41 }
0x13a4   :  { %v7693_v23 = vsel %vm1347_vm15, %v7686_v34, %v7692_v17  ;;  %v7581_v56 = vunpack.c.l.b16 %v7471_v21 }
0x13a5   :  { %v7457_v14 = vrot.slane %v7456_v55, 1  ;;  %v7460_v51 = vrot.slane %v7459_v12, 4  ;;  %7695 = vst.msk [vmem:[#allocation9] sm:$0xff] %vm1350_vm0, %v7693_v23  ;;  %v7579_v19 = vunpack.c.l.b16 %v7469_v0 }
0x13a6   :  { %7745 = dma.vmem_to_hbm [thread:$0]  %s7741_s22, 128, %s7743_s24, [#allocation10]  }
0x13a7   :  { %v7461_v5 = vadd.f32 %v7460_v51, %v7459_v12  ;;  %v7458_v29 = vadd.f32 %v7457_v14, %v7456_v55  ;;  %v7586_v6 = vsel %vm1339_vm11, %v7579_v19, %v7585_v43 }
0x13a8   :  { %v7587_v48 = vsel %vm1341_vm12, %v7580_v33, %v7586_v6 }
0x13a9   :  { %v7462_v4 = vrot.slane %v7461_v5, 2  ;;  %v7472_v47 = vpack.c.bf16 %v7458_v29, %v7458_v29  ;;  %v7588_v10 = vsel %vm1343_vm13, %v7581_v56, %v7587_v48 }
0x13ab   :  { %v7463_v45 = vadd.f32 %v7462_v4, %v7461_v5  ;;  %v7582_v8 = vunpack.c.l.b16 %v7472_v47 }
0x13ad   :  { %v7464_v52 = vrot.slane %v7463_v45, 1  ;;  %v7589_v2 = vsel %vm1345_vm14, %v7582_v8, %v7588_v10 }
0x13af   :  { %v7465_v25 = vadd.f32 %v7464_v52, %v7463_v45 }
0x13b1   :  { %v7473_v30 = vpack.c.bf16 %v7465_v25, %v7465_v25 }
0x13b3   :  { %v7583_v31 = vunpack.c.l.b16 %v7473_v30 }
0x13b5   :  { %v7590_v58 = vsel %vm1347_vm15, %v7583_v31, %v7589_v2 }
0x13b6   :  { %v7591_v26 = vpack.c.b16 %v7590_v58, %v7590_v58 }
0x13b8   :  { %7649 = vmatmul.bf16.vlgmr.msrb.gmra.mxu3 %v7591_v26 }
0x143b   :  { %v7650_v18 = vpop.f32.mrf.mxu3 }
0x143c   :  { %v7651_v3 = vadd.f32 %v7650_v18, %v13210_v46 }
0x143e   :  { %11024 = vtanh.f32 %v7651_v3 }
0x1443   :  { %v7652_v27 = vpop.f32.mrf.mxu3 }
0x1444   :  { %v11025_v24 = vpop.eup %11024 }
0x1445   :  { %7656 = vst [vmem:[#allocation5 + $0x18] sm:$0xff] %v11025_v24 }
0x1446   :  { %7708 = dma.vmem_to_hbm [thread:$0]  %s7701_s12, 512, %s7703_s27, [#allocation4], %s11255_s0, %s11255_s0, %s11256_s7  }
0x1447   :  { %11244 = dma.done.wait [#allocation4], 512  }
0x1448   :  { %11245 = vsyncadd [#allocation4], 4294966784 }
0x1449   :  { %11246 = dma.done.wait [#allocation7], 512  }
0x144a   :  { %11247 = vsyncadd [#allocation7], 4294966784 }
0x144b   :  { %11248 = dma.done.wait [#allocation10], 128  }
0x144c   :  { %11249 = vsyncadd [#allocation10], 4294967168 }
0x144d   :  { %7762 = vsyncpa [#allocation3], 1 }
0x144e   :  { %7763 = vsyncpa [#allocation4], 1 }
0x144f   :  { %7764 = vsyncpa [#allocation7], 1 }
0x1450   :  { %7765 = vsyncpa [#allocation10], 1 }

</bundles_post_ra>
